<compile_context>
chip_gen: v6e
topology: v6e:2x2x1
jax: 0.10.0
libtpu: 0.0.40
codegen_flags: <defaults>
</compile_context>

<pallas_src>
import jax
import jax.numpy as jnp
from jax.experimental import pallas as pl
from jax.experimental.pallas import tpu as pltpu

# Model dims (EMB=200 is hardcoded by conv1's kernel width in the module).
SEQ_LEN = 8      # gene_num + 1 (small synthetic value)
EMB = 200        # conv1 kernel width
H1 = 512         # fc1 out_features
H_DIM = 100      # fc2 out_features
H_PAD = 128      # lane-dense padded fc2 width (zero-padded, inert through ReLU/fc3)
OUT_DIM = 10     # fc3 out_features
OUT_PAD = 128    # lane-dense padded output width (sliced to OUT_DIM in wrapper)

B_TILE = 256     # batch rows per grid step (multiple of MXU edge / 128 lanes)


def identity_kernel(x_ref, wc_ref, bc_ref,
                    w1_ref, b1_ref, w2_ref, b2_ref, w3_ref, b3_ref,
                    o_ref):
    # ---- conv1 (1x200 kernel, 1->1 channel) == dot over EMB axis + bias ----
    # Kept on the VPU/XLU in f32 (multiply + lane reduce); these run in
    # different VLIW slots than the MXU dots, so they overlap with the matmuls.
    x = x_ref[...]                                    # (B_TILE, S, E) f32
    wc = wc_ref[...]                                  # (1, E)        f32
    s = jnp.sum(x * wc[None, :, :], axis=-1)          # (B_TILE, S)   f32
    s = jnp.maximum(s + bc_ref[0, 0], 0.0)            # SMEM scalar bias + ReLU

    # ---- fc1 + ReLU (dropout p=0.0 -> identity) ----
    # bf16 operands, f32 accumulation on the MXU; M = B_TILE fills MXU rows.
    h1 = jnp.dot(s.astype(jnp.bfloat16), w1_ref[...],
                 preferred_element_type=jnp.float32) + b1_ref[...]
    h1 = jnp.maximum(h1, 0.0)
    # TODO(synk): dropout layers have p=0.0 (inference identity); no RNG masking emitted.

    # ---- fc2 + ReLU (lane-dense padded to 128; pad columns stay 0) ----
    h2 = jnp.dot(h1.astype(jnp.bfloat16), w2_ref[...],
                 preferred_element_type=jnp.float32) + b2_ref[...]
    h2 = jnp.maximum(h2, 0.0)                          # (B_TILE, H_PAD)

    # ---- fc3 (lane-dense padded output, no activation) ----
    o = jnp.dot(h2.astype(jnp.bfloat16), w3_ref[...],
                preferred_element_type=jnp.float32) + b3_ref[...]
    o_ref[...] = o.astype(o_ref.dtype)                # full (B_TILE, 128) store


def identity_forward(x, params, *, b_tile=B_TILE):
    (wc, bc, w1, b1, w2, b2, w3, b3) = params
    B = x.shape[0]
    n_tiles = pl.cdiv(B, b_tile)
    B_pad = n_tiles * b_tile
    if B_pad != B:
        x = jnp.pad(x, ((0, B_pad - B), (0, 0), (0, 0)))

    # bf16 weights for the MXU dots (f32 accumulation inside the kernel);
    # conv weight/bias stay f32 (elementwise path, v5e has no bf16 VPU).
    w1b = w1.astype(jnp.bfloat16)                                   # (S, H1)
    w2p = jnp.zeros((H1, H_PAD), jnp.bfloat16).at[:, :H_DIM].set(   # (H1, 128)
        w2.astype(jnp.bfloat16))
    b2p = jnp.zeros((1, H_PAD), jnp.float32).at[:, :H_DIM].set(b2)
    w3p = jnp.zeros((H_PAD, OUT_PAD), jnp.bfloat16).at[:H_DIM, :OUT_DIM].set(
        w3.astype(jnp.bfloat16))                                     # (128, 128)
    b3p = jnp.zeros((1, OUT_PAD), jnp.float32).at[:, :OUT_DIM].set(b3)

    const = lambda i: (0, 0)      # weights/biases resident across grid steps

    flops = 2 * B_pad * (SEQ_LEN * EMB + SEQ_LEN * H1
                         + H1 * H_PAD + H_PAD * OUT_PAD)
    bytes_accessed = (x.size * 4
                      + (w1b.size + w2p.size + w3p.size) * 2
                      + (wc.size + bc.size + b1.size + b2p.size + b3p.size) * 4
                      + B_pad * OUT_PAD * 4)

    out = pl.pallas_call(
        identity_kernel,
        out_shape=jax.ShapeDtypeStruct((B_pad, OUT_PAD), jnp.float32),
        grid_spec=pltpu.PrefetchScalarGridSpec(
            num_scalar_prefetch=0,
            grid=(n_tiles,),
            in_specs=[
                pl.BlockSpec((b_tile, SEQ_LEN, EMB), lambda i: (i, 0, 0)),  # x tile
                pl.BlockSpec((1, EMB), const),                              # conv w
                pl.BlockSpec((1, 1), const,
                             memory_space=pltpu.MemorySpace.SMEM),          # conv b
                pl.BlockSpec((SEQ_LEN, H1), const),                         # w1
                pl.BlockSpec((1, H1), const),                               # b1
                pl.BlockSpec((H1, H_PAD), const),                           # w2 (pad)
                pl.BlockSpec((1, H_PAD), const),                            # b2 (pad)
                pl.BlockSpec((H_PAD, OUT_PAD), const),                      # w3 (pad)
                pl.BlockSpec((1, OUT_PAD), const),                          # b3 (pad)
            ],
            out_specs=pl.BlockSpec((b_tile, OUT_PAD), lambda i: (i, 0)),
        ),
        compiler_params=pltpu.CompilerParams(
            dimension_semantics=("parallel",)),       # v7x: 2 TCs split batch
        cost_estimate=pl.CostEstimate(
            flops=flops, transcendentals=0, bytes_accessed=bytes_accessed),
    )(x, wc, bc, w1b, b1, w2p, b2p, w3p, b3p)
    return out[:B, :OUT_DIM]


def init_params(key):
    ks = jax.random.split(key, 8)
    # conv1: weight (1,1,1,200) -> store as (1, EMB); bias scalar -> (1,1)
    wc = jax.random.normal(ks[0], (1, EMB), jnp.float32) * 0.05
    bc = jax.random.normal(ks[1], (1, 1), jnp.float32) * 0.05
    # Linear weights stored pre-transposed: [in_features, out_features]
    w1 = jax.random.normal(ks[2], (SEQ_LEN, H1), jnp.float32) * 0.05
    b1 = jax.random.normal(ks[3], (1, H1), jnp.float32) * 0.05
    w2 = jax.random.normal(ks[4], (H1, H_DIM), jnp.float32) * 0.05
    b2 = jax.random.normal(ks[5], (1, H_DIM), jnp.float32) * 0.05
    w3 = jax.random.normal(ks[6], (H_DIM, OUT_DIM), jnp.float32) * 0.05
    b3 = jax.random.normal(ks[7], (1, OUT_DIM), jnp.float32) * 0.05
    return (wc, bc, w1, b1, w2, b2, w3, b3)


def identity_ref(x, params):
    # Pure-JAX reference with the same numerics (bf16 operands, f32 accumulate).
    (wc, bc, w1, b1, w2, b2, w3, b3) = params
    s = jax.nn.relu(jnp.sum(x * wc[None, :, :], axis=-1) + bc[0, 0])
    h1 = jax.nn.relu(jnp.dot(s.astype(jnp.bfloat16), w1.astype(jnp.bfloat16),
                             preferred_element_type=jnp.float32) + b1)
    h2 = jax.nn.relu(jnp.dot(h1.astype(jnp.bfloat16), w2.astype(jnp.bfloat16),
                             preferred_element_type=jnp.float32) + b2)
    return jnp.dot(h2.astype(jnp.bfloat16), w3.astype(jnp.bfloat16),
                   preferred_element_type=jnp.float32) + b3


if __name__ == "__main__":
    B = 2  # small demo batch; wrapper pads to one B_TILE grid step
    key = jax.random.PRNGKey(0)
    k_x, k_p = jax.random.split(key)
    x = jax.random.normal(k_x, (B, SEQ_LEN, EMB), jnp.float32)
    params = init_params(k_p)

    out = identity_forward(x, params)
    out = jax.block_until_ready(out)

    ref = identity_ref(x, params)
    assert out.shape == (B, OUT_DIM)
    assert jnp.allclose(out, ref, atol=1e-2, rtol=1e-2)
    print("KERNEL_OK")
</pallas_src>

<mosaic_0001>
module attributes {stable_mosaic.version = 11 : i64} {
  func.func @identity_kernel(%arg0: i32, %arg1: memref<256x8x200xf32, #tpu.memory_space<vmem>>, %arg2: memref<1x200xf32, #tpu.memory_space<vmem>>, %arg3: memref<1x1xf32, #tpu.memory_space<smem>>, %arg4: memref<8x512xbf16, #tpu.memory_space<vmem>>, %arg5: memref<1x512xf32, #tpu.memory_space<vmem>>, %arg6: memref<512x128xbf16, #tpu.memory_space<vmem>>, %arg7: memref<1x128xf32, #tpu.memory_space<vmem>>, %arg8: memref<128x128xbf16, #tpu.memory_space<vmem>>, %arg9: memref<1x128xf32, #tpu.memory_space<vmem>>, %arg10: memref<256x128xf32, #tpu.memory_space<vmem>>) attributes {dimension_semantics = [#tpu.dimension_semantics<parallel>], iteration_bounds = array<i64: 1>, scalar_prefetch = 0 : i64, scratch_operands = 0 : i64, tpu.core_type = #tpu.core_type<tc>, window_params = [{transform_indices = @transform_0, window_bounds = array<i64: 256, 8, 200>}, {pipeline_mode = #tpu.pipeline_mode<synchronous>, transform_indices = @transform_1, window_bounds = array<i64: 1, 200>}, {transform_indices = @transform_2, window_bounds = array<i64: 1, 1>}, {pipeline_mode = #tpu.pipeline_mode<synchronous>, transform_indices = @transform_3, window_bounds = array<i64: 8, 512>}, {pipeline_mode = #tpu.pipeline_mode<synchronous>, transform_indices = @transform_4, window_bounds = array<i64: 1, 512>}, {pipeline_mode = #tpu.pipeline_mode<synchronous>, transform_indices = @transform_5, window_bounds = array<i64: 512, 128>}, {pipeline_mode = #tpu.pipeline_mode<synchronous>, transform_indices = @transform_6, window_bounds = array<i64: 1, 128>}, {pipeline_mode = #tpu.pipeline_mode<synchronous>, transform_indices = @transform_7, window_bounds = array<i64: 128, 128>}, {pipeline_mode = #tpu.pipeline_mode<synchronous>, transform_indices = @transform_8, window_bounds = array<i64: 1, 128>}, {transform_indices = @transform_9, window_bounds = array<i64: 256, 128>}]} {
    %c0 = arith.constant 0 : index
    %c0_0 = arith.constant 0 : index
    %c0_1 = arith.constant 0 : index
    %0 = vector.load %arg1[%c0, %c0_0, %c0_1] : memref<256x8x200xf32, #tpu.memory_space<vmem>>, vector<256x8x200xf32>
    %c0_2 = arith.constant 0 : index
    %c0_3 = arith.constant 0 : index
    %1 = vector.load %arg2[%c0_2, %c0_3] : memref<1x200xf32, #tpu.memory_space<vmem>>, vector<1x200xf32>
    %2 = vector.shape_cast %1 : vector<1x200xf32> to vector<1x1x200xf32>
    %3 = vector.broadcast %2 : vector<1x1x200xf32> to vector<256x8x200xf32>
    %4 = arith.mulf %0, %3 : vector<256x8x200xf32>
    %cst = arith.constant dense<0.000000e+00> : vector<256x8xf32>
    %5 = vector.multi_reduction <add>, %4, %cst [2] : vector<256x8x200xf32> to vector<256x8xf32>
    %c0_4 = arith.constant 0 : index
    %c0_5 = arith.constant 0 : index
    %6 = memref.load %arg3[%c0_4, %c0_5] : memref<1x1xf32, #tpu.memory_space<smem>>
    %7 = vector.broadcast %6 : f32 to vector<256x8xf32>
    %8 = arith.addf %5, %7 : vector<256x8xf32>
    %cst_6 = arith.constant 0.000000e+00 : f32
    %9 = vector.broadcast %cst_6 : f32 to vector<256x8xf32>
    %10 = arith.maximumf %8, %9 : vector<256x8xf32>
    %11 = arith.truncf %10 : vector<256x8xf32> to vector<256x8xbf16>
    %c0_7 = arith.constant 0 : index
    %c0_8 = arith.constant 0 : index
    %12 = vector.load %arg4[%c0_7, %c0_8] : memref<8x512xbf16, #tpu.memory_space<vmem>>, vector<8x512xbf16>
    %cst_9 = arith.constant dense<0.000000e+00> : vector<256x512xf32>
    %13 = tpu.matmul %11, %12, %cst_9 {dimension_numbers = #tpu.dot_dimension_numbers<[1], [0], [0], [1], [0, 0, 1, 1], [], []>} : vector<256x8xbf16>, vector<8x512xbf16>, vector<256x512xf32> -> vector<256x512xf32>
    %c0_10 = arith.constant 0 : index
    %c0_11 = arith.constant 0 : index
    %14 = vector.load %arg5[%c0_10, %c0_11] : memref<1x512xf32, #tpu.memory_space<vmem>>, vector<1x512xf32>
    %15 = vector.broadcast %14 : vector<1x512xf32> to vector<256x512xf32>
    %16 = arith.addf %13, %15 : vector<256x512xf32>
    %cst_12 = arith.constant 0.000000e+00 : f32
    %17 = vector.broadcast %cst_12 : f32 to vector<256x512xf32>
    %18 = arith.maximumf %16, %17 : vector<256x512xf32>
    %19 = arith.truncf %18 : vector<256x512xf32> to vector<256x512xbf16>
    %c0_13 = arith.constant 0 : index
    %c0_14 = arith.constant 0 : index
    %20 = vector.load %arg6[%c0_13, %c0_14] : memref<512x128xbf16, #tpu.memory_space<vmem>>, vector<512x128xbf16>
    %cst_15 = arith.constant dense<0.000000e+00> : vector<256x128xf32>
    %21 = tpu.matmul %19, %20, %cst_15 {dimension_numbers = #tpu.dot_dimension_numbers<[1], [0], [0], [1], [0, 0, 1, 1], [], []>} : vector<256x512xbf16>, vector<512x128xbf16>, vector<256x128xf32> -> vector<256x128xf32>
    %c0_16 = arith.constant 0 : index
    %c0_17 = arith.constant 0 : index
    %22 = vector.load %arg7[%c0_16, %c0_17] : memref<1x128xf32, #tpu.memory_space<vmem>>, vector<1x128xf32>
    %23 = vector.broadcast %22 : vector<1x128xf32> to vector<256x128xf32>
    %24 = arith.addf %21, %23 : vector<256x128xf32>
    %cst_18 = arith.constant 0.000000e+00 : f32
    %25 = vector.broadcast %cst_18 : f32 to vector<256x128xf32>
    %26 = arith.maximumf %24, %25 : vector<256x128xf32>
    %27 = arith.truncf %26 : vector<256x128xf32> to vector<256x128xbf16>
    %c0_19 = arith.constant 0 : index
    %c0_20 = arith.constant 0 : index
    %28 = vector.load %arg8[%c0_19, %c0_20] : memref<128x128xbf16, #tpu.memory_space<vmem>>, vector<128x128xbf16>
    %cst_21 = arith.constant dense<0.000000e+00> : vector<256x128xf32>
    %29 = tpu.matmul %27, %28, %cst_21 {dimension_numbers = #tpu.dot_dimension_numbers<[1], [0], [0], [1], [0, 0, 1, 1], [], []>} : vector<256x128xbf16>, vector<128x128xbf16>, vector<256x128xf32> -> vector<256x128xf32>
    %c0_22 = arith.constant 0 : index
    %c0_23 = arith.constant 0 : index
    %30 = vector.load %arg9[%c0_22, %c0_23] : memref<1x128xf32, #tpu.memory_space<vmem>>, vector<1x128xf32>
    %31 = vector.broadcast %30 : vector<1x128xf32> to vector<256x128xf32>
    %32 = arith.addf %29, %31 : vector<256x128xf32>
    %c0_24 = arith.constant 0 : index
    %c0_25 = arith.constant 0 : index
    %33 = vector.load %arg10[%c0_24, %c0_25] : memref<256x128xf32, #tpu.memory_space<vmem>>, vector<256x128xf32>
    tpu.vector_store %arg10[%c0_24, %c0_25], %32 {strides = array<i32>} : memref<256x128xf32, #tpu.memory_space<vmem>>, vector<256x128xf32>,
    return
  }
  func.func @transform_0(%arg0: i32) -> (i32, i32, i32) {
    %c0_i32 = arith.constant 0 : i32
    %c0_i32_0 = arith.constant 0 : i32
    %c0_i32_1 = arith.constant 0 : i32
    return %arg0, %c0_i32, %c0_i32_0 : i32, i32, i32
  }
  func.func @transform_1(%arg0: i32) -> (i32, i32) {
    %c0_i32 = arith.constant 0 : i32
    %c0_i32_0 = arith.constant 0 : i32
    %c0_i32_1 = arith.constant 0 : i32
    return %c0_i32, %c0_i32_0 : i32, i32
  }
  func.func @transform_2(%arg0: i32) -> (i32, i32) {
    %c0_i32 = arith.constant 0 : i32
    %c0_i32_0 = arith.constant 0 : i32
    %c0_i32_1 = arith.constant 0 : i32
    return %c0_i32, %c0_i32_0 : i32, i32
  }
  func.func @transform_3(%arg0: i32) -> (i32, i32) {
    %c0_i32 = arith.constant 0 : i32
    %c0_i32_0 = arith.constant 0 : i32
    %c0_i32_1 = arith.constant 0 : i32
    return %c0_i32, %c0_i32_0 : i32, i32
  }
  func.func @transform_4(%arg0: i32) -> (i32, i32) {
    %c0_i32 = arith.constant 0 : i32
    %c0_i32_0 = arith.constant 0 : i32
    %c0_i32_1 = arith.constant 0 : i32
    return %c0_i32, %c0_i32_0 : i32, i32
  }
  func.func @transform_5(%arg0: i32) -> (i32, i32) {
    %c0_i32 = arith.constant 0 : i32
    %c0_i32_0 = arith.constant 0 : i32
    %c0_i32_1 = arith.constant 0 : i32
    return %c0_i32, %c0_i32_0 : i32, i32
  }
  func.func @transform_6(%arg0: i32) -> (i32, i32) {
    %c0_i32 = arith.constant 0 : i32
    %c0_i32_0 = arith.constant 0 : i32
    %c0_i32_1 = arith.constant 0 : i32
    return %c0_i32, %c0_i32_0 : i32, i32
  }
  func.func @transform_7(%arg0: i32) -> (i32, i32) {
    %c0_i32 = arith.constant 0 : i32
    %c0_i32_0 = arith.constant 0 : i32
    %c0_i32_1 = arith.constant 0 : i32
    return %c0_i32, %c0_i32_0 : i32, i32
  }
  func.func @transform_8(%arg0: i32) -> (i32, i32) {
    %c0_i32 = arith.constant 0 : i32
    %c0_i32_0 = arith.constant 0 : i32
    %c0_i32_1 = arith.constant 0 : i32
    return %c0_i32, %c0_i32_0 : i32, i32
  }
  func.func @transform_9(%arg0: i32) -> (i32, i32) {
    %c0_i32 = arith.constant 0 : i32
    %c0_i32_0 = arith.constant 0 : i32
    return %arg0, %c0_i32 : i32, i32
  }
}

</mosaic_0001>

<bundles_post_ra>
// kernel: tpu_custom_call.1
= control target key start
LH: loop header
LB: loop body
LE: loop exit
PB: predicated region body
PF: predicated region fallthrough
CT: control target
= control target key end

     0   :  { %v549_v0 = vlaneseq  ;;  %vm1071_vm0 = vcmask 588800   ;;  %vm4734_vm1 = vcmask 1043456   ;;  %s11282_s0 = inlined_call_operand.vmem [shape: f32[256,8,200], index: 0, kind: input, shape index: {}]   ;;  %s11283_s1 = inlined_call_operand.vmem [shape: f32[1,200], index: 1, kind: input, shape index: {}]   ;;  %s11284_s2 = inlined_call_operand.<no memory space> [shape: f32[1,1], index: 2, kind: input, shape index: {}]   ;;  %s11285_s3 = inlined_call_operand.vmem [shape: bf16[8,512], index: 3, kind: input, shape index: {}]   ;;  %s11286_s4 = inlined_call_operand.vmem [shape: f32[1,512], index: 4, kind: input, shape index: {}]   ;;  %s11287_s5 = inlined_call_operand.vmem [shape: bf16[512,128], index: 5, kind: input, shape index: {}]   ;;  %s11288_s6 = inlined_call_operand.vmem [shape: f32[1,128], index: 6, kind: input, shape index: {}]   ;;  %s11289_s7 = inlined_call_operand.vmem [shape: bf16[128,128], index: 7, kind: input, shape index: {}]   ;;  %s11290_s8 = inlined_call_operand.vmem [shape: f32[1,128], index: 8, kind: input, shape index: {}]   ;;  %s11291_s9 = inlined_call_operand.hbm [shape: f32[256,128], index: 9, kind: output, shape index: {}]  }
   0x1   :  { %v547_v2 = vld [vmem:[%s11283_s1] sm:$0x3]  ;;  %v436_v4 = vld [vmem:[%s11282_s0 + $0xc88] sm:$0xff]  ;;  %v437_v9 = vld [vmem:[%s11282_s0 + $0xc90] sm:$0xff] }
   0x2   :  { %v6742_v1 = vshrl.u32 %v549_v0, 7  ;;  %v435_v3 = vld [vmem:[%s11282_s0 + $0xc80] sm:$0xff]  ;;  %v420_v8 = vld [vmem:[%s11282_s0 + $0xc08] sm:$0xff]  ;;  %v438_v12 = vld [vmem:[%s11282_s0 + $0xc98] sm:$0xff] }
   0x3   :  { %v419_v7 = vld [vmem:[%s11282_s0 + $0xc00] sm:$0xff]  ;;  %v421_v13 = vld [vmem:[%s11282_s0 + $0xc10] sm:$0xff]  ;;  %v422_v14 = vld [vmem:[%s11282_s0 + $0xc18] sm:$0xff] }
   0x4   :  { %11300 = vst [vmem:[#allocation6_spill] sm:$0xff] %v6742_v1  ;;  %v11293_v5 = vsub.s32 0, %v6742_v1  ;;  %v11292_v6 = vsub.s32 1, %v6742_v1  ;;  %v440_v15 = vld [vmem:[%s11282_s0 + $0xca8] sm:$0xff]  ;;  %v439_v24 = vld [vmem:[%s11282_s0 + $0xca0] sm:$0xff]  ;;  %v442_v34 = vld [vmem:[%s11282_s0 + $0xcb8] sm:$0xff] }
   0x5   :  { %v423_v28 = vld [vmem:[%s11282_s0 + $0xc20] sm:$0xff]  ;;  %v424_v29 = vld [vmem:[%s11282_s0 + $0xc28] sm:$0xff]  ;;  %v426_v35 = vld [vmem:[%s11282_s0 + $0xc38] sm:$0xff] }
   0x6   :  { %v6766_v10 = vrot.slane %v547_v2, %v11293_v5  ;;  %v6770_v11 = vrot.slane %v547_v2, %v11292_v6  ;;  %v441_v42 = vld [vmem:[%s11282_s0 + $0xcb0] sm:$0xff]  ;;  %v444_v46 = vld [vmem:[%s11282_s0 + $0xcc8] sm:$0xff]  ;;  %v443_v53 = vld [vmem:[%s11282_s0 + $0xcc0] sm:$0xff] }
   0x7   :  { %v425_v44 = vld [vmem:[%s11282_s0 + $0xc30] sm:$0xff]  ;;  %v428_v48 = vld [vmem:[%s11282_s0 + $0xc48] sm:$0xff]  ;;  %v427_v57 = vld [vmem:[%s11282_s0 + $0xc40] sm:$0xff] }
   0x8   :  { %v959_v16 = vmul.f32 %v6766_v10, %v435_v3  ;;  %v960_v17 = vmul.f32 %v6770_v11, %v436_v4  ;;  %v943_v18 = vmul.f32 %v6766_v10, %v419_v7  ;;  %v944_v19 = vmul.f32 %v6770_v11, %v420_v8  ;;  %v446_v59 = vld [vmem:[%s11282_s0 + $0xcd8] sm:$0xff]  ;;  %v445_v4 = vld [vmem:[%s11282_s0 + $0xcd0] sm:$0xff]  ;;  %v448_v7 = vld [vmem:[%s11282_s0 + $0xce8] sm:$0xff] }
   0x9   :  { %v961_v20 = vmul.f32 %v6766_v10, %v437_v9  ;;  %v962_v21 = vmul.f32 %v6770_v11, %v438_v12  ;;  %v945_v22 = vmul.f32 %v6766_v10, %v421_v13  ;;  %v946_v23 = vmul.f32 %v6770_v11, %v422_v14  ;;  %v430_v60 = vld [vmem:[%s11282_s0 + $0xc58] sm:$0xff]  ;;  %v429_v12 = vld [vmem:[%s11282_s0 + $0xc50] sm:$0xff]  ;;  %v432_v14 = vld [vmem:[%s11282_s0 + $0xc68] sm:$0xff] }
   0xa   :  { %v1872_v25 = vsel %vm1071_vm0, %v960_v17, 0.0  ;;  %v1840_v26 = vsel %vm1071_vm0, %v944_v19, 0.0  ;;  %v964_v27 = vmul.f32 %v6770_v11, %v440_v15  ;;  %v963_v37 = vmul.f32 %v6766_v10, %v439_v24  ;;  %v447_v17 = vld [vmem:[%s11282_s0 + $0xce0] sm:$0xff]  ;;  %v450_v19 = vld [vmem:[%s11282_s0 + $0xcf8] sm:$0xff] }
   0xb   :  { %v1873_v30 = vadd.f32 %v1872_v25, %v959_v16  ;;  %v1841_v31 = vadd.f32 %v1840_v26, %v943_v18  ;;  %v1876_v32 = vsel %vm1071_vm0, %v962_v21, 0.0  ;;  %v1844_v33 = vsel %vm1071_vm0, %v946_v23, 0.0  ;;  %v434_v24 = vld [vmem:[%s11282_s0 + $0xc78] sm:$0xff] }
   0xc   :  { %v1877_v36 = vadd.f32 %v1876_v32, %v961_v20  ;;  %v1845_v38 = vadd.f32 %v1844_v33, %v945_v22  ;;  %v1880_v39 = vsel %vm1071_vm0, %v964_v27, 0.0  ;;  %v947_v40 = vmul.f32 %v6766_v10, %v423_v28  ;;  %v431_v22 = vld [vmem:[%s11282_s0 + $0xc60] sm:$0xff]  ;;  %v454_v25 = vld [vmem:[%s11282_s0 + $0xd18] sm:$0xff]  ;;  %v449_v28 = vld [vmem:[%s11282_s0 + $0xcf0] sm:$0xff] }
   0xd   :  { %1874 = vadd.xlane.f32.xlu1 %v1873_v30  ;;  %1842 = vadd.xlane.f32.xlu0 %v1841_v31  ;;  %v948_v41 = vmul.f32 %v6770_v11, %v424_v29  ;;  %v966_v43 = vmul.f32 %v6770_v11, %v442_v34  ;;  %v950_v45 = vmul.f32 %v6770_v11, %v426_v35  ;;  %v433_v31 = vld [vmem:[%s11282_s0 + $0xc70] sm:$0xff]  ;;  %v452_v32 = vld [vmem:[%s11282_s0 + $0xd08] sm:$0xff]  ;;  %v470_v33 = vld [vmem:[%s11282_s0 + $0xd98] sm:$0xff] }
   0xe   :  { %v1881_v49 = vadd.f32 %v1880_v39, %v963_v37  ;;  %v965_v50 = vmul.f32 %v6766_v10, %v441_v42  ;;  %v949_v52 = vmul.f32 %v6766_v10, %v425_v44  ;;  %v968_v54 = vmul.f32 %v6770_v11, %v444_v46  ;;  %v453_v37 = vld [vmem:[%s11282_s0 + $0xd10] sm:$0xff]  ;;  %v468_v39 = vld [vmem:[%s11282_s0 + $0xd88] sm:$0xff]  ;;  %v451_v46 = vld [vmem:[%s11282_s0 + $0xd00] sm:$0xff] }
   0xf   :  { %v1848_v47 = vsel %vm1071_vm0, %v948_v41, 0.0  ;;  %v1884_v55 = vsel %vm1071_vm0, %v966_v43, 0.0  ;;  %v1852_v56 = vsel %vm1071_vm0, %v950_v45, 0.0  ;;  %v952_v58 = vmul.f32 %v6770_v11, %v428_v48  ;;  %v472_v43 = vld [vmem:[%s11282_s0 + $0xda8] sm:$0xff]  ;;  %v469_v48 = vld [vmem:[%s11282_s0 + $0xd90] sm:$0xff]  ;;  %v70_v6 = vld [vmem:[%s11282_s0 + $0x118] sm:$0xff] }
  0x10   :  { %v1849_v51 = vadd.f32 %v1848_v47, %v947_v40  ;;  %v967_v61 = vmul.f32 %v6766_v10, %v443_v53  ;;  %v1885_v62 = vadd.f32 %v1884_v55, %v965_v50  ;;  %v1853_v63 = vadd.f32 %v1852_v56, %v949_v52  ;;  %v456_v50 = vld [vmem:[%s11282_s0 + $0xd28] sm:$0xff] }
  0x11   :  { %1878 = vadd.xlane.f32.xlu1 %v1877_v36  ;;  %1846 = vadd.xlane.f32.xlu0 %v1845_v38  ;;  %v1888_v2 = vsel %vm1071_vm0, %v968_v54, 0.0  ;;  %v951_v3 = vmul.f32 %v6766_v10, %v427_v57  ;;  %v1856_v8 = vsel %vm1071_vm0, %v952_v58, 0.0  ;;  %v970_v9 = vmul.f32 %v6770_v11, %v446_v59  ;;  %v467_v54 = vld [vmem:[%s11282_s0 + $0xd80] sm:$0xff] }
  0x12   :  { %v954_v13 = vmul.f32 %v6770_v11, %v430_v60  ;;  %v1889_v15 = vadd.f32 %v1888_v2, %v967_v61  ;;  %v969_v16 = vmul.f32 %v6766_v10, %v445_v4  ;;  %v972_v18 = vmul.f32 %v6770_v11, %v448_v7  ;;  %v471_v59 = vld [vmem:[%s11282_s0 + $0xda0] sm:$0xff]  ;;  %v458_v4 = vld [vmem:[%s11282_s0 + $0xd38] sm:$0xff] }
  0x13   :  { %v1857_v20 = vadd.f32 %v1856_v8, %v951_v3  ;;  %v953_v21 = vmul.f32 %v6766_v10, %v429_v12  ;;  %v956_v23 = vmul.f32 %v6770_v11, %v432_v14  ;;  %v1892_v26 = vsel %vm1071_vm0, %v970_v9, 0.0  ;;  %v474_v3 = vld [vmem:[%s11282_s0 + $0xdb8] sm:$0xff] }
  0x14   :  { %v1860_v27 = vsel %vm1071_vm0, %v954_v13, 0.0  ;;  %v971_v29 = vmul.f32 %v6766_v10, %v447_v17  ;;  %v974_v30 = vmul.f32 %v6770_v11, %v450_v19  ;;  %v1896_v34 = vsel %vm1071_vm0, %v972_v18, 0.0  ;;  %v476_v13 = vld [vmem:[%s11282_s0 + $0xdc8] sm:$0xff]  ;;  %v478_v19 = vld [vmem:[%s11282_s0 + $0xdd8] sm:$0xff] }
  0x15   :  { %1882 = vadd.xlane.f32.xlu1 %v1881_v49  ;;  %1850 = vadd.xlane.f32.xlu0 %v1849_v51  ;;  %v955_v35 = vmul.f32 %v6766_v10, %v431_v22  ;;  %v958_v36 = vmul.f32 %v6770_v11, %v434_v24  ;;  %v978_v38 = vmul.f32 %v6770_v11, %v454_v25  ;;  %v1864_v42 = vsel %vm1071_vm0, %v956_v23, 0.0  ;;  %v460_v18 = vld [vmem:[%s11282_s0 + $0xd48] sm:$0xff]  ;;  %v473_v23 = vld [vmem:[%s11282_s0 + $0xdb0] sm:$0xff] }
  0x16   :  { %v1893_v40 = vadd.f32 %v1892_v26, %v969_v16  ;;  %v1861_v41 = vadd.f32 %v1860_v27, %v953_v21  ;;  %v973_v44 = vmul.f32 %v6766_v10, %v449_v28  ;;  %v957_v45 = vmul.f32 %v6766_v10, %v433_v31  ;;  %v457_v25 = vld [vmem:[%s11282_s0 + $0xd30] sm:$0xff]  ;;  %v475_v27 = vld [vmem:[%s11282_s0 + $0xdc0] sm:$0xff] }
  0x17   :  { %v976_v47 = vmul.f32 %v6770_v11, %v452_v32  ;;  %v994_v49 = vmul.f32 %v6770_v11, %v470_v33  ;;  %v1897_v51 = vadd.f32 %v1896_v34, %v971_v29  ;;  %v1900_v52 = vsel %vm1071_vm0, %v974_v30, 0.0  ;;  %v459_v32 = vld [vmem:[%s11282_s0 + $0xd40] sm:$0xff] }
  0x18   :  { %v977_v53 = vmul.f32 %v6766_v10, %v453_v37  ;;  %v992_v55 = vmul.f32 %v6770_v11, %v468_v39  ;;  %v1865_v56 = vadd.f32 %v1864_v42, %v955_v35  ;;  %v1868_v57 = vsel %vm1071_vm0, %v958_v36, 0.0  ;;  %v477_v35 = vld [vmem:[%s11282_s0 + $0xdd0] sm:$0xff]  ;;  %v480_v39 = vld [vmem:[%s11282_s0 + $0xde8] sm:$0xff] }
  0x19   :  { %1886 = vadd.xlane.f32.xlu1 %v1885_v62  ;;  %1854 = vadd.xlane.f32.xlu0 %v1853_v63  ;;  %v1908_v58 = vsel %vm1071_vm0, %v978_v38, 0.0  ;;  %v996_v60 = vmul.f32 %v6770_v11, %v472_v43  ;;  %v975_v61 = vmul.f32 %v6766_v10, %v451_v46  ;;  %v993_v62 = vmul.f32 %v6766_v10, %v469_v48  ;;  %v455_v63 = vld [vmem:[%s11282_s0 + $0xd20] sm:$0xff]  ;;  %v461_v37 = vld [vmem:[%s11282_s0 + $0xd50] sm:$0xff] }
  0x1a   :  { %v980_v2 = vmul.f32 %v6770_v11, %v456_v50  ;;  %v1901_v7 = vadd.f32 %v1900_v52, %v973_v44  ;;  %v1904_v8 = vsel %vm1071_vm0, %v976_v47, 0.0  ;;  %v1940_v9 = vsel %vm1071_vm0, %v994_v49, 0.0  ;;  %v464_v44 = vld [vmem:[%s11282_s0 + $0xd68] sm:$0xff]  ;;  %v482_v49 = vld [vmem:[%s11282_s0 + $0xdf8] sm:$0xff] }
  0x1b   :  { %v991_v12 = vmul.f32 %v6766_v10, %v467_v54  ;;  %v1869_v14 = vadd.f32 %v1868_v57, %v957_v45  ;;  %v1936_v16 = vsel %vm1071_vm0, %v992_v55, 0.0  ;;  %v995_v17 = vmul.f32 %v6766_v10, %v471_v59  ;;  %v466_v50 = vld [vmem:[%s11282_s0 + $0xd78] sm:$0xff]  ;;  %v479_v54 = vld [vmem:[%s11282_s0 + $0xde0] sm:$0xff] }
  0x1c   :  { %v1944_v21 = vsel %vm1071_vm0, %v996_v60, 0.0  ;;  %v979_v22 = vmul.f32 %v6766_v10, %v455_v63  ;;  %v998_v24 = vmul.f32 %v6770_v11, %v474_v3  ;;  %v982_v26 = vmul.f32 %v6770_v11, %v458_v4  ;;  %v486_v57 = vld [vmem:[%s11282_s0 + $0xe18] sm:$0xff]  ;;  %v465_v4 = vld [vmem:[%s11282_s0 + $0xd70] sm:$0xff] }
  0x1d   :  { %1890 = vadd.xlane.f32.xlu1 %v1889_v15  ;;  %1858 = vadd.xlane.f32.xlu0 %v1857_v20  ;;  %v6959_v15 = vadd.f32 %v1908_v58, %v977_v53  ;;  %v462_v20 = vld [vmem:[%s11282_s0 + $0xd58] sm:$0xff]  ;;  %v1905_v28 = vadd.f32 %v1904_v8, %v975_v61  ;;  %v6985_v29 = vadd.f32 %v1940_v9, %v993_v62  ;;  %v1912_v30 = vsel %vm1071_vm0, %v980_v2, 0.0  ;;  %v481_v2 = vld [vmem:[%s11282_s0 + $0xdf0] sm:$0xff]  ;;  %v484_v8 = vld [vmem:[%s11282_s0 + $0xe08] sm:$0xff] }
  0x1e   :  { %v1000_v31 = vmul.f32 %v6770_v11, %v476_v13  ;;  %v6992_v33 = vadd.f32 %v1936_v16, %v991_v12  ;;  %v984_v34 = vmul.f32 %v6770_v11, %v460_v18  ;;  %v1002_v36 = vmul.f32 %v6770_v11, %v478_v19 }
  0x1f   :  { %v986_v38 = vmul.f32 %v6770_v11, %v462_v20  ;;  %v981_v42 = vmul.f32 %v6766_v10, %v457_v25  ;;  %v999_v43 = vmul.f32 %v6766_v10, %v475_v27  ;;  %v7014_v45 = vadd.f32 %v1912_v30, %v979_v22  ;;  %v500_v22 = vld [vmem:[%s11282_s0 + $0xe88] sm:$0xff] }
  0x20   :  { %v1948_v46 = vsel %vm1071_vm0, %v998_v24, 0.0  ;;  %v1916_v47 = vsel %vm1071_vm0, %v982_v26, 0.0  ;;  %v983_v48 = vmul.f32 %v6766_v10, %v459_v32  ;;  %v1001_v52 = vmul.f32 %v6766_v10, %v477_v35  ;;  %v483_v26 = vld [vmem:[%s11282_s0 + $0xe00] sm:$0xff] }
  0x21   :  { %1894 = vadd.xlane.f32.xlu1 %v1893_v40  ;;  %1862 = vadd.xlane.f32.xlu0 %v1861_v41  ;;  %v7006_v40 = vadd.f32 %v1944_v21, %v995_v17  ;;  %v997_v41 = vmul.f32 %v6766_v10, %v473_v23  ;;  %v985_v53 = vmul.f32 %v6766_v10, %v461_v37  ;;  %v1920_v58 = vsel %vm1071_vm0, %v984_v34, 0.0  ;;  %v502_v17 = vld [vmem:[%s11282_s0 + $0xe98] sm:$0xff]  ;;  %v504_v23 = vld [vmem:[%s11282_s0 + $0xea8] sm:$0xff]  ;;  %v501_v34 = vld [vmem:[%s11282_s0 + $0xe90] sm:$0xff] }
  0x22   :  { %v1004_v55 = vmul.f32 %v6770_v11, %v480_v39  ;;  %v1956_v59 = vsel %vm1071_vm0, %v1002_v36, 0.0  ;;  %v1924_v60 = vsel %vm1071_vm0, %v986_v38, 0.0  ;;  %v988_v61 = vmul.f32 %v6770_v11, %v464_v44  ;;  %v499_v38 = vld [vmem:[%s11282_s0 + $0xe80] sm:$0xff] }
  0x23   :  { %v7042_v62 = vadd.f32 %v1948_v46, %v997_v41  ;;  %v7044_v63 = vadd.f32 %v1916_v47, %v981_v42  ;;  %v1006_v3 = vmul.f32 %v6770_v11, %v482_v49  ;;  %v1003_v12 = vmul.f32 %v6766_v10, %v479_v54  ;;  %v503_v41 = vld [vmem:[%s11282_s0 + $0xea0] sm:$0xff] }
  0x24   :  { %v1010_v16 = vmul.f32 %v6770_v11, %v486_v57  ;;  %v7069_v18 = vadd.f32 %v1920_v58, %v983_v48  ;;  %v7071_v19 = vadd.f32 %v1956_v59, %v1001_v52  ;;  %v7073_v20 = vadd.f32 %v1924_v60, %v985_v53  ;;  %v487_v46 = vld [vmem:[%s11282_s0 + $0xe20] sm:$0xff]  ;;  %v506_v48 = vld [vmem:[%s11282_s0 + $0xeb8] sm:$0xff]  ;;  %v508_v52 = vld [vmem:[%s11282_s0 + $0xec8] sm:$0xff] }
  0x25   :  { %1898 = vadd.xlane.f32.xlu1 %v1897_v51  ;;  %1866 = vadd.xlane.f32.xlu0 %v1865_v56  ;;  %v1952_v51 = vsel %vm1071_vm0, %v1000_v31, 0.0  ;;  %v463_v56 = vld [vmem:[%s11282_s0 + $0xd60] sm:$0xff]  ;;  %v1960_v21 = vsel %vm1071_vm0, %v1004_v55, 0.0  ;;  %v1928_v24 = vsel %vm1071_vm0, %v988_v61, 0.0  ;;  %v989_v25 = vmul.f32 %v6766_v10, %v465_v4  ;;  %v505_v57 = vld [vmem:[%s11282_s0 + $0xeb0] sm:$0xff]  ;;  %v492_v58 = vld [vmem:[%s11282_s0 + $0xe48] sm:$0xff] }
  0x26   :  { %v7057_v9 = vadd.f32 %v1952_v51, %v999_v43  ;;  %v987_v13 = vmul.f32 %v6766_v10, %v463_v56  ;;  %v1008_v27 = vmul.f32 %v6770_v11, %v484_v8  ;;  %v1964_v30 = vsel %vm1071_vm0, %v1006_v3, 0.0  ;;  %v490_v51 = vld [vmem:[%s11282_s0 + $0xe38] sm:$0xff]  ;;  %v489_v4 = vld [vmem:[%s11282_s0 + $0xe30] sm:$0xff] }
  0x27   :  { %v1026_v35 = vmul.f32 %v6770_v11, %v502_v17  ;;  %v7099_v36 = vadd.f32 %v1960_v21, %v1003_v12  ;;  %v1972_v37 = vsel %vm1071_vm0, %v1010_v16, 0.0  ;;  %v1024_v39 = vmul.f32 %v6770_v11, %v500_v22  ;;  %v510_v59 = vld [vmem:[%s11282_s0 + $0xed8] sm:$0xff]  ;;  %v512_v17 = vld [vmem:[%s11282_s0 + $0xee8] sm:$0xff] }
  0x28   :  { %v1028_v42 = vmul.f32 %v6770_v11, %v504_v23  ;;  %v7112_v43 = vadd.f32 %v1928_v24, %v987_v13  ;;  %v1007_v44 = vmul.f32 %v6766_v10, %v483_v26  ;;  %v1023_v55 = vmul.f32 %v6766_v10, %v499_v38  ;;  %v509_v23 = vld [vmem:[%s11282_s0 + $0xed0] sm:$0xff]  ;;  %v514_v38 = vld [vmem:[%s11282_s0 + $0xef8] sm:$0xff] }
  0x29   :  { %1902 = vadd.xlane.f32.xlu1 %v1901_v7  ;;  %1870 = vadd.xlane.f32.xlu0 %v1869_v14  ;;  %v990_v7 = vmul.f32 %v6770_v11, %v466_v50  ;;  %v485_v14 = vld [vmem:[%s11282_s0 + $0xe10] sm:$0xff]  ;;  %v2004_v54 = vsel %vm1071_vm0, %v1026_v35, 0.0  ;;  %v1027_v56 = vmul.f32 %v6766_v10, %v503_v41  ;;  %v2000_v60 = vsel %vm1071_vm0, %v1024_v39, 0.0  ;;  %v511_v35 = vld [vmem:[%s11282_s0 + $0xee0] sm:$0xff] }
  0x2a   :  { %v1009_v32 = vmul.f32 %v6766_v10, %v485_v14  ;;  %v2008_v61 = vsel %vm1071_vm0, %v1028_v42, 0.0  ;;  %v1030_v3 = vmul.f32 %v6770_v11, %v506_v48  ;;  %v1014_v13 = vmul.f32 %v6770_v11, %v490_v51  ;;  %v507_v14 = vld [vmem:[%s11282_s0 + $0xec0] sm:$0xff] }
  0x2b   :  { %v1932_v31 = vsel %vm1071_vm0, %v990_v7, 0.0  ;;  %v494_v7 = vld [vmem:[%s11282_s0 + $0xe58] sm:$0xff]  ;;  %v1032_v16 = vmul.f32 %v6770_v11, %v508_v52  ;;  %v1016_v22 = vmul.f32 %v6770_v11, %v492_v58  ;;  %v1034_v24 = vmul.f32 %v6770_v11, %v510_v59 }
  0x2c   :  { %v7124_v50 = vadd.f32 %v1932_v31, %v989_v25  ;;  %v7134_v53 = vadd.f32 %v1972_v37, %v1009_v32  ;;  %v7184_v25 = vadd.f32 %v2008_v61, %v1027_v56  ;;  %v1013_v26 = vmul.f32 %v6766_v10, %v489_v4  ;;  %v497_v56 = vld [vmem:[%s11282_s0 + $0xe70] sm:$0xff]  ;;  %v516_v4 = vld [vmem:[%s11282_s0 + $0xf08] sm:$0xff] }
  0x2d   :  { %1910 = vadd.xlane.f32.xlu1 %v6959_v15  ;;  %1906 = vadd.xlane.f32.xlu0 %v1905_v28  ;;  %v1005_v15 = vmul.f32 %v6766_v10, %v481_v2  ;;  %v488_v28 = vld [vmem:[%s11282_s0 + $0xe28] sm:$0xff]  ;;  %v1011_v2 = vmul.f32 %v6766_v10, %v487_v46  ;;  %v2012_v32 = vsel %vm1071_vm0, %v1030_v3, 0.0  ;;  %v1036_v37 = vmul.f32 %v6770_v11, %v512_v17  ;;  %v498_v46 = vld [vmem:[%s11282_s0 + $0xe78] sm:$0xff]  ;;  %v515_v3 = vld [vmem:[%s11282_s0 + $0xf00] sm:$0xff] }
  0x2e   :  { %v1012_v47 = vmul.f32 %v6770_v11, %v488_v28  ;;  %v1018_v28 = vmul.f32 %v6770_v11, %v494_v7  ;;  %v1980_v39 = vsel %vm1071_vm0, %v1014_v13, 0.0  ;;  %v2016_v41 = vsel %vm1071_vm0, %v1032_v16, 0.0  ;;  %v534_v16 = vld [vmem:[%s11282_s0 + $0xf98] sm:$0xff] }
  0x2f   :  { %v7122_v49 = vadd.f32 %v1964_v30, %v1005_v15  ;;  %v7182_v15 = vadd.f32 %v2000_v60, %v1023_v55  ;;  %v496_v30 = vld [vmem:[%s11282_s0 + $0xe68] sm:$0xff]  ;;  %v2020_v48 = vsel %vm1071_vm0, %v1034_v24, 0.0  ;;  %v1035_v52 = vmul.f32 %v6766_v10, %v511_v35 }
  0x30   :  { %v1976_v12 = vsel %vm1071_vm0, %v1012_v47, 0.0  ;;  %v1984_v47 = vsel %vm1071_vm0, %v1016_v22, 0.0  ;;  %v1988_v51 = vsel %vm1071_vm0, %v1018_v28, 0.0  ;;  %v1038_v55 = vmul.f32 %v6770_v11, %v514_v38  ;;  %v531_v22 = vld [vmem:[%s11282_s0 + $0xf80] sm:$0xff]  ;;  %v536_v24 = vld [vmem:[%s11282_s0 + $0xfa8] sm:$0xff] }
  0x31   :  { %1942 = vadd.xlane.f32.xlu1 %v6985_v29  ;;  %1938 = vadd.xlane.f32.xlu0 %v6992_v33  ;;  %v1968_v29 = vsel %vm1071_vm0, %v1008_v27, 0.0  ;;  %v1025_v33 = vmul.f32 %v6766_v10, %v501_v34  ;;  %v493_v27 = vld [vmem:[%s11282_s0 + $0xe50] sm:$0xff]  ;;  %v7194_v31 = vadd.f32 %v1976_v12, %v1011_v2  ;;  %v1031_v34 = vmul.f32 %v6766_v10, %v507_v14 }
  0x32   :  { %v7160_v8 = vadd.f32 %v1968_v29, %v1007_v44  ;;  %v1033_v44 = vmul.f32 %v6766_v10, %v509_v23  ;;  %v1020_v29 = vmul.f32 %v6770_v11, %v496_v30  ;;  %v7235_v58 = vadd.f32 %v1980_v39, %v1013_v26  ;;  %v517_v2 = vld [vmem:[%s11282_s0 + $0xf10] sm:$0xff]  ;;  %v535_v23 = vld [vmem:[%s11282_s0 + $0xfa0] sm:$0xff] }
  0x33   :  { %v7171_v21 = vadd.f32 %v2004_v54, %v1025_v33  ;;  %v513_v54 = vld [vmem:[%s11282_s0 + $0xef0] sm:$0xff]  ;;  %v7237_v59 = vadd.f32 %v2016_v41, %v1031_v34  ;;  %v2024_v60 = vsel %vm1071_vm0, %v1036_v37, 0.0  ;;  %v1022_v61 = vmul.f32 %v6770_v11, %v498_v46  ;;  %v519_v39 = vld [vmem:[%s11282_s0 + $0xf20] sm:$0xff]  ;;  %v538_v41 = vld [vmem:[%s11282_s0 + $0xfb8] sm:$0xff] }
  0x34   :  { %v7254_v12 = vadd.f32 %v2020_v48, %v1033_v44  ;;  %v533_v14 = vld [vmem:[%s11282_s0 + $0xf90] sm:$0xff]  ;;  %v7280_v26 = vadd.f32 %v2024_v60, %v1035_v52  ;;  %v1021_v28 = vmul.f32 %v6766_v10, %v497_v56  ;;  %v1040_v30 = vmul.f32 %v6770_v11, %v516_v4  ;;  %v540_v48 = vld [vmem:[%s11282_s0 + $0xfc8] sm:$0xff] }
  0x35   :  { %1946 = vadd.xlane.f32.xlu1 %v7006_v40  ;;  %1914 = vadd.xlane.f32.xlu0 %v7014_v45  ;;  %v1029_v40 = vmul.f32 %v6766_v10, %v505_v57  ;;  %v491_v45 = vld [vmem:[%s11282_s0 + $0xe40] sm:$0xff]  ;;  %v518_v57 = vld [vmem:[%s11282_s0 + $0xf18] sm:$0xff]  ;;  %v1996_v34 = vsel %vm1071_vm0, %v1022_v61, 0.0  ;;  %v1041_v35 = vmul.f32 %v6766_v10, %v517_v2  ;;  %v1058_v37 = vmul.f32 %v6770_v11, %v534_v16 }
  0x36   :  { %v1015_v42 = vmul.f32 %v6766_v10, %v491_v45  ;;  %v1042_v45 = vmul.f32 %v6770_v11, %v518_v57  ;;  %v1039_v44 = vmul.f32 %v6766_v10, %v515_v3  ;;  %v1060_v46 = vmul.f32 %v6770_v11, %v536_v24  ;;  %v542_v57 = vld [vmem:[%s11282_s0 + $0xfd8] sm:$0xff]  ;;  %v521_v3 = vld [vmem:[%s11282_s0 + $0xf30] sm:$0xff] }
  0x37   :  { %v7221_v33 = vadd.f32 %v2012_v32, %v1029_v40  ;;  %v1037_v40 = vmul.f32 %v6766_v10, %v513_v54  ;;  %v520_v32 = vld [vmem:[%s11282_s0 + $0xf28] sm:$0xff]  ;;  %v7321_v52 = vadd.f32 %v1996_v34, %v1021_v28  ;;  %v2032_v54 = vsel %vm1071_vm0, %v1040_v30, 0.0  ;;  %v525_v24 = vld [vmem:[%s11282_s0 + $0xf50] sm:$0xff] }
  0x38   :  { %v7252_v7 = vadd.f32 %v1984_v47, %v1015_v42  ;;  %v522_v47 = vld [vmem:[%s11282_s0 + $0xf38] sm:$0xff]  ;;  %v1059_v56 = vmul.f32 %v6766_v10, %v535_v23  ;;  %v2068_v60 = vsel %vm1071_vm0, %v1058_v37, 0.0  ;;  %v1062_v2 = vmul.f32 %v6770_v11, %v538_v41  ;;  %v544_v37 = vld [vmem:[%s11282_s0 + $0xfe8] sm:$0xff] }
  0x39   :  { %1950 = vadd.xlane.f32.xlu1 %v7042_v62  ;;  %1918 = vadd.xlane.f32.xlu0 %v7044_v63  ;;  %v1017_v62 = vmul.f32 %v6766_v10, %v493_v27  ;;  %v495_v63 = vld [vmem:[%s11282_s0 + $0xe60] sm:$0xff]  ;;  %v2028_v27 = vsel %vm1071_vm0, %v1038_v55, 0.0  ;;  %v1055_v55 = vmul.f32 %v6766_v10, %v531_v22  ;;  %v1046_v4 = vmul.f32 %v6770_v11, %v522_v47  ;;  %v38_v47 = vld [vmem:[%s11282_s0 + $0x18] sm:$0xff] }
  0x3a   :  { %v1019_v13 = vmul.f32 %v6766_v10, %v495_v63  ;;  %v1044_v63 = vmul.f32 %v6770_v11, %v520_v32  ;;  %v2072_v16 = vsel %vm1071_vm0, %v1060_v46, 0.0  ;;  %v7352_v22 = vadd.f32 %v2032_v54, %v1039_v44  ;;  %v528_v46 = vld [vmem:[%s11282_s0 + $0xf68] sm:$0xff] }
  0x3b   :  { %v7266_v17 = vadd.f32 %v1988_v51, %v1017_v62  ;;  %v7310_v62 = vadd.f32 %v2028_v27, %v1037_v40  ;;  %v524_v51 = vld [vmem:[%s11282_s0 + $0xf48] sm:$0xff]  ;;  %v523_v40 = vld [vmem:[%s11282_s0 + $0xf40] sm:$0xff]  ;;  %v1066_v23 = vmul.f32 %v6770_v11, %v542_v57  ;;  %v526_v27 = vld [vmem:[%s11282_s0 + $0xf58] sm:$0xff]  ;;  %v1045_v34 = vmul.f32 %v6766_v10, %v521_v3 }
  0x3c   :  { %v2044_v41 = vsel %vm1071_vm0, %v1046_v4, 0.0  ;;  %v37_v57 = vld [vmem:[%s11282_s0 + $0x10] sm:$0xff]  ;;  %v1049_v3 = vmul.f32 %v6766_v10, %v525_v24  ;;  %v1052_v4 = vmul.f32 %v6770_v11, %v528_v46 }
  0x3d   :  { %1954 = vadd.xlane.f32.xlu1 %v7057_v9  ;;  %1922 = vadd.xlane.f32.xlu0 %v7069_v18  ;;  %v532_v9 = vld [vmem:[%s11282_s0 + $0xf88] sm:$0xff]  ;;  %v1992_v18 = vsel %vm1071_vm0, %v1020_v29, 0.0  ;;  %v537_v29 = vld [vmem:[%s11282_s0 + $0xfb0] sm:$0xff]  ;;  %v2084_v54 = vsel %vm1071_vm0, %v1066_v23, 0.0  ;;  %v561_v46 = vmul.f32 %v6766_v10, %v37_v57 }
  0x3e   :  { %v1056_v38 = vmul.f32 %v6770_v11, %v532_v9  ;;  %v7300_v42 = vadd.f32 %v1992_v18, %v1019_v13  ;;  %v539_v13 = vld [vmem:[%s11282_s0 + $0xfc0] sm:$0xff]  ;;  %v1043_v9 = vmul.f32 %v6766_v10, %v519_v39  ;;  %v1064_v18 = vmul.f32 %v6770_v11, %v540_v48 }
  0x3f   :  { %v1061_v32 = vmul.f32 %v6766_v10, %v537_v29  ;;  %v2076_v39 = vsel %vm1071_vm0, %v1062_v2, 0.0  ;;  %v1063_v44 = vmul.f32 %v6766_v10, %v539_v13  ;;  %v527_v29 = vld [vmem:[%s11282_s0 + $0xf60] sm:$0xff]  ;;  %v7414_v2 = vadd.f32 %v2044_v41, %v1045_v34  ;;  %v53_v13 = vld [vmem:[%s11282_s0 + $0x90] sm:$0xff]  ;;  %v530_v34 = vld [vmem:[%s11282_s0 + $0xf78] sm:$0xff] }
  0x40   :  { %v2064_v61 = vsel %vm1071_vm0, %v1056_v38, 0.0  ;;  %v7375_v38 = vadd.f32 %v2072_v16, %v1059_v56  ;;  %v1068_v56 = vmul.f32 %v6770_v11, %v544_v37  ;;  %v52_v16 = vld [vmem:[%s11282_s0 + $0x88] sm:$0xff] }
  0x41   :  { %1958 = vadd.xlane.f32.xlu1 %v7071_v19  ;;  %1926 = vadd.xlane.f32.xlu0 %v7073_v20  ;;  %v2036_v19 = vsel %vm1071_vm0, %v1042_v45, 0.0  ;;  %v1057_v20 = vmul.f32 %v6766_v10, %v533_v14  ;;  %v541_v45 = vld [vmem:[%s11282_s0 + $0xfd0] sm:$0xff]  ;;  %v7365_v30 = vadd.f32 %v2064_v61, %v1055_v55  ;;  %v1050_v55 = vmul.f32 %v6770_v11, %v526_v27 }
  0x42   :  { %v7341_v14 = vadd.f32 %v2036_v19, %v1041_v35  ;;  %v543_v35 = vld [vmem:[%s11282_s0 + $0xfe0] sm:$0xff]  ;;  %v2080_v19 = vsel %vm1071_vm0, %v1064_v18, 0.0  ;;  %v7412_v61 = vadd.f32 %v2076_v39, %v1061_v32  ;;  %v545_v32 = vld [vmem:[%s11282_s0 + $0xff0] sm:$0xff]  ;;  %v2088_v37 = vsel %vm1071_vm0, %v1068_v56, 0.0 }
  0x43   :  { %v7363_v28 = vadd.f32 %v2068_v60, %v1057_v20  ;;  %v1047_v20 = vmul.f32 %v6766_v10, %v523_v40  ;;  %v35_v60 = vld [vmem:[%s11282_s0] sm:$0xff]  ;;  %v1067_v18 = vmul.f32 %v6766_v10, %v543_v35  ;;  %v562_v40 = vmul.f32 %v6770_v11, %v38_v47 }
  0x44   :  { %v2052_v35 = vsel %vm1071_vm0, %v1050_v55, 0.0  ;;  %v1051_v39 = vmul.f32 %v6766_v10, %v527_v29  ;;  %v576_v41 = vmul.f32 %v6770_v11, %v52_v16  ;;  %v559_v47 = vmul.f32 %v6766_v10, %v35_v60  ;;  %v40_v60 = vld [vmem:[%s11282_s0 + $0x28] sm:$0xff]  ;;  %v57_v16 = vld [vmem:[%s11282_s0 + $0xb0] sm:$0xff] }
  0x45   :  { %1962 = vadd.xlane.f32.xlu1 %v7099_v36  ;;  %1930 = vadd.xlane.f32.xlu0 %v7112_v43  ;;  %v2040_v36 = vsel %vm1071_vm0, %v1044_v63, 0.0  ;;  %v1048_v43 = vmul.f32 %v6770_v11, %v524_v51  ;;  %v1065_v63 = vmul.f32 %v6766_v10, %v541_v45  ;;  %v36_v51 = vld [vmem:[%s11282_s0 + $0x8] sm:$0xff]  ;;  %v577_v29 = vmul.f32 %v6766_v10, %v53_v13 }
  0x46   :  { %v7388_v48 = vadd.f32 %v2040_v36, %v1043_v9  ;;  %v7424_v9 = vadd.f32 %v2080_v19, %v1063_v44  ;;  %v560_v45 = vmul.f32 %v6770_v11, %v36_v51  ;;  %v51_v36 = vld [vmem:[%s11282_s0 + $0x80] sm:$0xff]  ;;  %v2056_v44 = vsel %vm1071_vm0, %v1052_v4, 0.0  ;;  %v58_v4 = vld [vmem:[%s11282_s0 + $0xb8] sm:$0xff] }
  0x47   :  { %v7439_v24 = vadd.f32 %v2084_v54, %v1065_v63  ;;  %v1054_v51 = vmul.f32 %v6770_v11, %v530_v34  ;;  %v7475_v54 = vadd.f32 %v2052_v35, %v1049_v3  ;;  %v575_v56 = vmul.f32 %v6766_v10, %v51_v36 }
  0x48   :  { %v1072_v63 = vsel %vm1071_vm0, %v560_v45, 0.0  ;;  %v7486_v13 = vadd.f32 %v2088_v37, %v1067_v18  ;;  %v1069_v3 = vmul.f32 %v6766_v10, %v545_v32  ;;  %v60_v32 = vld [vmem:[%s11282_s0 + $0xc8] sm:$0xff]  ;;  %v564_v37 = vmul.f32 %v6770_v11, %v40_v60 }
  0x49   :  { %1966 = vadd.xlane.f32.xlu1 %v7122_v49  ;;  %1934 = vadd.xlane.f32.xlu0 %v7124_v50  ;;  %v54_v49 = vld [vmem:[%s11282_s0 + $0x98] sm:$0xff]  ;;  %v2048_v50 = vsel %vm1071_vm0, %v1048_v43, 0.0  ;;  %v7500_v36 = vadd.f32 %v1072_v63, %v559_v47  ;;  %v61_v63 = vld [vmem:[%s11282_s0 + $0xd0] sm:$0xff] }
  0x4a   :  { %v546_v43 = vld [vmem:[%s11282_s0 + $0xff8] sm:$0xff]  ;;  %v7437_v23 = vadd.f32 %v2048_v50, %v1047_v20  ;;  %v578_v27 = vmul.f32 %v6770_v11, %v54_v49  ;;  %v1076_v20 = vsel %vm1071_vm0, %v562_v40, 0.0  ;;  %v55_v49 = vld [vmem:[%s11282_s0 + $0xa0] sm:$0xff] }
  0x4b   :  { %v1070_v19 = vmul.f32 %v6770_v11, %v546_v43  ;;  %v39_v50 = vld [vmem:[%s11282_s0 + $0x20] sm:$0xff]  ;;  %v42_v40 = vld [vmem:[%s11282_s0 + $0x38] sm:$0xff]  ;;  %v7498_v45 = vadd.f32 %v1076_v20, %v561_v46  ;;  %v579_v35 = vmul.f32 %v6766_v10, %v55_v49 }
  0x4c   :  { %v1108_v55 = vsel %vm1071_vm0, %v578_v27, 0.0  ;;  %v41_v27 = vld [vmem:[%s11282_s0 + $0x30] sm:$0xff]  ;;  %v43_v20 = vld [vmem:[%s11282_s0 + $0x40] sm:$0xff]  ;;  %v566_v49 = vmul.f32 %v6770_v11, %v42_v40 }
  0x4d   :  { %1974 = vadd.xlane.f32.xlu1 %v7134_v53  ;;  %1970 = vadd.xlane.f32.xlu0 %v7160_v8  ;;  %v56_v53 = vld [vmem:[%s11282_s0 + $0xa8] sm:$0xff]  ;;  %v3403_v8 = vand.u32 127, %v549_v0  ;;  %v529_v0 = vld [vmem:[%s11282_s0 + $0xf70] sm:$0xff]  ;;  %v2092_v18 = vsel %vm1071_vm0, %v1070_v19, 0.0  ;;  %v7510_v34 = vadd.f32 %v1108_v55, %v577_v29  ;;  %v563_v19 = vmul.f32 %v6766_v10, %v39_v50 }
  0x4e   :  { %v580_v57 = vmul.f32 %v6770_v11, %v56_v53  ;;  %v1053_v43 = vmul.f32 %v6766_v10, %v529_v0  ;;  %v2060_v53 = vsel %vm1071_vm0, %v1054_v51, 0.0  ;;  %v582_v0 = vmul.f32 %v6770_v11, %v58_v4  ;;  %v48_v55 = vld [vmem:[%s11282_s0 + $0x68] sm:$0xff] }
  0x4f   :  { %v7543_v29 = vadd.f32 %v2092_v18, %v1069_v3  ;;  %v7546_v51 = vsub.s32 %v3403_v8, %v6742_v1  ;;  %v584_v50 = vmul.f32 %v6770_v11, %v60_v32  ;;  %v45_v8 = vld [vmem:[%s11282_s0 + $0x50] sm:$0xff]  ;;  %v1080_v3 = vsel %vm1071_vm0, %v564_v37, 0.0  ;;  %v66_v37 = vld [vmem:[%s11282_s0 + $0xf8] sm:$0xff] }
  0x50   :  { %v1112_v47 = vsel %vm1071_vm0, %v580_v57, 0.0  ;;  %v581_v57 = vmul.f32 %v6766_v10, %v57_v16  ;;  %v565_v40 = vmul.f32 %v6766_v10, %v41_v27  ;;  %v63_v16 = vld [vmem:[%s11282_s0 + $0xe0] sm:$0xff]  ;;  %v1116_v32 = vsel %vm1071_vm0, %v582_v0, 0.0 }
  0x51   :  { %2006 = vadd.xlane.f32.xlu1 %v7171_v21  ;;  %2002 = vadd.xlane.f32.xlu0 %v7182_v15  ;;  %v7488_v21 = vadd.f32 %v2056_v44, %v1051_v39  ;;  %v1104_v15 = vsel %vm1071_vm0, %v576_v41, 0.0  ;;  %v59_v39 = vld [vmem:[%s11282_s0 + $0xc0] sm:$0xff]  ;;  %v44_v41 = vld [vmem:[%s11282_s0 + $0x48] sm:$0xff]  ;;  %v62_v44 = vld [vmem:[%s11282_s0 + $0xd8] sm:$0xff]  ;;  %11301 = vst [vmem:[#allocation7_spill] sm:$0xff] %v7546_v51  ;;  %v7591_v0 = vadd.f32 %v1080_v3, %v563_v19 }
  0x52   :  { %v7526_v46 = vadd.f32 %v1104_v15, %v575_v56  ;;  %v7553_v56 = vadd.f32 %v2060_v53, %v1053_v43  ;;  %v568_v60 = vmul.f32 %v6770_v11, %v44_v41  ;;  %v586_v4 = vmul.f32 %v6770_v11, %v62_v44  ;;  %v47_v43 = vld [vmem:[%s11282_s0 + $0x60] sm:$0xff]  ;;  %v50_v41 = vld [vmem:[%s11282_s0 + $0x78] sm:$0xff]  ;;  %v68_v19 = vld [vmem:[%s11282_s0 + $0x108] sm:$0xff] }
  0x53   :  { %v7561_v15 = vadd.f32 %v1112_v47, %v579_v35  ;;  %v583_v53 = vmul.f32 %v6766_v10, %v59_v39  ;;  %v572_v35 = vmul.f32 %v6770_v11, %v48_v55  ;;  %v567_v44 = vmul.f32 %v6766_v10, %v43_v20  ;;  %v65_v47 = vld [vmem:[%s11282_s0 + $0xf0] sm:$0xff] }
  0x54   :  { %v585_v39 = vmul.f32 %v6766_v10, %v61_v63  ;;  %v569_v55 = vmul.f32 %v6766_v10, %v45_v8  ;;  %v571_v20 = vmul.f32 %v6766_v10, %v47_v43  ;;  %v590_v63 = vmul.f32 %v6770_v11, %v66_v37  ;;  %v49_v3 = vld [vmem:[%s11282_s0 + $0x70] sm:$0xff]  ;;  %v88_v37 = vld [vmem:[%s11282_s0 + $0x1a8] sm:$0xff] }
  0x55   :  { %2010 = vadd.xlane.f32.xlu1 %v7184_v25  ;;  %1978 = vadd.xlane.f32.xlu0 %v7194_v31  ;;  %v46_v25 = vld [vmem:[%s11282_s0 + $0x58] sm:$0xff]  ;;  %v64_v31 = vld [vmem:[%s11282_s0 + $0xe8] sm:$0xff]  ;;  %v1096_v8 = vsel %vm1071_vm0, %v572_v35, 0.0  ;;  %v67_v35 = vld [vmem:[%s11282_s0 + $0x100] sm:$0xff]  ;;  %v589_v5 = vmul.f32 %v6766_v10, %v65_v47 }
  0x56   :  { %v570_v18 = vmul.f32 %v6770_v11, %v46_v25  ;;  %v588_v27 = vmul.f32 %v6770_v11, %v64_v31  ;;  %v1088_v25 = vsel %vm1071_vm0, %v568_v60, 0.0  ;;  %v1124_v31 = vsel %vm1071_vm0, %v586_v4, 0.0 }
  0x57   :  { %v7608_v60 = vadd.f32 %v1116_v32, %v581_v57  ;;  %v7629_v32 = vadd.f32 %v1088_v25, %v567_v44  ;;  %v7649_v44 = vadd.f32 %v1096_v8, %v571_v20  ;;  %v85_v25 = vld [vmem:[%s11282_s0 + $0x190] sm:$0xff]  ;;  %v612_v20 = vmul.f32 %v6770_v11, %v88_v37 }
  0x58   :  { %v1128_v4 = vsel %vm1071_vm0, %v588_v27, 0.0  ;;  %v7631_v27 = vadd.f32 %v1124_v31, %v585_v39  ;;  %v1132_v39 = vsel %vm1071_vm0, %v590_v63, 0.0  ;;  %v573_v63 = vmul.f32 %v6766_v10, %v49_v3 }
  0x59   :  { %2014 = vadd.xlane.f32.xlu1 %v7221_v33  ;;  %1982 = vadd.xlane.f32.xlu0 %v7235_v58  ;;  %v1084_v33 = vsel %vm1071_vm0, %v566_v49, 0.0  ;;  %v1120_v58 = vsel %vm1071_vm0, %v584_v50, 0.0  ;;  %v1092_v49 = vsel %vm1071_vm0, %v570_v18, 0.0  ;;  %v587_v50 = vmul.f32 %v6766_v10, %v63_v16  ;;  %v69_v16 = vld [vmem:[%s11282_s0 + $0x110] sm:$0xff]  ;;  %11305 = vst [vmem:[#allocation11_spill] sm:$0xff] %v7649_v44 }
  0x5a   :  { %v574_v18 = vmul.f32 %v6770_v11, %v50_v41  ;;  %v7625_v57 = vadd.f32 %v1084_v33, %v565_v40  ;;  %v7627_v43 = vadd.f32 %v1120_v58, %v583_v53  ;;  %11302 = vst [vmem:[#allocation8_spill] sm:$0xff] %v7631_v27  ;;  %v7639_v41 = vadd.f32 %v1092_v49, %v569_v55  ;;  %v2866_v33 = vld [vmem:[%s11285_s3] sm:$0xff] }
  0x5b   :  { %v594_v40 = vmul.f32 %v6770_v11, %v70_v6  ;;  %v592_v53 = vmul.f32 %v6770_v11, %v68_v19  ;;  %v7647_v58 = vadd.f32 %v1128_v4, %v587_v50  ;;  %v72_v6 = vld [vmem:[%s11282_s0 + $0x128] sm:$0xff]  ;;  %v83_v55 = vld [vmem:[%s11282_s0 + $0x180] sm:$0xff]  ;;  %v593_v19 = vmul.f32 %v6766_v10, %v69_v16  ;;  %v89_v16 = vld [vmem:[%s11282_s0 + $0x1b0] sm:$0xff] }
  0x5c   :  { %11303 = vst [vmem:[#allocation9_spill] sm:$0xff] %v7639_v41  ;;  %v1100_v31 = vsel %vm1071_vm0, %v574_v18, 0.0  ;;  %v87_v50 = vld [vmem:[%s11282_s0 + $0x1a0] sm:$0xff]  ;;  %v6239_v8 = vcombine.high %v2866_v33, %v2866_v33  ;;  %v6238_v18 = vcombine.low %v2866_v33, %v2866_v33  ;;  %v609_v1 = vmul.f32 %v6766_v10, %v85_v25  ;;  %v73_v33 = vld [vmem:[%s11282_s0 + $0x130] sm:$0xff] }
  0x5d   :  { %2018 = vadd.xlane.f32.xlu1 %v7237_v59  ;;  %1986 = vadd.xlane.f32.xlu0 %v7252_v7  ;;  %v86_v59 = vld [vmem:[%s11282_s0 + $0x198] sm:$0xff]  ;;  %v84_v7 = vld [vmem:[%s11282_s0 + $0x188] sm:$0xff]  ;;  %11304 = vst [vmem:[#allocation10_spill] sm:$0xff] %v7647_v58  ;;  %v71_v4 = vld [vmem:[%s11282_s0 + $0x120] sm:$0xff]  ;;  %v1136_v37 = vsel %vm1071_vm0, %v592_v53, 0.0  ;;  %v596_v3 = vmul.f32 %v6770_v11, %v72_v6  ;;  %v1176_v25 = vsel %vm1071_vm0, %v612_v20, 0.0  ;;  %v611_v20 = vmul.f32 %v6766_v10, %v87_v50 }
  0x5e   :  { %v610_v47 = vmul.f32 %v6770_v11, %v86_v59  ;;  %v608_v49 = vmul.f32 %v6770_v11, %v84_v7  ;;  %v1140_v59 = vsel %vm1071_vm0, %v594_v40, 0.0  ;;  %v591_v7 = vmul.f32 %v6766_v10, %v67_v35  ;;  %6614 = vmatprep.subr.msk.bf16.mxu1 %vm4734_vm1, %v6239_v8  ;;  %v92_v40 = vld [vmem:[%s11282_s0 + $0x1c8] sm:$0xff]  ;;  %6242 = vmatprep.subr.msk.bf16.mxu0 %vm4734_vm1, %v6239_v8  ;;  %v94_v8 = vld [vmem:[%s11282_s0 + $0x1d8] sm:$0xff] }
  0x5f   :  { %v4736_v35 = vsel %vm4734_vm1, %v6238_v18, 0  ;;  %v76_v18 = vld [vmem:[%s11282_s0 + $0x148] sm:$0xff]  ;;  %v11297_v58 = vmov 0   ;;  %v7725_v51 = vadd.f32 %v1100_v31, %v573_v63  ;;  %v1144_v50 = vsel %vm1071_vm0, %v596_v3, 0.0  ;;  %v93_v31 = vld [vmem:[%s11282_s0 + $0x1d0] sm:$0xff] }
  0x60   :  { %v1172_v44 = vsel %vm1071_vm0, %v610_v47, 0.0  ;;  %v1168_v53 = vsel %vm1071_vm0, %v608_v49, 0.0  ;;  %v607_v49 = vmul.f32 %v6766_v10, %v83_v55  ;;  %6615 = vmatpush1.bf16.msra.mxu1 %v4736_v35  ;;  %4899 = vmatprep.mubr.bf16.mxu1 %v11297_v58  ;;  %v613_v55 = vmul.f32 %v6766_v10, %v89_v16  ;;  %v77_v63 = vld [vmem:[%s11282_s0 + $0x150] sm:$0xff] }
  0x61   :  { %2022 = vadd.xlane.f32.xlu1 %v7254_v12  ;;  %1990 = vadd.xlane.f32.xlu0 %v7266_v17  ;;  %v90_v12 = vld [vmem:[%s11282_s0 + $0x1b8] sm:$0xff]  ;;  %v616_v41 = vmul.f32 %v6770_v11, %v92_v40  ;;  %v600_v27 = vmul.f32 %v6770_v11, %v76_v18 }
  0x62   :  { %v74_v17 = vld [vmem:[%s11282_s0 + $0x138] sm:$0xff]  ;;  %v614_v47 = vmul.f32 %v6770_v11, %v90_v12  ;;  %v91_v12 = vld [vmem:[%s11282_s0 + $0x1c0] sm:$0xff]  ;;  %4762 = vmatpush1.bf16.msra.mxu0 %v4736_v35  ;;  %4779 = vmatprep.mubr.bf16.mxu0 %v11297_v58  ;;  %v80_v35 = vld [vmem:[%s11282_s0 + $0x168] sm:$0xff]  ;;  %v7759_v40 = vadd.f32 %v1168_v53, %v607_v49 }
  0x63   :  { %v598_v6 = vmul.f32 %v6770_v11, %v74_v17  ;;  %v75_v17 = vld [vmem:[%s11282_s0 + $0x140] sm:$0xff]  ;;  %v1152_v49 = vsel %vm1071_vm0, %v600_v27, 0.0  ;;  %v81_v27 = vld [vmem:[%s11282_s0 + $0x170] sm:$0xff] }
  0x64   :  { %v1180_v3 = vsel %vm1071_vm0, %v614_v47, 0.0  ;;  %v599_v47 = vmul.f32 %v6766_v10, %v75_v17  ;;  %v79_v53 = vld [vmem:[%s11282_s0 + $0x160] sm:$0xff]  ;;  %v617_v17 = vmul.f32 %v6766_v10, %v93_v31 }
  0x65   :  { %2026 = vadd.xlane.f32.xlu1 %v7280_v26  ;;  %1994 = vadd.xlane.f32.xlu0 %v7300_v42  ;;  %v78_v26 = vld [vmem:[%s11282_s0 + $0x158] sm:$0xff]  ;;  %v7714_v42 = vadd.f32 %v1132_v39, %v589_v5  ;;  %v7727_v5 = vadd.f32 %v1140_v59, %v593_v19  ;;  %v595_v39 = vmul.f32 %v6766_v10, %v71_v4  ;;  %v96_v19 = vld [vmem:[%s11282_s0 + $0x1e8] sm:$0xff]  ;;  %v1148_v16 = vsel %vm1071_vm0, %v598_v6, 0.0 }
  0x66   :  { %v7747_v4 = vadd.f32 %v1136_v37, %v591_v7  ;;  %v7749_v59 = vadd.f32 %v1172_v44, %v609_v1  ;;  %v602_v1 = vmul.f32 %v6770_v11, %v78_v26  ;;  %v98_v44 = vld [vmem:[%s11282_s0 + $0x1f8] sm:$0xff]  ;;  %v615_v37 = vmul.f32 %v6766_v10, %v91_v12 }
  0x67   :  { %11306 = vst [vmem:[#allocation12_spill] sm:$0xff] %v7714_v42  ;;  %v597_v42 = vmul.f32 %v6766_v10, %v73_v33  ;;  %v95_v33 = vld [vmem:[%s11282_s0 + $0x1e0] sm:$0xff]  ;;  %v7768_v7 = vadd.f32 %v1144_v50, %v595_v39  ;;  %v620_v6 = vmul.f32 %v6770_v11, %v96_v19  ;;  %v7779_v18 = vadd.f32 %v1180_v3, %v613_v55  ;;  %v102_v12 = vld [vmem:[%s11282_s0 + $0x218] sm:$0xff]  ;;  %v100_v39 = vld [vmem:[%s11282_s0 + $0x208] sm:$0xff] }
  0x68   :  { %v1184_v26 = vsel %vm1071_vm0, %v616_v41, 0.0  ;;  %v619_v41 = vmul.f32 %v6766_v10, %v95_v33  ;;  %v1156_v55 = vsel %vm1071_vm0, %v602_v1, 0.0  ;;  %v604_v50 = vmul.f32 %v6770_v11, %v80_v35  ;;  %v99_v19 = vld [vmem:[%s11282_s0 + $0x200] sm:$0xff]  ;;  %v116_v35 = vld [vmem:[%s11282_s0 + $0x288] sm:$0xff] }
  0x69   :  { %2030 = vadd.xlane.f32.xlu1 %v7310_v62  ;;  %1998 = vadd.xlane.f32.xlu0 %v7321_v52  ;;  %v7761_v62 = vadd.f32 %v1176_v25, %v611_v20  ;;  %v618_v52 = vmul.f32 %v6770_v11, %v94_v8  ;;  %v82_v25 = vld [vmem:[%s11282_s0 + $0x178] sm:$0xff]  ;;  %v7781_v8 = vadd.f32 %v1148_v16, %v597_v42  ;;  %v97_v20 = vld [vmem:[%s11282_s0 + $0x1f0] sm:$0xff]  ;;  %v1192_v33 = vsel %vm1071_vm0, %v620_v6, 0.0 }
  0x6a   :  { %v601_v42 = vmul.f32 %v6766_v10, %v77_v63  ;;  %v622_v31 = vmul.f32 %v6770_v11, %v98_v44  ;;  %v101_v63 = vld [vmem:[%s11282_s0 + $0x210] sm:$0xff]  ;;  %v7815_v3 = vadd.f32 %v1184_v26, %v615_v37  ;;  %v7817_v16 = vadd.f32 %v1152_v49, %v599_v47  ;;  %v120_v47 = vld [vmem:[%s11282_s0 + $0x2a8] sm:$0xff]  ;;  %v122_v49 = vld [vmem:[%s11282_s0 + $0x2b8] sm:$0xff] }
  0x6b   :  { %11307 = vst [vmem:[#allocation13_spill] sm:$0xff] %v7781_v8  ;;  %v603_v1 = vmul.f32 %v6766_v10, %v79_v53  ;;  %v621_v44 = vmul.f32 %v6766_v10, %v97_v20  ;;  %v626_v58 = vmul.f32 %v6770_v11, %v102_v12  ;;  %v624_v8 = vmul.f32 %v6770_v11, %v100_v39  ;;  %v117_v37 = vld [vmem:[%s11282_s0 + $0x290] sm:$0xff]  ;;  %v104_v26 = vld [vmem:[%s11282_s0 + $0x228] sm:$0xff] }
  0x6c   :  { %v7838_v53 = vadd.f32 %v1156_v55, %v601_v42  ;;  %v7847_v20 = vadd.f32 %v1192_v33, %v619_v41  ;;  %v605_v12 = vmul.f32 %v6766_v10, %v81_v27 }
  0x6d   :  { %2038 = vadd.xlane.f32.xlu1 %v7341_v14  ;;  %2034 = vadd.xlane.f32.xlu0 %v7352_v22  ;;  %v118_v14 = vld [vmem:[%s11282_s0 + $0x298] sm:$0xff]  ;;  %v1188_v22 = vsel %vm1071_vm0, %v618_v52, 0.0  ;;  %v606_v52 = vmul.f32 %v6770_v11, %v82_v25 }
  0x6e   :  { %v7836_v6 = vadd.f32 %v1188_v22, %v617_v17  ;;  %v642_v25 = vmul.f32 %v6770_v11, %v118_v14 }
  0x71   :  { %2070 = vadd.xlane.f32.xlu1 %v7363_v28  ;;  %2066 = vadd.xlane.f32.xlu0 %v7365_v30  ;;  %v1160_v28 = vsel %vm1071_vm0, %v604_v50, 0.0  ;;  %v1196_v30 = vsel %vm1071_vm0, %v622_v31, 0.0 }
  0x72   :  { %15 = vsyncpa [#allocation4], 0  ;;  %v1164_v17 = vsel %vm1071_vm0, %v606_v52, 0.0  ;;  %v625_v42 = vmul.f32 %v6766_v10, %v101_v63  ;;  %v623_v39 = vmul.f32 %v6766_v10, %v99_v19  ;;  %v115_v14 = vld [vmem:[%s11282_s0 + $0x280] sm:$0xff]  ;;  %v640_v41 = vmul.f32 %v6770_v11, %v116_v35  ;;  %v106_v22 = vld [vmem:[%s11282_s0 + $0x238] sm:$0xff] }
  0x73   :  { %v1204_v55 = vsel %vm1071_vm0, %v626_v58, 0.0  ;;  %v1200_v27 = vsel %vm1071_vm0, %v624_v8, 0.0  ;;  %v641_v50 = vmul.f32 %v6766_v10, %v117_v37  ;;  %v119_v31 = vld [vmem:[%s11282_s0 + $0x2a0] sm:$0xff]  ;;  %v644_v63 = vmul.f32 %v6770_v11, %v120_v47  ;;  %v121_v52 = vld [vmem:[%s11282_s0 + $0x2b0] sm:$0xff] }
  0x74   :  { %v7871_v19 = vadd.f32 %v1160_v28, %v603_v1  ;;  %v1236_v33 = vsel %vm1071_vm0, %v642_v25, 0.0  ;;  %v103_v58 = vld [vmem:[%s11282_s0 + $0x220] sm:$0xff]  ;;  %v628_v8 = vmul.f32 %v6770_v11, %v104_v26  ;;  %v646_v35 = vmul.f32 %v6770_v11, %v122_v49  ;;  %v105_v1 = vld [vmem:[%s11282_s0 + $0x230] sm:$0xff]  ;;  %v124_v25 = vld [vmem:[%s11282_s0 + $0x2c8] sm:$0xff] }
  0x75   :  { %2074 = vadd.xlane.f32.xlu1 %v7375_v38  ;;  %2042 = vadd.xlane.f32.xlu0 %v7388_v48  ;;  %v7882_v37 = vadd.f32 %v1196_v30, %v621_v44  ;;  %v7884_v38 = vadd.f32 %v1164_v17, %v605_v12  ;;  %v639_v48 = vmul.f32 %v6766_v10, %v115_v14  ;;  %v1232_v44 = vsel %vm1071_vm0, %v640_v41, 0.0  ;;  %v108_v30 = vld [vmem:[%s11282_s0 + $0x248] sm:$0xff]  ;;  %v126_v12 = vld [vmem:[%s11282_s0 + $0x2d8] sm:$0xff]  ;;  %v123_v41 = vld [vmem:[%s11282_s0 + $0x2c0] sm:$0xff] }
  0x76   :  { %v630_v47 = vmul.f32 %v6770_v11, %v106_v22  ;;  %v7894_v26 = vadd.f32 %v1204_v55, %v625_v42  ;;  %v7896_v28 = vadd.f32 %v1200_v27, %v623_v39  ;;  %v643_v49 = vmul.f32 %v6766_v10, %v119_v31  ;;  %v110_v22 = vld [vmem:[%s11282_s0 + $0x258] sm:$0xff]  ;;  %v128_v55 = vld [vmem:[%s11282_s0 + $0x2e8] sm:$0xff] }
  0x77   :  { %v7906_v17 = vadd.f32 %v1236_v33, %v641_v50  ;;  %v1240_v14 = vsel %vm1071_vm0, %v644_v63, 0.0  ;;  %v627_v42 = vmul.f32 %v6766_v10, %v103_v58  ;;  %v645_v39 = vmul.f32 %v6766_v10, %v121_v52  ;;  %v107_v33 = vld [vmem:[%s11282_s0 + $0x240] sm:$0xff]  ;;  %v112_v58 = vld [vmem:[%s11282_s0 + $0x268] sm:$0xff] }
  0x78   :  { %v1208_v27 = vsel %vm1071_vm0, %v628_v8, 0.0  ;;  %v1244_v50 = vsel %vm1071_vm0, %v646_v35, 0.0  ;;  %v629_v31 = vmul.f32 %v6766_v10, %v105_v1  ;;  %v648_v63 = vmul.f32 %v6770_v11, %v124_v25  ;;  %v125_v8 = vld [vmem:[%s11282_s0 + $0x2d0] sm:$0xff] }
  0x79   :  { %11308 = vst [vmem:[#allocation14_spill] sm:$0xff] %v7906_v17  ;;  %2078 = vadd.xlane.f32.xlu1 %v7412_v61  ;;  %2046 = vadd.xlane.f32.xlu0 %v7414_v2  ;;  %v7932_v52 = vadd.f32 %v1232_v44, %v639_v48  ;;  %v1212_v61 = vsel %vm1071_vm0, %v630_v47, 0.0  ;;  %v632_v2 = vmul.f32 %v6770_v11, %v108_v30  ;;  %v109_v1 = vld [vmem:[%s11282_s0 + $0x250] sm:$0xff]  ;;  %v127_v47 = vld [vmem:[%s11282_s0 + $0x2e0] sm:$0xff]  ;;  %v130_v30 = vld [vmem:[%s11282_s0 + $0x2f8] sm:$0xff]  ;;  %vm4428_vm2 = vcmask 1041409  }
  0x7a   :  { %v650_v35 = vmul.f32 %v6770_v11, %v126_v12  ;;  %v7943_v25 = vadd.f32 %v1240_v14, %v643_v49  ;;  %v647_v17 = vmul.f32 %v6766_v10, %v123_v41  ;;  %v634_v48 = vmul.f32 %v6770_v11, %v110_v22  ;;  %v111_v14 = vld [vmem:[%s11282_s0 + $0x260] sm:$0xff]  ;;  %v114_v22 = vld [vmem:[%s11282_s0 + $0x278] sm:$0xff] }
  0x7b   :  { %11309 = vst [vmem:[#allocation15_spill] sm:$0xff] %v7932_v52  ;;  %v652_v44 = vmul.f32 %v6770_v11, %v128_v55  ;;  %v7954_v12 = vadd.f32 %v1208_v27, %v627_v42  ;;  %v7956_v52 = vadd.f32 %v1244_v50, %v645_v39  ;;  %v631_v49 = vmul.f32 %v6766_v10, %v107_v33  ;;  %v134_v50 = vld [vmem:[%s11282_s0 + $0x318] sm:$0xff]  ;;  %v132_v33 = vld [vmem:[%s11282_s0 + $0x308] sm:$0xff] }
  0x7c   :  { %v636_v41 = vmul.f32 %v6770_v11, %v112_v58  ;;  %v7968_v42 = vadd.f32 %v1212_v61, %v629_v31  ;;  %v1248_v39 = vsel %vm1071_vm0, %v648_v63, 0.0  ;;  %v649_v55 = vmul.f32 %v6766_v10, %v125_v8  ;;  %v129_v63 = vld [vmem:[%s11282_s0 + $0x2f0] sm:$0xff] }
  0x7d   :  { %2082 = vadd.xlane.f32.xlu1 %v7424_v9  ;;  %2050 = vadd.xlane.f32.xlu0 %v7437_v23  ;;  %v633_v27 = vmul.f32 %v6766_v10, %v109_v1  ;;  %v1216_v9 = vsel %vm1071_vm0, %v632_v2, 0.0  ;;  %v1252_v23 = vsel %vm1071_vm0, %v650_v35, 0.0  ;;  %v651_v31 = vmul.f32 %v6766_v10, %v127_v47  ;;  %v113_v2 = vld [vmem:[%s11282_s0 + $0x270] sm:$0xff] }
  0x7e   :  { %11310 = vst [vmem:[#allocation16_spill] sm:$0xff] %v7968_v42  ;;  %v654_v58 = vmul.f32 %v6770_v11, %v130_v30  ;;  %v1220_v61 = vsel %vm1071_vm0, %v634_v48, 0.0  ;;  %v1256_v8 = vsel %vm1071_vm0, %v652_v44, 0.0  ;;  %v635_v1 = vmul.f32 %v6766_v10, %v111_v14  ;;  %v133_v30 = vld [vmem:[%s11282_s0 + $0x310] sm:$0xff]  ;;  %v131_v44 = vld [vmem:[%s11282_s0 + $0x300] sm:$0xff] }
  0x7f   :  { %v638_v35 = vmul.f32 %v6770_v11, %v114_v22  ;;  %v7993_v42 = vadd.f32 %v1248_v39, %v647_v17  ;;  %v1224_v47 = vsel %vm1071_vm0, %v636_v41, 0.0  ;;  %v658_v48 = vmul.f32 %v6770_v11, %v134_v50  ;;  %v150_v39 = vld [vmem:[%s11282_s0 + $0x398] sm:$0xff]  ;;  %v148_v50 = vld [vmem:[%s11282_s0 + $0x388] sm:$0xff] }
  0x80   :  { %v656_v14 = vmul.f32 %v6770_v11, %v132_v33  ;;  %v8006_v17 = vadd.f32 %v1216_v9, %v631_v49  ;;  %v8008_v22 = vadd.f32 %v1252_v23, %v649_v55  ;;  %v653_v41 = vmul.f32 %v6766_v10, %v129_v63  ;;  %v149_v49 = vld [vmem:[%s11282_s0 + $0x390] sm:$0xff]  ;;  %v152_v55 = vld [vmem:[%s11282_s0 + $0x3a8] sm:$0xff] }
  0x81   :  { %11311 = vst [vmem:[#allocation17_spill] sm:$0xff] %v7993_v42  ;;  %2086 = vadd.xlane.f32.xlu1 %v7439_v24  ;;  %2054 = vadd.xlane.f32.xlu0 %v7475_v54  ;;  %v8017_v42 = vadd.f32 %v1220_v61, %v633_v27  ;;  %v8019_v33 = vadd.f32 %v1256_v8, %v651_v31  ;;  %v1260_v24 = vsel %vm1071_vm0, %v654_v58, 0.0  ;;  %v1228_v23 = vsel %vm1071_vm0, %v638_v35, 0.0  ;;  %v136_v63 = vld [vmem:[%s11282_s0 + $0x328] sm:$0xff]  ;;  %v154_v58 = vld [vmem:[%s11282_s0 + $0x3b8] sm:$0xff]  ;;  %v147_v35 = vld [vmem:[%s11282_s0 + $0x380] sm:$0xff] }
  0x82   :  { %v637_v54 = vmul.f32 %v6766_v10, %v113_v2  ;;  %v8029_v9 = vadd.f32 %v1224_v47, %v635_v1  ;;  %v657_v27 = vmul.f32 %v6766_v10, %v133_v30  ;;  %v655_v31 = vmul.f32 %v6766_v10, %v131_v44  ;;  %v138_v61 = vld [vmem:[%s11282_s0 + $0x338] sm:$0xff]  ;;  %v156_v30 = vld [vmem:[%s11282_s0 + $0x3c8] sm:$0xff] }
  0x83   :  { %11312 = vst [vmem:[#allocation18_spill] sm:$0xff] %v8017_v42  ;;  %11313 = vst [vmem:[#allocation19_spill] sm:$0xff] %v8019_v33  ;;  %v1268_v8 = vsel %vm1071_vm0, %v658_v48, 0.0  ;;  %v1264_v1 = vsel %vm1071_vm0, %v656_v14, 0.0  ;;  %v674_v2 = vmul.f32 %v6770_v11, %v150_v39  ;;  %v672_v47 = vmul.f32 %v6770_v11, %v148_v50  ;;  %v151_v14 = vld [vmem:[%s11282_s0 + $0x3a0] sm:$0xff] }
  0x84   :  { %11314 = vst [vmem:[#allocation20_spill] sm:$0xff] %v8029_v9  ;;  %v8055_v44 = vadd.f32 %v1260_v24, %v653_v41  ;;  %v673_v48 = vmul.f32 %v6766_v10, %v149_v49  ;;  %v676_v39 = vmul.f32 %v6770_v11, %v152_v55  ;;  %v135_v50 = vld [vmem:[%s11282_s0 + $0x320] sm:$0xff]  ;;  %v8065_v9 = vadd.f32 %v1228_v23, %v637_v54  ;;  %v137_v24 = vld [vmem:[%s11282_s0 + $0x330] sm:$0xff]  ;;  %v140_v55 = vld [vmem:[%s11282_s0 + $0x348] sm:$0xff] }
  0x85   :  { %2090 = vadd.xlane.f32.xlu1 %v7486_v13  ;;  %2058 = vadd.xlane.f32.xlu0 %v7488_v21  ;;  %v660_v13 = vmul.f32 %v6770_v11, %v136_v63  ;;  %v153_v21 = vld [vmem:[%s11282_s0 + $0x3b0] sm:$0xff]  ;;  %v678_v41 = vmul.f32 %v6770_v11, %v154_v58  ;;  %v662_v49 = vmul.f32 %v6770_v11, %v138_v61  ;;  %v155_v58 = vld [vmem:[%s11282_s0 + $0x3c0] sm:$0xff]  ;;  %v1296_v61 = vsel %vm1071_vm0, %v672_v47, 0.0 }
  0x86   :  { %11315 = vst [vmem:[#allocation21_spill] sm:$0xff] %v8055_v44  ;;  %11316 = vst [vmem:[#allocation22_spill] sm:$0xff] %v8065_v9  ;;  %v8079_v54 = vadd.f32 %v1268_v8, %v657_v27  ;;  %v8081_v23 = vadd.f32 %v1264_v1, %v655_v31  ;;  %v671_v63 = vmul.f32 %v6766_v10, %v147_v35  ;;  %v1300_v44 = vsel %vm1071_vm0, %v674_v2, 0.0  ;;  %v158_v27 = vld [vmem:[%s11282_s0 + $0x3d8] sm:$0xff]  ;;  %v139_v35 = vld [vmem:[%s11282_s0 + $0x340] sm:$0xff] }
  0x87   :  { %v680_v9 = vmul.f32 %v6770_v11, %v156_v30  ;;  %v675_v33 = vmul.f32 %v6766_v10, %v151_v14  ;;  %v659_v42 = vmul.f32 %v6766_v10, %v135_v50  ;;  %v142_v31 = vld [vmem:[%s11282_s0 + $0x358] sm:$0xff]  ;;  %v1304_v8 = vsel %vm1071_vm0, %v676_v39, 0.0  ;;  %v160_v30 = vld [vmem:[%s11282_s0 + $0x3e8] sm:$0xff] }
  0x88   :  { %v677_v1 = vmul.f32 %v6766_v10, %v153_v21  ;;  %v661_v2 = vmul.f32 %v6766_v10, %v137_v24  ;;  %v664_v47 = vmul.f32 %v6770_v11, %v140_v55  ;;  %v1276_v14 = vsel %vm1071_vm0, %v662_v49, 0.0  ;;  %v157_v24 = vld [vmem:[%s11282_s0 + $0x3d0] sm:$0xff]  ;;  %v159_v49 = vld [vmem:[%s11282_s0 + $0x3e0] sm:$0xff] }
  0x89   :  { %1078 = vadd.xlane.f32.xlu1 %v7498_v45  ;;  %1074 = vadd.xlane.f32.xlu0 %v7500_v36  ;;  %v1272_v45 = vsel %vm1071_vm0, %v660_v13, 0.0  ;;  %v1308_v36 = vsel %vm1071_vm0, %v678_v41, 0.0  ;;  %v679_v39 = vmul.f32 %v6766_v10, %v155_v58  ;;  %v8114_v50 = vadd.f32 %v1300_v44, %v673_v48  ;;  %v141_v13 = vld [vmem:[%s11282_s0 + $0x350] sm:$0xff] }
  0x8a   :  { %v1312_v21 = vsel %vm1071_vm0, %v680_v9, 0.0  ;;  %v682_v55 = vmul.f32 %v6770_v11, %v158_v27  ;;  %v666_v41 = vmul.f32 %v6770_v11, %v142_v31  ;;  %v8128_v44 = vadd.f32 %v1296_v61, %v671_v63  ;;  %v144_v27 = vld [vmem:[%s11282_s0 + $0x368] sm:$0xff]  ;;  %v162_v31 = vld [vmem:[%s11282_s0 + $0x3f8] sm:$0xff] }
  0x8b   :  { %v8130_v48 = vadd.f32 %v1304_v8, %v675_v33  ;;  %v663_v9 = vmul.f32 %v6766_v10, %v139_v35  ;;  %v684_v58 = vmul.f32 %v6770_v11, %v160_v30  ;;  %v8142_v63 = vadd.f32 %v1272_v45, %v659_v42  ;;  %v143_v35 = vld [vmem:[%s11282_s0 + $0x360] sm:$0xff]  ;;  %v146_v30 = vld [vmem:[%s11282_s0 + $0x378] sm:$0xff] }
  0x8c   :  { %v8144_v33 = vadd.f32 %v1308_v36, %v677_v1  ;;  %v8146_v61 = vadd.f32 %v1276_v14, %v661_v2  ;;  %v1280_v8 = vsel %vm1071_vm0, %v664_v47, 0.0  ;;  %v683_v42 = vmul.f32 %v6766_v10, %v159_v49  ;;  %v166_v1 = vld [vmem:[%s11282_s0 + $0x418] sm:$0xff]  ;;  %v164_v2 = vld [vmem:[%s11282_s0 + $0x408] sm:$0xff] }
  0x8d   :  { %11317 = vst [vmem:[#allocation23_spill] sm:$0xff] %v8130_v48  ;;  %1110 = vadd.xlane.f32.xlu1 %v7510_v34  ;;  %1106 = vadd.xlane.f32.xlu0 %v7526_v46  ;;  %11318 = vst [vmem:[#allocation24_spill] sm:$0xff] %v8142_v63  ;;  %v8155_v48 = vadd.f32 %v1312_v21, %v679_v39  ;;  %v681_v34 = vmul.f32 %v6766_v10, %v157_v24  ;;  %v182_v47 = vld [vmem:[%s11282_s0 + $0x498] sm:$0xff]  ;;  %v1316_v45 = vsel %vm1071_vm0, %v682_v55, 0.0  ;;  %v161_v39 = vld [vmem:[%s11282_s0 + $0x3f0] sm:$0xff]  ;;  %vm4430_vm3 = vcmask 1042434  }
  0x8e   :  { %11319 = vst [vmem:[#allocation25_spill] sm:$0xff] %v8144_v33  ;;  %11320 = vst [vmem:[#allocation26_spill] sm:$0xff] %v8146_v61  ;;  %v665_v46 = vmul.f32 %v6766_v10, %v141_v13  ;;  %v1284_v36 = vsel %vm1071_vm0, %v666_v41, 0.0  ;;  %v668_v14 = vmul.f32 %v6770_v11, %v144_v27  ;;  %v686_v21 = vmul.f32 %v6770_v11, %v162_v31  ;;  %v180_v24 = vld [vmem:[%s11282_s0 + $0x488] sm:$0xff]  ;;  %v145_v41 = vld [vmem:[%s11282_s0 + $0x370] sm:$0xff] }
  0x8f   :  { %11321 = vst [vmem:[#allocation27_spill] sm:$0xff] %v8155_v48  ;;  %v8179_v13 = vadd.f32 %v1280_v8, %v663_v9  ;;  %v1320_v49 = vsel %vm1071_vm0, %v684_v58, 0.0  ;;  %v667_v55 = vmul.f32 %v6766_v10, %v143_v35  ;;  %v670_v27 = vmul.f32 %v6770_v11, %v146_v30  ;;  %v165_v9 = vld [vmem:[%s11282_s0 + $0x410] sm:$0xff]  ;;  %v163_v8 = vld [vmem:[%s11282_s0 + $0x400] sm:$0xff] }
  0x90   :  { %v8192_v31 = vstv %s11284_s2  ;;  %v690_v58 = vmul.f32 %v6770_v11, %v166_v1  ;;  %v688_v35 = vmul.f32 %v6770_v11, %v164_v2  ;;  %v8206_v30 = vadd.f32 %v1316_v45, %v681_v34  ;;  %v179_v1 = vld [vmem:[%s11282_s0 + $0x480] sm:$0xff]  ;;  %v184_v34 = vld [vmem:[%s11282_s0 + $0x4a8] sm:$0xff] }
  0x91   :  { %11322 = vst [vmem:[#allocation28_spill] sm:$0xff] %v8179_v13  ;;  %2094 = vadd.xlane.f32.xlu1 %v7543_v29  ;;  %2062 = vadd.xlane.f32.xlu0 %v7553_v56  ;;  %v181_v29 = vld [vmem:[%s11282_s0 + $0x490] sm:$0xff]  ;;  %v706_v56 = vmul.f32 %v6770_v11, %v182_v47  ;;  %v8208_v13 = vadd.f32 %v1284_v36, %v665_v46  ;;  %v1288_v2 = vsel %vm1071_vm0, %v668_v14, 0.0  ;;  %v1324_v63 = vsel %vm1071_vm0, %v686_v21, 0.0 }
  0x92   :  { %v685_v48 = vmul.f32 %v6766_v10, %v161_v39  ;;  %v704_v61 = vmul.f32 %v6770_v11, %v180_v24  ;;  %v8215_v33 = vadd.f32 %v1320_v49, %v683_v42  ;;  %v669_v47 = vmul.f32 %v6766_v10, %v145_v41  ;;  %v168_v42 = vld [vmem:[%s11282_s0 + $0x428] sm:$0xff]  ;;  %v186_v41 = vld [vmem:[%s11282_s0 + $0x4b8] sm:$0xff] }
  0x93   :  { %v1292_v46 = vsel %vm1071_vm0, %v670_v27, 0.0  ;;  %v689_v45 = vmul.f32 %v6766_v10, %v165_v9  ;;  %v687_v36 = vmul.f32 %v6766_v10, %v163_v8  ;;  %v705_v39 = vmul.f32 %v6766_v10, %v181_v29 }
  0x94   :  { %v1332_v14 = vsel %vm1071_vm0, %v690_v58, 0.0  ;;  %v1328_v21 = vsel %vm1071_vm0, %v688_v35, 0.0  ;;  %v1364_v24 = vsel %vm1071_vm0, %v706_v56, 0.0  ;;  %v703_v49 = vmul.f32 %v6766_v10, %v179_v1 }
  0x95   :  { %1114 = vadd.xlane.f32.xlu1 %v7561_v15  ;;  %1082 = vadd.xlane.f32.xlu0 %v7591_v0  ;;  %v8239_v8 = vadd.f32 %v1288_v2, %v667_v55  ;;  %v8241_v29 = vadd.f32 %v1324_v63, %v685_v48  ;;  %v1360_v15 = vsel %vm1071_vm0, %v704_v61, 0.0  ;;  %v183_v0 = vld [vmem:[%s11282_s0 + $0x4a0] sm:$0xff]  ;;  %v708_v58 = vmul.f32 %v6770_v11, %v184_v34  ;;  %v170_v63 = vld [vmem:[%s11282_s0 + $0x438] sm:$0xff] }
  0x96   :  { %v1875_v27 = vpop.xlane.xlu1 %1874  ;;  %v1843_v9 = vpop.xlane.xlu0 %1842  ;;  %v8250_v1 = vadd.f32 %v1292_v46, %v669_v47  ;;  %v167_v55 = vld [vmem:[%s11282_s0 + $0x420] sm:$0xff]  ;;  %v692_v48 = vmul.f32 %v6770_v11, %v168_v42  ;;  %v8259_v61 = vadd.f32 %v1332_v14, %v689_v45  ;;  %v8261_v2 = vadd.f32 %v1328_v21, %v687_v36  ;;  %v185_v47 = vld [vmem:[%s11282_s0 + $0x4b0] sm:$0xff]  ;;  %v172_v14 = vld [vmem:[%s11282_s0 + $0x448] sm:$0xff] }
  0x97   :  { %v2298_v35 = vadd.f32 %v8192_v31, %v1875_v27  ;;  %v2290_v56 = vadd.f32 %v8192_v31, %v1843_v9  ;;  %v8263_v34 = vadd.f32 %v1364_v24, %v705_v39  ;;  %v710_v46 = vmul.f32 %v6770_v11, %v186_v41  ;;  %v169_v36 = vld [vmem:[%s11282_s0 + $0x430] sm:$0xff]  ;;  %v188_v39 = vld [vmem:[%s11282_s0 + $0x4c8] sm:$0xff]  ;;  %v187_v41 = vld [vmem:[%s11282_s0 + $0x4c0] sm:$0xff] }
  0x98   :  { %11323 = vst [vmem:[#allocation29_spill] sm:$0xff] %v8259_v61  ;;  %11324 = vst [vmem:[#allocation30_spill] sm:$0xff] %v8261_v2  ;;  %v8271_v42 = vadd.f32 %v1360_v15, %v703_v49  ;;  %v707_v45 = vmul.f32 %v6766_v10, %v183_v0  ;;  %v691_v24 = vmul.f32 %v6766_v10, %v167_v55  ;;  %vm4432_vm4 = vcmask 1043459  }
  0x99   :  { %11325 = vst [vmem:[#allocation31_spill] sm:$0xff] %v8263_v34  ;;  %v2554_v27 = vmax.f32 %v2298_v35, 0.0  ;;  %v2546_v9 = vmax.f32 %v2290_v56, 0.0  ;;  %1118 = vadd.xlane.f32.xlu1 %v7608_v60  ;;  %1086 = vadd.xlane.f32.xlu0 %v7625_v57  ;;  %v1368_v57 = vsel %vm1071_vm0, %v708_v58, 0.0  ;;  %v694_v49 = vmul.f32 %v6770_v11, %v170_v63  ;;  %v171_v63 = vld [vmem:[%s11282_s0 + $0x440] sm:$0xff] }
  0x9a   :  { %11326 = vst [vmem:[#allocation32_spill] sm:$0xff] %v8271_v42  ;;  %v1879_v21 = vpop.xlane.xlu1 %1878  ;;  %v1847_v60 = vpop.xlane.xlu0 %1846  ;;  %v712_v15 = vmul.f32 %v6770_v11, %v188_v39  ;;  %v1336_v56 = vsel %vm1071_vm0, %v692_v48, 0.0  ;;  %v709_v42 = vmul.f32 %v6766_v10, %v185_v47  ;;  %v1372_v58 = vsel %vm1071_vm0, %v710_v46, 0.0 }
  0x9b   :  { %v2299_v0 = vadd.f32 %v8192_v31, %v1879_v21  ;;  %v2291_v35 = vadd.f32 %v8192_v31, %v1847_v60  ;;  %v2810_v34 = vpack.c.bf16 %v2554_v27, %v2554_v27  ;;  %v693_v55 = vmul.f32 %v6766_v10, %v169_v36 }
  0x9c   :  { %v696_v2 = vmul.f32 %v6770_v11, %v172_v14  ;;  %v8300_v39 = vpack.c.bf16 %v2546_v9, %v2546_v9  ;;  %v711_v48 = vmul.f32 %v6766_v10, %v187_v41  ;;  %v8305_v27 = vadd.f32 %v1368_v57, %v707_v45  ;;  %v190_v9 = vld [vmem:[%s11282_s0 + $0x4d8] sm:$0xff] }
  0x9d   :  { %v2555_v21 = vmax.f32 %v2299_v0, 0.0  ;;  %v2547_v61 = vmax.f32 %v2291_v35, 0.0  ;;  %1122 = vadd.xlane.f32.xlu1 %v7627_v43  ;;  %1090 = vadd.xlane.f32.xlu0 %v7629_v32  ;;  %v8307_v36 = vadd.f32 %v1336_v56, %v691_v24  ;;  %v1340_v60 = vsel %vm1071_vm0, %v694_v49, 0.0  ;;  %v174_v45 = vld [vmem:[%s11282_s0 + $0x458] sm:$0xff]  ;;  %v11330_v56 = vld [vmem:[#allocation8_spill] sm:$0xff] }
  0x9e   :  { %v1883_v47 = vpop.xlane.xlu1 %1882  ;;  %v1851_v46 = vpop.xlane.xlu0 %1850  ;;  %11327 = vst [vmem:[#allocation33_spill] sm:$0xff] %v8305_v27  ;;  %v1376_v14 = vsel %vm1071_vm0, %v712_v15, 0.0  ;;  %v8314_v32 = vadd.f32 %v1372_v58, %v709_v42  ;;  %v695_v41 = vmul.f32 %v6766_v10, %v171_v63  ;;  %v3346_v57 = vunpack.c.l.b16 %v2810_v34  ;;  %v189_v34 = vld [vmem:[%s11282_s0 + $0x4d0] sm:$0xff]  ;;  %v11336_v27 = vld [vmem:[#allocation11_spill] sm:$0xff] }
  0x9f   :  { %11328 = vst [vmem:[#allocation34_spill] sm:$0xff] %v8307_v36  ;;  %v2811_v43 = vpack.c.bf16 %v2555_v21, %v2555_v21  ;;  %v2803_v0 = vpack.c.bf16 %v2547_v61, %v2547_v61  ;;  %v2300_v24 = vadd.f32 %v8192_v31, %v1883_v47  ;;  %v2292_v49 = vadd.f32 %v8192_v31, %v1851_v46  ;;  %v11331_v61 = vld [vmem:[#allocation9_spill] sm:$0xff]  ;;  %v11335_v36 = vld [vmem:[#allocation10_spill] sm:$0xff] }
  0xa0   :  { %11329 = vst [vmem:[#allocation35_spill] sm:$0xff] %v8314_v32  ;;  %v1344_v15 = vsel %vm1071_vm0, %v696_v2, 0.0  ;;  %v3338_v35 = vunpack.c.l.b16 %v8300_v39  ;;  %v8326_v42 = vadd.f32 %v1340_v60, %v693_v55  ;;  %v8328_v58 = vadd.f32 %v1376_v14, %v711_v48 }
  0xa1   :  { %1126 = vadd.xlane.f32.xlu1 %v11330_v56  ;;  %1094 = vadd.xlane.f32.xlu0 %v11331_v61  ;;  %v714_v63 = vmul.f32 %v6770_v11, %v190_v9  ;;  %v3347_v21 = vunpack.c.l.b16 %v2811_v43  ;;  %v2556_v47 = vmax.f32 %v2300_v24, 0.0  ;;  %v2548_v2 = vmax.f32 %v2292_v49, 0.0  ;;  %v173_v56 = vld [vmem:[%s11282_s0 + $0x450] sm:$0xff]  ;;  %v11334_v9 = vld [vmem:[#allocation7_spill] sm:$0xff] }
  0xa2   :  { %11332 = vst [vmem:[#allocation8_spill] sm:$0xff] %v8326_v42  ;;  %11333 = vst [vmem:[#allocation9_spill] sm:$0xff] %v8328_v58  ;;  %v1887_v46 = vpop.xlane.xlu1 %1886  ;;  %v1855_v39 = vpop.xlane.xlu0 %1854  ;;  %v698_v55 = vmul.f32 %v6770_v11, %v174_v45  ;;  %v3339_v48 = vunpack.c.l.b16 %v2803_v0  ;;  %v8340_v61 = vadd.f32 %v1344_v15, %v695_v41  ;;  %v4207_v43 = vrot.slane %v3346_v57, %v11334_v9  ;;  %v192_v41 = vld [vmem:[%s11282_s0 + $0x4e8] sm:$0xff] }
  0xa3   :  { %v2301_v60 = vadd.f32 %v8192_v31, %v1887_v46  ;;  %v2293_v14 = vadd.f32 %v8192_v31, %v1855_v39  ;;  %v2812_v58 = vpack.c.bf16 %v2556_v47, %v2556_v47  ;;  %v2804_v24 = vpack.c.bf16 %v2548_v2, %v2548_v2 }
  0xa4   :  { %v713_v49 = vmul.f32 %v6766_v10, %v189_v34  ;;  %v1380_v0 = vsel %vm1071_vm0, %v714_v63, 0.0  ;;  %v697_v45 = vmul.f32 %v6766_v10, %v173_v56  ;;  %v4211_v57 = vrot.slane %v3347_v21, %v11334_v9  ;;  %v191_v56 = vld [vmem:[%s11282_s0 + $0x4e0] sm:$0xff] }
  0xa5   :  { %v2557_v42 = vmax.f32 %v2301_v60, 0.0  ;;  %v2549_v32 = vmax.f32 %v2293_v14, 0.0  ;;  %1130 = vadd.xlane.f32.xlu1 %v11335_v36  ;;  %1098 = vadd.xlane.f32.xlu0 %v11336_v27  ;;  %v3348_v15 = vunpack.c.l.b16 %v2812_v58  ;;  %v3340_v47 = vunpack.c.l.b16 %v2804_v24 }
  0xa6   :  { %v1891_v34 = vpop.xlane.xlu1 %1890  ;;  %v1859_v2 = vpop.xlane.xlu0 %1858  ;;  %v1348_v46 = vsel %vm1071_vm0, %v698_v55, 0.0  ;;  %v4179_v36 = vrot.slane %v3339_v48, %v11334_v9  ;;  %v4175_v21 = vrot.slane %v3338_v35, %v11334_v9  ;;  %v8360_v60 = vadd.f32 %v1380_v0, %v713_v49  ;;  %v176_v55 = vld [vmem:[%s11282_s0 + $0x468] sm:$0xff] }
  0xa7   :  { %v2813_v27 = vpack.c.bf16 %v2557_v42, %v2557_v42  ;;  %v2302_v63 = vadd.f32 %v8192_v31, %v1891_v34  ;;  %v2294_v39 = vadd.f32 %v8192_v31, %v1859_v2  ;;  %v2805_v58 = vpack.c.bf16 %v2549_v32, %v2549_v32  ;;  %v11338_v2 = vld [vmem:[#allocation12_spill] sm:$0xff] }
  0xa8   :  { %11337 = vst [vmem:[#allocation7_spill] sm:$0xff] %v8360_v60  ;;  %v716_v14 = vmul.f32 %v6770_v11, %v192_v41  ;;  %v4215_v42 = vrot.slane %v3348_v15, %v11334_v9  ;;  %v4610_v35 = vsel %vm4428_vm2, %v4211_v57, %v4207_v43  ;;  %v4183_v32 = vrot.slane %v3340_v47, %v11334_v9  ;;  %v175_v15 = vld [vmem:[%s11282_s0 + $0x460] sm:$0xff] }
  0xa9   :  { %v3349_v48 = vunpack.c.l.b16 %v2813_v27  ;;  %v2558_v24 = vmax.f32 %v2302_v63, 0.0  ;;  %v2550_v34 = vmax.f32 %v2294_v39, 0.0  ;;  %1134 = vadd.xlane.f32.xlu1 %v11338_v2  ;;  %1102 = vadd.xlane.f32.xlu0 %v7725_v51  ;;  %v8371_v41 = vadd.f32 %v1348_v46, %v697_v45  ;;  %v193_v39 = vld [vmem:[%s11282_s0 + $0x4f0] sm:$0xff] }
  0xaa   :  { %v1895_v49 = vpop.xlane.xlu1 %1894  ;;  %v1863_v0 = vpop.xlane.xlu0 %1862  ;;  %v8374_v60 = vmul.f32 %v6766_v10, %v191_v56  ;;  %v4603_v27 = vsel %vm4428_vm2, %v4179_v36, %v4175_v21  ;;  %vm4434_vm5 = vcmask 1044484   ;;  %v700_v43 = vmul.f32 %v6770_v11, %v176_v55 }
  0xab   :  { %11339 = vst [vmem:[#allocation10_spill] sm:$0xff] %v8371_v41  ;;  %v2814_v63 = vpack.c.bf16 %v2558_v24, %v2558_v24  ;;  %v2806_v51 = vpack.c.bf16 %v2550_v34, %v2550_v34  ;;  %v3341_v57 = vunpack.c.l.b16 %v2805_v58  ;;  %v2303_v47 = vadd.f32 %v8192_v31, %v1895_v49 }
  0xac   :  { %v2295_v45 = vadd.f32 %v8192_v31, %v1863_v0  ;;  %v8384_v46 = vsel %vm1071_vm0, %v716_v14, 0.0  ;;  %v4611_v56 = vsel %vm4430_vm3, %v4215_v42, %v4610_v35  ;;  %v4219_v36 = vrot.slane %v3349_v48, %v11334_v9  ;;  %v194_v14 = vld [vmem:[%s11282_s0 + $0x4f8] sm:$0xff] }
  0xad   :  { %v3350_v21 = vunpack.c.l.b16 %v2814_v63  ;;  %1142 = vadd.xlane.f32.xlu1 %v7727_v5  ;;  %1138 = vadd.xlane.f32.xlu0 %v7747_v4  ;;  %v8394_v58 = vmul.f32 %v6766_v10, %v175_v15  ;;  %v4604_v55 = vsel %vm4430_vm3, %v4183_v32, %v4603_v27  ;;  %v3342_v24 = vunpack.c.l.b16 %v2806_v51  ;;  %v178_v32 = vld [vmem:[%s11282_s0 + $0x478] sm:$0xff] }
  0xae   :  { %vm4436_vm6 = vcmask 1045509   ;;  %v2559_v34 = vmax.f32 %v2303_v47, 0.0  ;;  %v2551_v42 = vmax.f32 %v2295_v45, 0.0  ;;  %v1899_v2 = vpop.xlane.xlu1 %1898  ;;  %v1867_v48 = vpop.xlane.xlu0 %1866  ;;  %v8403_v4 = vsel %vm1071_vm0, %v700_v43, 0.0 }
  0xaf   :  { %v2304_v35 = vadd.f32 %v8192_v31, %v1899_v2  ;;  %v2296_v5 = vadd.f32 %v8192_v31, %v1867_v48  ;;  %v8406_v49 = vmul.f32 %v6766_v10, %v193_v39  ;;  %v4187_v0 = vrot.slane %v3341_v57, %v11334_v9 }
  0xb0   :  { %v2815_v15 = vpack.c.bf16 %v2559_v34, %v2559_v34  ;;  %v2807_v27 = vpack.c.bf16 %v2551_v42, %v2551_v42  ;;  %v718_v63 = vmul.f32 %v6770_v11, %v194_v14  ;;  %v4612_v51 = vsel %vm4432_vm4, %v4219_v36, %v4611_v56 }
  0xb1   :  { %v4223_v47 = vrot.slane %v3350_v21, %v11334_v9  ;;  %vm4438_vm7 = vcmask 1046534   ;;  %v2560_v43 = vmax.f32 %v2304_v35, 0.0  ;;  %v2552_v45 = vmax.f32 %v2296_v5, 0.0  ;;  %1174 = vadd.xlane.f32.xlu1 %v7749_v59  ;;  %1170 = vadd.xlane.f32.xlu0 %v7759_v40  ;;  %v177_v59 = vld [vmem:[%s11282_s0 + $0x470] sm:$0xff]  ;;  %v198_v40 = vld [vmem:[%s11282_s0 + $0x518] sm:$0xff] }
  0xb2   :  { %v4191_v39 = vrot.slane %v3342_v24, %v11334_v9  ;;  %v3351_v2 = vunpack.c.l.b16 %v2815_v15  ;;  %v3343_v48 = vunpack.c.l.b16 %v2807_v27  ;;  %v1903_v57 = vpop.xlane.xlu1 %1902  ;;  %v1871_v34 = vpop.xlane.xlu0 %1870  ;;  %vm4440_vm8 = vcmask 1047559   ;;  %v197_v15 = vld [vmem:[%s11282_s0 + $0x510] sm:$0xff] }
  0xb3   :  { %v702_v14 = vmul.f32 %v6770_v11, %v178_v32  ;;  %v2816_v42 = vpack.c.bf16 %v2560_v43, %v2560_v43  ;;  %v2808_v56 = vpack.c.bf16 %v2552_v45, %v2552_v45  ;;  %v2305_v36 = vadd.f32 %v8192_v31, %v1903_v57 }
  0xb4   :  { %v2297_v21 = vadd.f32 %v8192_v31, %v1871_v34  ;;  %v4605_v24 = vsel %vm4432_vm4, %v4187_v0, %v4604_v55  ;;  %v4227_v35 = vrot.slane %v3351_v2, %v11334_v9  ;;  %v4195_v5 = vrot.slane %v3343_v48, %v11334_v9 }
  0xb5   :  { %v8431_v32 = vsel %vm1071_vm0, %v718_v63, 0.0  ;;  %v3352_v27 = vunpack.c.l.b16 %v2816_v42  ;;  %v3344_v43 = vunpack.c.l.b16 %v2808_v56  ;;  %v2561_v45 = vmax.f32 %v2305_v36, 0.0  ;;  %1178 = vadd.xlane.f32.xlu1 %v7761_v62  ;;  %1146 = vadd.xlane.f32.xlu0 %v7768_v7  ;;  %v196_v7 = vld [vmem:[%s11282_s0 + $0x508] sm:$0xff] }
  0xb6   :  { %v2553_v57 = vmax.f32 %v2297_v21, 0.0  ;;  %vm4685_vm9 = vcmask 64512   ;;  %v4613_v55 = vsel %vm4434_vm5, %v4223_v47, %v4612_v51  ;;  %v4606_v0 = vsel %vm4434_vm5, %v4191_v39, %v4605_v24  ;;  %v1911_v2 = vpop.xlane.xlu1 %1910  ;;  %v1907_v63 = vpop.xlane.xlu0 %1906 }
  0xb7   :  { %v8441_v48 = vmul.f32 %v6766_v10, %v177_v59  ;;  %v722_v34 = vmul.f32 %v6770_v11, %v198_v40  ;;  %v2817_v42 = vpack.c.bf16 %v2561_v45, %v2561_v45  ;;  %v1356_v36 = vsel %vm1071_vm0, %v702_v14, 0.0 }
  0xb8   :  { %v2809_v56 = vpack.c.bf16 %v2553_v57, %v2553_v57  ;;  %v721_v62 = vmul.f32 %v6766_v10, %v197_v15  ;;  %v4231_v51 = vrot.slane %v3352_v27, %v11334_v9  ;;  %v4199_v47 = vrot.slane %v3344_v43, %v11334_v9  ;;  %v11340_v15 = vld [vmem:[#allocation13_spill] sm:$0xff] }
  0xb9   :  { %v2307_v39 = vadd.f32 %v8192_v31, %v1911_v2  ;;  %v2306_v21 = vadd.f32 %v8192_v31, %v1907_v63  ;;  %v4614_v59 = vsel %vm4436_vm6, %v4227_v35, %v4613_v55  ;;  %v4607_v40 = vsel %vm4436_vm6, %v4195_v5, %v4606_v0  ;;  %1182 = vadd.xlane.f32.xlu1 %v7779_v18  ;;  %v195_v18 = vld [vmem:[%s11282_s0 + $0x500] sm:$0xff]  ;;  %v214_v0 = vld [vmem:[%s11282_s0 + $0x598] sm:$0xff] }
  0xba   :  { %v3353_v24 = vunpack.c.l.b16 %v2817_v42  ;;  %v3345_v14 = vunpack.c.l.b16 %v2809_v56  ;;  %1150 = vadd.xlane.f32.xlu0 %v11340_v15  ;;  %v1943_v41 = vpop.xlane.xlu1 %1942  ;;  %v1939_v27 = vpop.xlane.xlu0 %1938  ;;  %v1396_v43 = vsel %vm1071_vm0, %v722_v34, 0.0  ;;  %v720_v2 = vmul.f32 %v6770_v11, %v196_v7 }
  0xbb   :  { %v2563_v45 = vmax.f32 %v2307_v39, 0.0  ;;  %v2562_v57 = vmax.f32 %v2306_v21, 0.0  ;;  %v2315_v5 = vadd.f32 %v8192_v31, %v1943_v41  ;;  %v2314_v55 = vadd.f32 %v8192_v31, %v1939_v27 }
  0xbc   :  { %v4235_v63 = vrot.slane %v3353_v24, %v11334_v9  ;;  %v4203_v35 = vrot.slane %v3345_v14, %v11334_v9  ;;  %v4615_v34 = vsel %vm4438_vm7, %v4231_v51, %v4614_v59  ;;  %v4608_v42 = vsel %vm4438_vm7, %v4199_v47, %v4607_v40  ;;  %v213_v59 = vld [vmem:[%s11282_s0 + $0x590] sm:$0xff] }
  0xbd   :  { %v2819_v56 = vpack.c.bf16 %v2563_v45, %v2563_v45  ;;  %v2818_v7 = vpack.c.bf16 %v2562_v57, %v2562_v57  ;;  %v2571_v39 = vmax.f32 %v2315_v5, 0.0  ;;  %v2570_v21 = vmax.f32 %v2314_v55, 0.0  ;;  %1186 = vadd.xlane.f32.xlu1 %v7815_v3 }
  0xbe   :  { %1154 = vadd.xlane.f32.xlu0 %v7817_v16  ;;  %v4609_v41 = vsel %vm4440_vm8, %v4203_v35, %v4608_v42  ;;  %v4616_v24 = vsel %vm4440_vm8, %v4235_v63, %v4615_v34  ;;  %v1947_v14 = vpop.xlane.xlu1 %1946  ;;  %v1915_v15 = vpop.xlane.xlu0 %1914  ;;  %v719_v51 = vmul.f32 %v6766_v10, %v195_v18  ;;  %v1392_v47 = vsel %vm1071_vm0, %v720_v2, 0.0 }
  0xbf   :  { %v8475_v27 = vpack.c.b16 %v4616_v24, %v4609_v41  ;;  %v738_v3 = vmul.f32 %v6770_v11, %v214_v0  ;;  %v3355_v40 = vunpack.c.l.b16 %v2819_v56  ;;  %v2827_v16 = vpack.c.bf16 %v2571_v39, %v2571_v39 }
  0xc0   :  { %v2316_v45 = vadd.f32 %v8192_v31, %v1947_v14  ;;  %v2308_v57 = vadd.f32 %v8192_v31, %v1915_v15  ;;  %v2826_v63 = vpack.c.bf16 %v2570_v21, %v2570_v21  ;;  %v8489_v35 = vadd.f32 %v8384_v46, %v8374_v60  ;;  %v212_v60 = vld [vmem:[%s11282_s0 + $0x588] sm:$0xff] }
  0xc1   :  { %6255 = vmatmul.mubr.msk.bf16.vlgmr.msra.gmra.mxu1 %vm4685_vm9, %v8475_v27  ;;  %v8493_v2 = vadd.f32 %v8403_v4, %v8394_v58  ;;  %v8497_v5 = vadd.f32 %v8431_v32, %v8406_v49  ;;  %v3354_v55 = vunpack.c.l.b16 %v2818_v7  ;;  %1190 = vadd.xlane.f32.xlu1 %v7836_v6  ;;  %v737_v34 = vmul.f32 %v6766_v10, %v213_v59 }
  0xc2   :  { %v2572_v18 = vmax.f32 %v2316_v45, 0.0  ;;  %v2564_v0 = vmax.f32 %v2308_v57, 0.0  ;;  %1158 = vadd.xlane.f32.xlu0 %v7838_v53  ;;  %v1951_v46 = vpop.xlane.xlu1 %1950  ;;  %v1919_v58 = vpop.xlane.xlu0 %1918  ;;  %v11341_v4 = vmov 0   ;;  %v8507_v49 = vadd.f32 %v1356_v36, %v8441_v48  ;;  %v216_v53 = vld [vmem:[%s11282_s0 + $0x5a8] sm:$0xff]  ;;  %v211_v36 = vld [vmem:[%s11282_s0 + $0x580] sm:$0xff] }
  0xc3   :  { %4909 = vmatprep.mubr.bf16.mxu1 %v11341_v4  ;;  %v8509_v32 = vadd.f32 %v1396_v43, %v721_v62  ;;  %v8511_v42 = vadd.f32 %v1392_v47, %v719_v51  ;;  %v1428_v6 = vsel %vm1071_vm0, %v738_v3, 0.0  ;;  %v4243_v56 = vrot.slane %v3355_v40, %v11334_v9  ;;  %v215_v43 = vld [vmem:[%s11282_s0 + $0x5a0] sm:$0xff] }
  0xc4   :  { %v3363_v7 = vunpack.c.l.b16 %v2827_v16  ;;  %v2828_v39 = vpack.c.bf16 %v2572_v18, %v2572_v18  ;;  %v2820_v21 = vpack.c.bf16 %v2564_v0, %v2564_v0  ;;  %v3362_v41 = vunpack.c.l.b16 %v2826_v63 }
  0xc5   :  { %v2317_v24 = vadd.f32 %v8192_v31, %v1951_v46  ;;  %v2309_v48 = vadd.f32 %v8192_v31, %v1919_v58  ;;  %v736_v62 = vmul.f32 %v6770_v11, %v212_v60  ;;  %v4239_v14 = vrot.slane %v3354_v55, %v11334_v9  ;;  %1194 = vadd.xlane.f32.xlu1 %v7847_v20 }
  0xc6   :  { %1162 = vadd.xlane.f32.xlu0 %v7871_v19  ;;  %v8530_v15 = vadd.f32 %v1428_v6, %v737_v34  ;;  %v740_v51 = vmul.f32 %v6770_v11, %v216_v53  ;;  %v3364_v47 = vunpack.c.l.b16 %v2828_v39  ;;  %v3356_v59 = vunpack.c.l.b16 %v2820_v21  ;;  %v1955_v16 = vpop.xlane.xlu1 %1954  ;;  %v1923_v45 = vpop.xlane.xlu0 %1922  ;;  %v200_v19 = vld [vmem:[%s11282_s0 + $0x528] sm:$0xff] }
  0xc7   :  { %v2573_v3 = vmax.f32 %v2317_v24, 0.0  ;;  %v2565_v40 = vmax.f32 %v2309_v48, 0.0  ;;  %v2318_v57 = vadd.f32 %v8192_v31, %v1955_v16  ;;  %v2310_v63 = vadd.f32 %v8192_v31, %v1923_v45  ;;  %v199_v48 = vld [vmem:[%s11282_s0 + $0x520] sm:$0xff] }
  0xc8   :  { %v735_v55 = vmul.f32 %v6766_v10, %v211_v36  ;;  %v739_v20 = vmul.f32 %v6766_v10, %v215_v43  ;;  %v4275_v18 = vrot.slane %v3363_v7, %v11334_v9  ;;  %v4271_v0 = vrot.slane %v3362_v41, %v11334_v9 }
  0xc9   :  { %v2829_v34 = vpack.c.bf16 %v2573_v3, %v2573_v3  ;;  %v1424_v60 = vsel %vm1071_vm0, %v736_v62, 0.0  ;;  %v2821_v46 = vpack.c.bf16 %v2565_v40, %v2565_v40  ;;  %v2574_v58 = vmax.f32 %v2318_v57, 0.0  ;;  %1198 = vadd.xlane.f32.xlu1 %v7882_v37  ;;  %v2867_v57 = vld [vmem:[%s11285_s3 + $0x8] sm:$0xff] }
  0xca   :  { %v2566_v6 = vmax.f32 %v2310_v63, 0.0  ;;  %1166 = vadd.xlane.f32.xlu0 %v7884_v38  ;;  %v1432_v53 = vsel %vm1071_vm0, %v740_v51, 0.0  ;;  %v4617_v39 = vsel %vm4428_vm2, %v4243_v56, %v4239_v14  ;;  %v4279_v21 = vrot.slane %v3364_v47, %v11334_v9  ;;  %v1959_v24 = vpop.xlane.xlu1 %1958  ;;  %v1927_v41 = vpop.xlane.xlu0 %1926  ;;  %v217_v56 = vld [vmem:[%s11282_s0 + $0x5b0] sm:$0xff] }
  0xcb   :  { %v4247_v7 = vrot.slane %v3356_v59, %v11334_v9  ;;  %v724_v36 = vmul.f32 %v6770_v11, %v200_v19  ;;  %v3365_v62 = vunpack.c.l.b16 %v2829_v34  ;;  %v2830_v37 = vpack.c.bf16 %v2574_v58, %v2574_v58 }
  0xcc   :  { %v2319_v38 = vadd.f32 %v8192_v31, %v1959_v24  ;;  %v2311_v43 = vadd.f32 %v8192_v31, %v1927_v41  ;;  %v4624_v14 = vsel %vm4428_vm2, %v4275_v18, %v4271_v0  ;;  %v2822_v51 = vpack.c.bf16 %v2566_v6, %v2566_v6  ;;  %v11342_v24 = vld [vmem:[#allocation14_spill] sm:$0xff]  ;;  %v11343_v41 = vld [vmem:[#allocation15_spill] sm:$0xff] }
  0xcd   :  { %v8559_v47 = vadd.f32 %v1424_v60, %v735_v55  ;;  %v8561_v59 = vadd.f32 %v1432_v53, %v739_v20  ;;  %v3357_v3 = vunpack.c.l.b16 %v2821_v46  ;;  %1206 = vadd.xlane.f32.xlu1 %v7894_v26  ;;  %v723_v45 = vmul.f32 %v6766_v10, %v199_v48  ;;  %v218_v26 = vld [vmem:[%s11282_s0 + $0x5b8] sm:$0xff] }
  0xce   :  { %v2575_v40 = vmax.f32 %v2319_v38, 0.0  ;;  %v2567_v16 = vmax.f32 %v2311_v43, 0.0  ;;  %1202 = vadd.xlane.f32.xlu0 %v7896_v28  ;;  %v4625_v63 = vsel %vm4430_vm3, %v4279_v21, %v4624_v14  ;;  %v4618_v55 = vsel %vm4430_vm3, %v4247_v7, %v4617_v39  ;;  %v1963_v19 = vpop.xlane.xlu1 %1962  ;;  %v1931_v20 = vpop.xlane.xlu0 %1930  ;;  %v201_v14 = vld [vmem:[%s11282_s0 + $0x530] sm:$0xff] }
  0xcf   :  { %v1400_v18 = vsel %vm1071_vm0, %v724_v36, 0.0  ;;  %v8576_v28 = vmul.f32 %v6766_v10, %v217_v56  ;;  %v4283_v0 = vrot.slane %v3365_v62, %v11334_v9  ;;  %v3366_v34 = vunpack.c.l.b16 %v2830_v37 }
  0xd0   :  { %v2831_v60 = vpack.c.bf16 %v2575_v40, %v2575_v40  ;;  %v2823_v46 = vpack.c.bf16 %v2567_v16, %v2567_v16  ;;  %v3358_v58 = vunpack.c.l.b16 %v2822_v51  ;;  %v2320_v6 = vadd.f32 %v8192_v31, %v1963_v19 }
  0xd1   :  { %v2312_v53 = vadd.f32 %v8192_v31, %v1931_v20  ;;  %v6241_v39 = vcombine.high %v2867_v57, %v2867_v57  ;;  %v4251_v21 = vrot.slane %v3357_v3, %v11334_v9  ;;  %1238 = vadd.xlane.f32.xlu1 %v11342_v24  ;;  %v8584_v48 = vadd.f32 %v1400_v18, %v723_v45 }
  0xd2   :  { %v3367_v7 = vunpack.c.l.b16 %v2831_v60  ;;  %1234 = vadd.xlane.f32.xlu0 %v11343_v41  ;;  %v8587_v36 = vmul.f32 %v6770_v11, %v218_v26  ;;  %v3359_v62 = vunpack.c.l.b16 %v2823_v46  ;;  %v2576_v37 = vmax.f32 %v2320_v6, 0.0  ;;  %v1967_v43 = vpop.xlane.xlu1 %1966  ;;  %v1935_v56 = vpop.xlane.xlu0 %1934 }
  0xd3   :  { %v2568_v38 = vmax.f32 %v2312_v53, 0.0  ;;  %6259 = vmatprep.subr.msk.bf16.mxu1 %vm4734_vm1, %v6241_v39  ;;  %v6240_v51 = vcombine.low %v2867_v57, %v2867_v57  ;;  %v4626_v3 = vsel %vm4432_vm4, %v4283_v0, %v4625_v63  ;;  %v4287_v40 = vrot.slane %v3366_v34, %v11334_v9 }
  0xd4   :  { %v2321_v16 = vadd.f32 %v8192_v31, %v1967_v43  ;;  %v2313_v45 = vadd.f32 %v8192_v31, %v1935_v56  ;;  %v4255_v19 = vrot.slane %v3358_v58, %v11334_v9  ;;  %v2832_v20 = vpack.c.bf16 %v2576_v37, %v2576_v37 }
  0xd5   :  { %v2824_v18 = vpack.c.bf16 %v2568_v38, %v2568_v38  ;;  %v4742_v26 = vsel %vm4734_vm1, %v6240_v51, 0  ;;  %v4619_v60 = vsel %vm4432_vm4, %v4251_v21, %v4618_v55  ;;  %1242 = vadd.xlane.f32.xlu1 %v7943_v25  ;;  %v8603_v57 = vmul.f32 %v6766_v10, %v201_v14 }
  0xd6   :  { %v2577_v46 = vmax.f32 %v2321_v16, 0.0  ;;  %v2569_v6 = vmax.f32 %v2313_v45, 0.0  ;;  %1210 = vadd.xlane.f32.xlu0 %v7954_v12  ;;  %v4291_v63 = vrot.slane %v3367_v7, %v11334_v9  ;;  %v4259_v0 = vrot.slane %v3359_v62, %v11334_v9  ;;  %v1975_v53 = vpop.xlane.xlu1 %1974  ;;  %v1971_v39 = vpop.xlane.xlu0 %1970  ;;  %4955 = vmatpush1.bf16.msra.mxu1 %v4742_v26  ;;  %v202_v12 = vld [vmem:[%s11282_s0 + $0x538] sm:$0xff]  ;;  %v220_v7 = vld [vmem:[%s11282_s0 + $0x5c8] sm:$0xff]  ;;  %v11344_v16 = vld [vmem:[#allocation16_spill] sm:$0xff] }
  0xd7   :  { %v3368_v34 = vunpack.c.l.b16 %v2832_v20  ;;  %v3360_v58 = vunpack.c.l.b16 %v2824_v18  ;;  %v2323_v21 = vadd.f32 %v8192_v31, %v1975_v53  ;;  %v2322_v25 = vadd.f32 %v8192_v31, %v1971_v39  ;;  %v204_v45 = vld [vmem:[%s11282_s0 + $0x548] sm:$0xff] }
  0xd8   :  { %v2833_v24 = vpack.c.bf16 %v2577_v46, %v2577_v46  ;;  %v2825_v55 = vpack.c.bf16 %v2569_v6, %v2569_v6  ;;  %v4627_v41 = vsel %vm4434_vm5, %v4287_v40, %v4626_v3  ;;  %v4620_v62 = vsel %vm4434_vm5, %v4255_v19, %v4619_v60 }
  0xd9   :  { %v4295_v37 = vrot.slane %v3368_v34, %v11334_v9  ;;  %v4263_v38 = vrot.slane %v3360_v58, %v11334_v9  ;;  %v2579_v14 = vmax.f32 %v2323_v21, 0.0  ;;  %v2578_v51 = vmax.f32 %v2322_v25, 0.0  ;;  %1246 = vadd.xlane.f32.xlu1 %v7956_v52 }
  0xda   :  { %v3369_v43 = vunpack.c.l.b16 %v2833_v24  ;;  %v3361_v56 = vunpack.c.l.b16 %v2825_v55  ;;  %1214 = vadd.xlane.f32.xlu0 %v11344_v16  ;;  %v4628_v3 = vsel %vm4436_vm6, %v4291_v63, %v4627_v41  ;;  %v4621_v40 = vsel %vm4436_vm6, %v4259_v0, %v4620_v62  ;;  %v2007_v19 = vpop.xlane.xlu1 %2006  ;;  %v2003_v20 = vpop.xlane.xlu0 %2002  ;;  %v219_v0 = vld [vmem:[%s11282_s0 + $0x5c0] sm:$0xff]  ;;  %v11345_v24 = vld [vmem:[#allocation17_spill] sm:$0xff] }
  0xdb   :  { %v726_v18 = vmul.f32 %v6770_v11, %v202_v12  ;;  %v744_v26 = vmul.f32 %v6770_v11, %v220_v7  ;;  %v4629_v60 = vsel %vm4438_vm7, %v4295_v37, %v4628_v3  ;;  %v4622_v52 = vsel %vm4438_vm7, %v4263_v38, %v4621_v40  ;;  %v203_v12 = vld [vmem:[%s11282_s0 + $0x540] sm:$0xff] }
  0xdc   :  { %v4299_v46 = vrot.slane %v3369_v43, %v11334_v9  ;;  %v4267_v6 = vrot.slane %v3361_v56, %v11334_v9  ;;  %v2835_v34 = vpack.c.bf16 %v2579_v14, %v2579_v14  ;;  %v2331_v58 = vadd.f32 %v8192_v31, %v2007_v19 }
  0xdd   :  { %v2330_v63 = vadd.f32 %v8192_v31, %v2003_v20  ;;  %v728_v53 = vmul.f32 %v6770_v11, %v204_v45  ;;  %v2834_v39 = vpack.c.bf16 %v2578_v51, %v2578_v51  ;;  %1250 = vadd.xlane.f32.xlu1 %v11345_v24  ;;  %v1436_v25 = vsel %vm1071_vm0, %v8587_v36, 0.0  ;;  %v222_v51 = vld [vmem:[%s11282_s0 + $0x5d8] sm:$0xff] }
  0xde   :  { %1218 = vadd.xlane.f32.xlu0 %v8006_v17  ;;  %v4623_v55 = vsel %vm4440_vm8, %v4267_v6, %v4622_v52  ;;  %v4630_v21 = vsel %vm4440_vm8, %v4299_v46, %v4629_v60  ;;  %v2587_v7 = vmax.f32 %v2331_v58, 0.0  ;;  %v2011_v62 = vpop.xlane.xlu1 %2010  ;;  %v1979_v37 = vpop.xlane.xlu0 %1978  ;;  %v1404_v43 = vsel %vm1071_vm0, %v726_v18, 0.0  ;;  %v221_v52 = vld [vmem:[%s11282_s0 + $0x5d0] sm:$0xff] }
  0xdf   :  { %v2586_v41 = vmax.f32 %v2330_v63, 0.0  ;;  %v8647_v38 = vpack.c.b16 %v4630_v21, %v4623_v55  ;;  %v2332_v17 = vadd.f32 %v8192_v31, %v2011_v62  ;;  %v2324_v56 = vadd.f32 %v8192_v31, %v1979_v37  ;;  %v205_v55 = vld [vmem:[%s11282_s0 + $0x550] sm:$0xff]  ;;  %v206_v21 = vld [vmem:[%s11282_s0 + $0x558] sm:$0xff] }
  0xe0   :  { %v743_v14 = vmul.f32 %v6766_v10, %v219_v0  ;;  %v1440_v36 = vsel %vm1071_vm0, %v744_v26, 0.0  ;;  %v2843_v16 = vpack.c.bf16 %v2587_v7, %v2587_v7  ;;  %v727_v3 = vmul.f32 %v6766_v10, %v203_v12  ;;  %v11346_v26 = vld [vmem:[#allocation18_spill] sm:$0xff] }
  0xe1   :  { %v2842_v45 = vpack.c.bf16 %v2586_v41, %v2586_v41  ;;  %6256 = vmatmul.mubr.msk.bf16.gmra.mxu1 %vm4685_vm9, %v8647_v38  ;;  %v1408_v40 = vsel %vm1071_vm0, %v728_v53, 0.0  ;;  %v3371_v19 = vunpack.c.l.b16 %v2835_v34  ;;  %v3370_v20 = vunpack.c.l.b16 %v2834_v39  ;;  %1254 = vadd.xlane.f32.xlu1 %v8008_v22 }
  0xe2   :  { %v2588_v18 = vmax.f32 %v2332_v17, 0.0  ;;  %v2580_v60 = vmax.f32 %v2324_v56, 0.0  ;;  %1222 = vadd.xlane.f32.xlu0 %v11346_v26  ;;  %v3379_v46 = vunpack.c.l.b16 %v2843_v16  ;;  %v2015_v58 = vpop.xlane.xlu1 %2014  ;;  %v1983_v63 = vpop.xlane.xlu0 %1982  ;;  %4919 = vmatprep.mubr.bf16.mxu1 %v11341_v4  ;;  %v8668_v0 = vadd.f32 %v1436_v25, %v8576_v28  ;;  %v11347_v56 = vld [vmem:[#allocation19_spill] sm:$0xff] }
  0xe3   :  { %v3378_v6 = vunpack.c.l.b16 %v2842_v45  ;;  %v746_v34 = vmul.f32 %v6770_v11, %v222_v51  ;;  %v2333_v22 = vadd.f32 %v8192_v31, %v2015_v58  ;;  %v2325_v24 = vadd.f32 %v8192_v31, %v1983_v63  ;;  %v11348_v51 = vld [vmem:[#allocation20_spill] sm:$0xff]  ;;  %v208_v26 = vld [vmem:[%s11282_s0 + $0x568] sm:$0xff] }
  0xe4   :  { %v2844_v53 = vpack.c.bf16 %v2588_v18, %v2588_v18  ;;  %v2836_v39 = vpack.c.bf16 %v2580_v60, %v2580_v60  ;;  %v8680_v12 = vadd.f32 %v1404_v43, %v8603_v57  ;;  %v8682_v28 = vadd.f32 %v1440_v36, %v743_v14  ;;  %v224_v57 = vld [vmem:[%s11282_s0 + $0x5e8] sm:$0xff] }
  0xe5   :  { %v8684_v25 = vadd.f32 %v1408_v40, %v727_v3  ;;  %v745_v7 = vmul.f32 %v6766_v10, %v221_v52  ;;  %v4307_v41 = vrot.slane %v3371_v19, %v11334_v9  ;;  %v4303_v62 = vrot.slane %v3370_v20, %v11334_v9  ;;  %1258 = vadd.xlane.f32.xlu1 %v11347_v56  ;;  %v223_v40 = vld [vmem:[%s11282_s0 + $0x5e0] sm:$0xff] }
  0xe6   :  { %v2589_v37 = vmax.f32 %v2333_v22, 0.0  ;;  %v2581_v17 = vmax.f32 %v2325_v24, 0.0  ;;  %1226 = vadd.xlane.f32.xlu0 %v11348_v51  ;;  %v4339_v43 = vrot.slane %v3379_v46, %v11334_v9  ;;  %v2019_v14 = vpop.xlane.xlu1 %2018  ;;  %v1987_v36 = vpop.xlane.xlu0 %1986  ;;  %v1444_v16 = vsel %vm1071_vm0, %v746_v34, 0.0  ;;  %v11349_v22 = vld [vmem:[#allocation21_spill] sm:$0xff]  ;;  %v11350_v24 = vld [vmem:[#allocation22_spill] sm:$0xff] }
  0xe7   :  { %v729_v45 = vmul.f32 %v6766_v10, %v205_v55  ;;  %v730_v3 = vmul.f32 %v6770_v11, %v206_v21  ;;  %v4335_v19 = vrot.slane %v3378_v6, %v11334_v9  ;;  %v3380_v20 = vunpack.c.l.b16 %v2844_v53 }
  0xe8   :  { %v3372_v18 = vunpack.c.l.b16 %v2836_v39  ;;  %v2845_v60 = vpack.c.bf16 %v2589_v37, %v2589_v37  ;;  %v2837_v52 = vpack.c.bf16 %v2581_v17, %v2581_v17  ;;  %v2334_v46 = vadd.f32 %v8192_v31, %v2019_v14 }
  0xe9   :  { %v2326_v58 = vadd.f32 %v8192_v31, %v1987_v36  ;;  %v748_v63 = vmul.f32 %v6770_v11, %v224_v57  ;;  %v4631_v34 = vsel %vm4428_vm2, %v4307_v41, %v4303_v62  ;;  %1262 = vadd.xlane.f32.xlu1 %v11349_v22  ;;  %v8711_v6 = vadd.f32 %v1444_v16, %v745_v7  ;;  %v207_v7 = vld [vmem:[%s11282_s0 + $0x560] sm:$0xff] }
  0xea   :  { %1230 = vadd.xlane.f32.xlu0 %v11350_v24  ;;  %v747_v53 = vmul.f32 %v6766_v10, %v223_v40  ;;  %v3381_v39 = vunpack.c.l.b16 %v2845_v60  ;;  %v2590_v55 = vmax.f32 %v2334_v46, 0.0  ;;  %v2023_v37 = vpop.xlane.xlu1 %2022  ;;  %v1991_v17 = vpop.xlane.xlu0 %1990  ;;  %v732_v56 = vmul.f32 %v6770_v11, %v208_v26 }
  0xeb   :  { %v2582_v21 = vmax.f32 %v2326_v58, 0.0  ;;  %v4638_v51 = vsel %vm4428_vm2, %v4339_v43, %v4335_v19  ;;  %v2335_v57 = vadd.f32 %v8192_v31, %v2023_v37  ;;  %v2327_v41 = vadd.f32 %v8192_v31, %v1991_v17  ;;  %v226_v37 = vld [vmem:[%s11282_s0 + $0x5f8] sm:$0xff] }
  0xec   :  { %v1412_v62 = vsel %vm1071_vm0, %v730_v3, 0.0  ;;  %v4343_v14 = vrot.slane %v3380_v20, %v11334_v9  ;;  %v4311_v36 = vrot.slane %v3372_v18, %v11334_v9  ;;  %v3373_v16 = vunpack.c.l.b16 %v2837_v52 }
  0xed   :  { %v1448_v40 = vsel %vm1071_vm0, %v748_v63, 0.0  ;;  %v2846_v60 = vpack.c.bf16 %v2590_v55, %v2590_v55  ;;  %v2838_v26 = vpack.c.bf16 %v2582_v21, %v2582_v21  ;;  %v2591_v43 = vmax.f32 %v2335_v57, 0.0  ;;  %1270 = vadd.xlane.f32.xlu1 %v8079_v54  ;;  %v225_v54 = vld [vmem:[%s11282_s0 + $0x5f0] sm:$0xff] }
  0xee   :  { %v2583_v19 = vmax.f32 %v2327_v41, 0.0  ;;  %1266 = vadd.xlane.f32.xlu0 %v8081_v23  ;;  %v4347_v3 = vrot.slane %v3381_v39, %v11334_v9  ;;  %v2027_v46 = vpop.xlane.xlu1 %2026  ;;  %v1995_v58 = vpop.xlane.xlu0 %1994  ;;  %v8728_v22 = vadd.f32 %v1412_v62, %v729_v45  ;;  %v731_v20 = vmul.f32 %v6766_v10, %v207_v7 }
  0xef   :  { %v1416_v18 = vsel %vm1071_vm0, %v732_v56, 0.0  ;;  %v2847_v52 = vpack.c.bf16 %v2591_v43, %v2591_v43  ;;  %v2336_v24 = vadd.f32 %v8192_v31, %v2027_v46  ;;  %v2328_v55 = vadd.f32 %v8192_v31, %v1995_v58 }
  0xf0   :  { %v2839_v63 = vpack.c.bf16 %v2583_v19, %v2583_v19  ;;  %v4639_v23 = vsel %vm4430_vm3, %v4343_v14, %v4638_v51  ;;  %v4632_v39 = vsel %vm4430_vm3, %v4311_v36, %v4631_v34  ;;  %v4315_v45 = vrot.slane %v3373_v16, %v11334_v9  ;;  %v209_v34 = vld [vmem:[%s11282_s0 + $0x570] sm:$0xff] }
  0xf1   :  { %v8740_v21 = vadd.f32 %v1448_v40, %v747_v53  ;;  %v3382_v17 = vunpack.c.l.b16 %v2846_v60  ;;  %v3374_v56 = vunpack.c.l.b16 %v2838_v26  ;;  %v2592_v57 = vmax.f32 %v2336_v24, 0.0  ;;  %1302 = vadd.xlane.f32.xlu1 %v8114_v50 }
  0xf2   :  { %v2584_v41 = vmax.f32 %v2328_v55, 0.0  ;;  %1298 = vadd.xlane.f32.xlu0 %v8128_v44  ;;  %v4640_v51 = vsel %vm4432_vm4, %v4347_v3, %v4639_v23  ;;  %v3383_v53 = vunpack.c.l.b16 %v2847_v52  ;;  %v2031_v62 = vpop.xlane.xlu1 %2030  ;;  %v1999_v7 = vpop.xlane.xlu0 %1998  ;;  %v8751_v14 = vadd.f32 %v1416_v18, %v731_v20  ;;  %v210_v44 = vld [vmem:[%s11282_s0 + $0x578] sm:$0xff]  ;;  %v11351_v52 = vld [vmem:[#allocation23_spill] sm:$0xff] }
  0xf3   :  { %v8754_v36 = vmul.f32 %v6766_v10, %v225_v54  ;;  %v3375_v16 = vunpack.c.l.b16 %v2839_v63  ;;  %v2848_v40 = vpack.c.bf16 %v2592_v57, %v2592_v57  ;;  %v750_v50 = vmul.f32 %v6770_v11, %v226_v37  ;;  %v11352_v63 = vld [vmem:[#allocation24_spill] sm:$0xff] }
  0xf4   :  { %v2840_v60 = vpack.c.bf16 %v2584_v41, %v2584_v41  ;;  %v4633_v26 = vsel %vm4432_vm4, %v4315_v45, %v4632_v39  ;;  %v2337_v43 = vadd.f32 %v8192_v31, %v2031_v62  ;;  %v2329_v19 = vadd.f32 %v8192_v31, %v1999_v7  ;;  %v230_v7 = vld [vmem:[%s11282_s0 + $0x618] sm:$0xff] }
  0xf5   :  { %v733_v3 = vmul.f32 %v6766_v10, %v209_v34  ;;  %v4351_v46 = vrot.slane %v3382_v17, %v11334_v9  ;;  %v4319_v58 = vrot.slane %v3374_v56, %v11334_v9  ;;  %v3384_v20 = vunpack.c.l.b16 %v2848_v40  ;;  %1306 = vadd.xlane.f32.xlu1 %v11351_v52 }
  0xf6   :  { %v3376_v18 = vunpack.c.l.b16 %v2840_v60  ;;  %1274 = vadd.xlane.f32.xlu0 %v11352_v63  ;;  %v4355_v24 = vrot.slane %v3383_v53, %v11334_v9  ;;  %v2593_v55 = vmax.f32 %v2337_v43, 0.0  ;;  %v2585_v54 = vmax.f32 %v2329_v19, 0.0  ;;  %v2039_v23 = vpop.xlane.xlu1 %2038  ;;  %v2035_v39 = vpop.xlane.xlu0 %2034  ;;  %v11353_v43 = vld [vmem:[#allocation25_spill] sm:$0xff]  ;;  %v11354_v19 = vld [vmem:[#allocation26_spill] sm:$0xff] }
  0xf7   :  { %v734_v45 = vmul.f32 %v6770_v11, %v210_v44  ;;  %v4323_v37 = vrot.slane %v3375_v16, %v11334_v9  ;;  %v2339_v17 = vadd.f32 %v8192_v31, %v2039_v23  ;;  %v2338_v56 = vadd.f32 %v8192_v31, %v2035_v39 }
  0xf8   :  { %v1452_v57 = vsel %vm1071_vm0, %v750_v50, 0.0  ;;  %v4359_v41 = vrot.slane %v3384_v20, %v11334_v9  ;;  %v4327_v34 = vrot.slane %v3376_v18, %v11334_v9  ;;  %v2849_v62 = vpack.c.bf16 %v2593_v55, %v2593_v55 }
  0xf9   :  { %v2841_v53 = vpack.c.bf16 %v2585_v54, %v2585_v54  ;;  %v4641_v40 = vsel %vm4434_vm5, %v4351_v46, %v4640_v51  ;;  %v4634_v16 = vsel %vm4434_vm5, %v4319_v58, %v4633_v26  ;;  %v2595_v60 = vmax.f32 %v2339_v17, 0.0  ;;  %1310 = vadd.xlane.f32.xlu1 %v11353_v43  ;;  %v228_v58 = vld [vmem:[%s11282_s0 + $0x608] sm:$0xff] }
  0xfa   :  { %v2594_v44 = vmax.f32 %v2338_v56, 0.0  ;;  %1278 = vadd.xlane.f32.xlu0 %v11354_v19  ;;  %v4642_v50 = vsel %vm4436_vm6, %v4355_v24, %v4641_v40  ;;  %v3385_v20 = vunpack.c.l.b16 %v2849_v62  ;;  %v2071_v52 = vpop.xlane.xlu1 %2070  ;;  %v2067_v63 = vpop.xlane.xlu0 %2066  ;;  %v1420_v55 = vsel %vm1071_vm0, %v734_v45, 0.0  ;;  %v11356_v40 = vld [vmem:[#allocation28_spill] sm:$0xff] }
  0xfb   :  { %v3377_v18 = vunpack.c.l.b16 %v2841_v53  ;;  %v4635_v54 = vsel %vm4436_vm6, %v4323_v37, %v4634_v16  ;;  %v2347_v51 = vadd.f32 %v8192_v31, %v2071_v52  ;;  %v2346_v26 = vadd.f32 %v8192_v31, %v2067_v63  ;;  %v229_v37 = vld [vmem:[%s11282_s0 + $0x610] sm:$0xff] }
  0xfc   :  { %v754_v46 = vmul.f32 %v6770_v11, %v230_v7  ;;  %v4643_v24 = vsel %vm4438_vm7, %v4359_v41, %v4642_v50  ;;  %v4636_v23 = vsel %vm4438_vm7, %v4327_v34, %v4635_v54  ;;  %v4363_v39 = vrot.slane %v3385_v20, %v11334_v9  ;;  %v11355_v7 = vld [vmem:[#allocation27_spill] sm:$0xff]  ;;  %v227_v41 = vld [vmem:[%s11282_s0 + $0x600] sm:$0xff] }
  0xfd   :  { %v4331_v45 = vrot.slane %v3377_v18, %v11334_v9  ;;  %v2851_v17 = vpack.c.bf16 %v2595_v60, %v2595_v60  ;;  %v2850_v56 = vpack.c.bf16 %v2594_v44, %v2594_v44  ;;  %v2603_v62 = vmax.f32 %v2347_v51, 0.0  ;;  %1314 = vadd.xlane.f32.xlu1 %v11355_v7  ;;  %v246_v44 = vld [vmem:[%s11282_s0 + $0x698] sm:$0xff] }
  0xfe   :  { %v2602_v53 = vmax.f32 %v2346_v26, 0.0  ;;  %1282 = vadd.xlane.f32.xlu0 %v11356_v40  ;;  %v2075_v34 = vpop.xlane.xlu1 %2074  ;;  %v2043_v16 = vpop.xlane.xlu0 %2042  ;;  %v4644_v19 = vsel %vm4440_vm8, %v4363_v39, %v4643_v24  ;;  %v8807_v50 = vadd.f32 %v1452_v57, %v8754_v36  ;;  %v752_v60 = vmul.f32 %v6770_v11, %v228_v58  ;;  %v245_v57 = vld [vmem:[%s11282_s0 + $0x690] sm:$0xff]  ;;  %v244_v39 = vld [vmem:[%s11282_s0 + $0x688] sm:$0xff] }
  0xff   :  { %v4637_v43 = vsel %vm4440_vm8, %v4331_v45, %v4636_v23  ;;  %v2859_v20 = vpack.c.bf16 %v2603_v62, %v2603_v62  ;;  %v8813_v52 = vadd.f32 %v1420_v55, %v733_v3  ;;  %v753_v63 = vmul.f32 %v6766_v10, %v229_v37  ;;  %v243_v23 = vld [vmem:[%s11282_s0 + $0x680] sm:$0xff]  ;;  %v248_v40 = vld [vmem:[%s11282_s0 + $0x6a8] sm:$0xff] }
 0x100   :  { %v2858_v18 = vpack.c.bf16 %v2602_v53, %v2602_v53  ;;  %v2348_v54 = vadd.f32 %v8192_v31, %v2075_v34  ;;  %v2340_v51 = vadd.f32 %v8192_v31, %v2043_v16  ;;  %v8818_v26 = vpack.c.b16 %v4644_v19, %v4637_v43 }
 0x101   :  { %v751_v36 = vmul.f32 %v6766_v10, %v227_v41  ;;  %v3387_v58 = vunpack.c.l.b16 %v2851_v17  ;;  %v3386_v24 = vunpack.c.l.b16 %v2850_v56  ;;  %1318 = vadd.xlane.f32.xlu1 %v8206_v30  ;;  %v1460_v3 = vsel %vm1071_vm0, %v754_v46, 0.0 }
 0x102   :  { %11357 = vst [vmem:[#allocation11_spill] sm:$0xff] %v8818_v26  ;;  %1286 = vadd.xlane.f32.xlu0 %v8208_v13  ;;  %v770_v55 = vmul.f32 %v6770_v11, %v246_v44  ;;  %v3395_v45 = vunpack.c.l.b16 %v2859_v20  ;;  %v2604_v37 = vmax.f32 %v2348_v54, 0.0  ;;  %v2596_v17 = vmax.f32 %v2340_v51, 0.0  ;;  %6257 = vmatmul.mubr.msk.bf16.gmra.mxu1 %vm4685_vm9, %v8818_v26  ;;  %v2079_v30 = vpop.xlane.xlu1 %2078  ;;  %v2047_v13 = vpop.xlane.xlu0 %2046 }
 0x103   :  { %v1456_v46 = vsel %vm1071_vm0, %v752_v60, 0.0  ;;  %v3394_v56 = vunpack.c.l.b16 %v2858_v18  ;;  %v2349_v62 = vadd.f32 %v8192_v31, %v2079_v30  ;;  %v2341_v53 = vadd.f32 %v8192_v31, %v2047_v13  ;;  %4929 = vmatprep.mubr.bf16.mxu1 %v11341_v4  ;;  %v232_v13 = vld [vmem:[%s11282_s0 + $0x628] sm:$0xff] }
 0x104   :  { %v769_v7 = vmul.f32 %v6766_v10, %v245_v57  ;;  %v2860_v41 = vpack.c.bf16 %v2604_v37, %v2604_v37  ;;  %v2852_v34 = vpack.c.bf16 %v2596_v17, %v2596_v17  ;;  %v767_v16 = vmul.f32 %v6766_v10, %v243_v23  ;;  %v247_v23 = vld [vmem:[%s11282_s0 + $0x6a0] sm:$0xff] }
 0x105   :  { %v768_v43 = vmul.f32 %v6770_v11, %v244_v39  ;;  %v4371_v19 = vrot.slane %v3387_v58, %v11334_v9  ;;  %v4367_v60 = vrot.slane %v3386_v24, %v11334_v9  ;;  %v2605_v44 = vmax.f32 %v2349_v62, 0.0  ;;  %1322 = vadd.xlane.f32.xlu1 %v8215_v33 }
 0x106   :  { %1290 = vadd.xlane.f32.xlu0 %v8239_v8  ;;  %v1492_v20 = vsel %vm1071_vm0, %v770_v55, 0.0  ;;  %v4403_v18 = vrot.slane %v3395_v45, %v11334_v9  ;;  %v3396_v54 = vunpack.c.l.b16 %v2860_v41  ;;  %v2597_v51 = vmax.f32 %v2341_v53, 0.0  ;;  %v2083_v57 = vpop.xlane.xlu1 %2082  ;;  %v2051_v37 = vpop.xlane.xlu0 %2050 }
 0x107   :  { %v772_v58 = vmul.f32 %v6770_v11, %v248_v40  ;;  %v4399_v24 = vrot.slane %v3394_v56, %v11334_v9  ;;  %v3388_v39 = vunpack.c.l.b16 %v2852_v34  ;;  %v2350_v33 = vadd.f32 %v8192_v31, %v2083_v57 }
 0x108   :  { %v2342_v8 = vadd.f32 %v8192_v31, %v2051_v37  ;;  %v2861_v55 = vpack.c.bf16 %v2605_v44, %v2605_v44  ;;  %v8859_v17 = vadd.f32 %v1460_v3, %v753_v63  ;;  %v8861_v45 = vadd.f32 %v1456_v46, %v751_v36  ;;  %v231_v63 = vld [vmem:[%s11282_s0 + $0x620] sm:$0xff] }
 0x109   :  { %v1488_v30 = vsel %vm1071_vm0, %v768_v43, 0.0  ;;  %v4645_v62 = vsel %vm4428_vm2, %v4371_v19, %v4367_v60  ;;  %v2606_v53 = vmax.f32 %v2350_v33, 0.0  ;;  %1326 = vadd.xlane.f32.xlu1 %v8241_v29  ;;  %v771_v40 = vmul.f32 %v6766_v10, %v247_v23  ;;  %v11359_v23 = vld [vmem:[#allocation30_spill] sm:$0xff] }
 0x10a   :  { %v2598_v56 = vmax.f32 %v2342_v8, 0.0  ;;  %1294 = vadd.xlane.f32.xlu0 %v8250_v1  ;;  %v4407_v36 = vrot.slane %v3396_v54, %v11334_v9  ;;  %v2853_v3 = vpack.c.bf16 %v2597_v51, %v2597_v51  ;;  %v2087_v46 = vpop.xlane.xlu1 %2086  ;;  %v2055_v41 = vpop.xlane.xlu0 %2054  ;;  %v8875_v34 = vadd.f32 %v1492_v20, %v769_v7  ;;  %v11358_v20 = vld [vmem:[#allocation29_spill] sm:$0xff] }
 0x10b   :  { %v1496_v43 = vsel %vm1071_vm0, %v772_v58, 0.0  ;;  %v4652_v19 = vsel %vm4428_vm2, %v4403_v18, %v4399_v24  ;;  %v4375_v29 = vrot.slane %v3388_v39, %v11334_v9  ;;  %v8880_v1 = vadd.f32 %v1488_v30, %v767_v16  ;;  %v250_v16 = vld [vmem:[%s11282_s0 + $0x6b8] sm:$0xff] }
 0x10c   :  { %v756_v60 = vmul.f32 %v6770_v11, %v232_v13  ;;  %v3397_v44 = vunpack.c.l.b16 %v2861_v55  ;;  %v2351_v57 = vadd.f32 %v8192_v31, %v2087_v46  ;;  %v2343_v54 = vadd.f32 %v8192_v31, %v2055_v41 }
 0x10d   :  { %v755_v51 = vmul.f32 %v6766_v10, %v231_v63  ;;  %v2862_v37 = vpack.c.bf16 %v2606_v53, %v2606_v53  ;;  %v2854_v7 = vpack.c.bf16 %v2598_v56, %v2598_v56  ;;  %1334 = vadd.xlane.f32.xlu1 %v11358_v20  ;;  %v8888_v18 = vadd.f32 %v1496_v43, %v771_v40  ;;  %v249_v40 = vld [vmem:[%s11282_s0 + $0x6b0] sm:$0xff]  ;;  %v234_v63 = vld [vmem:[%s11282_s0 + $0x638] sm:$0xff] }
 0x10e   :  { %1330 = vadd.xlane.f32.xlu0 %v11359_v23  ;;  %v4653_v58 = vsel %vm4430_vm3, %v4407_v36, %v4652_v19  ;;  %v3389_v24 = vunpack.c.l.b16 %v2853_v3  ;;  %v2607_v39 = vmax.f32 %v2351_v57, 0.0  ;;  %v2599_v33 = vmax.f32 %v2343_v54, 0.0  ;;  %v2091_v8 = vpop.xlane.xlu1 %2090  ;;  %v2059_v55 = vpop.xlane.xlu0 %2058  ;;  %v11360_v57 = vld [vmem:[#allocation31_spill] sm:$0xff] }
 0x10f   :  { %v4646_v30 = vsel %vm4430_vm3, %v4375_v29, %v4645_v62  ;;  %v2352_v13 = vadd.f32 %v8192_v31, %v2091_v8  ;;  %v2344_v53 = vadd.f32 %v8192_v31, %v2059_v55  ;;  %v1464_v56 = vsel %vm1071_vm0, %v756_v60, 0.0  ;;  %v11361_v60 = vld [vmem:[#allocation32_spill] sm:$0xff] }
 0x110   :  { %v4411_v36 = vrot.slane %v3397_v44, %v11334_v9  ;;  %v2863_v3 = vpack.c.bf16 %v2607_v39, %v2607_v39  ;;  %v2855_v46 = vpack.c.bf16 %v2599_v33, %v2599_v33  ;;  %v774_v62 = vmul.f32 %v6770_v11, %v250_v16 }
 0x111   :  { %v3398_v41 = vunpack.c.l.b16 %v2862_v37  ;;  %v3390_v43 = vunpack.c.l.b16 %v2854_v7  ;;  %v2608_v19 = vmax.f32 %v2352_v13, 0.0  ;;  %v2600_v29 = vmax.f32 %v2344_v53, 0.0  ;;  %1366 = vadd.xlane.f32.xlu1 %v11360_v57  ;;  %v252_v37 = vld [vmem:[%s11282_s0 + $0x6c8] sm:$0xff] }
 0x112   :  { %1362 = vadd.xlane.f32.xlu0 %v11361_v60  ;;  %v4379_v54 = vrot.slane %v3389_v24, %v11334_v9  ;;  %v1079_v20 = vpop.xlane.xlu1 %1078  ;;  %v1075_v23 = vpop.xlane.xlu0 %1074  ;;  %v8909_v8 = vadd.f32 %v1464_v56, %v755_v51  ;;  %v773_v44 = vmul.f32 %v6766_v10, %v249_v40  ;;  %v758_v39 = vmul.f32 %v6770_v11, %v234_v63  ;;  %v233_v24 = vld [vmem:[%s11282_s0 + $0x630] sm:$0xff] }
 0x113   :  { %v3399_v7 = vunpack.c.l.b16 %v2863_v3  ;;  %v3391_v16 = vunpack.c.l.b16 %v2855_v46  ;;  %v2099_v33 = vadd.f32 %v8192_v31, %v1079_v20  ;;  %v2098_v55 = vadd.f32 %v8192_v31, %v1075_v23  ;;  %v11362_v3 = vld [vmem:[#allocation33_spill] sm:$0xff]  ;;  %v11363_v46 = vld [vmem:[#allocation34_spill] sm:$0xff] }
 0x114   :  { %v4654_v51 = vsel %vm4432_vm4, %v4411_v36, %v4653_v58  ;;  %v2864_v13 = vpack.c.bf16 %v2608_v19, %v2608_v19  ;;  %v2856_v53 = vpack.c.bf16 %v2600_v29, %v2600_v29  ;;  %v1500_v56 = vsel %vm1071_vm0, %v774_v62, 0.0  ;;  %v251_v62 = vld [vmem:[%s11282_s0 + $0x6c0] sm:$0xff] }
 0x115   :  { %v4415_v40 = vrot.slane %v3398_v41, %v11334_v9  ;;  %v4383_v63 = vrot.slane %v3390_v43, %v11334_v9  ;;  %1370 = vadd.xlane.f32.xlu1 %v11362_v3  ;;  %v776_v57 = vmul.f32 %v6770_v11, %v252_v37  ;;  %v4647_v60 = vsel %vm4432_vm4, %v4379_v54, %v4646_v30  ;;  %v11364_v3 = vld [vmem:[#allocation35_spill] sm:$0xff] }
 0x116   :  { %1338 = vadd.xlane.f32.xlu0 %v11363_v46  ;;  %v2355_v20 = vmax.f32 %v2099_v33, 0.0  ;;  %v2354_v23 = vmax.f32 %v2098_v55, 0.0  ;;  %v1111_v26 = vpop.xlane.xlu1 %1110  ;;  %v1107_v58 = vpop.xlane.xlu0 %1106  ;;  %v757_v36 = vmul.f32 %v6766_v10, %v233_v24  ;;  %v4419_v41 = vrot.slane %v3399_v7, %v11334_v9  ;;  %v11365_v46 = vld [vmem:[#allocation8_spill] sm:$0xff] }
 0x117   :  { %v4387_v43 = vrot.slane %v3391_v16, %v11334_v9  ;;  %v8935_v19 = vadd.f32 %v1500_v56, %v773_v44  ;;  %v1468_v29 = vsel %vm1071_vm0, %v758_v39, 0.0  ;;  %v3400_v37 = vunpack.c.l.b16 %v2864_v13 }
 0x118   :  { %v3392_v30 = vunpack.c.l.b16 %v2856_v53  ;;  %v2107_v54 = vadd.f32 %v8192_v31, %v1111_v26  ;;  %v2106_v33 = vadd.f32 %v8192_v31, %v1107_v58  ;;  %v4655_v55 = vsel %vm4434_vm5, %v4415_v40, %v4654_v51  ;;  %v235_v51 = vld [vmem:[%s11282_s0 + $0x640] sm:$0xff] }
 0x119   :  { %v4648_v24 = vsel %vm4434_vm5, %v4383_v63, %v4647_v60  ;;  %1374 = vadd.xlane.f32.xlu1 %v11364_v3  ;;  %v775_v7 = vmul.f32 %v6766_v10, %v251_v62  ;;  %v1504_v44 = vsel %vm1071_vm0, %v776_v57, 0.0  ;;  %v2611_v16 = vpack.c.bf16 %v2355_v20, %v2355_v20  ;;  %v236_v57 = vld [vmem:[%s11282_s0 + $0x648] sm:$0xff] }
 0x11a   :  { %1342 = vadd.xlane.f32.xlu0 %v11365_v46  ;;  %v2610_v39 = vpack.c.bf16 %v2354_v23, %v2354_v23  ;;  %v2363_v13 = vmax.f32 %v2107_v54, 0.0  ;;  %v2362_v53 = vmax.f32 %v2106_v33, 0.0  ;;  %v2095_v56 = vpop.xlane.xlu1 %2094  ;;  %v2063_v26 = vpop.xlane.xlu0 %2062  ;;  %v4656_v40 = vsel %vm4436_vm6, %v4419_v41, %v4655_v55  ;;  %v11366_v41 = vld [vmem:[#allocation9_spill] sm:$0xff] }
 0x11b   :  { %v2353_v63 = vadd.f32 %v8192_v31, %v2095_v56  ;;  %v2345_v60 = vadd.f32 %v8192_v31, %v2063_v26  ;;  %v8952_v58 = vadd.f32 %v1468_v29, %v757_v36  ;;  %v4649_v20 = vsel %vm4436_vm6, %v4387_v43, %v4648_v24  ;;  %v254_v29 = vld [vmem:[%s11282_s0 + $0x6d8] sm:$0xff] }
 0x11c   :  { %v4423_v23 = vrot.slane %v3400_v37, %v11334_v9  ;;  %v4391_v62 = vrot.slane %v3392_v30, %v11334_v9  ;;  %v2619_v54 = vpack.c.bf16 %v2363_v13, %v2363_v13  ;;  %v8962_v55 = vadd.f32 %v1504_v44, %v775_v7  ;;  %v253_v7 = vld [vmem:[%s11282_s0 + $0x6d0] sm:$0xff] }
 0x11d   :  { %v2609_v33 = vmax.f32 %v2353_v63, 0.0  ;;  %v2601_v3 = vmax.f32 %v2345_v60, 0.0  ;;  %1378 = vadd.xlane.f32.xlu1 %v11366_v41  ;;  %v759_v36 = vmul.f32 %v6766_v10, %v235_v51  ;;  %v3147_v43 = vunpack.c.l.b16 %v2611_v16  ;;  %v11368_v41 = vld [vmem:[#allocation10_spill] sm:$0xff] }
 0x11e   :  { %1346 = vadd.xlane.f32.xlu0 %v8340_v61  ;;  %v3146_v24 = vunpack.c.l.b16 %v2610_v39  ;;  %v2618_v37 = vpack.c.bf16 %v2362_v53, %v2362_v53  ;;  %v1115_v46 = vpop.xlane.xlu1 %1114  ;;  %v1083_v30 = vpop.xlane.xlu0 %1082  ;;  %v760_v13 = vmul.f32 %v6770_v11, %v236_v57  ;;  %v4657_v44 = vsel %vm4438_vm7, %v4423_v23, %v4656_v40 }
 0x11f   :  { %v2865_v56 = vpack.c.bf16 %v2609_v33, %v2609_v33  ;;  %v2857_v26 = vpack.c.bf16 %v2601_v3, %v2601_v3  ;;  %v2108_v63 = vadd.f32 %v8192_v31, %v1115_v46  ;;  %v2100_v61 = vadd.f32 %v8192_v31, %v1083_v30  ;;  %v11367_v3 = vld [vmem:[#allocation7_spill] sm:$0xff]  ;;  %v238_v46 = vld [vmem:[%s11282_s0 + $0x658] sm:$0xff] }
 0x120   :  { %v4650_v16 = vsel %vm4438_vm7, %v4391_v62, %v4649_v20  ;;  %v3155_v39 = vunpack.c.l.b16 %v2619_v54  ;;  %v778_v53 = vmul.f32 %v6770_v11, %v254_v29  ;;  %v3411_v30 = vrot.slane %v3147_v43, %v11334_v9 }
 0x121   :  { %v3401_v51 = vunpack.c.l.b16 %v2865_v56  ;;  %v3393_v60 = vunpack.c.l.b16 %v2857_v26  ;;  %v2364_v57 = vmax.f32 %v2108_v63, 0.0  ;;  %v2356_v33 = vmax.f32 %v2100_v61, 0.0  ;;  %1382 = vadd.xlane.f32.xlu1 %v11367_v3 }
 0x122   :  { %1350 = vadd.xlane.f32.xlu0 %v11368_v41  ;;  %v3154_v40 = vunpack.c.l.b16 %v2618_v37  ;;  %v1119_v23 = vpop.xlane.xlu1 %1118  ;;  %v1087_v20 = vpop.xlane.xlu0 %1086  ;;  %v1472_v62 = vsel %vm1071_vm0, %v760_v13, 0.0  ;;  %v777_v54 = vmul.f32 %v6766_v10, %v253_v7  ;;  %v3407_v29 = vrot.slane %v3146_v24, %v11334_v9  ;;  %v256_v37 = vld [vmem:[%s11282_s0 + $0x6e8] sm:$0xff] }
 0x123   :  { %v4427_v56 = vrot.slane %v3401_v51, %v11334_v9  ;;  %v4395_v26 = vrot.slane %v3393_v60, %v11334_v9  ;;  %v2620_v63 = vpack.c.bf16 %v2364_v57, %v2364_v57  ;;  %v2612_v61 = vpack.c.bf16 %v2356_v33, %v2356_v33  ;;  %v237_v60 = vld [vmem:[%s11282_s0 + $0x650] sm:$0xff] }
 0x124   :  { %v2109_v3 = vadd.f32 %v8192_v31, %v1119_v23  ;;  %v2101_v41 = vadd.f32 %v8192_v31, %v1087_v20  ;;  %v762_v43 = vmul.f32 %v6770_v11, %v238_v46  ;;  %v3443_v13 = vrot.slane %v3155_v39, %v11334_v9 }
 0x125   :  { %1386 = vadd.xlane.f32.xlu1 %v8489_v35  ;;  %v4651_v24 = vsel %vm4440_vm8, %v4395_v26, %v4650_v16  ;;  %v4658_v7 = vsel %vm4440_vm8, %v4427_v56, %v4657_v44  ;;  %v1508_v51 = vsel %vm1071_vm0, %v778_v53, 0.0  ;;  %v3439_v57 = vrot.slane %v3154_v40, %v11334_v9  ;;  %v255_v44 = vld [vmem:[%s11282_s0 + $0x6e0] sm:$0xff] }
 0x126   :  { %1354 = vadd.xlane.f32.xlu0 %v8493_v2  ;;  %v2365_v33 = vmax.f32 %v2109_v3, 0.0  ;;  %v2357_v46 = vmax.f32 %v2101_v41, 0.0  ;;  %v1123_v23 = vpop.xlane.xlu1 %1122  ;;  %v1091_v39 = vpop.xlane.xlu0 %1090  ;;  %v9004_v20 = vpack.c.b16 %v4658_v7, %v4651_v24  ;;  %v3156_v35 = vunpack.c.l.b16 %v2620_v63 }
 0x127   :  { %v2110_v2 = vadd.f32 %v8192_v31, %v1123_v23  ;;  %v2102_v16 = vadd.f32 %v8192_v31, %v1091_v39  ;;  %v780_v53 = vmul.f32 %v6770_v11, %v256_v37  ;;  %v3148_v56 = vunpack.c.l.b16 %v2612_v61 }
 0x128   :  { %6258 = vmatmul.mubr.msk.bf16.gmra.mxu1 %vm4685_vm9, %v9004_v20  ;;  %v9014_v40 = vadd.f32 %v1472_v62, %v759_v36  ;;  %v761_v26 = vmul.f32 %v6766_v10, %v237_v60  ;;  %v1476_v63 = vsel %vm1071_vm0, %v762_v43, 0.0  ;;  %v2621_v3 = vpack.c.bf16 %v2365_v33, %v2365_v33 }
 0x129   :  { %v2613_v41 = vpack.c.bf16 %v2357_v46, %v2357_v46  ;;  %v2366_v24 = vmax.f32 %v2110_v2, 0.0  ;;  %v2358_v7 = vmax.f32 %v2102_v16, 0.0  ;;  %1390 = vadd.xlane.f32.xlu1 %v8497_v5  ;;  %v4429_v37 = vsel %vm4428_vm2, %v3411_v30, %v3407_v29  ;;  %4972 = vmatprep.mubr.bf16.mxu1 %v11341_v4  ;;  %v239_v30 = vld [vmem:[%s11282_s0 + $0x660] sm:$0xff]  ;;  %v240_v29 = vld [vmem:[%s11282_s0 + $0x668] sm:$0xff]  ;;  %v258_v46 = vld [vmem:[%s11282_s0 + $0x6f8] sm:$0xff] }
 0x12a   :  { %1358 = vadd.xlane.f32.xlu0 %v8507_v49  ;;  %v4442_v61 = vsel %vm4428_vm2, %v3443_v13, %v3439_v57  ;;  %v1127_v23 = vpop.xlane.xlu1 %1126  ;;  %v1095_v39 = vpop.xlane.xlu0 %1094  ;;  %v9023_v36 = vadd.f32 %v1508_v51, %v777_v54  ;;  %v779_v62 = vmul.f32 %v6766_v10, %v255_v44  ;;  %v3447_v43 = vrot.slane %v3156_v35, %v11334_v9  ;;  %v257_v54 = vld [vmem:[%s11282_s0 + $0x6f0] sm:$0xff] }
 0x12b   :  { %v2111_v60 = vadd.f32 %v8192_v31, %v1127_v23  ;;  %v2103_v5 = vadd.f32 %v8192_v31, %v1095_v39  ;;  %v1512_v49 = vsel %vm1071_vm0, %v780_v53, 0.0  ;;  %v3415_v13 = vrot.slane %v3148_v56, %v11334_v9 }
 0x12c   :  { %v2622_v51 = vpack.c.bf16 %v2366_v24, %v2366_v24  ;;  %v2614_v57 = vpack.c.bf16 %v2358_v7, %v2358_v7  ;;  %v9040_v33 = vadd.f32 %v1476_v63, %v761_v26  ;;  %v3157_v35 = vunpack.c.l.b16 %v2621_v3 }
 0x12d   :  { %v3149_v2 = vunpack.c.l.b16 %v2613_v41  ;;  %v2367_v16 = vmax.f32 %v2111_v60, 0.0  ;;  %v2359_v44 = vmax.f32 %v2103_v5, 0.0  ;;  %1398 = vadd.xlane.f32.xlu1 %v8509_v32  ;;  %v9047_v39 = vadd.f32 %v1512_v49, %v779_v62 }
 0x12e   :  { %1394 = vadd.xlane.f32.xlu0 %v8511_v42  ;;  %v1131_v53 = vpop.xlane.xlu1 %1130  ;;  %v1099_v23 = vpop.xlane.xlu0 %1098  ;;  %v763_v56 = vmul.f32 %v6766_v10, %v239_v30  ;;  %v764_v26 = vmul.f32 %v6770_v11, %v240_v29  ;;  %v781_v63 = vmul.f32 %v6766_v10, %v257_v54  ;;  %v4443_v24 = vsel %vm4430_vm3, %v3447_v43, %v4442_v61 }
 0x12f   :  { %v2623_v3 = vpack.c.bf16 %v2367_v16, %v2367_v16  ;;  %v2615_v41 = vpack.c.bf16 %v2359_v44, %v2359_v44  ;;  %v782_v7 = vmul.f32 %v6770_v11, %v258_v46  ;;  %v3158_v60 = vunpack.c.l.b16 %v2622_v51 }
 0x130   :  { %v3150_v32 = vunpack.c.l.b16 %v2614_v57  ;;  %v2112_v42 = vadd.f32 %v8192_v31, %v1131_v53  ;;  %v2104_v5 = vadd.f32 %v8192_v31, %v1099_v23  ;;  %v4431_v62 = vsel %vm4430_vm3, %v3415_v13, %v4429_v37 }
 0x131   :  { %v3451_v49 = vrot.slane %v3157_v35, %v11334_v9  ;;  %v3419_v30 = vrot.slane %v3149_v2, %v11334_v9  ;;  %1430 = vadd.xlane.f32.xlu1 %v8530_v15  ;;  %v3159_v61 = vunpack.c.l.b16 %v2623_v3  ;;  %v3151_v43 = vunpack.c.l.b16 %v2615_v41 }
 0x132   :  { %1426 = vadd.xlane.f32.xlu0 %v8559_v47  ;;  %v2368_v29 = vmax.f32 %v2112_v42, 0.0  ;;  %v2360_v54 = vmax.f32 %v2104_v5, 0.0  ;;  %v1135_v51 = vpop.xlane.xlu1 %1134  ;;  %v1103_v57 = vpop.xlane.xlu0 %1102  ;;  %v1480_v37 = vsel %vm1071_vm0, %v764_v26, 0.0  ;;  %v1516_v13 = vsel %vm1071_vm0, %v782_v7, 0.0 }
 0x133   :  { %v2113_v46 = vadd.f32 %v8192_v31, %v1135_v51  ;;  %v2105_v16 = vadd.f32 %v8192_v31, %v1103_v57  ;;  %v3455_v35 = vrot.slane %v3158_v60, %v11334_v9  ;;  %v3423_v15 = vrot.slane %v3150_v32, %v11334_v9 }
 0x134   :  { %v2624_v2 = vpack.c.bf16 %v2368_v29, %v2368_v29  ;;  %v2616_v47 = vpack.c.bf16 %v2360_v54, %v2360_v54  ;;  %v4444_v44 = vsel %vm4432_vm4, %v3451_v49, %v4443_v24  ;;  %v4433_v53 = vsel %vm4432_vm4, %v3419_v30, %v4431_v62 }
 0x135   :  { %v2369_v23 = vmax.f32 %v2113_v46, 0.0  ;;  %v2361_v3 = vmax.f32 %v2105_v16, 0.0  ;;  %1434 = vadd.xlane.f32.xlu1 %v8561_v59  ;;  %v3459_v26 = vrot.slane %v3159_v61, %v11334_v9  ;;  %v3427_v41 = vrot.slane %v3151_v43, %v11334_v9 }
 0x136   :  { %1402 = vadd.xlane.f32.xlu0 %v8584_v48  ;;  %v3160_v7 = vunpack.c.l.b16 %v2624_v2  ;;  %v3152_v60 = vunpack.c.l.b16 %v2616_v47  ;;  %v1143_v42 = vpop.xlane.xlu1 %1142  ;;  %v1139_v32 = vpop.xlane.xlu0 %1138  ;;  %v4445_v49 = vsel %vm4434_vm5, %v3455_v35, %v4444_v44  ;;  %v4435_v59 = vsel %vm4434_vm5, %v3423_v15, %v4433_v53  ;;  %v242_v47 = vld [vmem:[%s11282_s0 + $0x678] sm:$0xff] }
 0x137   :  { %v2625_v5 = vpack.c.bf16 %v2369_v23, %v2369_v23  ;;  %v2617_v29 = vpack.c.bf16 %v2361_v3, %v2361_v3  ;;  %v2115_v24 = vadd.f32 %v8192_v31, %v1143_v42  ;;  %v2114_v62 = vadd.f32 %v8192_v31, %v1139_v32  ;;  %v262_v23 = vld [vmem:[%s11282_s0 + $0x718] sm:$0xff]  ;;  %v260_v3 = vld [vmem:[%s11282_s0 + $0x708] sm:$0xff] }
 0x138   :  { %v3463_v48 = vrot.slane %v3160_v7, %v11334_v9  ;;  %v3431_v30 = vrot.slane %v3152_v60, %v11334_v9  ;;  %v4446_v57 = vsel %vm4436_vm6, %v3459_v26, %v4445_v49  ;;  %v4437_v46 = vsel %vm4436_vm6, %v3427_v41, %v4435_v59  ;;  %v278_v26 = vld [vmem:[%s11282_s0 + $0x798] sm:$0xff] }
 0x139   :  { %v3161_v61 = vunpack.c.l.b16 %v2625_v5  ;;  %v3153_v43 = vunpack.c.l.b16 %v2617_v29  ;;  %v2371_v54 = vmax.f32 %v2115_v24, 0.0  ;;  %v2370_v51 = vmax.f32 %v2114_v62, 0.0  ;;  %1438 = vadd.xlane.f32.xlu1 %v8668_v0  ;;  %v241_v62 = vld [vmem:[%s11282_s0 + $0x670] sm:$0xff] }
 0x13a   :  { %1406 = vadd.xlane.f32.xlu0 %v8680_v12  ;;  %v1175_v16 = vpop.xlane.xlu1 %1174  ;;  %v1171_v35 = vpop.xlane.xlu0 %1170  ;;  %v9083_v2 = vadd.f32 %v1480_v37, %v763_v56  ;;  %v9085_v15 = vadd.f32 %v1516_v13, %v781_v63  ;;  %v4447_v44 = vsel %vm4438_vm7, %v3463_v48, %v4446_v57  ;;  %v4439_v0 = vsel %vm4438_vm7, %v3431_v30, %v4437_v46  ;;  %v259_v48 = vld [vmem:[%s11282_s0 + $0x700] sm:$0xff] }
 0x13b   :  { %v3467_v12 = vrot.slane %v3161_v61, %v11334_v9  ;;  %v3435_v53 = vrot.slane %v3153_v43, %v11334_v9  ;;  %v2627_v56 = vpack.c.bf16 %v2371_v54, %v2371_v54  ;;  %v2626_v37 = vpack.c.bf16 %v2370_v51, %v2370_v51  ;;  %v277_v61 = vld [vmem:[%s11282_s0 + $0x790] sm:$0xff] }
 0x13c   :  { %v2123_v63 = vadd.f32 %v8192_v31, %v1175_v16  ;;  %v2122_v13 = vadd.f32 %v8192_v31, %v1171_v35  ;;  %v766_v60 = vmul.f32 %v6770_v11, %v242_v47  ;;  %v784_v30 = vmul.f32 %v6770_v11, %v260_v3 }
 0x13d   :  { %1442 = vadd.xlane.f32.xlu1 %v8682_v28  ;;  %v4441_v41 = vsel %vm4440_vm8, %v3435_v53, %v4439_v0  ;;  %v4448_v7 = vsel %vm4440_vm8, %v3467_v12, %v4447_v44  ;;  %v261_v28 = vld [vmem:[%s11282_s0 + $0x710] sm:$0xff]  ;;  %v802_v43 = vmul.f32 %v6770_v11, %v278_v26  ;;  %v3163_v54 = vunpack.c.l.b16 %v2627_v56 }
 0x13e   :  { %1410 = vadd.xlane.f32.xlu0 %v8684_v25  ;;  %v2379_v42 = vmax.f32 %v2123_v63, 0.0  ;;  %v2378_v32 = vmax.f32 %v2122_v13, 0.0  ;;  %v1179_v5 = vpop.xlane.xlu1 %1178  ;;  %v1147_v29 = vpop.xlane.xlu0 %1146  ;;  %v4659_v24 = vpack.c.b16 %v4448_v7, %v4441_v41  ;;  %v786_v25 = vmul.f32 %v6770_v11, %v262_v23 }
 0x13f   :  { %v2124_v49 = vadd.f32 %v8192_v31, %v1179_v5  ;;  %v2116_v59 = vadd.f32 %v8192_v31, %v1147_v29  ;;  %v3162_v51 = vunpack.c.l.b16 %v2626_v37  ;;  %v765_v35 = vmul.f32 %v6766_v10, %v241_v62 }
 0x140   :  { %v2635_v57 = vpack.c.bf16 %v2379_v42, %v2379_v42  ;;  %v2634_v46 = vpack.c.bf16 %v2378_v32, %v2378_v32  ;;  %6243 = vmatmul.mubr.msk.bf16.vlgmr.msra.gmra.mxu0 %vm4685_vm9, %v4659_v24  ;;  %6260 = vmatmul.mubr.msk.bf16.vlgmr.msra.gmra.mxu1 %vm4685_vm9, %v4659_v24  ;;  %v1484_v47 = vsel %vm1071_vm0, %v766_v60, 0.0  ;;  %v785_v44 = vmul.f32 %v6766_v10, %v261_v28  ;;  %v275_v42 = vld [vmem:[%s11282_s0 + $0x780] sm:$0xff]  ;;  %v280_v32 = vld [vmem:[%s11282_s0 + $0x7a8] sm:$0xff] }
 0x141   :  { %v2380_v16 = vmax.f32 %v2124_v49, 0.0  ;;  %1446 = vadd.xlane.f32.xlu1 %v8711_v6  ;;  %v2372_v0 = vmax.f32 %v2116_v59, 0.0  ;;  %4789 = vmatprep.mubr.bf16.mxu0 %v11341_v4  ;;  %v1524_v23 = vsel %vm1071_vm0, %v786_v25, 0.0  ;;  %v783_v56 = vmul.f32 %v6766_v10, %v259_v48 }
 0x142   :  { %1414 = vadd.xlane.f32.xlu0 %v8728_v22  ;;  %v1183_v12 = vpop.xlane.xlu1 %1182  ;;  %4982 = vmatprep.mubr.bf16.mxu1 %v11341_v4  ;;  %v801_v6 = vmul.f32 %v6766_v10, %v277_v61  ;;  %v276_v22 = vld [vmem:[%s11282_s0 + $0x788] sm:$0xff]  ;;  %v3171_v37 = vunpack.c.l.b16 %v2635_v57  ;;  %v1520_v3 = vsel %vm1071_vm0, %v784_v30, 0.0  ;;  %v3475_v26 = vrot.slane %v3163_v54, %v11334_v9 }
 0x143   :  { %v1151_v53 = vpop.xlane.xlu0 %1150  ;;  %v2125_v63 = vadd.f32 %v8192_v31, %v1183_v12  ;;  %v3471_v41 = vrot.slane %v3162_v51, %v11334_v9  ;;  %v3170_v7 = vunpack.c.l.b16 %v2634_v46  ;;  %v1556_v60 = vsel %vm1071_vm0, %v802_v43, 0.0 }
 0x144   :  { %v2117_v13 = vadd.f32 %v8192_v31, %v1151_v53  ;;  %v2636_v5 = vpack.c.bf16 %v2380_v16, %v2380_v16  ;;  %v800_v62 = vmul.f32 %v6770_v11, %v276_v22  ;;  %v2628_v28 = vpack.c.bf16 %v2372_v0, %v2372_v0  ;;  %v263_v53 = vld [vmem:[%s11282_s0 + $0x720] sm:$0xff] }
 0x145   :  { %v2381_v29 = vmax.f32 %v2125_v63, 0.0  ;;  %1450 = vadd.xlane.f32.xlu1 %v8740_v21  ;;  %v9157_v59 = vadd.f32 %v1484_v47, %v765_v35  ;;  %v9159_v48 = vadd.f32 %v1524_v23, %v785_v44  ;;  %v9161_v30 = vadd.f32 %v1520_v3, %v783_v56  ;;  %v279_v35 = vld [vmem:[%s11282_s0 + $0x7a0] sm:$0xff] }
 0x146   :  { %v2373_v24 = vmax.f32 %v2117_v13, 0.0  ;;  %1418 = vadd.xlane.f32.xlu0 %v8751_v14  ;;  %v1187_v25 = vpop.xlane.xlu1 %1186  ;;  %v3507_v61 = vrot.slane %v3171_v37, %v11334_v9  ;;  %v9164_v43 = vadd.f32 %v1556_v60, %v801_v6  ;;  %v799_v54 = vmul.f32 %v6766_v10, %v275_v42  ;;  %v264_v14 = vld [vmem:[%s11282_s0 + $0x728] sm:$0xff] }
 0x147   :  { %v1155_v49 = vpop.xlane.xlu0 %1154  ;;  %v804_v21 = vmul.f32 %v6770_v11, %v280_v32  ;;  %v3503_v51 = vrot.slane %v3170_v7, %v11334_v9  ;;  %v2637_v57 = vpack.c.bf16 %v2381_v29, %v2381_v29  ;;  %v2126_v46 = vadd.f32 %v8192_v31, %v1187_v25 }
 0x148   :  { %v2118_v16 = vadd.f32 %v8192_v31, %v1155_v49  ;;  %v4449_v47 = vsel %vm4428_vm2, %v3475_v26, %v3471_v41  ;;  %v3172_v44 = vunpack.c.l.b16 %v2636_v5  ;;  %v2629_v0 = vpack.c.bf16 %v2373_v24, %v2373_v24  ;;  %v281_v24 = vld [vmem:[%s11282_s0 + $0x7b0] sm:$0xff] }
 0x149   :  { %1454 = vadd.xlane.f32.xlu1 %v8807_v50  ;;  %v1552_v12 = vsel %vm1071_vm0, %v800_v62, 0.0  ;;  %v3164_v23 = vunpack.c.l.b16 %v2628_v28  ;;  %v2382_v56 = vmax.f32 %v2126_v46, 0.0  ;;  %v788_v63 = vmul.f32 %v6770_v11, %v264_v14  ;;  %v282_v62 = vld [vmem:[%s11282_s0 + $0x7b8] sm:$0xff] }
 0x14a   :  { %1422 = vadd.xlane.f32.xlu0 %v8813_v52  ;;  %v2374_v6 = vmax.f32 %v2118_v16, 0.0  ;;  %v1191_v22 = vpop.xlane.xlu1 %1190  ;;  %v803_v50 = vmul.f32 %v6766_v10, %v279_v35  ;;  %v1560_v52 = vsel %vm1071_vm0, %v804_v21, 0.0  ;;  %v4456_v26 = vsel %vm4428_vm2, %v3507_v61, %v3503_v51 }
 0x14b   :  { %v1159_v37 = vpop.xlane.xlu0 %1158  ;;  %v2127_v13 = vadd.f32 %v8192_v31, %v1191_v22  ;;  %v3173_v41 = vunpack.c.l.b16 %v2637_v57  ;;  %v9190_v7 = vadd.f32 %v1552_v12, %v799_v54  ;;  %v787_v60 = vmul.f32 %v6766_v10, %v263_v53 }
 0x14c   :  { %v2119_v3 = vadd.f32 %v8192_v31, %v1159_v37  ;;  %v3165_v42 = vunpack.c.l.b16 %v2629_v0  ;;  %v2638_v32 = vpack.c.bf16 %v2382_v56, %v2382_v56  ;;  %v3511_v28 = vrot.slane %v3172_v44, %v11334_v9 }
 0x14d   :  { %v2383_v5 = vmax.f32 %v2127_v13, 0.0  ;;  %1462 = vadd.xlane.f32.xlu1 %v8859_v17  ;;  %v3479_v25 = vrot.slane %v3164_v23, %v11334_v9  ;;  %v2630_v49 = vpack.c.bf16 %v2374_v6, %v2374_v6  ;;  %v1528_v21 = vsel %vm1071_vm0, %v788_v63, 0.0 }
 0x14e   :  { %v2375_v29 = vmax.f32 %v2119_v3, 0.0  ;;  %1458 = vadd.xlane.f32.xlu0 %v8861_v45  ;;  %v1195_v61 = vpop.xlane.xlu1 %1194  ;;  %v3515_v57 = vrot.slane %v3173_v41, %v11334_v9  ;;  %v9207_v46 = vadd.f32 %v1560_v52, %v803_v50  ;;  %v9210_v16 = vmul.f32 %v6766_v10, %v281_v24  ;;  %v265_v41 = vld [vmem:[%s11282_s0 + $0x730] sm:$0xff] }
 0x14f   :  { %v1163_v54 = vpop.xlane.xlu0 %1162  ;;  %v2639_v17 = vpack.c.bf16 %v2383_v5, %v2383_v5  ;;  %v2128_v45 = vadd.f32 %v8192_v31, %v1195_v61  ;;  %v806_v35 = vmul.f32 %v6770_v11, %v282_v62  ;;  %v3483_v44 = vrot.slane %v3165_v42, %v11334_v9 }
 0x150   :  { %v2631_v14 = vpack.c.bf16 %v2375_v29, %v2375_v29  ;;  %v2120_v51 = vadd.f32 %v8192_v31, %v1163_v54  ;;  %v3174_v0 = vunpack.c.l.b16 %v2638_v32  ;;  %v4457_v23 = vsel %vm4430_vm3, %v3511_v28, %v4456_v26 }
 0x151   :  { %v2384_v12 = vmax.f32 %v2128_v45, 0.0  ;;  %1494 = vadd.xlane.f32.xlu1 %v8875_v34  ;;  %v4450_v56 = vsel %vm4430_vm3, %v3479_v25, %v4449_v47  ;;  %v3166_v6 = vunpack.c.l.b16 %v2630_v49  ;;  %v9218_v63 = vadd.f32 %v1528_v21, %v787_v60  ;;  %v266_v49 = vld [vmem:[%s11282_s0 + $0x738] sm:$0xff] }
 0x152   :  { %v2376_v53 = vmax.f32 %v2120_v51, 0.0  ;;  %1490 = vadd.xlane.f32.xlu0 %v8880_v1  ;;  %v1199_v22 = vpop.xlane.xlu1 %1198  ;;  %v3175_v13 = vunpack.c.l.b16 %v2639_v17  ;;  %v3167_v3 = vunpack.c.l.b16 %v2631_v14  ;;  %v4458_v34 = vsel %vm4432_vm4, %v3515_v57, %v4457_v23  ;;  %v284_v17 = vld [vmem:[%s11282_s0 + $0x7c8] sm:$0xff] }
 0x153   :  { %v1167_v37 = vpop.xlane.xlu0 %1166  ;;  %v2640_v50 = vpack.c.bf16 %v2384_v12, %v2384_v12  ;;  %v2129_v1 = vadd.f32 %v8192_v31, %v1199_v22  ;;  %v1564_v47 = vsel %vm1071_vm0, %v806_v35, 0.0  ;;  %v4451_v42 = vsel %vm4432_vm4, %v3483_v44, %v4450_v56 }
 0x154   :  { %v2632_v52 = vpack.c.bf16 %v2376_v53, %v2376_v53  ;;  %v2121_v26 = vadd.f32 %v8192_v31, %v1167_v37  ;;  %v3519_v60 = vrot.slane %v3174_v0, %v11334_v9  ;;  %v3487_v29 = vrot.slane %v3166_v6, %v11334_v9 }
 0x155   :  { %v3176_v32 = vunpack.c.l.b16 %v2640_v50  ;;  %1498 = vadd.xlane.f32.xlu1 %v8888_v18  ;;  %v2385_v24 = vmax.f32 %v2129_v1, 0.0  ;;  %v789_v61 = vmul.f32 %v6766_v10, %v265_v41  ;;  %v3523_v54 = vrot.slane %v3175_v13, %v11334_v9  ;;  %v283_v1 = vld [vmem:[%s11282_s0 + $0x7c0] sm:$0xff] }
 0x156   :  { %v3168_v5 = vunpack.c.l.b16 %v2632_v52  ;;  %1466 = vadd.xlane.f32.xlu0 %v8909_v8  ;;  %v2377_v62 = vmax.f32 %v2121_v26, 0.0  ;;  %v1207_v28 = vpop.xlane.xlu1 %1206  ;;  %v3491_v21 = vrot.slane %v3167_v3, %v11334_v9  ;;  %v4459_v35 = vsel %vm4434_vm5, %v3519_v60, %v4458_v34 }
 0x157   :  { %v1203_v25 = vpop.xlane.xlu0 %1202  ;;  %v2131_v18 = vadd.f32 %v8192_v31, %v1207_v28  ;;  %v3527_v14 = vrot.slane %v3176_v32, %v11334_v9  ;;  %v2641_v51 = vpack.c.bf16 %v2385_v24, %v2385_v24  ;;  %v790_v12 = vmul.f32 %v6770_v11, %v266_v49 }
 0x158   :  { %v2130_v8 = vadd.f32 %v8192_v31, %v1203_v25  ;;  %v3495_v45 = vrot.slane %v3168_v5, %v11334_v9  ;;  %v2633_v57 = vpack.c.bf16 %v2377_v62, %v2377_v62  ;;  %v4452_v53 = vsel %vm4434_vm5, %v3487_v29, %v4451_v42  ;;  %v268_v5 = vld [vmem:[%s11282_s0 + $0x748] sm:$0xff] }
 0x159   :  { %v2387_v44 = vmax.f32 %v2131_v18, 0.0  ;;  %1502 = vadd.xlane.f32.xlu1 %v8935_v19  ;;  %v3177_v23 = vunpack.c.l.b16 %v2641_v51  ;;  %v808_v37 = vmul.f32 %v6770_v11, %v284_v17  ;;  %v4460_v13 = vsel %vm4436_vm6, %v3523_v54, %v4459_v35  ;;  %v285_v35 = vld [vmem:[%s11282_s0 + $0x7d0] sm:$0xff] }
 0x15a   :  { %v2386_v0 = vmax.f32 %v2130_v8, 0.0  ;;  %1470 = vadd.xlane.f32.xlu0 %v8952_v58  ;;  %v3169_v56 = vunpack.c.l.b16 %v2633_v57  ;;  %v1239_v6 = vpop.xlane.xlu1 %1238  ;;  %v4453_v3 = vsel %vm4436_vm6, %v3491_v21, %v4452_v53  ;;  %v4461_v58 = vsel %vm4438_vm7, %v3527_v14, %v4460_v13 }
 0x15b   :  { %v1235_v22 = vpop.xlane.xlu0 %1234  ;;  %v2139_v50 = vadd.f32 %v8192_v31, %v1239_v6  ;;  %v4454_v52 = vsel %vm4438_vm7, %v3495_v45, %v4453_v3  ;;  %v3531_v41 = vrot.slane %v3177_v23, %v11334_v9  ;;  %v2643_v26 = vpack.c.bf16 %v2387_v44, %v2387_v44 }
 0x15c   :  { %v2138_v19 = vadd.f32 %v8192_v31, %v1235_v22  ;;  %v3499_v34 = vrot.slane %v3169_v56, %v11334_v9  ;;  %v2642_v42 = vpack.c.bf16 %v2386_v0, %v2386_v0  ;;  %v9270_v25 = vadd.f32 %v1564_v47, %v9210_v16  ;;  %v267_v16 = vld [vmem:[%s11282_s0 + $0x740] sm:$0xff] }
 0x15d   :  { %v2395_v60 = vmax.f32 %v2139_v50, 0.0  ;;  %1506 = vadd.xlane.f32.xlu1 %v8962_v55  ;;  %v4462_v28 = vsel %vm4440_vm8, %v3531_v41, %v4461_v58  ;;  %v1532_v49 = vsel %vm1071_vm0, %v790_v12, 0.0  ;;  %v286_v55 = vld [vmem:[%s11282_s0 + $0x7d8] sm:$0xff]  ;;  %v807_v21 = vmul.f32 %v6766_v10, %v283_v1 }
 0x15e   :  { %v2394_v32 = vmax.f32 %v2138_v19, 0.0  ;;  %1474 = vadd.xlane.f32.xlu0 %v9014_v40  ;;  %v1243_v29 = vpop.xlane.xlu1 %1242  ;;  %v4455_v62 = vsel %vm4440_vm8, %v3499_v34, %v4454_v52  ;;  %v1568_v18 = vsel %vm1071_vm0, %v808_v37, 0.0  ;;  %v792_v47 = vmul.f32 %v6770_v11, %v268_v5  ;;  %v270_v37 = vld [vmem:[%s11282_s0 + $0x758] sm:$0xff]  ;;  %v2868_v34 = vld [vmem:[%s11286_s4] sm:$0xf] }
 0x15f   :  { %v1211_v24 = vpop.xlane.xlu0 %1210  ;;  %v2651_v40 = vpack.c.bf16 %v2395_v60, %v2395_v60  ;;  %v2140_v8 = vadd.f32 %v8192_v31, %v1243_v29  ;;  %v4660_v14 = vpack.c.b16 %v4462_v28, %v4455_v62  ;;  %v3179_v45 = vunpack.c.l.b16 %v2643_v26  ;;  %v269_v26 = vld [vmem:[%s11282_s0 + $0x750] sm:$0xff]  ;;  %v288_v29 = vld [vmem:[%s11282_s0 + $0x7e8] sm:$0xff] }
 0x160   :  { %v2650_v54 = vpack.c.bf16 %v2394_v32, %v2394_v32  ;;  %v2132_v17 = vadd.f32 %v8192_v31, %v1211_v24  ;;  %v3178_v51 = vunpack.c.l.b16 %v2642_v42  ;;  %v9286_v57 = vadd.f32 %v1532_v49, %v789_v61 }
 0x161   :  { %1510 = vadd.xlane.f32.xlu1 %v9023_v36  ;;  %v810_v44 = vmul.f32 %v6770_v11, %v286_v55  ;;  %v3187_v0 = vunpack.c.l.b16 %v2651_v40  ;;  %v2396_v53 = vmax.f32 %v2140_v8, 0.0  ;;  %6244 = vmatmul.mubr.msk.bf16.gmra.mxu0 %vm4685_vm9, %v4660_v14  ;;  %v9296_v6 = vadd.f32 %v1568_v18, %v807_v21  ;;  %v287_v55 = vld [vmem:[%s11282_s0 + $0x7e0] sm:$0xff] }
 0x162   :  { %1478 = vadd.xlane.f32.xlu0 %v9040_v33  ;;  %v3186_v12 = vunpack.c.l.b16 %v2650_v54  ;;  %v2388_v23 = vmax.f32 %v2132_v17, 0.0  ;;  %6261 = vmatmul.mubr.msk.bf16.gmra.mxu1 %vm4685_vm9, %v4660_v14  ;;  %v1247_v56 = vpop.xlane.xlu1 %1246  ;;  %v791_v22 = vmul.f32 %v6766_v10, %v267_v16  ;;  %v1536_v50 = vsel %vm1071_vm0, %v792_v47, 0.0  ;;  %v11369_v21 = vld [vmem:[#allocation6_spill] sm:$0xff] }
 0x163   :  { %v1215_v36 = vpop.xlane.xlu0 %1214  ;;  %v2141_v33 = vadd.f32 %v8192_v31, %v1247_v56  ;;  %4799 = vmatprep.mubr.bf16.mxu0 %v11341_v4  ;;  %v2652_v13 = vpack.c.bf16 %v2396_v53, %v2396_v53  ;;  %4992 = vmatprep.mubr.bf16.mxu1 %v11341_v4  ;;  %v809_v19 = vmul.f32 %v6766_v10, %v285_v35  ;;  %v1572_v1 = vsel %vm1071_vm0, %v810_v44, 0.0 }
 0x164   :  { %v2133_v61 = vadd.f32 %v8192_v31, %v1215_v36  ;;  %v2644_v3 = vpack.c.bf16 %v2388_v23, %v2388_v23  ;;  %v3539_v58 = vrot.slane %v3179_v45, %v11334_v9  ;;  %v3535_v42 = vrot.slane %v3178_v51, %v11334_v9  ;;  %v272_v23 = vld [vmem:[%s11282_s0 + $0x768] sm:$0xff] }
 0x165   :  { %v2397_v52 = vmax.f32 %v2141_v33, 0.0  ;;  %1514 = vadd.xlane.f32.xlu1 %v9047_v39  ;;  %v3571_v60 = vrot.slane %v3187_v0, %v11334_v9  ;;  %v3567_v32 = vrot.slane %v3186_v12, %v11334_v9  ;;  %v3188_v24 = vunpack.c.l.b16 %v2652_v13  ;;  %v271_v33 = vld [vmem:[%s11282_s0 + $0x760] sm:$0xff] }
 0x166   :  { %v2389_v41 = vmax.f32 %v2133_v61, 0.0  ;;  %1482 = vadd.xlane.f32.xlu0 %v9083_v2  ;;  %v1251_v5 = vpop.xlane.xlu1 %1250  ;;  %v794_v2 = vmul.f32 %v6770_v11, %v270_v37  ;;  %v3180_v62 = vunpack.c.l.b16 %v2644_v3  ;;  %v9328_v54 = vadd.f32 %v1536_v50, %v791_v22 }
 0x167   :  { %v1219_v39 = vpop.xlane.xlu0 %1218  ;;  %v2142_v28 = vadd.f32 %v8192_v31, %v1251_v5  ;;  %v2653_v40 = vpack.c.bf16 %v2397_v52, %v2397_v52  ;;  %v11370_v18 = vsub.s32 0, %v11369_v21  ;;  %v793_v17 = vmul.f32 %v6766_v10, %v269_v26  ;;  %v290_v5 = vld [vmem:[%s11282_s0 + $0x7f8] sm:$0xff] }
 0x168   :  { %v2134_v49 = vadd.f32 %v8192_v31, %v1219_v39  ;;  %v2645_v14 = vpack.c.bf16 %v2389_v41, %v2389_v41  ;;  %v812_v45 = vmul.f32 %v6770_v11, %v288_v29  ;;  %v4463_v51 = vsel %vm4428_vm2, %v3539_v58, %v3535_v42 }
 0x169   :  { %v9332_v8 = vrot.slane %v2868_v34, %v11370_v18  ;;  %v2398_v16 = vmax.f32 %v2142_v28, 0.0  ;;  %1518 = vadd.xlane.f32.xlu1 %v9085_v15  ;;  %v9339_v0 = vadd.f32 %v1572_v1, %v809_v19  ;;  %v1540_v12 = vsel %vm1071_vm0, %v794_v2, 0.0  ;;  %v274_v18 = vld [vmem:[%s11282_s0 + $0x778] sm:$0xff] }
 0x16a   :  { %v2390_v47 = vmax.f32 %v2134_v49, 0.0  ;;  %1486 = vadd.xlane.f32.xlu0 %v9157_v59  ;;  %v1255_v35 = vpop.xlane.xlu1 %1254  ;;  %v9343_v53 = vmul.f32 %v6766_v10, %v287_v55  ;;  %v4470_v15 = vsel %vm4428_vm2, %v3571_v60, %v3567_v32  ;;  %v3575_v59 = vrot.slane %v3188_v24, %v11334_v9 }
 0x16b   :  { %v1223_v44 = vpop.xlane.xlu0 %1222  ;;  %v3543_v56 = vrot.slane %v3180_v62, %v11334_v9  ;;  %v2654_v36 = vpack.c.bf16 %v2398_v16, %v2398_v16  ;;  %v3189_v61 = vunpack.c.l.b16 %v2653_v40  ;;  %v2143_v37 = vadd.f32 %v8192_v31, %v1255_v35  ;;  %v289_v40 = vld [vmem:[%s11282_s0 + $0x7f0] sm:$0xff] }
 0x16c   :  { %v2646_v22 = vpack.c.bf16 %v2390_v47, %v2390_v47  ;;  %v2135_v13 = vadd.f32 %v8192_v31, %v1223_v44  ;;  %v3181_v3 = vunpack.c.l.b16 %v2645_v14  ;;  %v9358_v50 = vadd.f32 %v1540_v12, %v793_v17 }
 0x16d   :  { %1526 = vadd.xlane.f32.xlu1 %v9159_v48  ;;  %v9361_v19 = vsel %vm1071_vm0, %v812_v45, 0.0  ;;  %v796_v58 = vmul.f32 %v6770_v11, %v272_v23  ;;  %v3190_v52 = vunpack.c.l.b16 %v2654_v36  ;;  %v2399_v41 = vmax.f32 %v2143_v37, 0.0 }
 0x16e   :  { %1522 = vadd.xlane.f32.xlu0 %v9161_v30  ;;  %v2391_v34 = vmax.f32 %v2135_v13, 0.0  ;;  %v1259_v1 = vpop.xlane.xlu1 %1258  ;;  %v9365_v42 = vmul.f32 %v6766_v10, %v271_v33  ;;  %v4471_v60 = vsel %vm4430_vm3, %v3575_v59, %v4470_v15  ;;  %v4464_v48 = vsel %vm4430_vm3, %v3543_v56, %v4463_v51  ;;  %v273_v59 = vld [vmem:[%s11282_s0 + $0x770] sm:$0xff] }
 0x16f   :  { %v1227_v26 = vpop.xlane.xlu0 %1226  ;;  %v2144_v30 = vadd.f32 %v8192_v31, %v1259_v1  ;;  %v3579_v39 = vrot.slane %v3189_v61, %v11334_v9  ;;  %v3182_v2 = vunpack.c.l.b16 %v2646_v22  ;;  %v2655_v29 = vpack.c.bf16 %v2399_v41, %v2399_v41 }
 0x170   :  { %v2136_v32 = vadd.f32 %v8192_v31, %v1227_v26  ;;  %v2647_v24 = vpack.c.bf16 %v2391_v34, %v2391_v34  ;;  %v3547_v62 = vrot.slane %v3181_v3, %v11334_v9  ;;  %v9379_v55 = vsel %vm1071_vm0, %v796_v58, 0.0 }
 0x171   :  { %v2400_v28 = vmax.f32 %v2144_v30, 0.0  ;;  %1558 = vadd.xlane.f32.xlu1 %v9164_v43  ;;  %v3583_v17 = vrot.slane %v3190_v52, %v11334_v9  ;;  %v3191_v14 = vunpack.c.l.b16 %v2655_v29  ;;  %v814_v43 = vmul.f32 %v6770_v11, %v290_v5 }
 0x172   :  { %v2392_v49 = vmax.f32 %v2136_v32, 0.0  ;;  %1554 = vadd.xlane.f32.xlu0 %v9190_v7  ;;  %v3183_v16 = vunpack.c.l.b16 %v2647_v24  ;;  %v1263_v47 = vpop.xlane.xlu1 %1262  ;;  %v4472_v12 = vsel %vm4432_vm4, %v3579_v39, %v4471_v60  ;;  %v3551_v23 = vrot.slane %v3182_v2, %v11334_v9  ;;  %v293_v24 = vld [vmem:[%s11282_s0 + $0x810] sm:$0xff] }
 0x173   :  { %v1231_v45 = vpop.xlane.xlu0 %1230  ;;  %v2656_v7 = vpack.c.bf16 %v2400_v28, %v2400_v28  ;;  %v2145_v35 = vadd.f32 %v8192_v31, %v1263_v47  ;;  %v9394_v15 = vmul.f32 %v6766_v10, %v289_v40  ;;  %v798_v56 = vmul.f32 %v6770_v11, %v274_v18  ;;  %v292_v47 = vld [vmem:[%s11282_s0 + $0x808] sm:$0xff] }
 0x174   :  { %v2648_v51 = vpack.c.bf16 %v2392_v49, %v2392_v49  ;;  %v2137_v44 = vadd.f32 %v8192_v31, %v1231_v45  ;;  %v4465_v37 = vsel %vm4432_vm4, %v3547_v62, %v4464_v48  ;;  %v3587_v13 = vrot.slane %v3191_v14, %v11334_v9 }
 0x175   :  { %v3192_v36 = vunpack.c.l.b16 %v2656_v7  ;;  %v2401_v61 = vmax.f32 %v2145_v35, 0.0  ;;  %1562 = vadd.xlane.f32.xlu1 %v9207_v46  ;;  %v3555_v3 = vrot.slane %v3183_v16, %v11334_v9  ;;  %v1580_v41 = vsel %vm1071_vm0, %v814_v43, 0.0  ;;  %v294_v46 = vld [vmem:[%s11282_s0 + $0x818] sm:$0xff] }
 0x176   :  { %v3184_v33 = vunpack.c.l.b16 %v2648_v51  ;;  %v2393_v22 = vmax.f32 %v2137_v44, 0.0  ;;  %1530 = vadd.xlane.f32.xlu0 %v9218_v63  ;;  %v1271_v58 = vpop.xlane.xlu1 %1270  ;;  %v4473_v34 = vsel %vm4434_vm5, %v3583_v17, %v4472_v12  ;;  %v797_v60 = vmul.f32 %v6766_v10, %v273_v59 }
 0x177   :  { %v1267_v52 = vpop.xlane.xlu0 %1266  ;;  %v2657_v1 = vpack.c.bf16 %v2401_v61, %v2401_v61  ;;  %v3591_v63 = vrot.slane %v3192_v36, %v11334_v9  ;;  %v2147_v30 = vadd.f32 %v8192_v31, %v1271_v58  ;;  %v4466_v5 = vsel %vm4434_vm5, %v3551_v23, %v4465_v37 }
 0x178   :  { %v2649_v26 = vpack.c.bf16 %v2393_v22, %v2393_v22  ;;  %v3559_v48 = vrot.slane %v3184_v33, %v11334_v9  ;;  %v2146_v32 = vadd.f32 %v8192_v31, %v1267_v52  ;;  %v1548_v29 = vsel %vm1071_vm0, %v798_v56, 0.0  ;;  %v291_v22 = vld [vmem:[%s11282_s0 + $0x800] sm:$0xff] }
 0x179   :  { %v3193_v39 = vunpack.c.l.b16 %v2657_v1  ;;  %1566 = vadd.xlane.f32.xlu1 %v9270_v25  ;;  %v4474_v62 = vsel %vm4436_vm6, %v3587_v13, %v4473_v34  ;;  %v4467_v28 = vsel %vm4436_vm6, %v3555_v3, %v4466_v5  ;;  %v2403_v49 = vmax.f32 %v2147_v30, 0.0  ;;  %v309_v30 = vld [vmem:[%s11282_s0 + $0x890] sm:$0xff] }
 0x17a   :  { %v3185_v2 = vunpack.c.l.b16 %v2649_v26  ;;  %1534 = vadd.xlane.f32.xlu0 %v9286_v57  ;;  %v1303_v40 = vpop.xlane.xlu1 %1302  ;;  %v818_v17 = vmul.f32 %v6770_v11, %v294_v46  ;;  %v4475_v45 = vsel %vm4438_vm7, %v3591_v63, %v4474_v62  ;;  %v4468_v43 = vsel %vm4438_vm7, %v3559_v48, %v4467_v28 }
 0x17b   :  { %v1299_v18 = vpop.xlane.xlu0 %1298  ;;  %v3595_v14 = vrot.slane %v3193_v39, %v11334_v9  ;;  %v2155_v57 = vadd.f32 %v8192_v31, %v1303_v40  ;;  %v2402_v7 = vmax.f32 %v2146_v32, 0.0  ;;  %v817_v51 = vmul.f32 %v6766_v10, %v293_v24  ;;  %v308_v24 = vld [vmem:[%s11282_s0 + $0x888] sm:$0xff] }
 0x17c   :  { %v3563_v25 = vrot.slane %v3185_v2, %v11334_v9  ;;  %v2154_v16 = vadd.f32 %v8192_v31, %v1299_v18  ;;  %v2659_v59 = vpack.c.bf16 %v2403_v49, %v2403_v49  ;;  %v1588_v61 = vsel %vm1071_vm0, %v818_v17, 0.0 }
 0x17d   :  { %v2411_v35 = vmax.f32 %v2155_v57, 0.0  ;;  %1570 = vadd.xlane.f32.xlu1 %v9296_v6  ;;  %v4476_v23 = vsel %vm4440_vm8, %v3595_v14, %v4475_v45  ;;  %v816_v37 = vmul.f32 %v6770_v11, %v292_v47  ;;  %v1577_v52 = vadd.f32 %v9361_v19, %v9343_v53  ;;  %v307_v45 = vld [vmem:[%s11282_s0 + $0x880] sm:$0xff] }
 0x17e   :  { %v2410_v44 = vmax.f32 %v2154_v16, 0.0  ;;  %1538 = vadd.xlane.f32.xlu0 %v9328_v54  ;;  %v4469_v12 = vsel %vm4440_vm8, %v3563_v25, %v4468_v43  ;;  %v1307_v56 = vpop.xlane.xlu1 %1306  ;;  %v1545_v34 = vadd.f32 %v9379_v55, %v9365_v42  ;;  %v1581_v1 = vadd.f32 %v1580_v41, %v9394_v15 }
 0x17f   :  { %v1275_v36 = vpop.xlane.xlu0 %1274  ;;  %v4661_v33 = vpack.c.b16 %v4476_v23, %v4469_v12  ;;  %v2667_v13 = vpack.c.bf16 %v2411_v35, %v2411_v35  ;;  %v2156_v54 = vadd.f32 %v8192_v31, %v1307_v56  ;;  %v2658_v26 = vpack.c.bf16 %v2402_v7, %v2402_v7 }
 0x180   :  { %v2666_v6 = vpack.c.bf16 %v2410_v44, %v2410_v44  ;;  %v2148_v3 = vadd.f32 %v8192_v31, %v1275_v36  ;;  %v815_v48 = vmul.f32 %v6766_v10, %v291_v22  ;;  %v3195_v32 = vunpack.c.l.b16 %v2659_v59 }
 0x181   :  { %6245 = vmatmul.mubr.msk.bf16.gmra.mxu0 %vm4685_vm9, %v4661_v33  ;;  %v4901_v58 = vpop.f32.mrf.mxu1  ;;  %6262 = vmatmul.mubr.msk.bf16.gmra.mxu1 %vm4685_vm9, %v4661_v33  ;;  %v2412_v46 = vmax.f32 %v2156_v54, 0.0  ;;  %v1549_v42 = vadd.f32 %v1548_v29, %v797_v60  ;;  %v1589_v55 = vadd.f32 %v1588_v61, %v817_v51  ;;  %v1584_v15 = vsel %vm1071_vm0, %v816_v37, 0.0  ;;  %v312_v33 = vld [vmem:[%s11282_s0 + $0x8a8] sm:$0xff] }
 0x182   :  { %v2404_v63 = vmax.f32 %v2148_v3, 0.0  ;;  %1574 = vadd.xlane.f32.xlu1 %v9339_v0  ;;  %1542 = vadd.xlane.f32.xlu0 %v9358_v50  ;;  %v1311_v19 = vpop.xlane.xlu1 %1310  ;;  %v310_v0 = vld [vmem:[%s11282_s0 + $0x898] sm:$0xff]  ;;  %v3203_v50 = vunpack.c.l.b16 %v2667_v13  ;;  %v3202_v41 = vunpack.c.l.b16 %v2666_v6  ;;  %v4902_v39 = vadd.f32 %v4901_v58, %v9332_v8 }
 0x183   :  { %v9459_v53 = vpop.f32.mrf.mxu1  ;;  %4809 = vmatprep.mubr.bf16.mxu0 %v11341_v4  ;;  %v2668_v5 = vpack.c.bf16 %v2412_v46, %v2412_v46  ;;  %v1279_v2 = vpop.xlane.xlu0 %1278  ;;  %5002 = vmatprep.mubr.bf16.mxu1 %v11341_v4  ;;  %v2157_v29 = vadd.f32 %v8192_v31, %v1311_v19  ;;  %v833_v49 = vmul.f32 %v6766_v10, %v309_v30  ;;  %v3194_v40 = vunpack.c.l.b16 %v2658_v26 }
 0x184   :  { %v2660_v60 = vpack.c.bf16 %v2404_v63, %v2404_v63  ;;  %v2149_v62 = vadd.f32 %v8192_v31, %v1279_v2  ;;  %v1585_v17 = vadd.f32 %v1584_v15, %v815_v48  ;;  %v834_v14 = vmul.f32 %v6770_v11, %v310_v0 }
 0x185   :  { %v4905_v28 = vpop.f32.mrf.mxu1  ;;  %v3603_v25 = vrot.slane %v3195_v32, %v11334_v9  ;;  %v3204_v57 = vunpack.c.l.b16 %v2668_v5  ;;  %v2413_v16 = vmax.f32 %v2157_v29, 0.0  ;;  %v832_v43 = vmul.f32 %v6770_v11, %v308_v24  ;;  %v296_v5 = vld [vmem:[%s11282_s0 + $0x828] sm:$0xff] }
 0x186   :  { %v4906_v18 = vadd.f32 %v4905_v28, %v9332_v8  ;;  %1578 = vadd.xlane.f32.xlu1 %v1577_v52  ;;  %1546 = vadd.xlane.f32.xlu0 %v1545_v34  ;;  %v1315_v47 = vpop.xlane.xlu1 %1314  ;;  %v3635_v7 = vrot.slane %v3203_v50, %v11334_v9  ;;  %v3631_v51 = vrot.slane %v3202_v41, %v11334_v9  ;;  %v5229_v35 = vmax.f32 %v4902_v39, 0.0  ;;  %v311_v34 = vld [vmem:[%s11282_s0 + $0x8a0] sm:$0xff] }
 0x187   :  { %v1283_v12 = vpop.xlane.xlu0 %1282  ;;  %v3196_v23 = vunpack.c.l.b16 %v2660_v60  ;;  %v2405_v59 = vmax.f32 %v2149_v62, 0.0  ;;  %v2158_v56 = vadd.f32 %v8192_v31, %v1315_v47  ;;  %v2669_v61 = vpack.c.bf16 %v2413_v16, %v2413_v16  ;;  %v295_v41 = vld [vmem:[%s11282_s0 + $0x820] sm:$0xff] }
 0x188   :  { %v5233_v44 = vmax.f32 %v4906_v18, 0.0  ;;  %v2150_v36 = vadd.f32 %v8192_v31, %v1283_v12  ;;  %v1620_v37 = vsel %vm1071_vm0, %v834_v14, 0.0  ;;  %v831_v13 = vmul.f32 %v6766_v10, %v307_v45 }
 0x189   :  { %v3599_v6 = vrot.slane %v3194_v40, %v11334_v9  ;;  %v3639_v54 = vrot.slane %v3204_v57, %v11334_v9  ;;  %v2414_v3 = vmax.f32 %v2158_v56, 0.0  ;;  %v1616_v52 = vsel %vm1071_vm0, %v832_v43, 0.0  ;;  %v313_v57 = vld [vmem:[%s11282_s0 + $0x8b0] sm:$0xff] }
 0x18a   :  { %v9488_v22 = vpack.c.bf16 %v5233_v44, %v5229_v35  ;;  %1582 = vadd.xlane.f32.xlu1 %v1581_v1  ;;  %1550 = vadd.xlane.f32.xlu0 %v1549_v42  ;;  %v1319_v58 = vpop.xlane.xlu1 %1318  ;;  %v2406_v26 = vmax.f32 %v2150_v36, 0.0  ;;  %v836_v63 = vmul.f32 %v6770_v11, %v312_v33  ;;  %v4484_v48 = vsel %vm4428_vm2, %v3635_v7, %v3631_v51  ;;  %v314_v7 = vld [vmem:[%s11282_s0 + $0x8b8] sm:$0xff] }
 0x18b   :  { %v2159_v1 = vadd.f32 %v8192_v31, %v1319_v58  ;;  %v1287_v46 = vpop.xlane.xlu0 %1286  ;;  %v3607_v30 = vrot.slane %v3196_v23, %v11334_v9  ;;  %v2661_v32 = vpack.c.bf16 %v2405_v59, %v2405_v59  ;;  %v1621_v19 = vadd.f32 %v1620_v37, %v833_v49 }
 0x18c   :  { %11371 = vst [vmem:[#allocation12_spill] sm:$0xff] %v9488_v22  ;;  %v3205_v42 = vunpack.c.l.b16 %v2669_v61  ;;  %v2151_v15 = vadd.f32 %v8192_v31, %v1287_v46  ;;  %v1617_v0 = vadd.f32 %v1616_v52, %v831_v13  ;;  %v835_v50 = vmul.f32 %v6766_v10, %v311_v34 }
 0x18d   :  { %v4477_v39 = vsel %vm4428_vm2, %v3603_v25, %v3599_v6  ;;  %v4485_v2 = vsel %vm4430_vm3, %v3639_v54, %v4484_v48  ;;  %v2670_v24 = vpack.c.bf16 %v2414_v3, %v2414_v3  ;;  %v2662_v29 = vpack.c.bf16 %v2406_v26, %v2406_v26  ;;  %v297_v26 = vld [vmem:[%s11282_s0 + $0x830] sm:$0xff] }
 0x18e   :  { %1590 = vadd.xlane.f32.xlu1 %v1589_v55  ;;  %1586 = vadd.xlane.f32.xlu0 %v1585_v17  ;;  %v1323_v60 = vpop.xlane.xlu1 %1322  ;;  %v1624_v55 = vsel %vm1071_vm0, %v836_v63, 0.0  ;;  %v2415_v62 = vmax.f32 %v2159_v1, 0.0  ;;  %v2407_v28 = vmax.f32 %v2151_v15, 0.0  ;;  %v4478_v18 = vsel %vm4430_vm3, %v3607_v30, %v4477_v39 }
 0x18f   :  { %v2160_v49 = vadd.f32 %v8192_v31, %v1323_v60  ;;  %v1291_v40 = vpop.xlane.xlu0 %1290  ;;  %v819_v14 = vmul.f32 %v6766_v10, %v295_v41  ;;  %v820_v25 = vmul.f32 %v6770_v11, %v296_v5  ;;  %v3643_v16 = vrot.slane %v3205_v42, %v11334_v9 }
 0x190   :  { %v2152_v17 = vadd.f32 %v8192_v31, %v1291_v40  ;;  %v3197_v47 = vunpack.c.l.b16 %v2661_v32  ;;  %v1625_v43 = vadd.f32 %v1624_v55, %v835_v50  ;;  %v3206_v51 = vunpack.c.l.b16 %v2670_v24  ;;  %v298_v32 = vld [vmem:[%s11282_s0 + $0x838] sm:$0xff] }
 0x191   :  { %v2416_v45 = vmax.f32 %v2160_v49, 0.0  ;;  %v2663_v35 = vpack.c.bf16 %v2407_v28, %v2407_v28  ;;  %v1592_v23 = vsel %vm1071_vm0, %v820_v25, 0.0  ;;  %v3198_v59 = vunpack.c.l.b16 %v2662_v29  ;;  %v299_v25 = vld [vmem:[%s11282_s0 + $0x840] sm:$0xff] }
 0x192   :  { %1622 = vadd.xlane.f32.xlu1 %v1621_v19  ;;  %1618 = vadd.xlane.f32.xlu0 %v1617_v0  ;;  %v2408_v44 = vmax.f32 %v2152_v17, 0.0  ;;  %v1327_v12 = vpop.xlane.xlu1 %1326  ;;  %v2671_v56 = vpack.c.bf16 %v2415_v62, %v2415_v62  ;;  %v837_v61 = vmul.f32 %v6766_v10, %v313_v57  ;;  %v1593_v6 = vadd.f32 %v1592_v23, %v819_v14  ;;  %v315_v62 = vld [vmem:[%s11282_s0 + $0x8c0] sm:$0xff] }
 0x193   :  { %v2161_v36 = vadd.f32 %v8192_v31, %v1327_v12  ;;  %v1295_v33 = vpop.xlane.xlu0 %1294  ;;  %v838_v54 = vmul.f32 %v6770_v11, %v314_v7  ;;  %v4486_v3 = vsel %vm4432_vm4, %v3643_v16, %v4485_v2  ;;  %v3611_v58 = vrot.slane %v3197_v47, %v11334_v9  ;;  %v300_v7 = vld [vmem:[%s11282_s0 + $0x848] sm:$0xff] }
 0x194   :  { %v2664_v37 = vpack.c.bf16 %v2408_v44, %v2408_v44  ;;  %v2153_v13 = vadd.f32 %v8192_v31, %v1295_v33  ;;  %v2672_v52 = vpack.c.bf16 %v2416_v45, %v2416_v45  ;;  %v3647_v1 = vrot.slane %v3206_v51, %v11334_v9  ;;  %v9569_v33 = vpop.f32.mrf.mxu1 }
 0x195   :  { %v2417_v34 = vmax.f32 %v2161_v36, 0.0  ;;  %v3199_v46 = vunpack.c.l.b16 %v2663_v35  ;;  %v1628_v30 = vsel %vm1071_vm0, %v838_v54, 0.0  ;;  %v3207_v19 = vunpack.c.l.b16 %v2671_v56 }
 0x196   :  { %1626 = vadd.xlane.f32.xlu1 %v1625_v43  ;;  %v2409_v63 = vmax.f32 %v2153_v13, 0.0  ;;  %1594 = vadd.xlane.f32.xlu0 %v1593_v6  ;;  %v1335_v48 = vpop.xlane.xlu1 %1334  ;;  %v3200_v42 = vunpack.c.l.b16 %v2664_v37  ;;  %v3615_v41 = vrot.slane %v3198_v59, %v11334_v9  ;;  %v1629_v39 = vadd.f32 %v1628_v30, %v837_v61 }
 0x197   :  { %v2673_v15 = vpack.c.bf16 %v2417_v34, %v2417_v34  ;;  %v2163_v0 = vadd.f32 %v8192_v31, %v1335_v48  ;;  %v1331_v50 = vpop.xlane.xlu0 %1330  ;;  %v821_v2 = vmul.f32 %v6766_v10, %v297_v26  ;;  %v4479_v24 = vsel %vm4432_vm4, %v3611_v58, %v4478_v18  ;;  %v316_v18 = vld [vmem:[%s11282_s0 + $0x8c8] sm:$0xff] }
 0x198   :  { %v2665_v5 = vpack.c.bf16 %v2409_v63, %v2409_v63  ;;  %v3208_v60 = vunpack.c.l.b16 %v2672_v52  ;;  %v2162_v55 = vadd.f32 %v8192_v31, %v1331_v50  ;;  %v822_v29 = vmul.f32 %v6770_v11, %v298_v32 }
 0x199   :  { %v3619_v28 = vrot.slane %v3199_v46, %v11334_v9  ;;  %v3209_v49 = vunpack.c.l.b16 %v2673_v15  ;;  %v2419_v17 = vmax.f32 %v2163_v0, 0.0  ;;  %v4487_v57 = vsel %vm4434_vm5, %v3647_v1, %v4486_v3  ;;  %v317_v15 = vld [vmem:[%s11282_s0 + $0x8d0] sm:$0xff]  ;;  %v318_v0 = vld [vmem:[%s11282_s0 + $0x8d8] sm:$0xff] }
 0x19a   :  { %v3201_v40 = vunpack.c.l.b16 %v2665_v5  ;;  %1630 = vadd.xlane.f32.xlu1 %v1629_v39  ;;  %v1367_v14 = vpop.xlane.xlu1 %1366  ;;  %v3651_v16 = vrot.slane %v3207_v19, %v11334_v9  ;;  %v3623_v47 = vrot.slane %v3200_v42, %v11334_v9  ;;  %v1596_v45 = vsel %vm1071_vm0, %v822_v29, 0.0  ;;  %v301_v39 = vld [vmem:[%s11282_s0 + $0x850] sm:$0xff] }
 0x19b   :  { %v1363_v43 = vpop.xlane.xlu0 %1362  ;;  %v4480_v51 = vsel %vm4434_vm5, %v3615_v41, %v4479_v24  ;;  %v1597_v44 = vadd.f32 %v1596_v45, %v821_v2  ;;  %v839_v12 = vmul.f32 %v6766_v10, %v315_v62  ;;  %v3655_v23 = vrot.slane %v3208_v60, %v11334_v9  ;;  %v302_v2 = vld [vmem:[%s11282_s0 + $0x858] sm:$0xff] }
 0x19c   :  { %v3627_v35 = vrot.slane %v3201_v40, %v11334_v9  ;;  %v2418_v59 = vmax.f32 %v2162_v55, 0.0  ;;  %v840_v56 = vmul.f32 %v6770_v11, %v316_v18  ;;  %v823_v36 = vmul.f32 %v6766_v10, %v299_v25 }
 0x19d   :  { %v4481_v61 = vsel %vm4436_vm6, %v3619_v28, %v4480_v51  ;;  %v3659_v37 = vrot.slane %v3209_v49, %v11334_v9  ;;  %v2675_v13 = vpack.c.bf16 %v2419_v17, %v2419_v17  ;;  %1598 = vadd.xlane.f32.xlu0 %v1597_v44  ;;  %v824_v6 = vmul.f32 %v6770_v11, %v300_v7  ;;  %v319_v7 = vld [vmem:[%s11282_s0 + $0x8e0] sm:$0xff] }
 0x19e   :  { %v1371_v54 = vpop.xlane.xlu1 %1370  ;;  %v4488_v3 = vsel %vm4436_vm6, %v3651_v16, %v4487_v57  ;;  %v4482_v58 = vsel %vm4438_vm7, %v3623_v47, %v4481_v61  ;;  %v2171_v52 = vadd.f32 %v8192_v31, %v1367_v14  ;;  %v1632_v34 = vsel %vm1071_vm0, %v840_v56, 0.0  ;;  %v303_v56 = vld [vmem:[%s11282_s0 + $0x860] sm:$0xff] }
 0x19f   :  { %v1339_v26 = vpop.xlane.xlu0 %1338  ;;  %v2170_v1 = vadd.f32 %v8192_v31, %v1363_v43  ;;  %v1633_v46 = vadd.f32 %v1632_v34, %v839_v12  ;;  %v1600_v63 = vsel %vm1071_vm0, %v824_v6, 0.0  ;;  %v4483_v48 = vsel %vm4440_vm8, %v3627_v35, %v4482_v58 }
 0x1a0   :  { %v4489_v32 = vsel %vm4438_vm7, %v3655_v23, %v4488_v3  ;;  %v2674_v19 = vpack.c.bf16 %v2418_v59, %v2418_v59  ;;  %v1601_v42 = vadd.f32 %v1600_v63, %v823_v36  ;;  %v3211_v50 = vunpack.c.l.b16 %v2675_v13  ;;  %v320_v59 = vld [vmem:[%s11282_s0 + $0x8e8] sm:$0xff] }
 0x1a1   :  { %v4911_v30 = vpop.f32.mrf.mxu1  ;;  %1634 = vadd.xlane.f32.xlu1 %v1633_v46  ;;  %v2172_v41 = vadd.f32 %v8192_v31, %v1371_v54  ;;  %v4490_v5 = vsel %vm4440_vm8, %v3659_v37, %v4489_v32  ;;  %v2427_v55 = vmax.f32 %v2171_v52, 0.0  ;;  %v2426_v28 = vmax.f32 %v2170_v1, 0.0  ;;  %v304_v54 = vld [vmem:[%s11282_s0 + $0x868] sm:$0xff] }
 0x1a2   :  { %v1375_v60 = vpop.xlane.xlu1 %1374  ;;  %1602 = vadd.xlane.f32.xlu0 %v1601_v42  ;;  %v4662_v29 = vpack.c.b16 %v4490_v5, %v4483_v48  ;;  %v2164_v49 = vadd.f32 %v8192_v31, %v1339_v26  ;;  %v841_v40 = vmul.f32 %v6766_v10, %v317_v15  ;;  %v842_v17 = vmul.f32 %v6770_v11, %v318_v0 }
 0x1a3   :  { %v9596_v24 = vpop.f32.mrf.mxu1  ;;  %v1343_v62 = vpop.xlane.xlu0 %1342  ;;  %v3210_v14 = vunpack.c.l.b16 %v2674_v19  ;;  %v825_v18 = vmul.f32 %v6766_v10, %v301_v39  ;;  %v826_v25 = vmul.f32 %v6770_v11, %v302_v2  ;;  %v9606_v57 = vrot.slane %v3211_v50, %v11334_v9  ;;  %v321_v39 = vld [vmem:[%s11282_s0 + $0x8f0] sm:$0xff]  ;;  %v322_v2 = vld [vmem:[%s11282_s0 + $0x8f8] sm:$0xff] }
 0x1a4   :  { %6246 = vmatmul.mubr.msk.bf16.gmra.mxu0 %vm4685_vm9, %v4662_v29  ;;  %6263 = vmatmul.mubr.msk.bf16.gmra.mxu1 %vm4685_vm9, %v4662_v29  ;;  %v2428_v16 = vmax.f32 %v2172_v41, 0.0  ;;  %v1636_v47 = vsel %vm1071_vm0, %v842_v17, 0.0  ;;  %v2173_v45 = vadd.f32 %v8192_v31, %v1375_v60  ;;  %v2683_v35 = vpack.c.bf16 %v2427_v55, %v2427_v55  ;;  %v305_v60 = vld [vmem:[%s11282_s0 + $0x870] sm:$0xff] }
 0x1a5   :  { %v4915_v43 = vpop.f32.mrf.mxu1  ;;  %4819 = vmatprep.mubr.bf16.mxu0 %v11341_v4  ;;  %5012 = vmatprep.mubr.bf16.mxu1 %v11341_v4  ;;  %v4912_v44 = vadd.f32 %v4911_v30, %v9332_v8  ;;  %v1637_v12 = vadd.f32 %v1636_v47, %v841_v40  ;;  %v1604_v23 = vsel %vm1071_vm0, %v826_v25, 0.0  ;;  %v2682_v61 = vpack.c.bf16 %v2426_v28, %v2426_v28 }
 0x1a6   :  { %v1379_v51 = vpop.xlane.xlu1 %1378  ;;  %v2420_v37 = vmax.f32 %v2164_v49, 0.0  ;;  %v1605_v13 = vadd.f32 %v1604_v23, %v825_v18  ;;  %v2165_v6 = vadd.f32 %v8192_v31, %v1343_v62  ;;  %v3663_v3 = vrot.slane %v3210_v14, %v11334_v9  ;;  %v306_v49 = vld [vmem:[%s11282_s0 + $0x878] sm:$0xff] }
 0x1a7   :  { %v1347_v36 = vpop.xlane.xlu0 %1346  ;;  %1638 = vadd.xlane.f32.xlu1 %v1637_v12  ;;  %v2429_v58 = vmax.f32 %v2173_v45, 0.0  ;;  %v4916_v52 = vadd.f32 %v4915_v43, %v9332_v8  ;;  %v843_v34 = vmul.f32 %v6766_v10, %v319_v7  ;;  %v2684_v26 = vpack.c.bf16 %v2428_v16, %v2428_v16 }
 0x1a8   :  { %1606 = vadd.xlane.f32.xlu0 %v1605_v13  ;;  %v2421_v1 = vmax.f32 %v2165_v6, 0.0  ;;  %v844_v46 = vmul.f32 %v6770_v11, %v320_v59  ;;  %v827_v63 = vmul.f32 %v6766_v10, %v303_v56  ;;  %v3219_v30 = vunpack.c.l.b16 %v2683_v35 }
 0x1a9   :  { %v5237_v32 = vmax.f32 %v4912_v44, 0.0  ;;  %v5241_v19 = vmax.f32 %v4916_v52, 0.0  ;;  %v828_v42 = vmul.f32 %v6770_v11, %v304_v54  ;;  %v3218_v0 = vunpack.c.l.b16 %v2682_v61  ;;  %v325_v61 = vld [vmem:[%s11282_s0 + $0x910] sm:$0xff] }
 0x1aa   :  { %v1383_v48 = vpop.xlane.xlu1 %1382  ;;  %v2676_v50 = vpack.c.bf16 %v2420_v37, %v2420_v37  ;;  %v1640_v41 = vsel %vm1071_vm0, %v844_v46, 0.0  ;;  %v2174_v5 = vadd.f32 %v8192_v31, %v1379_v51  ;;  %v2685_v55 = vpack.c.bf16 %v2429_v58, %v2429_v58  ;;  %v326_v37 = vld [vmem:[%s11282_s0 + $0x918] sm:$0xff] }
 0x1ab   :  { %v1351_v15 = vpop.xlane.xlu0 %1350  ;;  %v9644_v29 = vpack.c.bf16 %v5241_v19, %v5237_v32  ;;  %v1641_v62 = vadd.f32 %v1640_v41, %v843_v34  ;;  %v1608_v28 = vsel %vm1071_vm0, %v828_v42, 0.0  ;;  %v3220_v40 = vunpack.c.l.b16 %v2684_v26 }
 0x1ac   :  { %v2677_v17 = vpack.c.bf16 %v2421_v1, %v2421_v1  ;;  %v1609_v14 = vadd.f32 %v1608_v28, %v827_v63  ;;  %v2430_v18 = vmax.f32 %v2174_v5, 0.0  ;;  %v2166_v16 = vadd.f32 %v8192_v31, %v1347_v36 }
 0x1ad   :  { %11372 = vst [vmem:[#allocation13_spill] sm:$0xff] %v9644_v29  ;;  %1642 = vadd.xlane.f32.xlu1 %v1641_v62  ;;  %v845_v47 = vmul.f32 %v6766_v10, %v321_v39  ;;  %v846_v45 = vmul.f32 %v6770_v11, %v322_v2  ;;  %v829_v43 = vmul.f32 %v6766_v10, %v305_v60  ;;  %v3212_v44 = vunpack.c.l.b16 %v2676_v50  ;;  %v341_v60 = vld [vmem:[%s11282_s0 + $0x990] sm:$0xff] }
 0x1ae   :  { %v1387_v25 = vpop.xlane.xlu1 %1386  ;;  %v3699_v51 = vrot.slane %v3219_v30, %v11334_v9  ;;  %v3695_v35 = vrot.slane %v3218_v0, %v11334_v9  ;;  %1610 = vadd.xlane.f32.xlu0 %v1609_v14  ;;  %v830_v12 = vmul.f32 %v6770_v11, %v306_v49  ;;  %v4491_v23 = vsel %vm4428_vm2, %v9606_v57, %v3663_v3  ;;  %v323_v57 = vld [vmem:[%s11282_s0 + $0x900] sm:$0xff]  ;;  %v324_v3 = vld [vmem:[%s11282_s0 + $0x908] sm:$0xff] }
 0x1af   :  { %v1355_v7 = vpop.xlane.xlu0 %1354  ;;  %v3221_v59 = vunpack.c.l.b16 %v2685_v55  ;;  %v2422_v56 = vmax.f32 %v2166_v16, 0.0  ;;  %v1644_v36 = vsel %vm1071_vm0, %v846_v45, 0.0  ;;  %v3213_v13 = vunpack.c.l.b16 %v2677_v17  ;;  %v342_v17 = vld [vmem:[%s11282_s0 + $0x998] sm:$0xff]  ;;  %v339_v14 = vld [vmem:[%s11282_s0 + $0x980] sm:$0xff] }
 0x1b0   :  { %v1645_v6 = vadd.f32 %v1644_v36, %v845_v47  ;;  %v1612_v54 = vsel %vm1071_vm0, %v830_v12, 0.0  ;;  %v2175_v58 = vadd.f32 %v8192_v31, %v1383_v48  ;;  %v3703_v34 = vrot.slane %v3220_v40, %v11334_v9 }
 0x1b1   :  { %v2686_v26 = vpack.c.bf16 %v2430_v18, %v2430_v18  ;;  %v1613_v1 = vadd.f32 %v1612_v54, %v829_v43  ;;  %v2167_v46 = vadd.f32 %v8192_v31, %v1351_v15  ;;  %v4498_v30 = vsel %vm4428_vm2, %v3699_v51, %v3695_v35  ;;  %v343_v54 = vld [vmem:[%s11282_s0 + $0x9a0] sm:$0xff] }
 0x1b2   :  { %v1391_v52 = vpop.xlane.xlu1 %1390  ;;  %v3671_v48 = vrot.slane %v3212_v44, %v11334_v9  ;;  %1646 = vadd.xlane.f32.xlu1 %v1645_v6  ;;  %v849_v32 = vmul.f32 %v6766_v10, %v325_v61  ;;  %v850_v19 = vmul.f32 %v6770_v11, %v326_v37  ;;  %v3707_v42 = vrot.slane %v3221_v59, %v11334_v9 }
 0x1b3   :  { %v1359_v63 = vpop.xlane.xlu0 %1358  ;;  %v2678_v0 = vpack.c.bf16 %v2422_v56, %v2422_v56  ;;  %1614 = vadd.xlane.f32.xlu0 %v1613_v1  ;;  %v847_v50 = vmul.f32 %v6766_v10, %v323_v57  ;;  %v848_v41 = vmul.f32 %v6770_v11, %v324_v3  ;;  %v3675_v15 = vrot.slane %v3213_v13, %v11334_v9  ;;  %v344_v1 = vld [vmem:[%s11282_s0 + $0x9a8] sm:$0xff] }
 0x1b4   :  { %v2431_v5 = vmax.f32 %v2175_v58, 0.0  ;;  %v1652_v39 = vsel %vm1071_vm0, %v850_v19, 0.0  ;;  %v2168_v2 = vadd.f32 %v8192_v31, %v1355_v7  ;;  %v4499_v62 = vsel %vm4430_vm3, %v3703_v34, %v4498_v30  ;;  %v340_v7 = vld [vmem:[%s11282_s0 + $0x988] sm:$0xff] }
 0x1b5   :  { %v3222_v28 = vunpack.c.l.b16 %v2686_v26  ;;  %v2423_v49 = vmax.f32 %v2167_v46, 0.0  ;;  %v1653_v40 = vadd.f32 %v1652_v39, %v849_v32  ;;  %v4492_v16 = vsel %vm4430_vm3, %v3671_v48, %v4491_v23  ;;  %v327_v46 = vld [vmem:[%s11282_s0 + $0x920] sm:$0xff] }
 0x1b6   :  { %v1399_v55 = vpop.xlane.xlu1 %1398  ;;  %v1648_v47 = vsel %vm1071_vm0, %v848_v41, 0.0  ;;  %v2176_v45 = vadd.f32 %v8192_v31, %v1387_v25  ;;  %v2424_v43 = vmax.f32 %v2168_v2, 0.0  ;;  %v4500_v51 = vsel %vm4432_vm4, %v3707_v42, %v4499_v62 }
 0x1b7   :  { %v9696_v18 = vpop.xlane.xlu0 %1394  ;;  %v3214_v35 = vunpack.c.l.b16 %v2678_v0  ;;  %1654 = vadd.xlane.f32.xlu1 %v1653_v40  ;;  %v1649_v44 = vadd.f32 %v1648_v47, %v847_v50  ;;  %v865_v12 = vmul.f32 %v6766_v10, %v341_v60  ;;  %v4493_v59 = vsel %vm4432_vm4, %v3675_v15, %v4492_v16 }
 0x1b8   :  { %v2687_v56 = vpack.c.bf16 %v2431_v5, %v2431_v5  ;;  %v866_v23 = vmul.f32 %v6770_v11, %v342_v17  ;;  %v863_v36 = vmul.f32 %v6766_v10, %v339_v14  ;;  %v3711_v61 = vrot.slane %v3222_v28, %v11334_v9  ;;  %v345_v17 = vld [vmem:[%s11282_s0 + $0x9b0] sm:$0xff]  ;;  %v346_v14 = vld [vmem:[%s11282_s0 + $0x9b8] sm:$0xff] }
 0x1b9   :  { %v2679_v37 = vpack.c.bf16 %v2423_v49, %v2423_v49  ;;  %1650 = vadd.xlane.f32.xlu0 %v1649_v44  ;;  %v864_v13 = vmul.f32 %v6770_v11, %v340_v7  ;;  %v2177_v6 = vadd.f32 %v8192_v31, %v1391_v52  ;;  %v2432_v57 = vmax.f32 %v2176_v45, 0.0  ;;  %v328_v52 = vld [vmem:[%s11282_s0 + $0x928] sm:$0xff]  ;;  %v329_v7 = vld [vmem:[%s11282_s0 + $0x930] sm:$0xff] }
 0x1ba   :  { %v9709_v25 = vpop.xlane.xlu1 %1430  ;;  %v2680_v3 = vpack.c.bf16 %v2424_v43, %v2424_v43  ;;  %v1684_v34 = vsel %vm1071_vm0, %v866_v23, 0.0  ;;  %v2169_v26 = vadd.f32 %v8192_v31, %v1359_v63  ;;  %v3679_v30 = vrot.slane %v3214_v35, %v11334_v9 }
 0x1bb   :  { %v1427_v58 = vpop.xlane.xlu0 %1426  ;;  %v1685_v48 = vadd.f32 %v1684_v34, %v865_v12  ;;  %v1680_v32 = vsel %vm1071_vm0, %v864_v13, 0.0  ;;  %v2433_v19 = vmax.f32 %v2177_v6, 0.0  ;;  %v3223_v42 = vunpack.c.l.b16 %v2687_v56  ;;  %v330_v56 = vld [vmem:[%s11282_s0 + $0x938] sm:$0xff]  ;;  %v348_v34 = vld [vmem:[%s11282_s0 + $0x9c8] sm:$0xff] }
 0x1bc   :  { %v1681_v63 = vadd.f32 %v1680_v32, %v863_v36  ;;  %v2425_v0 = vmax.f32 %v2169_v26, 0.0  ;;  %v867_v50 = vmul.f32 %v6766_v10, %v343_v54  ;;  %v3215_v15 = vunpack.c.l.b16 %v2679_v37 }
 0x1bd   :  { %1686 = vadd.xlane.f32.xlu1 %v1685_v48  ;;  %v868_v5 = vmul.f32 %v6770_v11, %v344_v1  ;;  %v851_v39 = vmul.f32 %v6766_v10, %v327_v46  ;;  %v852_v2 = vmul.f32 %v6770_v11, %v328_v52  ;;  %v9739_v62 = vsel %vm4434_vm5, %v3711_v61, %v4500_v51  ;;  %v9780_v48 = vpop.f32.mrf.mxu1 }
 0x1be   :  { %v9731_v41 = vpop.xlane.xlu1 %1434  ;;  %v2688_v28 = vpack.c.bf16 %v2432_v57, %v2432_v57  ;;  %v3216_v49 = vunpack.c.l.b16 %v2680_v3  ;;  %1682 = vadd.xlane.f32.xlu0 %v1681_v63  ;;  %v2681_v40 = vpack.c.bf16 %v2425_v0, %v2425_v0  ;;  %v2689_v16 = vpack.c.bf16 %v2433_v19, %v2433_v19  ;;  %v332_v63 = vld [vmem:[%s11282_s0 + $0x948] sm:$0xff] }
 0x1bf   :  { %v9736_v60 = vpop.xlane.xlu0 %1402  ;;  %v1688_v47 = vsel %vm1071_vm0, %v868_v5, 0.0  ;;  %v1656_v45 = vsel %vm1071_vm0, %v852_v2, 0.0  ;;  %v2179_v43 = vadd.f32 %v8192_v31, %v1399_v55  ;;  %v4494_v51 = vsel %vm4434_vm5, %v3679_v30, %v4493_v59  ;;  %v347_v59 = vld [vmem:[%s11282_s0 + $0x9c0] sm:$0xff] }
 0x1c0   :  { %v3715_v35 = vrot.slane %v3223_v42, %v11334_v9  ;;  %v1689_v44 = vadd.f32 %v1688_v47, %v867_v50  ;;  %v1657_v12 = vadd.f32 %v1656_v45, %v851_v39  ;;  %v3683_v36 = vrot.slane %v3215_v15, %v11334_v9  ;;  %v331_v30 = vld [vmem:[%s11282_s0 + $0x940] sm:$0xff] }
 0x1c1   :  { %v3217_v61 = vunpack.c.l.b16 %v2681_v40  ;;  %v869_v55 = vmul.f32 %v6766_v10, %v345_v17  ;;  %v870_v37 = vmul.f32 %v6770_v11, %v346_v14  ;;  %v3224_v6 = vunpack.c.l.b16 %v2688_v28 }
 0x1c2   :  { %v9758_v23 = vpop.xlane.xlu1 %1438  ;;  %v3687_v54 = vrot.slane %v3216_v49, %v11334_v9  ;;  %1690 = vadd.xlane.f32.xlu1 %v1689_v44  ;;  %1658 = vadd.xlane.f32.xlu0 %v1657_v12  ;;  %v2178_v57 = vadd.f32 %v8192_v31, %v9696_v18  ;;  %v853_v3 = vmul.f32 %v6766_v10, %v329_v7  ;;  %v3225_v26 = vunpack.c.l.b16 %v2689_v16  ;;  %v4921_v40 = vpop.f32.mrf.mxu1 }
 0x1c3   :  { %v9766_v13 = vpop.xlane.xlu0 %1406  ;;  %v2435_v1 = vmax.f32 %v2179_v43, 0.0  ;;  %v1692_v46 = vsel %vm1071_vm0, %v870_v37, 0.0  ;;  %v854_v52 = vmul.f32 %v6770_v11, %v330_v56  ;;  %v2187_v18 = vadd.f32 %v8192_v31, %v9709_v25 }
 0x1c4   :  { %v1693_v32 = vadd.f32 %v1692_v46, %v869_v55  ;;  %v2186_v19 = vadd.f32 %v8192_v31, %v1427_v58  ;;  %v871_v42 = vmul.f32 %v6766_v10, %v347_v59  ;;  %v4495_v50 = vsel %vm4436_vm6, %v3683_v36, %v4494_v51  ;;  %v349_v55 = vld [vmem:[%s11282_s0 + $0x9d0] sm:$0xff] }
 0x1c5   :  { %v3691_v15 = vrot.slane %v3217_v61, %v11334_v9  ;;  %v1660_v5 = vsel %vm1071_vm0, %v854_v52, 0.0  ;;  %v872_v39 = vmul.f32 %v6770_v11, %v348_v34  ;;  %v3719_v25 = vrot.slane %v3224_v6, %v11334_v9 }
 0x1c6   :  { %v9789_v0 = vpop.xlane.xlu1 %1442  ;;  %v2434_v58 = vmax.f32 %v2178_v57, 0.0  ;;  %1694 = vadd.xlane.f32.xlu1 %v1693_v32  ;;  %v1661_v28 = vadd.f32 %v1660_v5, %v853_v3  ;;  %v855_v49 = vmul.f32 %v6766_v10, %v331_v30  ;;  %v3723_v17 = vrot.slane %v3225_v26, %v11334_v9  ;;  %v334_v57 = vld [vmem:[%s11282_s0 + $0x958] sm:$0xff]  ;;  %v9828_v3 = vpop.f32.mrf.mxu1 }
 0x1c7   :  { %v9795_v2 = vpop.xlane.xlu0 %1410  ;;  %v2691_v14 = vpack.c.bf16 %v2435_v1, %v2435_v1  ;;  %v1696_v16 = vsel %vm1071_vm0, %v872_v39, 0.0  ;;  %v856_v47 = vmul.f32 %v6770_v11, %v332_v63  ;;  %v4496_v45 = vsel %vm4438_vm7, %v3687_v54, %v4495_v50  ;;  %11373 = vst [vmem:[#allocation14_spill] sm:$0xff] %v9828_v3 }
 0x1c8   :  { %1662 = vadd.xlane.f32.xlu0 %v1661_v28  ;;  %v2443_v43 = vmax.f32 %v2187_v18, 0.0  ;;  %v2442_v7 = vmax.f32 %v2186_v19, 0.0  ;;  %v1697_v51 = vadd.f32 %v1696_v16, %v871_v42  ;;  %v4502_v12 = vsel %vm4436_vm6, %v3715_v35, %v9739_v62  ;;  %v333_v35 = vld [vmem:[%s11282_s0 + $0x950] sm:$0xff]  ;;  %v4925_v5 = vpop.f32.mrf.mxu1 }
 0x1c9   :  { %v1664_v56 = vsel %vm1071_vm0, %v856_v47, 0.0  ;;  %v2188_v36 = vadd.f32 %v8192_v31, %v9731_v41  ;;  %v4497_v61 = vsel %vm4440_vm8, %v3691_v15, %v4496_v45  ;;  %v4503_v59 = vsel %vm4438_vm7, %v3719_v25, %v4502_v12  ;;  %v350_v41 = vld [vmem:[%s11282_s0 + $0x9d8] sm:$0xff]  ;;  %v336_v12 = vld [vmem:[%s11282_s0 + $0x968] sm:$0xff] }
 0x1ca   :  { %v9803_v44 = vpop.xlane.xlu1 %1446  ;;  %v2690_v6 = vpack.c.bf16 %v2434_v58, %v2434_v58  ;;  %1698 = vadd.xlane.f32.xlu1 %v1697_v51  ;;  %v1665_v54 = vadd.f32 %v1664_v56, %v855_v49  ;;  %v2180_v62 = vadd.f32 %v8192_v31, %v9736_v60  ;;  %v3227_v34 = vunpack.c.l.b16 %v2691_v14  ;;  %v351_v49 = vld [vmem:[%s11282_s0 + $0x9e0] sm:$0xff] }
 0x1cb   :  { %v9814_v37 = vpop.xlane.xlu0 %1414  ;;  %v4504_v26 = vsel %vm4440_vm8, %v3723_v17, %v4503_v59  ;;  %v2699_v1 = vpack.c.bf16 %v2443_v43, %v2443_v43  ;;  %v2698_v46 = vpack.c.bf16 %v2442_v7, %v2442_v7  ;;  %v873_v52 = vmul.f32 %v6766_v10, %v349_v55  ;;  %v335_v51 = vld [vmem:[%s11282_s0 + $0x960] sm:$0xff] }
 0x1cc   :  { %1666 = vadd.xlane.f32.xlu0 %v1665_v54  ;;  %v4663_v60 = vpack.c.b16 %v4504_v26, %v4497_v61  ;;  %v2444_v32 = vmax.f32 %v2188_v36, 0.0  ;;  %v874_v18 = vmul.f32 %v6770_v11, %v350_v41  ;;  %v857_v19 = vmul.f32 %v6766_v10, %v333_v35 }
 0x1cd   :  { %v858_v42 = vmul.f32 %v6770_v11, %v334_v57  ;;  %v3226_v50 = vunpack.c.l.b16 %v2690_v6  ;;  %v2436_v15 = vmax.f32 %v2180_v62, 0.0  ;;  %v4922_v39 = vadd.f32 %v4921_v40, %v9332_v8  ;;  %v352_v40 = vld [vmem:[%s11282_s0 + $0x9e8] sm:$0xff] }
 0x1ce   :  { %v9832_v30 = vpop.xlane.xlu1 %1450  ;;  %6247 = vmatmul.mubr.msk.bf16.gmra.mxu0 %vm4685_vm9, %v4663_v60  ;;  %6264 = vmatmul.mubr.msk.bf16.gmra.mxu1 %vm4685_vm9, %v4663_v60  ;;  %v1700_v25 = vsel %vm1071_vm0, %v874_v18, 0.0  ;;  %v2189_v28 = vadd.f32 %v8192_v31, %v9758_v23  ;;  %v3235_v17 = vunpack.c.l.b16 %v2699_v1  ;;  %v3731_v45 = vrot.slane %v3227_v34, %v11334_v9  ;;  %v354_v18 = vld [vmem:[%s11282_s0 + $0x9f8] sm:$0xff] }
 0x1cf   :  { %v9837_v63 = vpop.xlane.xlu0 %1418  ;;  %v1668_v58 = vsel %vm1071_vm0, %v858_v42, 0.0  ;;  %4829 = vmatprep.mubr.bf16.mxu0 %v11341_v4  ;;  %5022 = vmatprep.mubr.bf16.mxu1 %v11341_v4  ;;  %v1701_v14 = vadd.f32 %v1700_v25, %v873_v52  ;;  %v3234_v23 = vunpack.c.l.b16 %v2698_v46  ;;  %v2700_v43 = vpack.c.bf16 %v2444_v32, %v2444_v32  ;;  %v353_v32 = vld [vmem:[%s11282_s0 + $0x9f0] sm:$0xff] }
 0x1d0   :  { %v1669_v16 = vadd.f32 %v1668_v58, %v857_v19  ;;  %v4926_v7 = vadd.f32 %v4925_v5, %v9332_v8  ;;  %v3727_v36 = vrot.slane %v3226_v50, %v11334_v9  ;;  %v2445_v61 = vmax.f32 %v2189_v28, 0.0 }
 0x1d1   :  { %1702 = vadd.xlane.f32.xlu1 %v1701_v14  ;;  %v2181_v55 = vadd.f32 %v8192_v31, %v9766_v13  ;;  %v875_v59 = vmul.f32 %v6766_v10, %v351_v49  ;;  %v2692_v6 = vpack.c.bf16 %v2436_v15, %v2436_v15  ;;  %v5245_v54 = vmax.f32 %v4922_v39, 0.0  ;;  %v338_v39 = vld [vmem:[%s11282_s0 + $0x978] sm:$0xff] }
 0x1d2   :  { %v9854_v47 = vpop.xlane.xlu1 %1454  ;;  %1670 = vadd.xlane.f32.xlu0 %v1669_v16  ;;  %v5249_v62 = vmax.f32 %v4926_v7, 0.0  ;;  %v876_v41 = vmul.f32 %v6770_v11, %v352_v40  ;;  %v3763_v35 = vrot.slane %v3235_v17, %v11334_v9  ;;  %v859_v57 = vmul.f32 %v6766_v10, %v335_v51 }
 0x1d3   :  { %v9864_v56 = vpop.xlane.xlu0 %1422  ;;  %v860_v34 = vmul.f32 %v6770_v11, %v336_v12  ;;  %v2190_v26 = vadd.f32 %v8192_v31, %v9789_v0  ;;  %v3759_v13 = vrot.slane %v3234_v23, %v11334_v9  ;;  %v3236_v46 = vunpack.c.l.b16 %v2700_v43  ;;  %v337_v0 = vld [vmem:[%s11282_s0 + $0x970] sm:$0xff] }
 0x1d4   :  { %v9879_v60 = vpack.c.bf16 %v5249_v62, %v5245_v54  ;;  %v1704_v52 = vsel %vm1071_vm0, %v876_v41, 0.0  ;;  %v2701_v42 = vpack.c.bf16 %v2445_v61, %v2445_v61  ;;  %v2437_v50 = vmax.f32 %v2181_v55, 0.0  ;;  %v356_v54 = vld [vmem:[%s11282_s0 + $0xa08] sm:$0xff] }
 0x1d5   :  { %v1705_v15 = vadd.f32 %v1704_v52, %v875_v59  ;;  %v1672_v5 = vsel %vm1071_vm0, %v860_v34, 0.0  ;;  %v3228_v25 = vunpack.c.l.b16 %v2692_v6  ;;  %v2182_v28 = vadd.f32 %v8192_v31, %v9795_v2  ;;  %v357_v2 = vld [vmem:[%s11282_s0 + $0xa10] sm:$0xff] }
 0x1d6   :  { %v9876_v1 = vpop.xlane.xlu1 %1462  ;;  %11374 = vst [vmem:[#allocation15_spill] sm:$0xff] %v9879_v60  ;;  %v1673_v58 = vadd.f32 %v1672_v5, %v859_v57  ;;  %v2446_v49 = vmax.f32 %v2190_v26, 0.0  ;;  %v877_v17 = vmul.f32 %v6766_v10, %v353_v32  ;;  %v878_v14 = vmul.f32 %v6770_v11, %v354_v18 }
 0x1d7   :  { %v9891_v19 = vpop.xlane.xlu0 %1458  ;;  %1706 = vadd.xlane.f32.xlu1 %v1705_v15  ;;  %v861_v16 = vmul.f32 %v6766_v10, %v337_v0  ;;  %v4505_v23 = vsel %vm4428_vm2, %v3731_v45, %v3727_v36  ;;  %v4512_v43 = vsel %vm4428_vm2, %v3763_v35, %v3759_v13  ;;  %v3767_v7 = vrot.slane %v3236_v46, %v11334_v9  ;;  %v358_v45 = vld [vmem:[%s11282_s0 + $0xa18] sm:$0xff]  ;;  %v355_v36 = vld [vmem:[%s11282_s0 + $0xa00] sm:$0xff] }
 0x1d8   :  { %1674 = vadd.xlane.f32.xlu0 %v1673_v58  ;;  %v862_v51 = vmul.f32 %v6770_v11, %v338_v39  ;;  %v3237_v61 = vunpack.c.l.b16 %v2701_v42  ;;  %v2693_v55 = vpack.c.bf16 %v2437_v50, %v2437_v50  ;;  %v2438_v59 = vmax.f32 %v2182_v28, 0.0  ;;  %v373_v39 = vld [vmem:[%s11282_s0 + $0xa90] sm:$0xff] }
 0x1d9   :  { %v1708_v6 = vsel %vm1071_vm0, %v878_v14, 0.0  ;;  %v3735_v62 = vrot.slane %v3228_v25, %v11334_v9  ;;  %v2191_v57 = vadd.f32 %v8192_v31, %v9803_v44  ;;  %v2702_v34 = vpack.c.bf16 %v2446_v49, %v2446_v49 }
 0x1da   :  { %v9902_v40 = vpop.xlane.xlu1 %1494  ;;  %v1709_v41 = vadd.f32 %v1708_v6, %v877_v17  ;;  %v1676_v35 = vsel %vm1071_vm0, %v862_v51, 0.0  ;;  %v2183_v13 = vadd.f32 %v8192_v31, %v9814_v37  ;;  %v881_v46 = vmul.f32 %v6766_v10, %v357_v2  ;;  %v374_v17 = vld [vmem:[%s11282_s0 + $0xa98] sm:$0xff]  ;;  %v372_v51 = vld [vmem:[%s11282_s0 + $0xa88] sm:$0xff] }
 0x1db   :  { %v9911_v12 = vpop.xlane.xlu0 %1490  ;;  %v1677_v26 = vadd.f32 %v1676_v35, %v861_v16  ;;  %v4513_v32 = vsel %vm4430_vm3, %v3767_v7, %v4512_v43  ;;  %v882_v18 = vmul.f32 %v6770_v11, %v358_v45  ;;  %v879_v0 = vmul.f32 %v6766_v10, %v355_v36  ;;  %v371_v7 = vld [vmem:[%s11282_s0 + $0xa80] sm:$0xff] }
 0x1dc   :  { %1710 = vadd.xlane.f32.xlu1 %v1709_v41  ;;  %v880_v42 = vmul.f32 %v6770_v11, %v356_v54  ;;  %v3771_v44 = vrot.slane %v3237_v61, %v11334_v9  ;;  %v3229_v15 = vunpack.c.l.b16 %v2693_v55  ;;  %v2694_v5 = vpack.c.bf16 %v2438_v59, %v2438_v59 }
 0x1dd   :  { %1678 = vadd.xlane.f32.xlu0 %v1677_v26  ;;  %v2192_v37 = vadd.f32 %v8192_v31, %v9832_v30  ;;  %v2447_v25 = vmax.f32 %v2191_v57, 0.0  ;;  %v1716_v58 = vsel %vm1071_vm0, %v882_v18, 0.0  ;;  %v2184_v49 = vadd.f32 %v8192_v31, %v9837_v63  ;;  %v359_v18 = vld [vmem:[%s11282_s0 + $0xa20] sm:$0xff] }
 0x1de   :  { %v9930_v52 = vpop.xlane.xlu1 %1498  ;;  %v1712_v28 = vsel %vm1071_vm0, %v880_v42, 0.0  ;;  %v3238_v14 = vunpack.c.l.b16 %v2702_v34  ;;  %v2439_v16 = vmax.f32 %v2183_v13, 0.0  ;;  %v1717_v43 = vadd.f32 %v1716_v58, %v881_v46 }
 0x1df   :  { %v9936_v50 = vpop.xlane.xlu0 %1466  ;;  %v1713_v30 = vadd.f32 %v1712_v28, %v879_v0  ;;  %v4506_v63 = vsel %vm4430_vm3, %v3735_v62, %v4505_v23  ;;  %v2448_v61 = vmax.f32 %v2192_v37, 0.0  ;;  %v2440_v55 = vmax.f32 %v2184_v49, 0.0  ;;  %v375_v62 = vld [vmem:[%s11282_s0 + $0xaa0] sm:$0xff]  ;;  %v360_v37 = vld [vmem:[%s11282_s0 + $0xa28] sm:$0xff] }
 0x1e0   :  { %v897_v59 = vmul.f32 %v6766_v10, %v373_v39  ;;  %v4514_v45 = vsel %vm4432_vm4, %v3771_v44, %v4513_v32  ;;  %v3739_v36 = vrot.slane %v3229_v15, %v11334_v9  ;;  %1718 = vadd.xlane.f32.xlu1 %v1717_v43  ;;  %v898_v54 = vmul.f32 %v6770_v11, %v374_v17  ;;  %v376_v32 = vld [vmem:[%s11282_s0 + $0xaa8] sm:$0xff] }
 0x1e1   :  { %1714 = vadd.xlane.f32.xlu0 %v1713_v30  ;;  %v3230_v41 = vunpack.c.l.b16 %v2694_v5  ;;  %v2703_v35 = vpack.c.bf16 %v2447_v25, %v2447_v25  ;;  %v895_v57 = vmul.f32 %v6766_v10, %v371_v7  ;;  %v896_v23 = vmul.f32 %v6770_v11, %v372_v51 }
 0x1e2   :  { %v9957_v2 = vpop.xlane.xlu1 %1502  ;;  %v3775_v34 = vrot.slane %v3238_v14, %v11334_v9  ;;  %v2695_v26 = vpack.c.bf16 %v2439_v16, %v2439_v16  ;;  %v1748_v13 = vsel %vm1071_vm0, %v898_v54, 0.0  ;;  %v2193_v46 = vadd.f32 %v8192_v31, %v9854_v47 }
 0x1e3   :  { %v9961_v6 = vpop.xlane.xlu0 %1470  ;;  %v2704_v42 = vpack.c.bf16 %v2448_v61, %v2448_v61  ;;  %v2696_v44 = vpack.c.bf16 %v2440_v55, %v2440_v55  ;;  %v1749_v15 = vadd.f32 %v1748_v13, %v897_v59  ;;  %v1744_v5 = vsel %vm1071_vm0, %v896_v23, 0.0 }
 0x1e4   :  { %v1745_v39 = vadd.f32 %v1744_v5, %v895_v57  ;;  %v2449_v25 = vmax.f32 %v2193_v46, 0.0  ;;  %v2185_v58 = vadd.f32 %v8192_v31, %v9864_v56  ;;  %v899_v28 = vmul.f32 %v6766_v10, %v375_v62  ;;  %v377_v56 = vld [vmem:[%s11282_s0 + $0xab0] sm:$0xff]  ;;  %v379_v5 = vld [vmem:[%s11282_s0 + $0xac0] sm:$0xff] }
 0x1e5   :  { %v3743_v49 = vrot.slane %v3230_v41, %v11334_v9  ;;  %v3239_v17 = vunpack.c.l.b16 %v2703_v35  ;;  %1750 = vadd.xlane.f32.xlu1 %v1749_v15  ;;  %v900_v14 = vmul.f32 %v6770_v11, %v376_v32  ;;  %v883_v16 = vmul.f32 %v6766_v10, %v359_v18 }
 0x1e6   :  { %v9981_v0 = vpop.xlane.xlu1 %1506  ;;  %v4507_v43 = vsel %vm4432_vm4, %v3739_v36, %v4506_v63  ;;  %v4515_v30 = vsel %vm4434_vm5, %v3775_v34, %v4514_v45  ;;  %1746 = vadd.xlane.f32.xlu0 %v1745_v39  ;;  %v2441_v7 = vmax.f32 %v2185_v58, 0.0  ;;  %v884_v51 = vmul.f32 %v6770_v11, %v360_v37  ;;  %v378_v63 = vld [vmem:[%s11282_s0 + $0xab8] sm:$0xff]  ;;  %v361_v45 = vld [vmem:[%s11282_s0 + $0xa30] sm:$0xff] }
 0x1e7   :  { %v9987_v47 = vpop.xlane.xlu0 %1474  ;;  %v3231_v55 = vunpack.c.l.b16 %v2695_v26  ;;  %v3240_v59 = vunpack.c.l.b16 %v2704_v42  ;;  %v2705_v54 = vpack.c.bf16 %v2449_v25, %v2449_v25  ;;  %v1752_v41 = vsel %vm1071_vm0, %v900_v14, 0.0  ;;  %v362_v34 = vld [vmem:[%s11282_s0 + $0xa38] sm:$0xff] }
 0x1e8   :  { %v3232_v35 = vunpack.c.l.b16 %v2696_v44  ;;  %v2697_v57 = vpack.c.bf16 %v2441_v7, %v2441_v7  ;;  %v1753_v23 = vadd.f32 %v1752_v41, %v899_v28  ;;  %v1720_v62 = vsel %vm1071_vm0, %v884_v51, 0.0  ;;  %v364_v7 = vld [vmem:[%s11282_s0 + $0xa48] sm:$0xff] }
 0x1e9   :  { %v4508_v26 = vsel %vm4434_vm5, %v3743_v49, %v4507_v43  ;;  %v3779_v13 = vrot.slane %v3239_v17, %v11334_v9  ;;  %v1721_v46 = vadd.f32 %v1720_v62, %v883_v16  ;;  %v901_v32 = vmul.f32 %v6766_v10, %v377_v56  ;;  %v363_v43 = vld [vmem:[%s11282_s0 + $0xa40] sm:$0xff] }
 0x1ea   :  { %v10001_v61 = vpop.xlane.xlu1 %1510  ;;  %1754 = vadd.xlane.f32.xlu1 %v1753_v23  ;;  %v2195_v18 = vadd.f32 %v8192_v31, %v9876_v1  ;;  %v2194_v42 = vadd.f32 %v8192_v31, %v9891_v19  ;;  %v902_v44 = vmul.f32 %v6770_v11, %v378_v63  ;;  %v885_v15 = vmul.f32 %v6766_v10, %v361_v45  ;;  %v380_v19 = vld [vmem:[%s11282_s0 + $0xac8] sm:$0xff] }
 0x1eb   :  { %v10010_v36 = vpop.xlane.xlu0 %1478  ;;  %v3747_v39 = vrot.slane %v3231_v55, %v11334_v9  ;;  %v3241_v25 = vunpack.c.l.b16 %v2705_v54  ;;  %v3233_v58 = vunpack.c.l.b16 %v2697_v57  ;;  %1722 = vadd.xlane.f32.xlu0 %v1721_v46  ;;  %v886_v1 = vmul.f32 %v6770_v11, %v362_v34 }
 0x1ec   :  { %v3783_v49 = vrot.slane %v3240_v59, %v11334_v9  ;;  %v3751_v17 = vrot.slane %v3232_v35, %v11334_v9  ;;  %v1756_v14 = vsel %vm1071_vm0, %v902_v44, 0.0  ;;  %v2203_v16 = vadd.f32 %v8192_v31, %v9902_v40 }
 0x1ed   :  { %v1757_v51 = vadd.f32 %v1756_v14, %v901_v32  ;;  %v1724_v56 = vsel %vm1071_vm0, %v886_v1, 0.0  ;;  %v2202_v55 = vadd.f32 %v8192_v31, %v9911_v12  ;;  %v903_v59 = vmul.f32 %v6766_v10, %v379_v5 }
 0x1ee   :  { %v10028_v37 = vpop.xlane.xlu1 %1514  ;;  %v2451_v54 = vmax.f32 %v2195_v18, 0.0  ;;  %v2450_v41 = vmax.f32 %v2194_v42, 0.0  ;;  %v1725_v63 = vadd.f32 %v1724_v56, %v885_v15  ;;  %v904_v40 = vmul.f32 %v6770_v11, %v380_v19  ;;  %v366_v19 = vld [vmem:[%s11282_s0 + $0xa58] sm:$0xff] }
 0x1ef   :  { %v10035_v28 = vpop.xlane.xlu0 %1482  ;;  %v3787_v35 = vrot.slane %v3241_v25, %v11334_v9  ;;  %v3755_v57 = vrot.slane %v3233_v58, %v11334_v9  ;;  %1758 = vadd.xlane.f32.xlu1 %v1757_v51  ;;  %v887_v23 = vmul.f32 %v6766_v10, %v363_v43  ;;  %v888_v62 = vmul.f32 %v6770_v11, %v364_v7  ;;  %v381_v25 = vld [vmem:[%s11282_s0 + $0xad0] sm:$0xff] }
 0x1f0   :  { %v4516_v12 = vsel %vm4436_vm6, %v3779_v13, %v4515_v30  ;;  %v4509_v46 = vsel %vm4436_vm6, %v3747_v39, %v4508_v26  ;;  %1726 = vadd.xlane.f32.xlu0 %v1725_v63  ;;  %v2459_v32 = vmax.f32 %v2203_v16, 0.0  ;;  %v1760_v18 = vsel %vm1071_vm0, %v904_v40, 0.0  ;;  %v382_v13 = vld [vmem:[%s11282_s0 + $0xad8] sm:$0xff]  ;;  %v365_v39 = vld [vmem:[%s11282_s0 + $0xa50] sm:$0xff]  ;;  %v10096_v63 = vpop.f32.mrf.mxu1 }
 0x1f1   :  { %v4517_v42 = vsel %vm4438_vm7, %v3783_v49, %v4516_v12  ;;  %v2458_v44 = vmax.f32 %v2202_v55, 0.0  ;;  %v1761_v15 = vadd.f32 %v1760_v18, %v903_v59  ;;  %v1728_v5 = vsel %vm1071_vm0, %v888_v62, 0.0 }
 0x1f2   :  { %v10053_v45 = vpop.xlane.xlu1 %1518  ;;  %v4510_v58 = vsel %vm4438_vm7, %v3751_v17, %v4509_v46  ;;  %v2707_v1 = vpack.c.bf16 %v2451_v54, %v2451_v54  ;;  %v10070_v30 = vpack.c.bf16 %v2450_v41, %v2450_v41  ;;  %v1729_v26 = vadd.f32 %v1728_v5, %v887_v23  ;;  %v367_v23 = vld [vmem:[%s11282_s0 + $0xa60] sm:$0xff] }
 0x1f3   :  { %v10059_v34 = vpop.xlane.xlu0 %1486  ;;  %1762 = vadd.xlane.f32.xlu1 %v1761_v15  ;;  %v2204_v17 = vadd.f32 %v8192_v31, %v9930_v52  ;;  %v4511_v14 = vsel %vm4440_vm8, %v3755_v57, %v4510_v58  ;;  %v4518_v16 = vsel %vm4440_vm8, %v3787_v35, %v4517_v42  ;;  %v2715_v7 = vpack.c.bf16 %v2459_v32, %v2459_v32  ;;  %v383_v52 = vld [vmem:[%s11282_s0 + $0xae0] sm:$0xff]  ;;  %v384_v57 = vld [vmem:[%s11282_s0 + $0xae8] sm:$0xff]  ;;  %v4931_v58 = vpop.f32.mrf.mxu1 }
 0x1f4   :  { %1730 = vadd.xlane.f32.xlu0 %v1729_v26  ;;  %v4664_v51 = vpack.c.b16 %v4518_v16, %v4511_v14  ;;  %v905_v56 = vmul.f32 %v6766_v10, %v381_v25  ;;  %v2714_v55 = vpack.c.bf16 %v2458_v44, %v2458_v44  ;;  %v906_v59 = vmul.f32 %v6770_v11, %v382_v13  ;;  %v368_v42 = vld [vmem:[%s11282_s0 + $0xa68] sm:$0xff] }
 0x1f5   :  { %v889_v54 = vmul.f32 %v6766_v10, %v365_v39  ;;  %v890_v41 = vmul.f32 %v6770_v11, %v366_v19  ;;  %v3243_v40 = vunpack.c.l.b16 %v2707_v1  ;;  %v3242_v35 = vunpack.c.l.b16 %v10070_v30 }
 0x1f6   :  { %v10081_v49 = vpop.xlane.xlu1 %1526  ;;  %6248 = vmatmul.mubr.msk.bf16.gmra.mxu0 %vm4685_vm9, %v4664_v51  ;;  %6265 = vmatmul.mubr.msk.bf16.gmra.mxu1 %vm4685_vm9, %v4664_v51  ;;  %v2460_v12 = vmax.f32 %v2204_v17, 0.0  ;;  %v2196_v46 = vadd.f32 %v8192_v31, %v9936_v50  ;;  %v1764_v32 = vsel %vm1071_vm0, %v906_v59, 0.0  ;;  %v2205_v25 = vadd.f32 %v8192_v31, %v9957_v2  ;;  %v385_v51 = vld [vmem:[%s11282_s0 + $0xaf0] sm:$0xff] }
 0x1f7   :  { %v10087_v43 = vpop.xlane.xlu0 %1522  ;;  %v1732_v18 = vsel %vm1071_vm0, %v890_v41, 0.0  ;;  %4839 = vmatprep.mubr.bf16.mxu0 %v11341_v4  ;;  %5032 = vmatprep.mubr.bf16.mxu1 %v11341_v4  ;;  %v1765_v15 = vadd.f32 %v1764_v32, %v905_v56  ;;  %v907_v50 = vmul.f32 %v6766_v10, %v383_v52  ;;  %v3251_v1 = vunpack.c.l.b16 %v2715_v7  ;;  %v369_v52 = vld [vmem:[%s11282_s0 + $0xa70] sm:$0xff] }
 0x1f8   :  { %v1733_v5 = vadd.f32 %v1732_v18, %v889_v54  ;;  %v3250_v30 = vunpack.c.l.b16 %v2714_v55  ;;  %v908_v26 = vmul.f32 %v6770_v11, %v384_v57  ;;  %v891_v13 = vmul.f32 %v6766_v10, %v367_v23 }
 0x1f9   :  { %1766 = vadd.xlane.f32.xlu1 %v1765_v15  ;;  %v2197_v39 = vadd.f32 %v8192_v31, %v9961_v6  ;;  %v892_v19 = vmul.f32 %v6770_v11, %v368_v42  ;;  %v3795_v2 = vrot.slane %v3243_v40, %v11334_v9  ;;  %v2452_v14 = vmax.f32 %v2196_v46, 0.0  ;;  %v386_v6 = vld [vmem:[%s11282_s0 + $0xaf8] sm:$0xff] }
 0x1fa   :  { %v10107_v62 = vpop.xlane.xlu1 %1558  ;;  %1734 = vadd.xlane.f32.xlu0 %v1733_v5  ;;  %v1768_v16 = vsel %vm1071_vm0, %v908_v26, 0.0  ;;  %v2206_v7 = vadd.f32 %v8192_v31, %v9981_v0  ;;  %v2716_v55 = vpack.c.bf16 %v2460_v12, %v2460_v12  ;;  %v2461_v59 = vmax.f32 %v2205_v25, 0.0  ;;  %v10146_v0 = vpop.f32.mrf.mxu1  ;;  %v370_v12 = vld [vmem:[%s11282_s0 + $0xa78] sm:$0xff] }
 0x1fb   :  { %v10116_v44 = vpop.xlane.xlu0 %1554  ;;  %v1769_v54 = vadd.f32 %v1768_v16, %v907_v50  ;;  %v1736_v41 = vsel %vm1071_vm0, %v892_v19, 0.0  ;;  %11375 = vst [vmem:[#allocation16_spill] sm:$0xff] %v10146_v0  ;;  %v3791_v40 = vrot.slane %v3242_v35, %v11334_v9  ;;  %v3827_v57 = vrot.slane %v3251_v1, %v11334_v9 }
 0x1fc   :  { %v3823_v23 = vrot.slane %v3250_v30, %v11334_v9  ;;  %v1737_v46 = vadd.f32 %v1736_v41, %v891_v13  ;;  %v2453_v32 = vmax.f32 %v2197_v39, 0.0  ;;  %v2198_v18 = vadd.f32 %v8192_v31, %v9987_v47  ;;  %v4935_v47 = vpop.f32.mrf.mxu1 }
 0x1fd   :  { %1770 = vadd.xlane.f32.xlu1 %v1769_v54  ;;  %v909_v42 = vmul.f32 %v6766_v10, %v385_v51  ;;  %v910_v15 = vmul.f32 %v6770_v11, %v386_v6  ;;  %v2708_v35 = vpack.c.bf16 %v2452_v14, %v2452_v14  ;;  %v2462_v25 = vmax.f32 %v2206_v7, 0.0  ;;  %v389_v14 = vld [vmem:[%s11282_s0 + $0xb10] sm:$0xff]  ;;  %v390_v54 = vld [vmem:[%s11282_s0 + $0xb18] sm:$0xff] }
 0x1fe   :  { %v10128_v17 = vpop.xlane.xlu1 %1562  ;;  %1738 = vadd.xlane.f32.xlu0 %v1737_v46  ;;  %v893_v50 = vmul.f32 %v6766_v10, %v369_v52  ;;  %v3252_v30 = vunpack.c.l.b16 %v2716_v55  ;;  %v2717_v26 = vpack.c.bf16 %v2461_v59, %v2461_v59  ;;  %v894_v39 = vmul.f32 %v6770_v11, %v370_v12 }
 0x1ff   :  { %v10140_v56 = vpop.xlane.xlu0 %1530  ;;  %v1772_v13 = vsel %vm1071_vm0, %v910_v15, 0.0  ;;  %v10166_v19 = vsel %vm4428_vm2, %v3795_v2, %v3791_v40  ;;  %v4932_v16 = vadd.f32 %v4931_v58, %v9332_v8  ;;  %v4526_v7 = vsel %vm4428_vm2, %v3827_v57, %v3823_v23  ;;  %v387_v57 = vld [vmem:[%s11282_s0 + $0xb00] sm:$0xff]  ;;  %v388_v23 = vld [vmem:[%s11282_s0 + $0xb08] sm:$0xff] }
 0x200   :  { %v1773_v51 = vadd.f32 %v1772_v13, %v909_v42  ;;  %v2709_v6 = vpack.c.bf16 %v2453_v32, %v2453_v32  ;;  %v2454_v55 = vmax.f32 %v2198_v18, 0.0  ;;  %v1740_v59 = vsel %vm1071_vm0, %v894_v39, 0.0 }
 0x201   :  { %v3244_v2 = vunpack.c.l.b16 %v2708_v35  ;;  %v2718_v52 = vpack.c.bf16 %v2462_v25, %v2462_v25  ;;  %v1741_v58 = vadd.f32 %v1740_v59, %v893_v50  ;;  %v4936_v40 = vadd.f32 %v4935_v47, %v9332_v8 }
 0x202   :  { %v10158_v5 = vpop.xlane.xlu1 %1566  ;;  %1774 = vadd.xlane.f32.xlu1 %v1773_v51  ;;  %v3831_v12 = vrot.slane %v3252_v30, %v11334_v9  ;;  %v3253_v32 = vunpack.c.l.b16 %v2717_v26  ;;  %v2207_v18 = vadd.f32 %v8192_v31, %v10001_v61  ;;  %v913_v42 = vmul.f32 %v6766_v10, %v389_v14 }
 0x203   :  { %v10161_v1 = vpop.xlane.xlu0 %1534  ;;  %v5253_v15 = vmax.f32 %v4932_v16, 0.0  ;;  %1742 = vadd.xlane.f32.xlu0 %v1741_v58  ;;  %v2199_v35 = vadd.f32 %v8192_v31, %v10010_v36  ;;  %v5257_v25 = vmax.f32 %v4936_v40, 0.0  ;;  %v914_v50 = vmul.f32 %v6770_v11, %v390_v54  ;;  %v405_v36 = vld [vmem:[%s11282_s0 + $0xb90] sm:$0xff] }
 0x204   :  { %v3245_v13 = vunpack.c.l.b16 %v2709_v6  ;;  %v2710_v39 = vpack.c.bf16 %v2454_v55, %v2454_v55  ;;  %v911_v47 = vmul.f32 %v6766_v10, %v387_v57  ;;  %v912_v30 = vmul.f32 %v6770_v11, %v388_v23  ;;  %v406_v6 = vld [vmem:[%s11282_s0 + $0xb98] sm:$0xff] }
 0x205   :  { %v3254_v51 = vunpack.c.l.b16 %v2718_v52  ;;  %v10199_v61 = vpack.c.bf16 %v5257_v25, %v5253_v15  ;;  %v1780_v16 = vsel %vm1071_vm0, %v914_v50, 0.0  ;;  %v2208_v14 = vadd.f32 %v8192_v31, %v10028_v37  ;;  %v403_v37 = vld [vmem:[%s11282_s0 + $0xb80] sm:$0xff]  ;;  %v404_v25 = vld [vmem:[%s11282_s0 + $0xb88] sm:$0xff] }
 0x206   :  { %v10177_v41 = vpop.xlane.xlu1 %1570  ;;  %v3799_v59 = vrot.slane %v3244_v2, %v11334_v9  ;;  %v2463_v54 = vmax.f32 %v2207_v18, 0.0  ;;  %v1781_v52 = vadd.f32 %v1780_v16, %v913_v42  ;;  %v1776_v58 = vsel %vm1071_vm0, %v912_v30, 0.0 }
 0x207   :  { %v10186_v46 = vpop.xlane.xlu0 %1538  ;;  %11376 = vst [vmem:[#allocation17_spill] sm:$0xff] %v10199_v61  ;;  %v4527_v40 = vsel %vm4430_vm3, %v3831_v12, %v4526_v7  ;;  %v2455_v57 = vmax.f32 %v2199_v35, 0.0  ;;  %v1777_v23 = vadd.f32 %v1776_v58, %v911_v47  ;;  %v2200_v15 = vadd.f32 %v8192_v31, %v10035_v28 }
 0x208   :  { %v3835_v2 = vrot.slane %v3253_v32, %v11334_v9  ;;  %v3803_v18 = vrot.slane %v3245_v13, %v11334_v9  ;;  %1782 = vadd.xlane.f32.xlu1 %v1781_v52  ;;  %v929_v42 = vmul.f32 %v6766_v10, %v405_v36  ;;  %v930_v50 = vmul.f32 %v6770_v11, %v406_v6  ;;  %v407_v32 = vld [vmem:[%s11282_s0 + $0xba0] sm:$0xff]  ;;  %v408_v13 = vld [vmem:[%s11282_s0 + $0xba8] sm:$0xff] }
 0x209   :  { %v3839_v7 = vrot.slane %v3254_v51, %v11334_v9  ;;  %v3246_v12 = vunpack.c.l.b16 %v2710_v39  ;;  %1778 = vadd.xlane.f32.xlu0 %v1777_v23  ;;  %v2464_v28 = vmax.f32 %v2208_v14, 0.0  ;;  %v927_v35 = vmul.f32 %v6766_v10, %v403_v37  ;;  %v391_v37 = vld [vmem:[%s11282_s0 + $0xb20] sm:$0xff] }
 0x20a   :  { %v2719_v16 = vpack.c.bf16 %v2463_v54, %v2463_v54  ;;  %v1812_v36 = vsel %vm1071_vm0, %v930_v50, 0.0  ;;  %v928_v51 = vmul.f32 %v6770_v11, %v404_v25  ;;  %v2209_v39 = vadd.f32 %v8192_v31, %v10053_v45  ;;  %v392_v54 = vld [vmem:[%s11282_s0 + $0xb28] sm:$0xff] }
 0x20b   :  { %v10197_v26 = vpop.xlane.xlu1 %1574  ;;  %v10210_v55 = vpop.xlane.xlu0 %1542  ;;  %v2711_v14 = vpack.c.bf16 %v2455_v57, %v2455_v57  ;;  %v2456_v6 = vmax.f32 %v2200_v15, 0.0  ;;  %v1813_v52 = vadd.f32 %v1812_v36, %v929_v42  ;;  %v2201_v58 = vadd.f32 %v8192_v31, %v10059_v34 }
 0x20c   :  { %v1808_v23 = vsel %vm1071_vm0, %v928_v51, 0.0  ;;  %v2465_v25 = vmax.f32 %v2209_v39, 0.0  ;;  %v931_v50 = vmul.f32 %v6766_v10, %v407_v32  ;;  %v932_v45 = vmul.f32 %v6770_v11, %v408_v13  ;;  %v409_v32 = vld [vmem:[%s11282_s0 + $0xbb0] sm:$0xff] }
 0x20d   :  { %v3807_v15 = vrot.slane %v3246_v12, %v11334_v9  ;;  %v2720_v34 = vpack.c.bf16 %v2464_v28, %v2464_v28  ;;  %1814 = vadd.xlane.f32.xlu1 %v1813_v52  ;;  %v1809_v42 = vadd.f32 %v1808_v23, %v927_v35  ;;  %v2457_v36 = vmax.f32 %v2201_v58, 0.0  ;;  %v393_v23 = vld [vmem:[%s11282_s0 + $0xb30] sm:$0xff] }
 0x20e   :  { %v3255_v60 = vunpack.c.l.b16 %v2719_v16  ;;  %v1816_v0 = vsel %vm1071_vm0, %v932_v45, 0.0  ;;  %v915_v51 = vmul.f32 %v6766_v10, %v391_v37  ;;  %v916_v39 = vmul.f32 %v6770_v11, %v392_v54  ;;  %v410_v16 = vld [vmem:[%s11282_s0 + $0xbb8] sm:$0xff] }
 0x20f   :  { %v10227_v30 = vpop.xlane.xlu1 %1578  ;;  %v10237_v47 = vpop.xlane.xlu0 %1546  ;;  %v4520_v12 = vsel %vm4430_vm3, %v3799_v59, %v10166_v19  ;;  %v3247_v28 = vunpack.c.l.b16 %v2711_v14  ;;  %v2712_v13 = vpack.c.bf16 %v2456_v6, %v2456_v6  ;;  %1810 = vadd.xlane.f32.xlu0 %v1809_v42  ;;  %v1817_v35 = vadd.f32 %v1816_v0, %v931_v50  ;;  %v394_v19 = vld [vmem:[%s11282_s0 + $0xb38] sm:$0xff] }
 0x210   :  { %v4528_v52 = vsel %vm4432_vm4, %v3835_v2, %v4527_v40  ;;  %v2721_v58 = vpack.c.bf16 %v2465_v25, %v2465_v25  ;;  %v2713_v37 = vpack.c.bf16 %v2457_v36, %v2457_v36  ;;  %v1784_v54 = vsel %vm1071_vm0, %v916_v39, 0.0 }
 0x211   :  { %v4521_v0 = vsel %vm4432_vm4, %v3803_v18, %v4520_v12  ;;  %v3256_v14 = vunpack.c.l.b16 %v2720_v34  ;;  %1818 = vadd.xlane.f32.xlu1 %v1817_v35  ;;  %v1785_v6 = vadd.f32 %v1784_v54, %v915_v51  ;;  %v933_v40 = vmul.f32 %v6766_v10, %v409_v32  ;;  %v411_v51 = vld [vmem:[%s11282_s0 + $0xbc0] sm:$0xff]  ;;  %v412_v12 = vld [vmem:[%s11282_s0 + $0xbc8] sm:$0xff] }
 0x212   :  { %v4529_v25 = vsel %vm4434_vm5, %v3839_v7, %v4528_v52  ;;  %v4522_v50 = vsel %vm4434_vm5, %v3807_v15, %v4521_v0  ;;  %v3843_v45 = vrot.slane %v3255_v60, %v11334_v9  ;;  %v934_v42 = vmul.f32 %v6770_v11, %v410_v16 }
 0x213   :  { %v10254_v57 = vpop.xlane.xlu1 %1582  ;;  %v10257_v61 = vpop.xlane.xlu0 %1550  ;;  %v3811_v36 = vrot.slane %v3247_v28, %v11334_v9  ;;  %v3248_v39 = vunpack.c.l.b16 %v2712_v13  ;;  %1786 = vadd.xlane.f32.xlu0 %v1785_v6  ;;  %v917_v18 = vmul.f32 %v6766_v10, %v393_v23  ;;  %v918_v34 = vmul.f32 %v6770_v11, %v394_v19  ;;  %v395_v28 = vld [vmem:[%s11282_s0 + $0xb40] sm:$0xff]  ;;  %v396_v13 = vld [vmem:[%s11282_s0 + $0xb48] sm:$0xff] }
 0x214   :  { %v3257_v32 = vunpack.c.l.b16 %v2721_v58  ;;  %v3249_v7 = vunpack.c.l.b16 %v2713_v37  ;;  %v2211_v15 = vadd.f32 %v8192_v31, %v10081_v49  ;;  %v1820_v60 = vsel %vm1071_vm0, %v934_v42, 0.0 }
 0x215   :  { %v3847_v16 = vrot.slane %v3256_v14, %v11334_v9  ;;  %v2210_v49 = vadd.f32 %v8192_v31, %v10087_v43  ;;  %v1821_v52 = vadd.f32 %v1820_v60, %v933_v40  ;;  %v1788_v58 = vsel %vm1071_vm0, %v918_v34, 0.0 }
 0x216   :  { %v1789_v54 = vadd.f32 %v1788_v58, %v917_v18  ;;  %v2219_v23 = vadd.f32 %v8192_v31, %v10107_v62  ;;  %v2218_v19 = vadd.f32 %v8192_v31, %v10116_v44  ;;  %v935_v0 = vmul.f32 %v6766_v10, %v411_v51 }
 0x217   :  { %v10278_v59 = vpop.xlane.xlu1 %1590  ;;  %v10282_v2 = vpop.xlane.xlu0 %1586  ;;  %v3815_v6 = vrot.slane %v3248_v39, %v11334_v9  ;;  %1822 = vadd.xlane.f32.xlu1 %v1821_v52  ;;  %v936_v14 = vmul.f32 %v6770_v11, %v412_v12  ;;  %v919_v43 = vmul.f32 %v6766_v10, %v395_v28  ;;  %v920_v40 = vmul.f32 %v6770_v11, %v396_v13 }
 0x218   :  { %v4530_v42 = vsel %vm4436_vm6, %v3843_v45, %v4529_v25  ;;  %v3851_v18 = vrot.slane %v3257_v32, %v11334_v9  ;;  %v3819_v62 = vrot.slane %v3249_v7, %v11334_v9  ;;  %v2467_v34 = vmax.f32 %v2211_v15, 0.0  ;;  %1790 = vadd.xlane.f32.xlu0 %v1789_v54  ;;  %v398_v54 = vld [vmem:[%s11282_s0 + $0xb58] sm:$0xff] }
 0x219   :  { %v4523_v44 = vsel %vm4436_vm6, %v3811_v36, %v4522_v50  ;;  %v2466_v51 = vmax.f32 %v2210_v49, 0.0  ;;  %v1824_v39 = vsel %vm1071_vm0, %v936_v14, 0.0  ;;  %v1792_v60 = vsel %vm1071_vm0, %v920_v40, 0.0  ;;  %v413_v50 = vld [vmem:[%s11282_s0 + $0xbd0] sm:$0xff]  ;;  %v414_v36 = vld [vmem:[%s11282_s0 + $0xbd8] sm:$0xff] }
 0x21a   :  { %v2475_v12 = vmax.f32 %v2219_v23, 0.0  ;;  %v2474_v52 = vmax.f32 %v2218_v19, 0.0  ;;  %v1825_v28 = vadd.f32 %v1824_v39, %v935_v0  ;;  %v1793_v58 = vadd.f32 %v1792_v60, %v919_v43 }
 0x21b   :  { %v10306_v35 = vpop.xlane.xlu1 %1622  ;;  %v10312_v37 = vpop.xlane.xlu0 %1618  ;;  %v4531_v25 = vsel %vm4438_vm7, %v3847_v16, %v4530_v42  ;;  %v4524_v45 = vsel %vm4438_vm7, %v3815_v6, %v4523_v44  ;;  %v2220_v32 = vadd.f32 %v8192_v31, %v10128_v17  ;;  %v2723_v15 = vpack.c.bf16 %v2467_v34, %v2467_v34  ;;  %v397_v17 = vld [vmem:[%s11282_s0 + $0xb50] sm:$0xff] }
 0x21c   :  { %1826 = vadd.xlane.f32.xlu1 %v1825_v28  ;;  %1794 = vadd.xlane.f32.xlu0 %v1793_v58  ;;  %v4525_v16 = vsel %vm4440_vm8, %v3819_v62, %v4524_v45  ;;  %v4532_v49 = vsel %vm4440_vm8, %v3851_v18, %v4531_v25  ;;  %v2722_v23 = vpack.c.bf16 %v2466_v51, %v2466_v51 }
 0x21d   :  { %v2212_v19 = vadd.f32 %v8192_v31, %v10140_v56  ;;  %v4665_v0 = vpack.c.b16 %v4532_v49, %v4525_v16  ;;  %v2731_v6 = vpack.c.bf16 %v2475_v12, %v2475_v12  ;;  %v2730_v14 = vpack.c.bf16 %v2474_v52, %v2474_v52  ;;  %v415_v52 = vld [vmem:[%s11282_s0 + $0xbe0] sm:$0xff]  ;;  %v400_v16 = vld [vmem:[%s11282_s0 + $0xb68] sm:$0xff] }
 0x21e   :  { %v937_v43 = vmul.f32 %v6766_v10, %v413_v50  ;;  %v938_v40 = vmul.f32 %v6770_v11, %v414_v36  ;;  %v2476_v42 = vmax.f32 %v2220_v32, 0.0  ;;  %v921_v18 = vmul.f32 %v6766_v10, %v397_v17  ;;  %v416_v32 = vld [vmem:[%s11282_s0 + $0xbe8] sm:$0xff] }
 0x21f   :  { %v10329_v13 = vpop.xlane.xlu1 %1626  ;;  %v10341_v7 = vpop.xlane.xlu0 %1594  ;;  %6249 = vmatmul.mubr.msk.bf16.gmra.mxu0 %vm4685_vm9, %v4665_v0  ;;  %6266 = vmatmul.mubr.msk.bf16.gmra.mxu1 %vm4685_vm9, %v4665_v0  ;;  %v922_v62 = vmul.f32 %v6770_v11, %v398_v54  ;;  %v3259_v34 = vunpack.c.l.b16 %v2723_v15  ;;  %v3258_v51 = vunpack.c.l.b16 %v2722_v23  ;;  %v2468_v39 = vmax.f32 %v2212_v19, 0.0  ;;  %v399_v15 = vld [vmem:[%s11282_s0 + $0xb60] sm:$0xff] }
 0x220   :  { %v1828_v44 = vsel %vm1071_vm0, %v938_v40, 0.0  ;;  %4849 = vmatprep.mubr.bf16.mxu0 %v11341_v4  ;;  %5042 = vmatprep.mubr.bf16.mxu1 %v11341_v4  ;;  %v3267_v58 = vunpack.c.l.b16 %v2731_v6  ;;  %v3266_v25 = vunpack.c.l.b16 %v2730_v14  ;;  %v2732_v50 = vpack.c.bf16 %v2476_v42, %v2476_v42 }
 0x221   :  { %v1829_v60 = vadd.f32 %v1828_v44, %v937_v43  ;;  %v1796_v12 = vsel %vm1071_vm0, %v922_v62, 0.0  ;;  %v2221_v36 = vadd.f32 %v8192_v31, %v10158_v5  ;;  %v2213_v49 = vadd.f32 %v8192_v31, %v10161_v1 }
 0x222   :  { %v1797_v45 = vadd.f32 %v1796_v12, %v921_v18  ;;  %v939_v17 = vmul.f32 %v6766_v10, %v415_v52  ;;  %v3859_v54 = vrot.slane %v3259_v34, %v11334_v9  ;;  %v3855_v23 = vrot.slane %v3258_v51, %v11334_v9 }
 0x223   :  { %v10362_v56 = vpop.xlane.xlu1 %1630  ;;  %1830 = vadd.xlane.f32.xlu1 %v1829_v60  ;;  %v2724_v19 = vpack.c.bf16 %v2468_v39, %v2468_v39  ;;  %v940_v5 = vmul.f32 %v6770_v11, %v416_v32  ;;  %v3891_v0 = vrot.slane %v3267_v58, %v11334_v9  ;;  %v3887_v6 = vrot.slane %v3266_v25, %v11334_v9  ;;  %v417_v39 = vld [vmem:[%s11282_s0 + $0xbf0] sm:$0xff]  ;;  %v418_v58 = vld [vmem:[%s11282_s0 + $0xbf8] sm:$0xff] }
 0x224   :  { %1798 = vadd.xlane.f32.xlu0 %v1797_v45  ;;  %v923_v14 = vmul.f32 %v6766_v10, %v399_v15  ;;  %v924_v43 = vmul.f32 %v6770_v11, %v400_v16  ;;  %v3268_v1 = vunpack.c.l.b16 %v2732_v50  ;;  %v2477_v42 = vmax.f32 %v2221_v36, 0.0  ;;  %v402_v50 = vld [vmem:[%s11282_s0 + $0xb78] sm:$0xff] }
 0x225   :  { %v1832_v18 = vsel %vm1071_vm0, %v940_v5, 0.0  ;;  %v2222_v62 = vadd.f32 %v8192_v31, %v10177_v41  ;;  %v2469_v44 = vmax.f32 %v2213_v49, 0.0  ;;  %v3260_v60 = vunpack.c.l.b16 %v2724_v19  ;;  %v401_v41 = vld [vmem:[%s11282_s0 + $0xb70] sm:$0xff] }
 0x226   :  { %v10368_v28 = vpop.xlane.xlu0 %1598  ;;  %v1833_v51 = vadd.f32 %v1832_v18, %v939_v17  ;;  %v1800_v12 = vsel %vm1071_vm0, %v924_v43, 0.0  ;;  %v10409_v25 = vsel %vm4428_vm2, %v3859_v54, %v3855_v23  ;;  %v2214_v32 = vadd.f32 %v8192_v31, %v10186_v46 }
 0x227   :  { %v2478_v52 = vmax.f32 %v2222_v62, 0.0  ;;  %v1801_v45 = vadd.f32 %v1800_v12, %v923_v14  ;;  %v4540_v36 = vsel %vm4428_vm2, %v3891_v0, %v3887_v6  ;;  %v3895_v15 = vrot.slane %v3268_v1, %v11334_v9 }
 0x228   :  { %1834 = vadd.xlane.f32.xlu1 %v1833_v51  ;;  %v2733_v16 = vpack.c.bf16 %v2477_v42, %v2477_v42  ;;  %v941_v49 = vmul.f32 %v6766_v10, %v417_v39  ;;  %v2725_v17 = vpack.c.bf16 %v2469_v44, %v2469_v44  ;;  %v2470_v54 = vmax.f32 %v2214_v32, 0.0 }
 0x229   :  { %1802 = vadd.xlane.f32.xlu0 %v1801_v45  ;;  %v942_v23 = vmul.f32 %v6770_v11, %v418_v58  ;;  %v925_v19 = vmul.f32 %v6766_v10, %v401_v41  ;;  %v3863_v46 = vrot.slane %v3260_v60, %v11334_v9  ;;  %v2734_v14 = vpack.c.bf16 %v2478_v52, %v2478_v52 }
 0x22a   :  { %v10391_v40 = vpop.xlane.xlu1 %1634  ;;  %v926_v43 = vmul.f32 %v6770_v11, %v402_v50  ;;  %v2223_v0 = vadd.f32 %v8192_v31, %v10197_v26  ;;  %v2726_v1 = vpack.c.bf16 %v2470_v54, %v2470_v54  ;;  %v2215_v18 = vadd.f32 %v8192_v31, %v10210_v55  ;;  %v6624_v11 = vld [vmem:[%s11287_s5 + $0x78] sm:$0xff]  }
 0x22b   :  { %v10396_v34 = vpop.xlane.xlu0 %1602  ;;  %v1836_v42 = vsel %vm1071_vm0, %v942_v23, 0.0  ;;  %v2224_v10 = vadd.f32 %v8192_v31, %v10227_v30  ;;  %v3269_v62 = vunpack.c.l.b16 %v2733_v16  ;;  %v3261_v26 = vunpack.c.l.b16 %v2725_v17  ;;  %v6625_v55 = vld [vmem:[%s11287_s5 + $0x38] sm:$0xff]   ;;  %6318 = vmatprep.subr.bf16.mxu0 %v6624_v11 }
 0x22c   :  { %v1837_v44 = vadd.f32 %v1836_v42, %v941_v49  ;;  %v1804_v51 = vsel %vm1071_vm0, %v926_v43, 0.0  ;;  %v2479_v39 = vmax.f32 %v2223_v0, 0.0  ;;  %v2471_v12 = vmax.f32 %v2215_v18, 0.0  ;;  %6319 = vmatpush3.bf16.msra.mxu0 %v6625_v55  ;;  %v6628_v55 = vld [vmem:[%s11287_s5 + $0x68] sm:$0xff]  }
 0x22d   :  { %v1805_v60 = vadd.f32 %v1804_v51, %v925_v19  ;;  %v2480_v52 = vmax.f32 %v2224_v10, 0.0  ;;  %v3270_v58 = vunpack.c.l.b16 %v2734_v14  ;;  %v2216_v41 = vadd.f32 %v8192_v31, %v10237_v47  ;;  %v6626_v47 = vld [vmem:[%s11287_s5 + $0x70] sm:$0xff]  }
 0x22e   :  { %1838 = vadd.xlane.f32.xlu1 %v1837_v44  ;;  %v2735_v30 = vpack.c.bf16 %v2479_v39, %v2479_v39  ;;  %v2225_v45 = vadd.f32 %v8192_v31, %v10254_v57  ;;  %v3262_v32 = vunpack.c.l.b16 %v2726_v1  ;;  %v2727_v50 = vpack.c.bf16 %v2471_v12, %v2471_v12  ;;  %6320 = vmatprep.subr.bf16.mxu0 %v6626_v47 }
 0x22f   :  { %1806 = vadd.xlane.f32.xlu0 %v1805_v60  ;;  %v2736_v16 = vpack.c.bf16 %v2480_v52, %v2480_v52  ;;  %v2217_v49 = vadd.f32 %v8192_v31, %v10257_v61  ;;  %v4541_v54 = vsel %vm4430_vm3, %v3895_v15, %v4540_v36  ;;  %v2472_v19 = vmax.f32 %v2216_v41, 0.0  ;;  %v6627_v61 = vld [vmem:[%s11287_s5 + $0x30] sm:$0xff]  }
 0x230   :  { %v10421_v5 = vpop.xlane.xlu1 %1638  ;;  %v3271_v23 = vunpack.c.l.b16 %v2735_v30  ;;  %v2481_v14 = vmax.f32 %v2225_v45, 0.0  ;;  %v3899_v57 = vrot.slane %v3269_v62, %v11334_v9  ;;  %v3263_v0 = vunpack.c.l.b16 %v2727_v50  ;;  %6321 = vmatpush3.bf16.msra.mxu0 %v6627_v61 }
 0x231   :  { %v10427_v6 = vpop.xlane.xlu0 %1606  ;;  %v3272_v1 = vunpack.c.l.b16 %v2736_v16  ;;  %v2473_v42 = vmax.f32 %v2217_v49, 0.0  ;;  %v3867_v36 = vrot.slane %v3261_v26, %v11334_v9  ;;  %v3903_v15 = vrot.slane %v3270_v58, %v11334_v9  ;;  %6322 = vmatprep.subr.bf16.mxu0 %v6628_v55 }
 0x232   :  { %v2728_v18 = vpack.c.bf16 %v2472_v19, %v2472_v19  ;;  %v2737_v10 = vpack.c.bf16 %v2481_v14, %v2481_v14  ;;  %v3871_v44 = vrot.slane %v3262_v32, %v11334_v9  ;;  %v3907_v51 = vrot.slane %v3271_v23, %v11334_v9  ;;  %v6629_v32 = vld [vmem:[%s11287_s5 + $0x28] sm:$0xff]  }
 0x233   :  { %v2729_v62 = vpack.c.bf16 %v2473_v42, %v2473_v42  ;;  %v2227_v39 = vadd.f32 %v8192_v31, %v10278_v59  ;;  %v3875_v11 = vrot.slane %v3263_v0, %v11334_v9  ;;  %v3911_v60 = vrot.slane %v3272_v1, %v11334_v9 }
 0x234   :  { %v3264_v12 = vunpack.c.l.b16 %v2728_v18  ;;  %v3273_v52 = vunpack.c.l.b16 %v2737_v10  ;;  %v4534_v58 = vsel %vm4430_vm3, %v3863_v46, %v10409_v25  ;;  %v4542_v30 = vsel %vm4432_vm4, %v3899_v57, %v4541_v54  ;;  %v6630_v57 = vld [vmem:[%s11287_s5 + $0x60] sm:$0xff]   ;;  %6323 = vmatpush3.bf16.msra.mxu0 %v6629_v32  ;;  %v6636_v32 = vld [vmem:[%s11287_s5 + $0x50] sm:$0xff]  }
 0x235   :  { %v3265_v41 = vunpack.c.l.b16 %v2729_v62  ;;  %v2226_v59 = vadd.f32 %v8192_v31, %v10282_v2  ;;  %v4535_v50 = vsel %vm4432_vm4, %v3867_v36, %v4534_v58  ;;  %v4543_v16 = vsel %vm4434_vm5, %v3903_v15, %v4542_v30  ;;  %6324 = vmatprep.subr.bf16.mxu0 %v6630_v57  ;;  %v6633_v62 = vld [vmem:[%s11287_s5 + $0x58] sm:$0xff]  }
 0x236   :  { %v10447_v17 = vpop.xlane.xlu1 %1642  ;;  %v3879_v49 = vrot.slane %v3264_v12, %v11334_v9  ;;  %v3915_v25 = vrot.slane %v3273_v52, %v11334_v9  ;;  %v4536_v46 = vsel %vm4434_vm5, %v3871_v44, %v4535_v50  ;;  %v4544_v2 = vsel %vm4436_vm6, %v3907_v51, %v4543_v16  ;;  %v6635_v12 = vld [vmem:[%s11287_s5 + $0x18] sm:$0xff]  }
 0x237   :  { %v10450_v43 = vpop.xlane.xlu0 %1610  ;;  %v3883_v54 = vrot.slane %v3265_v41, %v11334_v9  ;;  %v2235_v23 = vadd.f32 %v8192_v31, %v10306_v35  ;;  %v4537_v19 = vsel %vm4436_vm6, %v3875_v11, %v4536_v46  ;;  %v4545_v14 = vsel %vm4438_vm7, %v3911_v60, %v4544_v2  ;;  %v6631_v35 = vld [vmem:[%s11287_s5 + $0x20] sm:$0xff]  }
 0x238   :  { %v2483_v47 = vmax.f32 %v2227_v39, 0.0  ;;  %v4538_v0 = vsel %vm4438_vm7, %v3879_v49, %v4537_v19  ;;  %v2482_v1 = vmax.f32 %v2226_v59, 0.0  ;;  %v2234_v42 = vadd.f32 %v8192_v31, %v10312_v37  ;;  %6325 = vmatpush3.bf16.msra.mxu0 %v6631_v35  ;;  %v6632_v49 = vld [vmem:[%s11287_s5 + $0xf8] sm:$0xff]  }
 0x239   :  { %v2236_v61 = vadd.f32 %v8192_v31, %v10329_v13  ;;  %v4539_v15 = vsel %vm4440_vm8, %v3883_v54, %v4538_v0  ;;  %v4546_v18 = vsel %vm4440_vm8, %v3915_v25, %v4545_v14  ;;  %v2491_v10 = vmax.f32 %v2235_v23, 0.0  ;;  %6326 = vmatprep.subr.bf16.mxu0 %v6633_v62  ;;  %v6634_v25 = vld [vmem:[%s11287_s5 + $0xb8] sm:$0xff]   ;;  %6430 = vmatprep.subr.bf16.mxu1 %v6632_v49 }
 0x23a   :  { %v2228_v44 = vadd.f32 %v8192_v31, %v10341_v7  ;;  %v2739_v51 = vpack.c.bf16 %v2483_v47, %v2483_v47  ;;  %v4666_v13 = vpack.c.b16 %v4546_v18, %v4539_v15  ;;  %v2738_v39 = vpack.c.bf16 %v2482_v1, %v2482_v1  ;;  %6431 = vmatpush3.bf16.msra.mxu1 %v6634_v25  ;;  %v6638_v1 = vld [vmem:[%s11287_s5 + $0x48] sm:$0xff]  }
 0x23b   :  { %v10467_v26 = vpop.xlane.xlu1 %1646  ;;  %v2490_v11 = vmax.f32 %v2234_v42, 0.0  ;;  %v2492_v60 = vmax.f32 %v2236_v61, 0.0  ;;  %v2237_v7 = vadd.f32 %v8192_v31, %v10362_v56  ;;  %v2747_v52 = vpack.c.bf16 %v2491_v10, %v2491_v10 }
 0x23c   :  { %v10477_v45 = vpop.xlane.xlu0 %1614  ;;  %6250 = vmatmul.mubr.msk.bf16.gmra.mxu0 %vm4685_vm9, %v4666_v13  ;;  %6267 = vmatmul.mubr.msk.bf16.gmra.mxu1 %vm4685_vm9, %v4666_v13  ;;  %v2484_v55 = vmax.f32 %v2228_v44, 0.0  ;;  %v3275_v30 = vunpack.c.l.b16 %v2739_v51  ;;  %v2229_v41 = vadd.f32 %v8192_v31, %v10368_v28  ;;  %v3274_v56 = vunpack.c.l.b16 %v2738_v39  ;;  %v6637_v28 = vld [vmem:[%s11287_s5 + $0x10] sm:$0xff]  }
 0x23d   :  { %4859 = vmatprep.mubr.bf16.mxu0 %v11341_v4  ;;  %5052 = vmatprep.mubr.bf16.mxu1 %v11341_v4  ;;  %v2746_v50 = vpack.c.bf16 %v2490_v11, %v2490_v11  ;;  %v10533_v16 = vpack.c.bf16 %v2492_v60, %v2492_v60  ;;  %v2493_v46 = vmax.f32 %v2237_v7, 0.0  ;;  %v3283_v54 = vunpack.c.l.b16 %v2747_v52  ;;  %v6640_v11 = vld [vmem:[%s11287_s5 + $0x40] sm:$0xff]   ;;  %v6642_v60 = vld [vmem:[%s11287_s5 + $0xf0] sm:$0xff]  }
 0x23e   :  { %6327 = vmatpush3.bf16.msra.mxu0 %v6635_v12  ;;  %v2485_v2 = vmax.f32 %v2229_v41, 0.0  ;;  %v2740_v23 = vpack.c.bf16 %v2484_v55, %v2484_v55  ;;  %v2238_v19 = vadd.f32 %v8192_v31, %v10391_v40  ;;  %v3923_v14 = vrot.slane %v3275_v30, %v11334_v9  ;;  %6432 = vmatprep.subr.bf16.mxu1 %v6642_v60 }
 0x23f   :  { %6328 = vmatprep.subr.bf16.mxu0 %v6636_v32  ;;  %v2230_v47 = vadd.f32 %v8192_v31, %v10396_v34  ;;  %v3919_v42 = vrot.slane %v3274_v56, %v11334_v9  ;;  %v3282_v61 = vunpack.c.l.b16 %v2746_v50  ;;  %v3284_v40 = vunpack.c.l.b16 %v10533_v16  ;;  %v6639_v34 = vld [vmem:[%s11287_s5 + $0x8] sm:$0xff]   ;;  %v6641_v32 = vld [vmem:[%s11287_s5] sm:$0xff]  }
 0x240   :  { %v10501_v36 = vpop.xlane.xlu1 %1654  ;;  %v2494_v35 = vmax.f32 %v2238_v19, 0.0  ;;  %v2749_v15 = vpack.c.bf16 %v2493_v46, %v2493_v46  ;;  %v2741_v18 = vpack.c.bf16 %v2485_v2, %v2485_v2  ;;  %v2239_v44 = vadd.f32 %v8192_v31, %v10421_v5 }
 0x241   :  { %v2486_v10 = vmax.f32 %v2230_v47, 0.0  ;;  %v3955_v51 = vrot.slane %v3283_v54, %v11334_v9  ;;  %v3276_v13 = vunpack.c.l.b16 %v2740_v23  ;;  %v2231_v62 = vadd.f32 %v8192_v31, %v10427_v6 }
 0x242   :  { %v10510_v37 = vpop.xlane.xlu0 %1650  ;;  %6329 = vmatpush3.bf16.msra.mxu0 %v6637_v28  ;;  %v2240_v39 = vadd.f32 %v8192_v31, %v10447_v17  ;;  %v2750_v12 = vpack.c.bf16 %v2494_v35, %v2494_v35  ;;  %v2495_v7 = vmax.f32 %v2239_v44, 0.0  ;;  %v2232_v52 = vadd.f32 %v8192_v31, %v10450_v43 }
 0x243   :  { %6330 = vmatprep.subr.bf16.mxu0 %v6638_v1  ;;  %v2742_v5 = vpack.c.bf16 %v2486_v10, %v2486_v10  ;;  %v3951_v6 = vrot.slane %v3282_v61, %v11334_v9  ;;  %v2487_v30 = vmax.f32 %v2231_v62, 0.0  ;;  %v2241_v41 = vadd.f32 %v8192_v31, %v10467_v26 }
 0x244   :  { %v2496_v17 = vmax.f32 %v2240_v39, 0.0  ;;  %v3285_v56 = vunpack.c.l.b16 %v2749_v15  ;;  %v3277_v50 = vunpack.c.l.b16 %v2741_v18  ;;  %v2751_v16 = vpack.c.bf16 %v2495_v7, %v2495_v7 }
 0x245   :  { %v2488_v49 = vmax.f32 %v2232_v52, 0.0  ;;  %v3278_v25 = vunpack.c.l.b16 %v2742_v5  ;;  %v2743_v28 = vpack.c.bf16 %v2487_v30, %v2487_v30  ;;  %v2497_v2 = vmax.f32 %v2241_v41, 0.0 }
 0x246   :  { %v10522_v58 = vpop.xlane.xlu1 %1686  ;;  %6331 = vmatpush3.bf16.msra.mxu0 %v6639_v34  ;;  %v2752_v46 = vpack.c.bf16 %v2496_v17, %v2496_v17  ;;  %v4547_v54 = vsel %vm4428_vm2, %v3923_v14, %v3919_v42  ;;  %v3286_v26 = vunpack.c.l.b16 %v2750_v12  ;;  %v2233_v19 = vadd.f32 %v8192_v31, %v10477_v45  ;;  %v6643_v14 = vld [vmem:[%s11287_s5 + $0xb0] sm:$0xff]  }
 0x247   :  { %v10528_v59 = vpop.xlane.xlu0 %1682  ;;  %6332 = vmatprep.subr.bf16.mxu0 %v6640_v11  ;;  %v2744_v23 = vpack.c.bf16 %v2488_v49, %v2488_v49  ;;  %v3927_v47 = vrot.slane %v3276_v13, %v11334_v9  ;;  %v3287_v1 = vunpack.c.l.b16 %v2751_v16  ;;  %v3279_v61 = vunpack.c.l.b16 %v2743_v28  ;;  %6433 = vmatpush3.bf16.msra.mxu1 %v6643_v14  ;;  %v6647_v14 = vld [vmem:[%s11287_s5 + $0xa0] sm:$0xff]  }
 0x248   :  { %v2753_v35 = vpack.c.bf16 %v2497_v2, %v2497_v2  ;;  %v3959_v34 = vrot.slane %v3284_v40, %v11334_v9  ;;  %v3931_v15 = vrot.slane %v3277_v50, %v11334_v9  ;;  %v2489_v10 = vmax.f32 %v2233_v19, 0.0 }
 0x249   :  { %v3280_v18 = vunpack.c.l.b16 %v2744_v23  ;;  %v4554_v45 = vsel %vm4428_vm2, %v3955_v51, %v3951_v6  ;;  %v3963_v42 = vrot.slane %v3285_v56, %v11334_v9  ;;  %v3935_v13 = vrot.slane %v3278_v25, %v11334_v9 }
 0x24a   :  { %6333 = vmatpush3.bf16.msra.mxu0 %v6641_v32  ;;  %v3288_v62 = vunpack.c.l.b16 %v2752_v46  ;;  %v3967_v40 = vrot.slane %v3286_v26, %v11334_v9  ;;  %v3939_v11 = vrot.slane %v3279_v61, %v11334_v9  ;;  %v3289_v60 = vunpack.c.l.b16 %v2753_v35  ;;  %v6645_v35 = vld [vmem:[%s11287_s5 + $0xa8] sm:$0xff]  }
 0x24b   :  { %v10549_v57 = vpop.xlane.xlu1 %1690  ;;  %v10551_v0 = vpop.xlane.xlu0 %1658  ;;  %v2745_v12 = vpack.c.bf16 %v2489_v10, %v2489_v10  ;;  %v4548_v5 = vsel %vm4430_vm3, %v3927_v47, %v4547_v54  ;;  %v3971_v7 = vrot.slane %v3287_v1, %v11334_v9  ;;  %v3943_v51 = vrot.slane %v3280_v18, %v11334_v9  ;;  %v6644_v1 = vld [vmem:[%s11287_s5 + $0xe8] sm:$0xff]  }
 0x24c   :  { %v2243_v52 = vadd.f32 %v8192_v31, %v10501_v36  ;;  %v4555_v6 = vsel %vm4430_vm3, %v3959_v34, %v4554_v45  ;;  %v4549_v30 = vsel %vm4432_vm4, %v3931_v15, %v4548_v5  ;;  %v2242_v41 = vadd.f32 %v8192_v31, %v10510_v37  ;;  %v6646_v34 = vld [vmem:[%s11287_s5 + $0xe0] sm:$0xff]   ;;  %6434 = vmatprep.subr.bf16.mxu1 %v6644_v1 }
 0x24d   :  { %v3281_v17 = vunpack.c.l.b16 %v2745_v12  ;;  %v4556_v32 = vsel %vm4432_vm4, %v3963_v42, %v4555_v6  ;;  %v4550_v56 = vsel %vm4434_vm5, %v3935_v13, %v4549_v30  ;;  %v3975_v50 = vrot.slane %v3288_v62, %v11334_v9  ;;  %6435 = vmatpush3.bf16.msra.mxu1 %v6645_v35 }
 0x24e   :  { %v4557_v16 = vsel %vm4434_vm5, %v3967_v40, %v4556_v32  ;;  %v4551_v49 = vsel %vm4436_vm6, %v3939_v11, %v4550_v56  ;;  %v3979_v36 = vrot.slane %v3289_v60, %v11334_v9  ;;  %v2499_v2 = vmax.f32 %v2243_v52, 0.0  ;;  %6436 = vmatprep.subr.bf16.mxu1 %v6646_v34  ;;  %v6648_v52 = vld [vmem:[%s11287_s5 + $0xd8] sm:$0xff]  }
 0x24f   :  { %v10576_v55 = vpop.xlane.xlu1 %1694  ;;  %v3947_v25 = vrot.slane %v3281_v17, %v11334_v9  ;;  %v4558_v46 = vsel %vm4436_vm6, %v3971_v7, %v4557_v16  ;;  %v4552_v37 = vsel %vm4438_vm7, %v3943_v51, %v4551_v49  ;;  %v2498_v26 = vmax.f32 %v2242_v41, 0.0  ;;  %v6649_v17 = vld [vmem:[%s11287_s5 + $0x98] sm:$0xff]   ;;  %v6650_v41 = vld [vmem:[%s11287_s5 + $0xd0] sm:$0xff]  }
 0x250   :  { %v2251_v23 = vadd.f32 %v8192_v31, %v10522_v58  ;;  %v2250_v19 = vadd.f32 %v8192_v31, %v10528_v59  ;;  %v4559_v61 = vsel %vm4438_vm7, %v3975_v50, %v4558_v46  ;;  %v2252_v58 = vadd.f32 %v8192_v31, %v10549_v57 }
 0x251   :  { %v10584_v43 = vpop.xlane.xlu0 %1662  ;;  %v4553_v47 = vsel %vm4440_vm8, %v3947_v25, %v4552_v37  ;;  %v4560_v59 = vsel %vm4440_vm8, %v3979_v36, %v4559_v61  ;;  %v2755_v15 = vpack.c.bf16 %v2499_v2, %v2499_v2  ;;  %v2244_v18 = vadd.f32 %v8192_v31, %v10551_v0  ;;  %6437 = vmatpush3.bf16.msra.mxu1 %v6647_v14 }
 0x252   :  { %v4667_v10 = vpack.c.b16 %v4560_v59, %v4553_v47  ;;  %v2754_v45 = vpack.c.bf16 %v2498_v26, %v2498_v26  ;;  %v2507_v42 = vmax.f32 %v2251_v23, 0.0  ;;  %v2506_v13 = vmax.f32 %v2250_v19, 0.0  ;;  %6438 = vmatprep.subr.bf16.mxu1 %v6648_v52 }
 0x253   :  { %v10592_v44 = vpop.xlane.xlu1 %1698  ;;  %v2253_v57 = vadd.f32 %v8192_v31, %v10576_v55  ;;  %v2508_v0 = vmax.f32 %v2252_v58, 0.0  ;;  %v2245_v11 = vadd.f32 %v8192_v31, %v10584_v43  ;;  %v3291_v60 = vunpack.c.l.b16 %v2755_v15 }
 0x254   :  { %6251 = vmatmul.mubr.msk.bf16.gmra.mxu0 %vm4685_vm9, %v4667_v10  ;;  %6268 = vmatmul.mubr.msk.bf16.gmra.mxu1 %vm4685_vm9, %v4667_v10  ;;  %v2500_v12 = vmax.f32 %v2244_v18, 0.0  ;;  %v3290_v5 = vunpack.c.l.b16 %v2754_v45  ;;  %v2763_v7 = vpack.c.bf16 %v2507_v42, %v2507_v42  ;;  %v2762_v51 = vpack.c.bf16 %v2506_v13, %v2506_v13  ;;  %v6652_v42 = vld [vmem:[%s11287_s5 + $0xc8] sm:$0xff]  }
 0x255   :  { %v10600_v39 = vpop.xlane.xlu0 %1666  ;;  %4869 = vmatprep.mubr.bf16.mxu0 %v11341_v4  ;;  %5062 = vmatprep.mubr.bf16.mxu1 %v11341_v4  ;;  %v2509_v55 = vmax.f32 %v2253_v57, 0.0  ;;  %v2501_v6 = vmax.f32 %v2245_v11, 0.0  ;;  %v2254_v30 = vadd.f32 %v8192_v31, %v10592_v44  ;;  %v2764_v32 = vpack.c.bf16 %v2508_v0, %v2508_v0  ;;  %v6651_v44 = vld [vmem:[%s11287_s5 + $0x90] sm:$0xff]   ;;  %v6653_v0 = vld [vmem:[%s11287_s5 + $0x88] sm:$0xff]   ;;  %v6654_v11 = vld [vmem:[%s11287_s5 + $0xc0] sm:$0xff]  }
 0x256   :  { %v2246_v56 = vadd.f32 %v8192_v31, %v10600_v39  ;;  %v3987_v16 = vrot.slane %v3291_v60, %v11334_v9  ;;  %v2756_v49 = vpack.c.bf16 %v2500_v12, %v2500_v12  ;;  %6439 = vmatpush3.bf16.msra.mxu1 %v6649_v17  ;;  %v3983_v25 = vrot.slane %v3290_v5, %v11334_v9 }
 0x257   :  { %v2510_v36 = vmax.f32 %v2254_v30, 0.0  ;;  %v3299_v46 = vunpack.c.l.b16 %v2763_v7  ;;  %v3298_v37 = vunpack.c.l.b16 %v2762_v51  ;;  %6440 = vmatprep.subr.bf16.mxu1 %v6650_v41  ;;  %v2765_v26 = vpack.c.bf16 %v2509_v55, %v2509_v55 }
 0x258   :  { %v2502_v2 = vmax.f32 %v2246_v56, 0.0  ;;  %v2757_v23 = vpack.c.bf16 %v2501_v6, %v2501_v6  ;;  %v3300_v47 = vunpack.c.l.b16 %v2764_v32  ;;  %v3292_v59 = vunpack.c.l.b16 %v2756_v49 }
 0x259   :  { %v2766_v15 = vpack.c.bf16 %v2510_v36, %v2510_v36  ;;  %v4019_v14 = vrot.slane %v3299_v46, %v11334_v9  ;;  %v3301_v13 = vunpack.c.l.b16 %v2765_v26  ;;  %v4015_v51 = vrot.slane %v3298_v37, %v11334_v9 }
 0x25a   :  { %v10620_v28 = vpop.xlane.xlu1 %1702  ;;  %v2758_v1 = vpack.c.bf16 %v2502_v2, %v2502_v2  ;;  %6441 = vmatpush3.bf16.msra.mxu1 %v6651_v44  ;;  %v3991_v17 = vrot.slane %v3292_v59, %v11334_v9  ;;  %v4023_v36 = vrot.slane %v3300_v47, %v11334_v9 }
 0x25b   :  { %v1671_v54 = vpop.xlane.xlu0 %1670  ;;  %v2255_v39 = vadd.f32 %v8192_v31, %v10620_v28  ;;  %6442 = vmatprep.subr.bf16.mxu1 %v6652_v42  ;;  %v3302_v52 = vunpack.c.l.b16 %v2766_v15 }
 0x25c   :  { %v2247_v19 = vadd.f32 %v8192_v31, %v1671_v54  ;;  %v3294_v60 = vunpack.c.l.b16 %v2758_v1 }
 0x25d   :  { %v2511_v18 = vmax.f32 %v2255_v39, 0.0  ;;  %v4031_v39 = vrot.slane %v3302_v52, %v11334_v9 }
 0x25e   :  { %v2503_v10 = vmax.f32 %v2247_v19, 0.0  ;;  %6443 = vmatpush3.bf16.msra.mxu1 %v6653_v0  ;;  %v3999_v2 = vrot.slane %v3294_v60, %v11334_v9 }
 0x25f   :  { %v2767_v57 = vpack.c.bf16 %v2511_v18, %v2511_v18  ;;  %6444 = vmatprep.subr.bf16.mxu1 %v6654_v11 }
 0x260   :  { %v1707_v62 = vpop.xlane.xlu1 %1706 }
 0x261   :  { %v1675_v40 = vpop.xlane.xlu0 %1674  ;;  %v2256_v61 = vadd.f32 %v8192_v31, %v1707_v62  ;;  %v3293_v62 = vunpack.c.l.b16 %v2757_v23  ;;  %v3303_v41 = vunpack.c.l.b16 %v2767_v57  ;;  %v4561_v23 = vsel %vm4428_vm2, %v3987_v16, %v3983_v25 }
 0x262   :  { %v2248_v35 = vadd.f32 %v8192_v31, %v1675_v40  ;;  %v2759_v40 = vpack.c.bf16 %v2503_v10, %v2503_v10  ;;  %v4562_v47 = vsel %vm4430_vm3, %v3991_v17, %v4561_v23 }
 0x263   :  { %v2512_v28 = vmax.f32 %v2256_v61, 0.0  ;;  %v3995_v44 = vrot.slane %v3293_v62, %v11334_v9  ;;  %v4568_v61 = vsel %vm4428_vm2, %v4019_v14, %v4015_v51 }
 0x264   :  { %v2504_v45 = vmax.f32 %v2248_v35, 0.0  ;;  %v3295_v55 = vunpack.c.l.b16 %v2759_v40  ;;  %v4035_v35 = vrot.slane %v3303_v41, %v11334_v9  ;;  %v4569_v18 = vsel %vm4430_vm3, %v4023_v36, %v4568_v61 }
 0x265   :  { %v1711_v43 = vpop.xlane.xlu1 %1710  ;;  %v2768_v12 = vpack.c.bf16 %v2512_v28, %v2512_v28  ;;  %v4563_v10 = vsel %vm4432_vm4, %v3995_v44, %v4562_v47 }
 0x266   :  { %v1679_v50 = vpop.xlane.xlu0 %1678  ;;  %v2257_v54 = vadd.f32 %v8192_v31, %v1711_v43  ;;  %v2760_v5 = vpack.c.bf16 %v2504_v45, %v2504_v45  ;;  %v6655_v43 = vld [vmem:[%s11287_s5 + $0x80] sm:$0xff]   ;;  %v4003_v19 = vrot.slane %v3295_v55, %v11334_v9 }
 0x267   :  { %v2249_v6 = vadd.f32 %v8192_v31, %v1679_v50  ;;  %v3304_v46 = vunpack.c.l.b16 %v2768_v12  ;;  %v4027_v50 = vrot.slane %v3301_v13, %v11334_v9  ;;  %6445 = vmatpush3.bf16.msra.mxu1 %v6655_v43 }
 0x268   :  { %v2513_v7 = vmax.f32 %v2257_v54, 0.0  ;;  %v3296_v32 = vunpack.c.l.b16 %v2760_v5  ;;  %v4564_v54 = vsel %vm4434_vm5, %v3999_v2, %v4563_v10 }
 0x269   :  { %v10678_v34 = vpop.xlane.xlu1 %1718  ;;  %v2505_v37 = vmax.f32 %v2249_v6, 0.0  ;;  %v4039_v16 = vrot.slane %v3304_v46, %v11334_v9  ;;  %v4570_v45 = vsel %vm4432_vm4, %v4027_v50, %v4569_v18  ;;  %v4565_v13 = vsel %vm4436_vm6, %v4003_v19, %v4564_v54 }
 0x26a   :  { %v10680_v58 = vpop.xlane.xlu0 %1714  ;;  %v2769_v56 = vpack.c.bf16 %v2513_v7, %v2513_v7  ;;  %v4007_v59 = vrot.slane %v3296_v32, %v11334_v9  ;;  %v4571_v42 = vsel %vm4434_vm5, %v4031_v39, %v4570_v45  ;;  %v2259_v7 = vadd.f32 %v8192_v31, %v10678_v34 }
 0x26b   :  { %v2761_v1 = vpack.c.bf16 %v2505_v37, %v2505_v37  ;;  %v4572_v57 = vsel %vm4436_vm6, %v4035_v35, %v4571_v42  ;;  %v2258_v6 = vadd.f32 %v8192_v31, %v10680_v58 }
 0x26c   :  { %v3305_v26 = vunpack.c.l.b16 %v2769_v56  ;;  %v4566_v40 = vsel %vm4438_vm7, %v4007_v59, %v4565_v13  ;;  %v4573_v0 = vsel %vm4438_vm7, %v4039_v16, %v4572_v57  ;;  %v2515_v41 = vmax.f32 %v2259_v7, 0.0 }
 0x26d   :  { %v3297_v25 = vunpack.c.l.b16 %v2761_v1  ;;  %v2514_v44 = vmax.f32 %v2258_v6, 0.0 }
 0x26e   :  { %v1751_v30 = vpop.xlane.xlu1 %1750  ;;  %v4043_v14 = vrot.slane %v3305_v26, %v11334_v9  ;;  %v2771_v46 = vpack.c.bf16 %v2515_v41, %v2515_v41 }
 0x26f   :  { %v1747_v49 = vpop.xlane.xlu0 %1746  ;;  %v4011_v62 = vrot.slane %v3297_v25, %v11334_v9  ;;  %v2267_v52 = vadd.f32 %v8192_v31, %v1751_v30  ;;  %v2770_v35 = vpack.c.bf16 %v2514_v44, %v2514_v44 }
 0x270   :  { %v4574_v12 = vsel %vm4440_vm8, %v4043_v14, %v4573_v0  ;;  %v2266_v55 = vadd.f32 %v8192_v31, %v1747_v49  ;;  %v3307_v18 = vunpack.c.l.b16 %v2771_v46 }
 0x271   :  { %v4567_v11 = vsel %vm4440_vm8, %v4011_v62, %v4566_v40  ;;  %v2523_v56 = vmax.f32 %v2267_v52, 0.0  ;;  %v3306_v0 = vunpack.c.l.b16 %v2770_v35 }
 0x272   :  { %v4668_v51 = vpack.c.b16 %v4574_v12, %v4567_v11  ;;  %v2522_v49 = vmax.f32 %v2266_v55, 0.0 }
 0x273   :  { %v1755_v15 = vpop.xlane.xlu1 %1754  ;;  %v2779_v19 = vpack.c.bf16 %v2523_v56, %v2523_v56  ;;  %v4047_v46 = vrot.slane %v3306_v0, %v11334_v9 }
 0x274   :  { %v1723_v28 = vpop.xlane.xlu0 %1722  ;;  %6252 = vmatmul.mubr.msk.bf16.gmra.mxu0 %vm4685_vm9, %v4668_v51  ;;  %6269 = vmatmul.mubr.msk.bf16.gmra.mxu1 %vm4685_vm9, %v4668_v51  ;;  %v2268_v34 = vadd.f32 %v8192_v31, %v1755_v15  ;;  %v2778_v1 = vpack.c.bf16 %v2522_v49, %v2522_v49 }
 0x275   :  { %4879 = vmatprep.mubr.bf16.mxu0 %v11341_v4  ;;  %5072 = vmatprep.mubr.bf16.mxu1 %v11341_v4  ;;  %v2260_v30 = vadd.f32 %v8192_v31, %v1723_v28  ;;  %v3315_v42 = vunpack.c.l.b16 %v2779_v19 }
 0x276   :  { %v2524_v37 = vmax.f32 %v2268_v34, 0.0  ;;  %v3314_v13 = vunpack.c.l.b16 %v2778_v1 }
 0x277   :  { %v2516_v2 = vmax.f32 %v2260_v30, 0.0  ;;  %v4083_v41 = vrot.slane %v3315_v42, %v11334_v9 }
 0x278   :  { %v1759_v60 = vpop.xlane.xlu1 %1758  ;;  %v2780_v10 = vpack.c.bf16 %v2524_v37, %v2524_v37  ;;  %v4079_v34 = vrot.slane %v3314_v13, %v11334_v9 }
 0x279   :  { %v1727_v5 = vpop.xlane.xlu0 %1726  ;;  %v2269_v32 = vadd.f32 %v8192_v31, %v1759_v60  ;;  %v2772_v28 = vpack.c.bf16 %v2516_v2, %v2516_v2 }
 0x27a   :  { %v2261_v58 = vadd.f32 %v8192_v31, %v1727_v5  ;;  %v4051_v5 = vrot.slane %v3307_v18, %v11334_v9  ;;  %v3316_v7 = vunpack.c.l.b16 %v2780_v10 }
 0x27b   :  { %v2525_v26 = vmax.f32 %v2269_v32, 0.0  ;;  %v3308_v55 = vunpack.c.l.b16 %v2772_v28 }
 0x27c   :  { %v1763_v43 = vpop.xlane.xlu1 %1762  ;;  %v2517_v59 = vmax.f32 %v2261_v58, 0.0  ;;  %v4087_v37 = vrot.slane %v3316_v7, %v11334_v9  ;;  %v4575_v28 = vsel %vm4428_vm2, %v4051_v5, %v4047_v46 }
 0x27d   :  { %v1731_v17 = vpop.xlane.xlu0 %1730  ;;  %v2270_v36 = vadd.f32 %v8192_v31, %v1763_v43  ;;  %v2781_v45 = vpack.c.bf16 %v2525_v26, %v2525_v26  ;;  %v4055_v35 = vrot.slane %v3308_v55, %v11334_v9 }
 0x27e   :  { %v2262_v50 = vadd.f32 %v8192_v31, %v1731_v17  ;;  %v2773_v11 = vpack.c.bf16 %v2517_v59, %v2517_v59 }
 0x27f   :  { %v2526_v61 = vmax.f32 %v2270_v36, 0.0  ;;  %v3317_v6 = vunpack.c.l.b16 %v2781_v45 }
 0x280   :  { %v2518_v16 = vmax.f32 %v2262_v50, 0.0  ;;  %v3309_v49 = vunpack.c.l.b16 %v2773_v11  ;;  %v4576_v11 = vsel %vm4430_vm3, %v4055_v35, %v4575_v28 }
 0x281   :  { %v2782_v62 = vpack.c.bf16 %v2526_v61, %v2526_v61 }
 0x282   :  { %v1767_v23 = vpop.xlane.xlu1 %1766  ;;  %v2774_v51 = vpack.c.bf16 %v2518_v16, %v2518_v16  ;;  %v4059_v18 = vrot.slane %v3309_v49, %v11334_v9 }
 0x283   :  { %v1735_v39 = vpop.xlane.xlu0 %1734  ;;  %v2271_v47 = vadd.f32 %v8192_v31, %v1767_v23  ;;  %v3318_v30 = vunpack.c.l.b16 %v2782_v62  ;;  %v10750_v23 = vpop.f32.mrf.mxu0 }
 0x284   :  { %v2263_v15 = vadd.f32 %v8192_v31, %v1735_v39  ;;  %v3310_v50 = vunpack.c.l.b16 %v2774_v51  ;;  %v4091_v39 = vrot.slane %v3317_v6, %v11334_v9  ;;  %v4577_v7 = vsel %vm4432_vm4, %v4059_v18, %v4576_v11 }
 0x285   :  { %v2527_v25 = vmax.f32 %v2271_v47, 0.0  ;;  %v4582_v47 = vsel %vm4428_vm2, %v4083_v41, %v4079_v34  ;;  %v4095_v59 = vrot.slane %v3318_v30, %v11334_v9  ;;  %v10763_v42 = vpop.f32.mrf.mxu0 }
 0x286   :  { %v2519_v54 = vmax.f32 %v2263_v15, 0.0  ;;  %v1771_v14 = vpop.xlane.xlu1 %1770  ;;  %v4583_v45 = vsel %vm4430_vm3, %v4087_v37, %v4582_v47 }
 0x287   :  { %v2272_v57 = vadd.f32 %v8192_v31, %v1771_v14  ;;  %v1739_v40 = vpop.xlane.xlu0 %1738  ;;  %v2783_v60 = vpack.c.bf16 %v2527_v25, %v2527_v25  ;;  %v4584_v13 = vsel %vm4432_vm4, %v4091_v39, %v4583_v45 }
 0x288   :  { %v2264_v12 = vadd.f32 %v8192_v31, %v1739_v40  ;;  %v2775_v43 = vpack.c.bf16 %v2519_v54, %v2519_v54  ;;  %v4063_v54 = vrot.slane %v3310_v50, %v11334_v9 }
 0x289   :  { %v2528_v52 = vmax.f32 %v2272_v57, 0.0  ;;  %v3319_v36 = vunpack.c.l.b16 %v2783_v60  ;;  %v4585_v60 = vsel %vm4434_vm5, %v4095_v59, %v4584_v13 }
 0x28a   :  { %v2520_v17 = vmax.f32 %v2264_v12, 0.0  ;;  %v3311_v19 = vunpack.c.l.b16 %v2775_v43  ;;  %v4578_v6 = vsel %vm4434_vm5, %v4063_v54, %v4577_v7 }
 0x28b   :  { %v2784_v32 = vpack.c.bf16 %v2528_v52, %v2528_v52  ;;  %v1775_v56 = vpop.xlane.xlu1 %1774  ;;  %v4099_v10 = vrot.slane %v3319_v36, %v11334_v9 }
 0x28c   :  { %v2776_v44 = vpack.c.bf16 %v2520_v17, %v2520_v17  ;;  %v2273_v58 = vadd.f32 %v8192_v31, %v1775_v56  ;;  %v1743_v26 = vpop.xlane.xlu0 %1742  ;;  %v4067_v62 = vrot.slane %v3311_v19, %v11334_v9  ;;  %v10775_v17 = vpop.f32.mrf.mxu0 }
 0x28d   :  { %v3320_v2 = vunpack.c.l.b16 %v2784_v32  ;;  %v2265_v61 = vadd.f32 %v8192_v31, %v1743_v26  ;;  %v4586_v51 = vsel %vm4436_vm6, %v4099_v10, %v4585_v60 }
 0x28e   :  { %v2529_v1 = vmax.f32 %v2273_v58, 0.0  ;;  %v3312_v15 = vunpack.c.l.b16 %v2776_v44  ;;  %v4579_v41 = vsel %vm4436_vm6, %v4067_v62, %v4578_v6  ;;  %v10782_v58 = vpop.f32.mrf.mxu0 }
 0x28f   :  { %v2521_v25 = vmax.f32 %v2265_v61, 0.0  ;;  %v4103_v14 = vrot.slane %v3320_v2, %v11334_v9 }
 0x290   :  { %v2785_v16 = vpack.c.bf16 %v2529_v1, %v2529_v1  ;;  %v4071_v12 = vrot.slane %v3312_v15, %v11334_v9  ;;  %v10786_v37 = vpop.f32.mrf.mxu0  ;;  %v10794_v1 = vpop.f32.mrf.mxu1 }
 0x291   :  { %v2777_v40 = vpack.c.bf16 %v2521_v25, %v2521_v25  ;;  %v1783_v0 = vpop.xlane.xlu1 %1782  ;;  %v4587_v43 = vsel %vm4438_vm7, %v4103_v14, %v4586_v51  ;;  %11377 = vst [vmem:[#allocation18_spill] sm:$0xff] %v10794_v1 }
 0x292   :  { %v3321_v57 = vunpack.c.l.b16 %v2785_v16  ;;  %v1779_v5 = vpop.xlane.xlu0 %1778  ;;  %v4580_v32 = vsel %vm4438_vm7, %v4071_v12, %v4579_v41  ;;  %v10790_v2 = vpop.f32.mrf.mxu0  ;;  %v2275_v15 = vadd.f32 %v8192_v31, %v1783_v0 }
 0x293   :  { %v3313_v55 = vunpack.c.l.b16 %v2777_v40  ;;  %v10796_v61 = vpop.f32.mrf.mxu1  ;;  %v2274_v10 = vadd.f32 %v8192_v31, %v1779_v5 }
 0x294   :  { %v4107_v52 = vrot.slane %v3321_v57, %v11334_v9  ;;  %v10792_v19 = vpop.f32.mrf.mxu0  ;;  %v2531_v45 = vmax.f32 %v2275_v15, 0.0 }
 0x295   :  { %v4075_v34 = vrot.slane %v3313_v55, %v11334_v9  ;;  %v10805_v25 = vpop.f32.mrf.mxu1  ;;  %v2530_v62 = vmax.f32 %v2274_v10, 0.0 }
 0x296   :  { %v4588_v30 = vsel %vm4440_vm8, %v4107_v52, %v4587_v43  ;;  %v1815_v56 = vpop.xlane.xlu1 %1814  ;;  %v10798_v35 = vpop.f32.mrf.mxu0  ;;  %v2787_v55 = vpack.c.bf16 %v2531_v45, %v2531_v45 }
 0x297   :  { %v4581_v49 = vsel %vm4440_vm8, %v4075_v34, %v4580_v32  ;;  %v2283_v16 = vadd.f32 %v8192_v31, %v1815_v56  ;;  %v10813_v60 = vpop.f32.mrf.mxu1  ;;  %v2786_v34 = vpack.c.bf16 %v2530_v62, %v2530_v62 }
 0x298   :  { %v1811_v36 = vpop.xlane.xlu0 %1810  ;;  %v4669_v44 = vpack.c.b16 %v4588_v30, %v4581_v49  ;;  %v10801_v18 = vpop.f32.mrf.mxu0 }
 0x299   :  { %v2282_v28 = vadd.f32 %v8192_v31, %v1811_v36  ;;  %v2539_v57 = vmax.f32 %v2283_v16, 0.0  ;;  %v10822_v49 = vpop.f32.mrf.mxu1  ;;  %v3323_v16 = vunpack.c.l.b16 %v2787_v55  ;;  %v3322_v62 = vunpack.c.l.b16 %v2786_v34 }
 0x29a   :  { %v1819_v46 = vpop.xlane.xlu1 %1818  ;;  %6253 = vmatmul.mubr.msk.bf16.gmra.mxu0 %vm4685_vm9, %v4669_v44  ;;  %6270 = vmatmul.mubr.msk.bf16.gmra.mxu1 %vm4685_vm9, %v4669_v44  ;;  %v10809_v13 = vpop.f32.mrf.mxu0 }
 0x29b   :  { %4889 = vmatprep.mubr.bf16.mxu0 %v11341_v4  ;;  %5082 = vmatprep.mubr.bf16.mxu1 %v11341_v4  ;;  %v2284_v54 = vadd.f32 %v8192_v31, %v1819_v46  ;;  %v2538_v7 = vmax.f32 %v2282_v28, 0.0  ;;  %v2795_v30 = vpack.c.bf16 %v2539_v57, %v2539_v57  ;;  %v10827_v46 = vld [vmem:[%s11286_s4] sm:$0xf]  ;;  %v10834_v10 = vpop.f32.mrf.mxu1 }
 0x29c   :  { %v1787_v50 = vpop.xlane.xlu0 %1786  ;;  %v10820_v41 = vpop.f32.mrf.mxu0 }
 0x29d   :  { %v2276_v40 = vadd.f32 %v8192_v31, %v1787_v50  ;;  %v2540_v6 = vmax.f32 %v2284_v54, 0.0  ;;  %v11378_v50 = vsub.s32 1, %v11369_v21  ;;  %v3331_v57 = vunpack.c.l.b16 %v2795_v30 }
 0x29f   :  { %v2532_v32 = vmax.f32 %v2276_v40, 0.0  ;;  %v2796_v28 = vpack.c.bf16 %v2540_v6, %v2540_v6 }
 0x2a0   :  { %v1823_v26 = vpop.xlane.xlu1 %1822 }
 0x2a1   :  { %v1791_v39 = vpop.xlane.xlu0 %1790  ;;  %v2285_v0 = vadd.f32 %v8192_v31, %v1823_v26  ;;  %v10832_v26 = vrot.slane %v10827_v46, %v11378_v50  ;;  %v2788_v40 = vpack.c.bf16 %v2532_v32, %v2532_v32 }
 0x2a2   :  { %v2277_v12 = vadd.f32 %v8192_v31, %v1791_v39  ;;  %v2794_v39 = vpack.c.bf16 %v2538_v7, %v2538_v7 }
 0x2a3   :  { %v2541_v56 = vmax.f32 %v2285_v0, 0.0 }
 0x2a4   :  { %v2533_v36 = vmax.f32 %v2277_v12, 0.0  ;;  %v3330_v6 = vunpack.c.l.b16 %v2794_v39 }
 0x2a5   :  { %v1827_v47 = vpop.xlane.xlu1 %1826  ;;  %v1795_v59 = vpop.xlane.xlu0 %1794  ;;  %v2797_v0 = vpack.c.bf16 %v2541_v56, %v2541_v56 }
 0x2a6   :  { %v2286_v5 = vadd.f32 %v8192_v31, %v1827_v47  ;;  %v2278_v51 = vadd.f32 %v8192_v31, %v1795_v59  ;;  %v2789_v12 = vpack.c.bf16 %v2533_v36, %v2533_v36  ;;  %v10846_v56 = vpop.f32.mrf.mxu1  ;;  %v4115_v36 = vrot.slane %v3323_v16, %v11334_v9 }
 0x2a8   :  { %v2542_v44 = vmax.f32 %v2286_v5, 0.0  ;;  %v2534_v47 = vmax.f32 %v2278_v51, 0.0  ;;  %v3325_v29 = vunpack.c.l.b16 %v2789_v12 }
 0x2aa   :  { %v2798_v5 = vpack.c.bf16 %v2542_v44, %v2542_v44  ;;  %v4111_v44 = vrot.slane %v3322_v62, %v11334_v9 }
 0x2ac   :  { %v1831_v14 = vpop.xlane.xlu1 %1830  ;;  %v3334_v1 = vunpack.c.l.b16 %v2798_v5 }
 0x2ad   :  { %v1799_v11 = vpop.xlane.xlu0 %1798  ;;  %v2287_v52 = vadd.f32 %v8192_v31, %v1831_v14  ;;  %v10837_v14 = vpop.f32.mrf.mxu0 }
 0x2ae   :  { %v2279_v43 = vadd.f32 %v8192_v31, %v1799_v11 }
 0x2af   :  { %v2543_v59 = vmax.f32 %v2287_v52, 0.0  ;;  %v10842_v52 = vadd.f32 %v10782_v58, %v10832_v26  ;;  %v10844_v55 = vpop.f32.mrf.mxu0  ;;  %v4147_v58 = vrot.slane %v3331_v57, %v11334_v9  ;;  %v10857_v57 = vpop.f32.mrf.mxu1 }
 0x2b0   :  { %v2535_v45 = vmax.f32 %v2279_v43, 0.0  ;;  %v2790_v43 = vpack.c.bf16 %v2534_v47, %v2534_v47 }
 0x2b1   :  { %v1835_v15 = vpop.xlane.xlu1 %1834  ;;  %v2799_v50 = vpack.c.bf16 %v2543_v59, %v2543_v59  ;;  %v10851_v47 = vpop.f32.mrf.mxu0  ;;  %v4143_v59 = vrot.slane %v3330_v6, %v11334_v9  ;;  %v4589_v6 = vsel %vm4428_vm2, %v4115_v36, %v4111_v44 }
 0x2b2   :  { %v2288_v54 = vadd.f32 %v8192_v31, %v1835_v15  ;;  %v1803_v11 = vpop.xlane.xlu0 %1802  ;;  %v3332_v15 = vunpack.c.l.b16 %v2796_v28  ;;  %v2791_v34 = vpack.c.bf16 %v2535_v45, %v2535_v45  ;;  %v3326_v28 = vunpack.c.l.b16 %v2790_v43 }
 0x2b3   :  { %v2280_v51 = vadd.f32 %v8192_v31, %v1803_v11  ;;  %v3333_v11 = vunpack.c.l.b16 %v2797_v0  ;;  %v3335_v45 = vunpack.c.l.b16 %v2799_v50  ;;  %v4123_v43 = vrot.slane %v3325_v29, %v11334_v9  ;;  %v10872_v29 = vpop.f32.mrf.mxu1 }
 0x2b4   :  { %v2544_v7 = vmax.f32 %v2288_v54, 0.0  ;;  %v3324_v54 = vunpack.c.l.b16 %v2788_v40  ;;  %v4151_v16 = vrot.slane %v3332_v15, %v11334_v9  ;;  %v3327_v62 = vunpack.c.l.b16 %v2791_v34  ;;  %v10864_v15 = vpop.f32.mrf.mxu0 }
 0x2b5   :  { %v2536_v32 = vmax.f32 %v2280_v51, 0.0  ;;  %v4155_v5 = vrot.slane %v3333_v11, %v11334_v9  ;;  %v4159_v50 = vrot.slane %v3334_v1, %v11334_v9  ;;  %v4596_v34 = vsel %vm4428_vm2, %v4147_v58, %v4143_v59 }
 0x2b6   :  { %v2800_v30 = vpack.c.bf16 %v2544_v7, %v2544_v7  ;;  %v4119_v12 = vrot.slane %v3324_v54, %v11334_v9  ;;  %v4597_v11 = vsel %vm4430_vm3, %v4151_v16, %v4596_v34  ;;  %v10881_v16 = vpop.f32.mrf.mxu1 }
 0x2b7   :  { %v2792_v3 = vpack.c.bf16 %v2536_v32, %v2536_v32  ;;  %v1839_v39 = vpop.xlane.xlu1 %1838 }
 0x2b8   :  { %v2289_v7 = vadd.f32 %v8192_v31, %v1839_v39  ;;  %v1807_v51 = vpop.xlane.xlu0 %1806  ;;  %v3336_v40 = vunpack.c.l.b16 %v2800_v30  ;;  %v4163_v30 = vrot.slane %v3335_v45, %v11334_v9  ;;  %v4590_v1 = vsel %vm4430_vm3, %v4119_v12, %v4589_v6 }
 0x2b9   :  { %v2281_v0 = vadd.f32 %v8192_v31, %v1807_v51  ;;  %v3328_v32 = vunpack.c.l.b16 %v2792_v3  ;;  %v4127_v31 = vrot.slane %v3326_v28, %v11334_v9  ;;  %v4131_v3 = vrot.slane %v3327_v62, %v11334_v9  ;;  %v4817_v62 = vpop.f32.mrf.mxu0 }
 0x2ba   :  { %v2545_v22 = vmax.f32 %v2289_v7, 0.0  ;;  %v4167_v36 = vrot.slane %v3336_v40, %v11334_v9  ;;  %v4598_v7 = vsel %vm4432_vm4, %v4155_v5, %v4597_v11  ;;  %v4784_v28 = vadd.f32 %v10763_v42, %v10832_v26 }
 0x2bb   :  { %v2537_v39 = vmax.f32 %v2281_v0, 0.0  ;;  %v4135_v58 = vrot.slane %v3328_v32, %v11334_v9  ;;  %v4599_v45 = vsel %vm4434_vm5, %v4159_v50, %v4598_v7  ;;  %v5138_v5 = vmax.f32 %v10842_v52, 0.0 }
 0x2bc   :  { %v2801_v54 = vpack.c.bf16 %v2545_v22, %v2545_v22  ;;  %v4591_v22 = vsel %vm4432_vm4, %v4123_v43, %v4590_v1  ;;  %v4600_v0 = vsel %vm4436_vm6, %v4163_v30, %v4599_v45  ;;  %v10890_v43 = vpop.f32.mrf.mxu0  ;;  %v5134_v34 = vmax.f32 %v4784_v28, 0.0 }
 0x2bd   :  { %v2793_v44 = vpack.c.bf16 %v2537_v39, %v2537_v39  ;;  %v4592_v40 = vsel %vm4434_vm5, %v4127_v31, %v4591_v22  ;;  %v4601_v42 = vsel %vm4438_vm7, %v4167_v36, %v4600_v0  ;;  %v4786_v30 = vadd.f32 %v10775_v17, %v9332_v8 }
 0x2be   :  { %v3337_v59 = vunpack.c.l.b16 %v2801_v54  ;;  %v4593_v32 = vsel %vm4436_vm6, %v4131_v3, %v4592_v40  ;;  %v10897_v54 = vpop.f32.mrf.mxu1  ;;  %v4798_v11 = vadd.f32 %v10798_v35, %v10832_v26  ;;  %v5262_v3 = vpack.c.bf16 %v5138_v5, %v5134_v34  ;;  %v10903_v36 = vpop.f32.mrf.mxu0 }
 0x2bf   :  { %v3329_v51 = vunpack.c.l.b16 %v2793_v44  ;;  %v4594_v50 = vsel %vm4438_vm7, %v4135_v58, %v4593_v32  ;;  %v4794_v44 = vadd.f32 %v10790_v2, %v10832_v26  ;;  %v5137_v17 = vmax.f32 %v4786_v30, 0.0 }
 0x2c0   :  { %v4171_v12 = vrot.slane %v3337_v59, %v11334_v9  ;;  %v10910_v1 = vpop.f32.mrf.mxu1  ;;  %v5146_v35 = vmax.f32 %v4798_v11, 0.0  ;;  %v10912_v58 = vpop.f32.mrf.mxu0  ;;  %v4796_v28 = vadd.f32 %v10792_v19, %v9332_v8  ;;  %v4808_v2 = vadd.f32 %v10837_v14, %v10832_v26 }
 0x2c1   :  { %v4139_v6 = vrot.slane %v3329_v51, %v11334_v9  ;;  %v4782_v9 = vadd.f32 %v10750_v23, %v9332_v8  ;;  %v5142_v23 = vmax.f32 %v4794_v44, 0.0  ;;  %v4792_v51 = vadd.f32 %v10786_v37, %v9332_v8 }
 0x2c2   :  { %v4602_v39 = vsel %vm4440_vm8, %v4171_v12, %v4601_v42  ;;  %v10916_v22 = vpop.f32.mrf.mxu1  ;;  %v4827_v0 = vpop.f32.mrf.mxu0  ;;  %v4804_v12 = vadd.f32 %v10809_v13, %v10832_v26  ;;  %v5145_v19 = vmax.f32 %v4796_v28, 0.0  ;;  %v5154_v14 = vmax.f32 %v4808_v2, 0.0 }
 0x2c3   :  { %v4595_v31 = vsel %vm4440_vm8, %v4139_v6, %v4594_v50  ;;  %v5133_v7 = vmax.f32 %v4782_v9, 0.0  ;;  %v5266_v45 = vpack.c.bf16 %v5146_v35, %v5142_v23  ;;  %v5141_v32 = vmax.f32 %v4792_v51, 0.0 }
 0x2c4   :  { %v4670_v52 = vpack.c.b16 %v4602_v39, %v4595_v31  ;;  %v10922_v40 = vpop.f32.mrf.mxu1  ;;  %v10929_v5 = vpop.f32.mrf.mxu0  ;;  %v5150_v37 = vmax.f32 %v4804_v12, 0.0  ;;  %v4806_v50 = vadd.f32 %v10820_v41, %v9332_v8  ;;  %v4818_v39 = vadd.f32 %v4817_v62, %v10832_v26 }
 0x2c5   :  { %v5261_v59 = vpack.c.bf16 %v5137_v17, %v5133_v7  ;;  %v5265_v6 = vpack.c.bf16 %v5145_v19, %v5141_v32  ;;  %v4802_v13 = vadd.f32 %v10801_v18, %v9332_v8  ;;  %v2884_v30 = vsub.s32 3, %v11369_v21 }
 0x2c6   :  { %6254 = vmatmul.mubr.msk.bf16.gmra.mxu0 %vm4685_vm9, %v4670_v52  ;;  %6271 = vmatmul.mubr.msk.bf16.gmra.mxu1 %vm4685_vm9, %v4670_v52  ;;  %v10931_v42 = vpop.f32.mrf.mxu1  ;;  %v5270_v34 = vpack.c.bf16 %v5154_v14, %v5150_v37  ;;  %v4814_v52 = vadd.f32 %v10851_v47, %v10832_v26  ;;  %v5153_v41 = vmax.f32 %v4806_v50, 0.0  ;;  %v5162_v11 = vmax.f32 %v4818_v39, 0.0 }
 0x2c7   :  { %5620 = vmatprep.mubr.bf16.mxu0 %v5262_v3  ;;  %5092 = vmatprep.mubr.bf16.mxu1 %v11341_v4  ;;  %v5149_v3 = vmax.f32 %v4802_v13, 0.0  ;;  %v10949_v18 = vrot.slane %v10827_v46, %v2884_v30  ;;  %v4816_v17 = vadd.f32 %v10864_v15, %v9332_v8  ;;  %v4828_v23 = vadd.f32 %v4827_v0, %v10832_v26 }
 0x2c8   :  { %v10938_v31 = vpop.f32.mrf.mxu1  ;;  %v5158_v44 = vmax.f32 %v4814_v52, 0.0  ;;  %v2880_v28 = vsub.s32 2, %v11369_v21  ;;  %v4812_v2 = vadd.f32 %v10844_v55, %v9332_v8  ;;  %v4822_v52 = vadd.f32 %v10890_v43, %v9332_v8 }
 0x2c9   :  { %v4981_v7 = vadd.f32 %v10822_v49, %v10949_v18  ;;  %v4977_v15 = vadd.f32 %v10805_v25, %v10949_v18  ;;  %v4824_v49 = vadd.f32 %v10903_v36, %v10832_v26  ;;  %v5161_v0 = vmax.f32 %v4816_v17, 0.0 }
 0x2ca   :  { %v10946_v9 = vpop.f32.mrf.mxu1  ;;  %v5170_v55 = vmax.f32 %v4828_v23, 0.0  ;;  %v10973_v19 = vrot.slane %v10827_v46, %v2880_v28  ;;  %v5157_v14 = vmax.f32 %v4812_v2, 0.0  ;;  %v4826_v36 = vadd.f32 %v10912_v58, %v9332_v8 }
 0x2cb   :  { %v5140_v12 = vmax.f32 %v4981_v7, 0.0  ;;  %v5136_v37 = vmax.f32 %v4977_v15, 0.0  ;;  %v4991_v39 = vadd.f32 %v10872_v29, %v10949_v18  ;;  %v4987_v58 = vadd.f32 %v10846_v56, %v10949_v18 }
 0x2cc   :  { %v10953_v35 = vpop.f32.mrf.mxu1  ;;  %v4979_v25 = vadd.f32 %v10813_v60, %v10973_v19  ;;  %v5273_v50 = vpack.c.bf16 %v5161_v0, %v5157_v14  ;;  %v4975_v30 = vadd.f32 %v10796_v61, %v10973_v19  ;;  %v5165_v17 = vmax.f32 %v4822_v52, 0.0 }
 0x2cd   :  { %v5264_v13 = vpack.c.bf16 %v5140_v12, %v5136_v37  ;;  %v4989_v56 = vadd.f32 %v10857_v57, %v10973_v19  ;;  %v5001_v28 = vadd.f32 %v10916_v22, %v10949_v18  ;;  %v4832_v0 = vadd.f32 %v10929_v5, %v9332_v8 }
 0x2ce   :  { %6272 = vmatmul.mubr.msk.bf16.gmra.mxu1 %vm4685_vm9, %v8475_v27  ;;  %5621 = vmatmul.mubr.bf16.vlgmr.msra.gmra.mxu0 %v5261_v59  ;;  %v4833_v27 = vpop.f32.mrf.mxu0  ;;  %v5274_v59 = vpack.c.bf16 %v5162_v11, %v5158_v44  ;;  %v10970_v21 = vpop.f32.mrf.mxu1  ;;  %v5169_v11 = vmax.f32 %v4826_v36, 0.0  ;;  %v5148_v44 = vmax.f32 %v4991_v39, 0.0  ;;  %v4997_v57 = vadd.f32 %v10897_v54, %v10949_v18 }
 0x2cf   :  { %5628 = vmatprep.mubr.bf16.mxu0 %v5266_v45  ;;  %5102 = vmatprep.mubr.bf16.mxu1 %v11341_v4  ;;  %v11379_v45 = vld [vmem:[#allocation11_spill] sm:$0xff]  ;;  %v4834_v29 = vadd.f32 %v4833_v27, %v10832_v26  ;;  %v5147_v22 = vmax.f32 %v4989_v56, 0.0  ;;  %v5156_v14 = vmax.f32 %v5001_v28, 0.0  ;;  %v4999_v39 = vadd.f32 %v10910_v1, %v10973_v19 }
 0x2d0   :  { %v4835_v62 = vpop.f32.mrf.mxu0  ;;  %v5152_v5 = vmax.f32 %v4997_v57, 0.0  ;;  %v5007_v1 = vadd.f32 %v10931_v42, %v10949_v18  ;;  %v5005_v42 = vadd.f32 %v10922_v40, %v10973_v19 }
 0x2d1   :  { %v5174_v7 = vmax.f32 %v4834_v29, 0.0  ;;  %v4836_v27 = vadd.f32 %v4835_v62, %v9332_v8 }
 0x2d2   :  { %v4837_v47 = vpop.f32.mrf.mxu0 }
 0x2d6   :  { %6273 = vmatmul.mubr.msk.bf16.gmra.mxu1 %vm4685_vm9, %v8647_v38  ;;  %5629 = vmatmul.mubr.bf16.gmra.mxu0 %v5265_v6  ;;  %v5269_v38 = vpack.c.bf16 %v5153_v41, %v5149_v3  ;;  %v5166_v6 = vmax.f32 %v4824_v49, 0.0  ;;  %v5139_v41 = vmax.f32 %v4979_v25, 0.0  ;;  %v4985_v49 = vadd.f32 %v10834_v10, %v10973_v19 }
 0x2d7   :  { %5636 = vmatprep.mubr.bf16.mxu0 %v5270_v34  ;;  %5112 = vmatprep.mubr.bf16.mxu1 %v11341_v4  ;;  %v4838_v34 = vadd.f32 %v4837_v47, %v10832_v26  ;;  %v5173_v10 = vmax.f32 %v4832_v0, 0.0 }
 0x2d8   :  { %v5278_v46 = vpack.c.bf16 %v5170_v55, %v5166_v6  ;;  %v5177_v55 = vmax.f32 %v4836_v27, 0.0  ;;  %v5143_v6 = vmax.f32 %v4985_v49, 0.0 }
 0x2d9   :  { %v5178_v61 = vmax.f32 %v4838_v34, 0.0 }
 0x2da   :  { %v5267_v36 = vpack.c.bf16 %v5147_v22, %v5143_v6  ;;  %v5281_v34 = vpack.c.bf16 %v5177_v55, %v5173_v10 }
 0x2de   :  { %6274 = vmatmul.mubr.msk.bf16.gmra.mxu1 %vm4685_vm9, %v11379_v45  ;;  %5637 = vmatmul.mubr.bf16.gmra.mxu0 %v5269_v38  ;;  %v5135_v38 = vmax.f32 %v4975_v30, 0.0  ;;  %v5282_v45 = vpack.c.bf16 %v5178_v61, %v5174_v7  ;;  %v4995_v30 = vadd.f32 %v10881_v16, %v10973_v19  ;;  %v5160_v61 = vmax.f32 %v5007_v1, 0.0 }
 0x2df   :  { %v10963_v51 = vpop.f32.mrf.mxu0  ;;  %5644 = vmatprep.mubr.bf16.mxu0 %v5274_v59  ;;  %5122 = vmatprep.mubr.bf16.mxu1 %v11341_v4  ;;  %v10979_v4 = vpop.f32.mrf.mxu1  ;;  %v5277_v59 = vpack.c.bf16 %v5169_v11, %v5165_v17 }
 0x2e0   :  { %v5263_v23 = vpack.c.bf16 %v5139_v41, %v5135_v38  ;;  %v5151_v11 = vmax.f32 %v4995_v30, 0.0  ;;  %v5009_v38 = vadd.f32 %v10938_v31, %v10973_v19  ;;  %v5159_v31 = vmax.f32 %v5005_v42, 0.0 }
 0x2e1   :  { %v4843_v32 = vpop.f32.mrf.mxu0  ;;  %v5020_v3 = vpop.f32.mrf.mxu1  ;;  %v5019_v40 = vadd.f32 %v10979_v4, %v10973_v19 }
 0x2e2   :  { %v4844_v62 = vadd.f32 %v4843_v32, %v10832_v26  ;;  %v5011_v32 = vadd.f32 %v10946_v9, %v10949_v18  ;;  %v5163_v56 = vmax.f32 %v5009_v38, 0.0 }
 0x2e3   :  { %v4845_v60 = vpop.f32.mrf.mxu0  ;;  %v10993_v43 = vpop.f32.mrf.mxu1 }
 0x2e4   :  { %v4846_v54 = vadd.f32 %v4845_v60, %v9332_v8  ;;  %v5155_v60 = vmax.f32 %v4999_v39, 0.0  ;;  %v5164_v41 = vmax.f32 %v5011_v32, 0.0  ;;  %v5275_v49 = vpack.c.bf16 %v5163_v56, %v5159_v31 }
 0x2e5   :  { %v4847_v47 = vpop.f32.mrf.mxu0  ;;  %v11005_v12 = vpop.f32.mrf.mxu1 }
 0x2e6   :  { %6275 = vmatmul.mubr.msk.bf16.gmra.mxu1 %vm4685_vm9, %v9004_v20  ;;  %5645 = vmatmul.mubr.bf16.gmra.mxu0 %v5273_v50  ;;  %v5144_v20 = vmax.f32 %v4987_v58, 0.0  ;;  %v4848_v2 = vadd.f32 %v4847_v47, %v10832_v26  ;;  %v5182_v50 = vmax.f32 %v4844_v62, 0.0  ;;  %v4842_v58 = vadd.f32 %v10963_v51, %v9332_v8 }
 0x2e7   :  { %5652 = vmatprep.mubr.bf16.mxu0 %v5278_v46  ;;  %5781 = vmatprep.mubr.bf16.mxu1 %v5264_v13  ;;  %v11010_v25 = vpop.f32.mrf.mxu1  ;;  %v5272_v13 = vpack.c.bf16 %v5156_v14, %v5152_v5  ;;  %v5185_v9 = vmax.f32 %v4846_v54, 0.0  ;;  %v5271_v16 = vpack.c.bf16 %v5155_v60, %v5151_v11  ;;  %v5021_v47 = vadd.f32 %v5020_v3, %v10949_v18 }
 0x2e8   :  { %v5268_v15 = vpack.c.bf16 %v5148_v44, %v5144_v20  ;;  %v5186_v37 = vmax.f32 %v4848_v2, 0.0  ;;  %v5181_v44 = vmax.f32 %v4842_v58, 0.0  ;;  %v5276_v20 = vpack.c.bf16 %v5164_v41, %v5160_v61 }
 0x2e9   :  { %v5030_v52 = vpop.f32.mrf.mxu1  ;;  %v5172_v28 = vmax.f32 %v5021_v47, 0.0  ;;  %v5015_v14 = vadd.f32 %v10953_v35, %v10973_v19  ;;  %v5027_v10 = vadd.f32 %v11005_v12, %v10949_v18  ;;  %v5029_v35 = vadd.f32 %v11010_v25, %v10973_v19 }
 0x2ea   :  { %v5286_v46 = vpack.c.bf16 %v5186_v37, %v5182_v50  ;;  %v5285_v17 = vpack.c.bf16 %v5185_v9, %v5181_v44  ;;  %v5031_v22 = vadd.f32 %v5030_v52, %v10949_v18  ;;  %v5171_v50 = vmax.f32 %v5019_v40, 0.0 }
 0x2eb   :  { %v11023_v29 = vpop.f32.mrf.mxu1  ;;  %v5167_v54 = vmax.f32 %v5015_v14, 0.0  ;;  %v5025_v58 = vadd.f32 %v10993_v43, %v10973_v19  ;;  %v5179_v9 = vmax.f32 %v5029_v35, 0.0 }
 0x2ec   :  { %v5180_v39 = vmax.f32 %v5031_v22, 0.0  ;;  %v5035_v47 = vadd.f32 %v11023_v29, %v10973_v19 }
 0x2ed   :  { %v5036_v51 = vpop.f32.mrf.mxu1  ;;  %v5279_v30 = vpack.c.bf16 %v5171_v50, %v5167_v54  ;;  %v5175_v11 = vmax.f32 %v5025_v58, 0.0  ;;  %v6658_v58 = vld [vmem:[%s11289_s7 + $0x28] sm:$0xff]  }
 0x2ee   :  { %5653 = vmatmul.mubr.bf16.gmra.mxu0 %v5277_v59  ;;  %5782 = vmatmul.mubr.bf16.vlgmr.msra.gmra.mxu1 %v5263_v23  ;;  %v5017_v23 = vadd.f32 %v10970_v21, %v10949_v18  ;;  %v5037_v60 = vadd.f32 %v5036_v51, %v10949_v18  ;;  %v5183_v42 = vmax.f32 %v5035_v47, 0.0 }
 0x2ef   :  { %5660 = vmatprep.mubr.bf16.mxu0 %v5282_v45  ;;  %5789 = vmatprep.mubr.bf16.mxu1 %v5268_v15  ;;  %v5038_v59 = vpop.f32.mrf.mxu1 }
 0x2f0   :  { %v5168_v45 = vmax.f32 %v5017_v23, 0.0  ;;  %v5184_v61 = vmax.f32 %v5037_v60, 0.0  ;;  %v5039_v25 = vadd.f32 %v5038_v59, %v10973_v19 }
 0x2f1   :  { %v5040_v0 = vpop.f32.mrf.mxu1 }
 0x2f2   :  { %v5280_v62 = vpack.c.bf16 %v5172_v28, %v5168_v45  ;;  %v5041_v12 = vadd.f32 %v5040_v0, %v10949_v18  ;;  %v5187_v51 = vmax.f32 %v5039_v25, 0.0 }
 0x2f4   :  { %v5188_v41 = vmax.f32 %v5041_v12, 0.0  ;;  %v5287_v28 = vpack.c.bf16 %v5187_v51, %v5183_v42 }
 0x2f6   :  { %5661 = vmatmul.mubr.bf16.gmra.mxu0 %v5281_v34  ;;  %5790 = vmatmul.mubr.bf16.gmra.mxu1 %v5267_v36  ;;  %v5288_v38 = vpack.c.bf16 %v5188_v41, %v5184_v61 }
 0x2f7   :  { %5668 = vmatprep.mubr.bf16.mxu0 %v5286_v46  ;;  %5797 = vmatprep.mubr.bf16.mxu1 %v5272_v13  ;;  %v5176_v13 = vmax.f32 %v5027_v10, 0.0 }
 0x2f9   :  { %v5284_v52 = vpack.c.bf16 %v5180_v39, %v5176_v13 }
 0x2fc   :  { %v4851_v7 = vpop.f32.mrf.mxu0  ;;  %v5044_v37 = vpop.f32.mrf.mxu1 }
 0x2fd   :  { %v4852_v57 = vadd.f32 %v4851_v7, %v9332_v8  ;;  %v5045_v59 = vadd.f32 %v5044_v37, %v10973_v19 }
 0x2fe   :  { %5669 = vmatmul.mubr.bf16.gmra.mxu0 %v5285_v17  ;;  %5798 = vmatmul.mubr.bf16.gmra.mxu1 %v5271_v16  ;;  %v4853_v27 = vpop.f32.mrf.mxu0  ;;  %v5046_v32 = vpop.f32.mrf.mxu1  ;;  %v5283_v16 = vpack.c.bf16 %v5179_v9, %v5175_v11 }
 0x2ff   :  { %5805 = vmatprep.mubr.bf16.mxu1 %v5276_v20  ;;  %v4854_v3 = vadd.f32 %v4853_v27, %v10832_v26  ;;  %v5189_v36 = vmax.f32 %v4852_v57, 0.0  ;;  %v5047_v43 = vadd.f32 %v5046_v32, %v10949_v18  ;;  %v5191_v57 = vmax.f32 %v5045_v59, 0.0 }
 0x300   :  { %v4855_v2 = vpop.f32.mrf.mxu0  ;;  %v5048_v1 = vpop.f32.mrf.mxu1 }
 0x301   :  { %v4856_v15 = vadd.f32 %v4855_v2, %v9332_v8  ;;  %v5190_v4 = vmax.f32 %v4854_v3, 0.0  ;;  %v5192_v7 = vmax.f32 %v5047_v43, 0.0  ;;  %v5049_v23 = vadd.f32 %v5048_v1, %v10973_v19  ;;  %v6659_v1 = vld [vmem:[%s11289_s7 + $0x20] sm:$0xff]  }
 0x302   :  { %v4857_v21 = vpop.f32.mrf.mxu0  ;;  %v5050_v44 = vpop.f32.mrf.mxu1 }
 0x303   :  { %v4858_v55 = vadd.f32 %v4857_v21, %v10832_v26  ;;  %v5193_v6 = vmax.f32 %v4856_v15, 0.0  ;;  %v5051_v17 = vadd.f32 %v5050_v44, %v10949_v18  ;;  %v5195_v29 = vmax.f32 %v5049_v23, 0.0  ;;  %v6660_v44 = vld [vmem:[%s11289_s7 + $0x18] sm:$0xff]  }
 0x305   :  { %v5194_v5 = vmax.f32 %v4858_v55, 0.0  ;;  %v5289_v46 = vpack.c.bf16 %v5193_v6, %v5189_v36  ;;  %v5196_v20 = vmax.f32 %v5051_v17, 0.0  ;;  %v5291_v37 = vpack.c.bf16 %v5195_v29, %v5191_v57  ;;  %v6662_v57 = vld [vmem:[%s11289_s7 + $0x8] sm:$0xff]  }
 0x306   :  { %5806 = vmatmul.mubr.bf16.gmra.mxu1 %v5275_v49 }
 0x307   :  { %5813 = vmatprep.mubr.bf16.mxu1 %v5280_v62  ;;  %v5290_v34 = vpack.c.bf16 %v5194_v5, %v5190_v4  ;;  %v5292_v31 = vpack.c.bf16 %v5196_v20, %v5192_v7  ;;  %v6661_v7 = vld [vmem:[%s11289_s7 + $0x10] sm:$0xff]  }
 0x309   :  { %5676 = vmatprep.mubr.bf16.mxu0 %v5290_v34 }
 0x30a   :  { %5677 = vmatmul.mubr.bf16.gmra.mxu0 %v5289_v46 }
 0x30e   :  { %5814 = vmatmul.mubr.bf16.gmra.mxu1 %v5279_v30  ;;  %v6656_v30 = vld [vmem:[%s11289_s7 + $0x38] sm:$0xff]  }
 0x30f   :  { %5821 = vmatprep.mubr.bf16.mxu1 %v5284_v52  ;;  %6566 = vmatprep.subr.bf16.mxu0 %v6656_v30  ;;  %v6657_v52 = vld [vmem:[%s11289_s7 + $0x30] sm:$0xff]  }
 0x310   :  { %6567 = vmatpush3.bf16.msra.mxu0 %v6656_v30 }
 0x311   :  { %6568 = vmatprep.subr.bf16.mxu0 %v6657_v52 }
 0x314   :  { %v4861_v56 = vpop.f32.mrf.mxu0  ;;  %v5054_v27 = vpop.f32.mrf.mxu1  ;;  %6569 = vmatpush3.bf16.msra.mxu0 %v6657_v52 }
 0x315   :  { %v4862_v21 = vadd.f32 %v4861_v56, %v9332_v8  ;;  %v5055_v34 = vadd.f32 %v5054_v27, %v10973_v19  ;;  %6570 = vmatprep.subr.bf16.mxu0 %v6658_v58 }
 0x316   :  { %5822 = vmatmul.mubr.bf16.gmra.mxu1 %v5283_v16  ;;  %v4863_v2 = vpop.f32.mrf.mxu0  ;;  %v5056_v45 = vpop.f32.mrf.mxu1 }
 0x317   :  { %5829 = vmatprep.mubr.bf16.mxu1 %v5288_v38  ;;  %v4864_v3 = vadd.f32 %v4863_v2, %v10832_v26  ;;  %v5057_v40 = vadd.f32 %v5056_v45, %v10949_v18  ;;  %v5197_v39 = vmax.f32 %v4862_v21, 0.0  ;;  %v5199_v35 = vmax.f32 %v5055_v34, 0.0  ;;  %v6663_v21 = vld [vmem:[%s11289_s7] sm:$0xff]  }
 0x318   :  { %v4865_v15 = vpop.f32.mrf.mxu0  ;;  %v5058_v49 = vpop.f32.mrf.mxu1  ;;  %6571 = vmatpush3.bf16.msra.mxu0 %v6658_v58 }
 0x319   :  { %v4866_v0 = vadd.f32 %v4865_v15, %v9332_v8  ;;  %v5198_v6 = vmax.f32 %v4864_v3, 0.0  ;;  %v5200_v4 = vmax.f32 %v5057_v40, 0.0  ;;  %v5059_v5 = vadd.f32 %v5058_v49, %v10973_v19  ;;  %6572 = vmatprep.subr.bf16.mxu0 %v6659_v1 }
 0x31a   :  { %v4867_v62 = vpop.f32.mrf.mxu0  ;;  %v5060_v22 = vpop.f32.mrf.mxu1 }
 0x31b   :  { %v4868_v55 = vadd.f32 %v4867_v62, %v10832_v26  ;;  %v5061_v14 = vadd.f32 %v5060_v22, %v10949_v18  ;;  %v5201_v10 = vmax.f32 %v4866_v0, 0.0  ;;  %v5203_v13 = vmax.f32 %v5059_v5, 0.0 }
 0x31c   :  { %6573 = vmatpush3.bf16.msra.mxu0 %v6659_v1 }
 0x31d   :  { %v5202_v50 = vmax.f32 %v4868_v55, 0.0  ;;  %v5204_v36 = vmax.f32 %v5061_v14, 0.0  ;;  %v5293_v46 = vpack.c.bf16 %v5201_v10, %v5197_v39  ;;  %v5295_v12 = vpack.c.bf16 %v5203_v13, %v5199_v35  ;;  %6574 = vmatprep.subr.bf16.mxu0 %v6660_v44 }
 0x31e   :  { %5830 = vmatmul.mubr.bf16.gmra.mxu1 %v5287_v28 }
 0x31f   :  { %5837 = vmatprep.mubr.bf16.mxu1 %v5292_v31  ;;  %v5294_v54 = vpack.c.bf16 %v5202_v50, %v5198_v6  ;;  %v5296_v32 = vpack.c.bf16 %v5204_v36, %v5200_v4 }
 0x320   :  { %6575 = vmatpush3.bf16.msra.mxu0 %v6660_v44 }
 0x321   :  { %5684 = vmatprep.mubr.bf16.mxu0 %v5294_v54  ;;  %6576 = vmatprep.subr.bf16.mxu0 %v6661_v7 }
 0x322   :  { %5685 = vmatmul.mubr.bf16.gmra.mxu0 %v5293_v46 }
 0x324   :  { %6577 = vmatpush3.bf16.msra.mxu0 %v6661_v7 }
 0x325   :  { %6578 = vmatprep.subr.bf16.mxu0 %v6662_v57 }
 0x326   :  { %5838 = vmatmul.mubr.bf16.gmra.mxu1 %v5291_v37 }
 0x327   :  { %5845 = vmatprep.mubr.bf16.mxu1 %v5296_v32 }
 0x328   :  { %6579 = vmatpush3.bf16.msra.mxu0 %v6662_v57 }
 0x329   :  { %6580 = vmatprep.subr.bf16.mxu0 %v6663_v21 }
 0x32c   :  { %6581 = vmatpush3.bf16.msra.mxu0 %v6663_v21 }
 0x32e   :  { %5846 = vmatmul.mubr.bf16.gmra.mxu1 %v5295_v12 }
 0x334   :  { %v4871_v60 = vpop.f32.mrf.mxu0  ;;  %v5064_v9 = vpop.f32.mrf.mxu1 }
 0x335   :  { %v4872_v43 = vadd.f32 %v4871_v60, %v9332_v8  ;;  %v5065_v51 = vadd.f32 %v5064_v9, %v10973_v19 }
 0x336   :  { %v4873_v41 = vpop.f32.mrf.mxu0  ;;  %v5066_v11 = vpop.f32.mrf.mxu1 }
 0x337   :  { %v4874_v25 = vadd.f32 %v4873_v41, %v10832_v26  ;;  %v5067_v38 = vadd.f32 %v5066_v11, %v10949_v18  ;;  %v5205_v29 = vmax.f32 %v4872_v43, 0.0  ;;  %v5207_v3 = vmax.f32 %v5065_v51, 0.0 }
 0x338   :  { %v4875_v61 = vpop.f32.mrf.mxu0  ;;  %v5068_v16 = vpop.f32.mrf.mxu1 }
 0x339   :  { %v4876_v17 = vadd.f32 %v4875_v61, %v9332_v8  ;;  %v5069_v47 = vadd.f32 %v5068_v16, %v10973_v19  ;;  %v5206_v59 = vmax.f32 %v4874_v25, 0.0  ;;  %v5208_v31 = vmax.f32 %v5067_v38, 0.0 }
 0x33a   :  { %v4877_v20 = vpop.f32.mrf.mxu0  ;;  %v5070_v42 = vpop.f32.mrf.mxu1 }
 0x33b   :  { %v4878_v23 = vadd.f32 %v4877_v20, %v10832_v26  ;;  %v5071_v56 = vadd.f32 %v5070_v42, %v10949_v18  ;;  %v5209_v27 = vmax.f32 %v4876_v17, 0.0  ;;  %v5211_v28 = vmax.f32 %v5069_v47, 0.0 }
 0x33c   :  { %v4908_v17 = vadd.f32 %v9569_v33, %v10832_v26 }
 0x33d   :  { %v5210_v2 = vmax.f32 %v4878_v23, 0.0  ;;  %v5212_v45 = vmax.f32 %v5071_v56, 0.0  ;;  %v5297_v40 = vpack.c.bf16 %v5209_v27, %v5205_v29  ;;  %v5299_v0 = vpack.c.bf16 %v5211_v28, %v5207_v3 }
 0x33f   :  { %v5298_v15 = vpack.c.bf16 %v5210_v2, %v5206_v59  ;;  %v5300_v49 = vpack.c.bf16 %v5212_v45, %v5208_v31  ;;  %v4904_v59 = vadd.f32 %v9459_v53, %v10832_v26  ;;  %v5234_v2 = vmax.f32 %v4908_v17, 0.0 }
 0x341   :  { %5692 = vmatprep.mubr.bf16.mxu0 %v5298_v15  ;;  %5853 = vmatprep.mubr.bf16.mxu1 %v5300_v49  ;;  %v5230_v53 = vmax.f32 %v4904_v59, 0.0 }
 0x342   :  { %5693 = vmatmul.mubr.bf16.gmra.mxu0 %v5297_v40  ;;  %5854 = vmatmul.mubr.bf16.gmra.mxu1 %v5299_v0 }
 0x35a   :  { %v4881_v62 = vpop.f32.mrf.mxu0  ;;  %v5074_v22 = vpop.f32.mrf.mxu1 }
 0x35b   :  { %v4882_v36 = vadd.f32 %v4881_v62, %v9332_v8  ;;  %v5075_v39 = vadd.f32 %v5074_v22, %v10973_v19 }
 0x35c   :  { %v4883_v55 = vpop.f32.mrf.mxu0  ;;  %v5076_v14 = vpop.f32.mrf.mxu1 }
 0x35d   :  { %v4884_v10 = vadd.f32 %v4883_v55, %v10832_v26  ;;  %v5077_v4 = vadd.f32 %v5076_v14, %v10949_v18  ;;  %v5213_v1 = vmax.f32 %v4882_v36, 0.0  ;;  %v5215_v60 = vmax.f32 %v5075_v39, 0.0 }
 0x35e   :  { %v4885_v37 = vpop.f32.mrf.mxu0  ;;  %v5078_v6 = vpop.f32.mrf.mxu1  ;;  %v5310_v39 = vpack.c.bf16 %v5234_v2, %v5230_v53 }
 0x35f   :  { %v4886_v5 = vadd.f32 %v4885_v37, %v9332_v8  ;;  %v5079_v50 = vadd.f32 %v5078_v6, %v10973_v19  ;;  %v5214_v35 = vmax.f32 %v4884_v10, 0.0  ;;  %v5216_v52 = vmax.f32 %v5077_v4, 0.0 }
 0x360   :  { %v4887_v34 = vpop.f32.mrf.mxu0  ;;  %v5080_v54 = vpop.f32.mrf.mxu1  ;;  %v4918_v37 = vadd.f32 %v9780_v48, %v10832_v26  ;;  %v4914_v48 = vadd.f32 %v9596_v24, %v10832_v26  ;;  %v4928_v24 = vadd.f32 %v10096_v63, %v10832_v26 }
 0x361   :  { %v4888_v32 = vadd.f32 %v4887_v34, %v10832_v26  ;;  %v5081_v46 = vadd.f32 %v5080_v54, %v10949_v18  ;;  %v5217_v13 = vmax.f32 %v4886_v5, 0.0  ;;  %v5219_v30 = vmax.f32 %v5079_v50, 0.0 }
 0x363   :  { %v5218_v12 = vmax.f32 %v4888_v32, 0.0  ;;  %v5220_v58 = vmax.f32 %v5081_v46, 0.0  ;;  %v5301_v11 = vpack.c.bf16 %v5217_v13, %v5213_v1  ;;  %v5303_v44 = vpack.c.bf16 %v5219_v30, %v5215_v60 }
 0x365   :  { %v5302_v9 = vpack.c.bf16 %v5218_v12, %v5214_v35  ;;  %v5304_v41 = vpack.c.bf16 %v5220_v58, %v5216_v52  ;;  %v5242_v52 = vmax.f32 %v4918_v37, 0.0 }
 0x367   :  { %5700 = vmatprep.mubr.bf16.mxu0 %v5302_v9  ;;  %5861 = vmatprep.mubr.bf16.mxu1 %v5304_v41  ;;  %v5238_v41 = vmax.f32 %v4914_v48, 0.0 }
 0x368   :  { %5701 = vmatmul.mubr.bf16.gmra.mxu0 %v5301_v11  ;;  %5862 = vmatmul.mubr.bf16.gmra.mxu1 %v5303_v44 }
 0x369   :  { %v5314_v17 = vpack.c.bf16 %v5242_v52, %v5238_v41 }
 0x386   :  { %v4891_v61 = vpop.f32.mrf.mxu0  ;;  %v5084_v16 = vpop.f32.mrf.mxu1 }
 0x387   :  { %v4892_v23 = vadd.f32 %v4891_v61, %v9332_v8  ;;  %v5085_v56 = vadd.f32 %v5084_v16, %v10973_v19 }
 0x388   :  { %v4893_v25 = vpop.f32.mrf.mxu0  ;;  %v5086_v38 = vpop.f32.mrf.mxu1 }
 0x389   :  { %v4894_v51 = vadd.f32 %v4893_v25, %v10832_v26  ;;  %v5087_v20 = vadd.f32 %v5086_v38, %v10949_v18  ;;  %v5221_v57 = vmax.f32 %v4892_v23, 0.0  ;;  %v5223_v21 = vmax.f32 %v5085_v56, 0.0 }
 0x38a   :  { %v4895_v47 = vpop.f32.mrf.mxu0  ;;  %v5088_v43 = vpop.f32.mrf.mxu1 }
 0x38b   :  { %v4896_v42 = vadd.f32 %v4895_v47, %v9332_v8  ;;  %v5089_v7 = vadd.f32 %v5088_v43, %v10973_v19  ;;  %v5222_v49 = vmax.f32 %v4894_v51, 0.0  ;;  %v5224_v40 = vmax.f32 %v5087_v20, 0.0  ;;  %v11380_v20 = vld [vmem:[#allocation12_spill] sm:$0xff] }
 0x38c   :  { %v4897_v27 = vpop.f32.mrf.mxu0  ;;  %v5090_v28 = vpop.f32.mrf.mxu1 }
 0x38d   :  { %v4898_v33 = vadd.f32 %v4897_v27, %v10832_v26  ;;  %v5091_v31 = vadd.f32 %v5090_v28, %v10949_v18  ;;  %v5225_v45 = vmax.f32 %v4896_v42, 0.0  ;;  %v5227_v29 = vmax.f32 %v5089_v7, 0.0  ;;  %v11381_v42 = vld [vmem:[#allocation14_spill] sm:$0xff] }
 0x38e   :  { %v5094_v3 = vpop.f32.mrf.mxu1  ;;  %v11116_v15 = vpop.f32.mrf.mxu0  ;;  %v4924_v7 = vadd.f32 %v11381_v42, %v10832_v26  ;;  %v5250_v28 = vmax.f32 %v4928_v24, 0.0 }
 0x38f   :  { %v5226_v8 = vmax.f32 %v4898_v33, 0.0  ;;  %v5228_v0 = vmax.f32 %v5091_v31, 0.0  ;;  %v5305_v6 = vpack.c.bf16 %v5225_v45, %v5221_v57  ;;  %v5307_v10 = vpack.c.bf16 %v5227_v29, %v5223_v21 }
 0x390   :  { %v5096_v62 = vpop.f32.mrf.mxu1  ;;  %v11118_v22 = vpop.f32.mrf.mxu0  ;;  %v5095_v34 = vadd.f32 %v5094_v3, %v10973_v19  ;;  %v5246_v29 = vmax.f32 %v4924_v7, 0.0 }
 0x391   :  { %v5306_v55 = vpack.c.bf16 %v5226_v8, %v5222_v49  ;;  %v5308_v14 = vpack.c.bf16 %v5228_v0, %v5224_v40  ;;  %v5097_v50 = vadd.f32 %v5096_v62, %v10949_v18  ;;  %v11382_v0 = vld [vmem:[#allocation18_spill] sm:$0xff]  ;;  %v6336_v42 = vadd.f32 %v11118_v22, %v11116_v15 }
 0x392   :  { %v5098_v4 = vpop.f32.mrf.mxu1  ;;  %v11122_v5 = vpop.f32.mrf.mxu0  ;;  %v5231_v1 = vmax.f32 %v5095_v34, 0.0  ;;  %v4938_v57 = vadd.f32 %v11382_v0, %v10832_v26  ;;  %v5318_v53 = vpack.c.bf16 %v5250_v28, %v5246_v29  ;;  %v11386_v29 = vld [vmem:[#allocation17_spill] sm:$0xff] }
 0x393   :  { %v5099_v36 = vadd.f32 %v5098_v4, %v10973_v19  ;;  %5708 = vmatprep.mubr.bf16.mxu0 %v5306_v55  ;;  %5869 = vmatprep.mubr.bf16.mxu1 %v5308_v14  ;;  %v5232_v12 = vmax.f32 %v5097_v50, 0.0 }
 0x394   :  { %v5100_v54 = vpop.f32.mrf.mxu1  ;;  %v11127_v32 = vpop.f32.mrf.mxu0  ;;  %5709 = vmatmul.mubr.bf16.gmra.mxu0 %v5305_v6  ;;  %5870 = vmatmul.mubr.bf16.gmra.mxu1 %v5307_v10  ;;  %v11383_v6 = vld [vmem:[#allocation13_spill] sm:$0xff]  ;;  %v11384_v10 = vld [vmem:[#allocation16_spill] sm:$0xff] }
 0x395   :  { %v5101_v46 = vadd.f32 %v5100_v54, %v10949_v18  ;;  %5716 = vmatprep.mubr.bf16.mxu0 %v5310_v39  ;;  %v5235_v13 = vmax.f32 %v5099_v36, 0.0  ;;  %v4934_v4 = vadd.f32 %v11384_v10, %v10832_v26  ;;  %v5258_v54 = vmax.f32 %v4938_v57, 0.0 }
 0x396   :  { %v5104_v30 = vpop.f32.mrf.mxu1  ;;  %v11132_v35 = vpop.f32.mrf.mxu0 }
 0x397   :  { %v5236_v58 = vmax.f32 %v5101_v46, 0.0  ;;  %v5311_v44 = vpack.c.bf16 %v5235_v13, %v5231_v1  ;;  %v5105_v47 = vadd.f32 %v5104_v30, %v10973_v19 }
 0x398   :  { %v5106_v60 = vpop.f32.mrf.mxu1  ;;  %v11134_v9 = vpop.f32.mrf.mxu0 }
 0x399   :  { %v5312_v11 = vpack.c.bf16 %v5236_v58, %v5232_v12  ;;  %v5107_v25 = vadd.f32 %v5106_v60, %v10949_v18  ;;  %v5239_v31 = vmax.f32 %v5105_v47, 0.0  ;;  %v5254_v12 = vmax.f32 %v4934_v4, 0.0 }
 0x39a   :  { %v5108_v61 = vpop.f32.mrf.mxu1  ;;  %v11136_v16 = vpop.f32.mrf.mxu0 }
 0x39b   :  { %v5109_v38 = vadd.f32 %v5108_v61, %v10973_v19  ;;  %5877 = vmatprep.mubr.bf16.mxu1 %v5312_v11  ;;  %v5240_v59 = vmax.f32 %v5107_v25, 0.0 }
 0x39c   :  { %v5110_v43 = vpop.f32.mrf.mxu1  ;;  %v11143_v51 = vpop.f32.mrf.mxu0  ;;  %5717 = vmatmul.mubr.bf16.gmra.mxu0 %v11380_v20  ;;  %5878 = vmatmul.mubr.bf16.gmra.mxu1 %v5311_v44  ;;  %v5322_v44 = vpack.c.bf16 %v5258_v54, %v5254_v12 }
 0x39d   :  { %v5111_v23 = vadd.f32 %v5110_v43, %v10949_v18  ;;  %5724 = vmatprep.mubr.bf16.mxu0 %v5314_v17  ;;  %v5243_v63 = vmax.f32 %v5109_v38, 0.0  ;;  %v11385_v38 = vld [vmem:[#allocation15_spill] sm:$0xff] }
 0x39e   :  { %v5114_v56 = vpop.f32.mrf.mxu1  ;;  %v11149_v27 = vpop.f32.mrf.mxu0 }
 0x39f   :  { %v5244_v33 = vmax.f32 %v5111_v23, 0.0  ;;  %v5315_v49 = vpack.c.bf16 %v5243_v63, %v5239_v31  ;;  %v5115_v55 = vadd.f32 %v5114_v56, %v10973_v19 }
 0x3a0   :  { %v5116_v2 = vpop.f32.mrf.mxu1  ;;  %v11151_v45 = vpop.f32.mrf.mxu0 }
 0x3a1   :  { %v5316_v3 = vpack.c.bf16 %v5244_v33, %v5240_v59  ;;  %v5117_v21 = vadd.f32 %v5116_v2, %v10949_v18  ;;  %v5247_v13 = vmax.f32 %v5115_v55, 0.0 }
 0x3a2   :  { %v5118_v40 = vpop.f32.mrf.mxu1  ;;  %v11153_v8 = vpop.f32.mrf.mxu0 }
 0x3a3   :  { %v5119_v62 = vadd.f32 %v5118_v40, %v10973_v19  ;;  %5885 = vmatprep.mubr.bf16.mxu1 %v5316_v3  ;;  %v5248_v48 = vmax.f32 %v5117_v21, 0.0 }
 0x3a4   :  { %v5120_v14 = vpop.f32.mrf.mxu1  ;;  %v11160_v37 = vpop.f32.mrf.mxu0  ;;  %5725 = vmatmul.mubr.bf16.gmra.mxu0 %v11383_v6  ;;  %5886 = vmatmul.mubr.bf16.gmra.mxu1 %v5315_v49 }
 0x3a5   :  { %v5121_v50 = vadd.f32 %v5120_v14, %v10949_v18  ;;  %5732 = vmatprep.mubr.bf16.mxu0 %v5318_v53  ;;  %v5251_v36 = vmax.f32 %v5119_v62, 0.0  ;;  %v6345_v53 = vadd.f32 %v11143_v51, %v11136_v16 }
 0x3a6   :  { %v5124_v39 = vpop.f32.mrf.mxu1  ;;  %v11166_v34 = vpop.f32.mrf.mxu0 }
 0x3a7   :  { %v5252_v46 = vmax.f32 %v5121_v50, 0.0  ;;  %v5319_v1 = vpack.c.bf16 %v5251_v36, %v5247_v13  ;;  %v5125_v61 = vadd.f32 %v5124_v39, %v10973_v19 }
 0x3a8   :  { %v5126_v30 = vpop.f32.mrf.mxu1  ;;  %v11168_v52 = vpop.f32.mrf.mxu0 }
 0x3a9   :  { %v5320_v58 = vpack.c.bf16 %v5252_v46, %v5248_v48  ;;  %v5127_v26 = vadd.f32 %v5126_v30, %v10949_v18  ;;  %v5255_v63 = vmax.f32 %v5125_v61, 0.0  ;;  %v6351_v30 = vadd.f32 %v11160_v37, %v11153_v8 }
 0x3aa   :  { %v5128_v60 = vpop.f32.mrf.mxu1  ;;  %v11170_v41 = vpop.f32.mrf.mxu0 }
 0x3ab   :  { %v5129_v11 = vadd.f32 %v5128_v60, %v10973_v19  ;;  %5893 = vmatprep.mubr.bf16.mxu1 %v5320_v58  ;;  %v5256_v7 = vmax.f32 %v5127_v26, 0.0  ;;  %v11186_v19 = vld [vmem:[%s11288_s6] ss:$0 sm:$0xff] }
 0x3ac   :  { %v5130_v24 = vpop.f32.mrf.mxu1  ;;  %v11175_v25 = vpop.f32.mrf.mxu0  ;;  %5733 = vmatmul.mubr.bf16.gmra.mxu0 %v11385_v38  ;;  %5894 = vmatmul.mubr.bf16.gmra.mxu1 %v5319_v1  ;;  %v5623_v15 = vadd.f32 %v6336_v42, %v11186_v19  ;;  %v5634_v54 = vadd.f32 %v6345_v53, %v11186_v19 }
 0x3ad   :  { %v5131_v17 = vadd.f32 %v5130_v24, %v10949_v18  ;;  %5740 = vmatprep.mubr.bf16.mxu0 %v5322_v44  ;;  %v5259_v47 = vmax.f32 %v5129_v11, 0.0  ;;  %v6339_v18 = vadd.f32 %v11127_v32, %v11122_v5  ;;  %v6342_v5 = vadd.f32 %v11134_v9, %v11132_v35 }
 0x3ae   :  { %v11179_v43 = vpop.f32.mrf.mxu0  ;;  %v6446_v20 = vpop.f32.mrf.mxu1  ;;  %v6348_v9 = vadd.f32 %v11151_v45, %v11149_v27  ;;  %v5642_v24 = vadd.f32 %v6351_v30, %v11186_v19  ;;  %v6354_v45 = vadd.f32 %v11168_v52, %v11166_v34 }
 0x3af   :  { %v5260_v23 = vmax.f32 %v5131_v17, 0.0  ;;  %v5323_v31 = vpack.c.bf16 %v5259_v47, %v5255_v63  ;;  %v5626_v49 = vadd.f32 %v6339_v18, %v11186_v19  ;;  %v5631_v4 = vadd.f32 %v6342_v5, %v11186_v19 }
 0x3b0   :  { %v11188_v56 = vpop.f32.mrf.mxu0  ;;  %v6447_v28 = vpop.f32.mrf.mxu1  ;;  %v5639_v26 = vadd.f32 %v6348_v9, %v11186_v19 }
 0x3b1   :  { %v5324_v59 = vpack.c.bf16 %v5260_v23, %v5256_v7  ;;  %v6448_v33 = vadd.f32 %v6447_v28, %v6446_v20  ;;  %v6357_v20 = vadd.f32 %v11175_v25, %v11170_v41  ;;  %v5647_v28 = vadd.f32 %v6354_v45, %v11186_v19 }
 0x3b2   :  { %v6449_v2 = vpop.f32.mrf.mxu1  ;;  %v11193_v22 = vpop.f32.mrf.mxu0  ;;  %v6360_v52 = vadd.f32 %v11188_v56, %v11179_v43 }
 0x3b3   :  { %5901 = vmatprep.mubr.bf16.mxu1 %v5324_v59  ;;  %v5784_v40 = vadd.f32 %v6448_v33, %v5623_v15 }
 0x3b4   :  { %5741 = vmatmul.mubr.bf16.gmra.mxu0 %v11386_v29  ;;  %v6450_v3 = vpop.f32.mrf.mxu1  ;;  %5902 = vmatmul.mubr.bf16.gmra.mxu1 %v5323_v31  ;;  %v6362_v21 = vpop.f32.mrf.mxu0  ;;  %v5650_v31 = vadd.f32 %v6357_v20, %v11186_v19  ;;  %v5655_v5 = vadd.f32 %v6360_v52, %v11186_v19 }
 0x3b5   :  { %v6451_v0 = vadd.f32 %v6450_v3, %v6449_v2  ;;  %v5910_v55 = vmax.f32 %v5784_v40, 0.0  ;;  %v6363_v3 = vadd.f32 %v6362_v21, %v11193_v22 }
 0x3b6   :  { %v6452_v57 = vpop.f32.mrf.mxu1  ;;  %v6364_v36 = vpop.f32.mrf.mxu0 }
 0x3b7   :  { %v5787_v32 = vadd.f32 %v6451_v0, %v5626_v49 }
 0x3b8   :  { %v6453_v62 = vpop.f32.mrf.mxu1  ;;  %v6365_v16 = vpop.f32.mrf.mxu0 }
 0x3b9   :  { %v5911_v14 = vmax.f32 %v5787_v32, 0.0  ;;  %v6454_v6 = vadd.f32 %v6453_v62, %v6452_v57  ;;  %v6366_v56 = vadd.f32 %v6365_v16, %v6364_v36 }
 0x3ba   :  { %v6455_v10 = vpop.f32.mrf.mxu1  ;;  %v6367_v44 = vpop.f32.mrf.mxu0 }
 0x3bb   :  { %v5942_v50 = vpack.c.bf16 %v5911_v14, %v5910_v55  ;;  %v5792_v48 = vadd.f32 %v6454_v6, %v5631_v4  ;;  %v5658_v55 = vadd.f32 %v6363_v3, %v11186_v19 }
 0x3bc   :  { %v6456_v39 = vpop.f32.mrf.mxu1  ;;  %v6368_v8 = vpop.f32.mrf.mxu0 }
 0x3bd   :  { %v6457_v46 = vadd.f32 %v6456_v39, %v6455_v10  ;;  %6582 = vmatprep.mubr.bf16.mxu0 %v5942_v50  ;;  %v5912_v12 = vmax.f32 %v5792_v48, 0.0  ;;  %v6369_v22 = vadd.f32 %v6368_v8, %v6367_v44 }
 0x3be   :  { %v6458_v35 = vpop.f32.mrf.mxu1  ;;  %v6370_v59 = vpop.f32.mrf.mxu0 }
 0x3bf   :  { %v5795_v13 = vadd.f32 %v6457_v46, %v5634_v54 }
 0x3c0   :  { %v6459_v51 = vpop.f32.mrf.mxu1  ;;  %v6371_v41 = vpop.f32.mrf.mxu0 }
 0x3c1   :  { %v5913_v58 = vmax.f32 %v5795_v13, 0.0  ;;  %v6460_v1 = vadd.f32 %v6459_v51, %v6458_v35  ;;  %v5663_v35 = vadd.f32 %v6366_v56, %v11186_v19  ;;  %v5666_v51 = vadd.f32 %v6369_v22, %v11186_v19 }
 0x3c2   :  { %v6461_v60 = vpop.f32.mrf.mxu1  ;;  %v6373_v62 = vpop.f32.mrf.mxu0  ;;  %v6372_v16 = vadd.f32 %v6371_v41, %v6370_v59 }
 0x3c3   :  { %v5943_v11 = vpack.c.bf16 %v5913_v58, %v5912_v12  ;;  %v5800_v38 = vadd.f32 %v6460_v1, %v5639_v26 }
 0x3c4   :  { %v6462_v61 = vpop.f32.mrf.mxu1  ;;  %v6374_v4 = vpop.f32.mrf.mxu0 }
 0x3c5   :  { %v6463_v17 = vadd.f32 %v6462_v61, %v6461_v60  ;;  %6583 = vmatmul.mubr.bf16.vlgmr.msra.gmra.mxu0 %v5943_v11  ;;  %v5914_v42 = vmax.f32 %v5800_v38, 0.0  ;;  %v6375_v26 = vadd.f32 %v6374_v4, %v6373_v62 }
 0x3c6   :  { %v6464_v27 = vpop.f32.mrf.mxu1 }
 0x3c7   :  { %v5803_v47 = vadd.f32 %v6463_v17, %v5642_v24  ;;  %v5671_v17 = vadd.f32 %v6372_v16, %v11186_v19 }
 0x3c8   :  { %v6465_v37 = vpop.f32.mrf.mxu1 }
 0x3c9   :  { %v5915_v7 = vmax.f32 %v5803_v47, 0.0  ;;  %v6466_v23 = vadd.f32 %v6465_v37, %v6464_v27  ;;  %v5674_v47 = vadd.f32 %v6375_v26, %v11186_v19 }
 0x3ca   :  { %v6467_v63 = vpop.f32.mrf.mxu1  ;;  %v6376_v48 = vpop.f32.mrf.mxu0 }
 0x3cb   :  { %v5944_v18 = vpack.c.bf16 %v5915_v7, %v5914_v42  ;;  %v5808_v2 = vadd.f32 %v6466_v23, %v5647_v28 }
 0x3cc   :  { %v6468_v33 = vpop.f32.mrf.mxu1  ;;  %v6377_v58 = vpop.f32.mrf.mxu0 }
 0x3cd   :  { %v6469_v15 = vadd.f32 %v6468_v33, %v6467_v63  ;;  %6586 = vmatprep.mubr.bf16.mxu0 %v5944_v18  ;;  %v5916_v49 = vmax.f32 %v5808_v2, 0.0  ;;  %v6378_v7 = vadd.f32 %v6377_v58, %v6376_v48 }
 0x3ce   :  { %v6470_v34 = vpop.f32.mrf.mxu1  ;;  %v6379_v24 = vpop.f32.mrf.mxu0 }
 0x3cf   :  { %v5811_v29 = vadd.f32 %v6469_v15, %v5650_v31  ;;  %v5679_v15 = vadd.f32 %v6378_v7, %v11186_v19 }
 0x3d0   :  { %v6471_v25 = vpop.f32.mrf.mxu1  ;;  %v6380_v20 = vpop.f32.mrf.mxu0 }
 0x3d1   :  { %v5917_v40 = vmax.f32 %v5811_v29, 0.0  ;;  %v6472_v0 = vadd.f32 %v6471_v25, %v6470_v34  ;;  %v6381_v28 = vadd.f32 %v6380_v20, %v6379_v24 }
 0x3d2   :  { %v6473_v57 = vpop.f32.mrf.mxu1 }
 0x3d3   :  { %v5945_v32 = vpack.c.bf16 %v5917_v40, %v5916_v49  ;;  %v5816_v14 = vadd.f32 %v6472_v0, %v5655_v5  ;;  %v5682_v41 = vadd.f32 %v6381_v28, %v11186_v19 }
 0x3d4   :  { %v6474_v53 = vpop.f32.mrf.mxu1 }
 0x3d5   :  { %v6475_v6 = vadd.f32 %v6474_v53, %v6473_v57  ;;  %6587 = vmatmul.mubr.bf16.gmra.mxu0 %v5945_v32  ;;  %v5918_v21 = vmax.f32 %v5816_v14, 0.0 }
 0x3d6   :  { %v6476_v43 = vpop.f32.mrf.mxu1 }
 0x3d7   :  { %v5819_v10 = vadd.f32 %v6475_v6, %v5658_v55 }
 0x3d8   :  { %v6477_v50 = vpop.f32.mrf.mxu1 }
 0x3d9   :  { %v5919_v39 = vmax.f32 %v5819_v10, 0.0  ;;  %v6478_v54 = vadd.f32 %v6477_v50, %v6476_v43 }
 0x3da   :  { %v6479_v46 = vpop.f32.mrf.mxu1 }
 0x3db   :  { %v5946_v9 = vpack.c.bf16 %v5919_v39, %v5918_v21  ;;  %v5824_v30 = vadd.f32 %v6478_v54, %v5663_v35 }
 0x3dc   :  { %v6480_v13 = vpop.f32.mrf.mxu1 }
 0x3dd   :  { %v6481_v12 = vadd.f32 %v6480_v13, %v6479_v46  ;;  %6590 = vmatprep.mubr.bf16.mxu0 %v5946_v9  ;;  %v5920_v11 = vmax.f32 %v5824_v30, 0.0 }
 0x3de   :  { %v6482_v36 = vpop.f32.mrf.mxu1 }
 0x3df   :  { %v5827_v1 = vadd.f32 %v6481_v12, %v5666_v51 }
 0x3e0   :  { %v6483_v60 = vpop.f32.mrf.mxu1 }
 0x3e1   :  { %v5921_v44 = vmax.f32 %v5827_v1, 0.0  ;;  %v6484_v61 = vadd.f32 %v6483_v60, %v6482_v36 }
 0x3e2   :  { %v6485_v38 = vpop.f32.mrf.mxu1  ;;  %v6382_v31 = vpop.f32.mrf.mxu0 }
 0x3e3   :  { %v5947_v27 = vpack.c.bf16 %v5921_v44, %v5920_v11  ;;  %v5832_v8 = vadd.f32 %v6484_v61, %v5671_v17 }
 0x3e4   :  { %v6486_v45 = vpop.f32.mrf.mxu1  ;;  %v6383_v52 = vpop.f32.mrf.mxu0 }
 0x3e5   :  { %v6487_v37 = vadd.f32 %v6486_v45, %v6485_v38  ;;  %6591 = vmatmul.mubr.bf16.gmra.mxu0 %v5947_v27  ;;  %v5922_v18 = vmax.f32 %v5832_v8, 0.0  ;;  %v6384_v49 = vadd.f32 %v6383_v52, %v6382_v31 }
 0x3e6   :  { %v6488_v42 = vpop.f32.mrf.mxu1  ;;  %v6385_v40 = vpop.f32.mrf.mxu0 }
 0x3e7   :  { %v5835_v23 = vadd.f32 %v6487_v37, %v5674_v47  ;;  %v5687_v14 = vadd.f32 %v6384_v49, %v11186_v19 }
 0x3e8   :  { %v6489_v63 = vpop.f32.mrf.mxu1  ;;  %v6386_v5 = vpop.f32.mrf.mxu0 }
 0x3e9   :  { %v5923_v59 = vmax.f32 %v5835_v23, 0.0  ;;  %v6490_v33 = vadd.f32 %v6489_v63, %v6488_v42  ;;  %v6387_v62 = vadd.f32 %v6386_v5, %v6385_v40 }
 0x3ea   :  { %v6491_v2 = vpop.f32.mrf.mxu1 }
 0x3eb   :  { %v5948_v34 = vpack.c.bf16 %v5923_v59, %v5922_v18  ;;  %v5840_v25 = vadd.f32 %v6490_v33, %v5679_v15  ;;  %v5690_v10 = vadd.f32 %v6387_v62, %v11186_v19 }
 0x3ec   :  { %v6492_v29 = vpop.f32.mrf.mxu1 }
 0x3ed   :  { %v6493_v3 = vadd.f32 %v6492_v29, %v6491_v2  ;;  %6594 = vmatprep.mubr.bf16.mxu0 %v5948_v34  ;;  %v5924_v53 = vmax.f32 %v5840_v25, 0.0 }
 0x3ee   :  { %v6494_v0 = vpop.f32.mrf.mxu1 }
 0x3ef   :  { %v5843_v57 = vadd.f32 %v6493_v3, %v5682_v41 }
 0x3f0   :  { %v6495_v32 = vpop.f32.mrf.mxu1 }
 0x3f1   :  { %v5925_v55 = vmax.f32 %v5843_v57, 0.0  ;;  %v6496_v56 = vadd.f32 %v6495_v32, %v6494_v0 }
 0x3f2   :  { %v6497_v6 = vpop.f32.mrf.mxu1 }
 0x3f3   :  { %v5949_v43 = vpack.c.bf16 %v5925_v55, %v5924_v53  ;;  %v5848_v50 = vadd.f32 %v6496_v56, %v5687_v14 }
 0x3f4   :  { %v6498_v4 = vpop.f32.mrf.mxu1 }
 0x3f5   :  { %6595 = vmatmul.mubr.bf16.gmra.mxu0 %v5949_v43  ;;  %v6499_v22 = vadd.f32 %v6498_v4, %v6497_v6  ;;  %v5926_v39 = vmax.f32 %v5848_v50, 0.0 }
 0x3f7   :  { %v5851_v21 = vadd.f32 %v6499_v22, %v5690_v10 }
 0x3f9   :  { %v5927_v54 = vmax.f32 %v5851_v21, 0.0 }
 0x3fb   :  { %v5950_v48 = vpack.c.bf16 %v5927_v54, %v5926_v39 }
 0x3fd   :  { %6598 = vmatprep.mubr.bf16.mxu0 %v5950_v48 }
 0x402   :  { %v6388_v46 = vpop.f32.mrf.mxu0  ;;  %v6500_v35 = vpop.f32.mrf.mxu1 }
 0x404   :  { %v6389_v9 = vpop.f32.mrf.mxu0  ;;  %v6501_v13 = vpop.f32.mrf.mxu1 }
 0x405   :  { %v6390_v51 = vadd.f32 %v6389_v9, %v6388_v46  ;;  %v6502_v1 = vadd.f32 %v6501_v13, %v6500_v35 }
 0x406   :  { %v6391_v30 = vpop.f32.mrf.mxu0  ;;  %v6503_v12 = vpop.f32.mrf.mxu1 }
 0x407   :  { %v5695_v58 = vadd.f32 %v6390_v51, %v11186_v19 }
 0x408   :  { %v6392_v36 = vpop.f32.mrf.mxu0  ;;  %v6504_v16 = vpop.f32.mrf.mxu1 }
 0x409   :  { %v6393_v60 = vadd.f32 %v6392_v36, %v6391_v30  ;;  %v5856_v26 = vadd.f32 %v6502_v1, %v5695_v58  ;;  %v6505_v44 = vadd.f32 %v6504_v16, %v6503_v12 }
 0x40b   :  { %v5698_v11 = vadd.f32 %v6393_v60, %v11186_v19  ;;  %v5928_v24 = vmax.f32 %v5856_v26, 0.0 }
 0x40d   :  { %v5859_v61 = vadd.f32 %v6505_v44, %v5698_v11 }
 0x40f   :  { %v5929_v38 = vmax.f32 %v5859_v61, 0.0 }
 0x411   :  { %v5951_v17 = vpack.c.bf16 %v5929_v38, %v5928_v24 }
 0x413   :  { %6599 = vmatmul.mubr.bf16.gmra.mxu0 %v5951_v17 }
 0x428   :  { %v6394_v27 = vpop.f32.mrf.mxu0  ;;  %v6506_v45 = vpop.f32.mrf.mxu1 }
 0x42a   :  { %v6395_v47 = vpop.f32.mrf.mxu0  ;;  %v6507_v8 = vpop.f32.mrf.mxu1 }
 0x42b   :  { %v6396_v37 = vadd.f32 %v6395_v47, %v6394_v27  ;;  %v6508_v28 = vadd.f32 %v6507_v8, %v6506_v45 }
 0x42c   :  { %v6397_v20 = vpop.f32.mrf.mxu0  ;;  %v6509_v42 = vpop.f32.mrf.mxu1 }
 0x42d   :  { %v5703_v7 = vadd.f32 %v6396_v37, %v11186_v19 }
 0x42e   :  { %v6398_v23 = vpop.f32.mrf.mxu0  ;;  %v6510_v63 = vpop.f32.mrf.mxu1 }
 0x42f   :  { %v6399_v18 = vadd.f32 %v6398_v23, %v6397_v20  ;;  %v5864_v59 = vadd.f32 %v6508_v28, %v5703_v7  ;;  %v6511_v31 = vadd.f32 %v6510_v63, %v6509_v42 }
 0x431   :  { %v5706_v33 = vadd.f32 %v6399_v18, %v11186_v19  ;;  %v5930_v15 = vmax.f32 %v5864_v59, 0.0 }
 0x433   :  { %v5867_v2 = vadd.f32 %v6511_v31, %v5706_v33 }
 0x435   :  { %v5931_v34 = vmax.f32 %v5867_v2, 0.0 }
 0x437   :  { %v5952_v52 = vpack.c.bf16 %v5931_v34, %v5930_v15 }
 0x439   :  { %6602 = vmatprep.mubr.bf16.mxu0 %v5952_v52 }
 0x454   :  { %v6400_v29 = vpop.f32.mrf.mxu0  ;;  %v6512_v41 = vpop.f32.mrf.mxu1 }
 0x456   :  { %v6401_v25 = vpop.f32.mrf.mxu0  ;;  %v6513_v3 = vpop.f32.mrf.mxu1 }
 0x457   :  { %v6402_v49 = vadd.f32 %v6401_v25, %v6400_v29  ;;  %v6514_v62 = vadd.f32 %v6513_v3, %v6512_v41 }
 0x458   :  { %v6403_v40 = vpop.f32.mrf.mxu0  ;;  %v6515_v0 = vpop.f32.mrf.mxu1 }
 0x459   :  { %v5711_v57 = vadd.f32 %v6402_v49, %v11186_v19 }
 0x45a   :  { %v6404_v5 = vpop.f32.mrf.mxu0  ;;  %v6516_v32 = vpop.f32.mrf.mxu1 }
 0x45b   :  { %v6405_v53 = vadd.f32 %v6404_v5, %v6403_v40  ;;  %v5872_v6 = vadd.f32 %v6514_v62, %v5711_v57  ;;  %v6517_v56 = vadd.f32 %v6516_v32, %v6515_v0 }
 0x45c   :  { %v6406_v55 = vpop.f32.mrf.mxu0  ;;  %v6518_v14 = vpop.f32.mrf.mxu1 }
 0x45d   :  { %v5714_v43 = vadd.f32 %v6405_v53, %v11186_v19  ;;  %v5932_v54 = vmax.f32 %v5872_v6, 0.0 }
 0x45e   :  { %v6407_v10 = vpop.f32.mrf.mxu0  ;;  %v6519_v4 = vpop.f32.mrf.mxu1 }
 0x45f   :  { %v5875_v50 = vadd.f32 %v6517_v56, %v5714_v43  ;;  %v6408_v22 = vadd.f32 %v6407_v10, %v6406_v55  ;;  %v6520_v51 = vadd.f32 %v6519_v4, %v6518_v14 }
 0x460   :  { %v6409_v21 = vpop.f32.mrf.mxu0  ;;  %v6521_v39 = vpop.f32.mrf.mxu1 }
 0x461   :  { %v5933_v48 = vmax.f32 %v5875_v50, 0.0  ;;  %v5719_v46 = vadd.f32 %v6408_v22, %v11186_v19 }
 0x462   :  { %v6410_v35 = vpop.f32.mrf.mxu0  ;;  %v6522_v9 = vpop.f32.mrf.mxu1 }
 0x463   :  { %v5953_v13 = vpack.c.bf16 %v5933_v48, %v5932_v54  ;;  %v6411_v30 = vadd.f32 %v6410_v35, %v6409_v21  ;;  %v5880_v36 = vadd.f32 %v6520_v51, %v5719_v46  ;;  %v6523_v1 = vadd.f32 %v6522_v9, %v6521_v39 }
 0x464   :  { %v6412_v12 = vpop.f32.mrf.mxu0  ;;  %v6524_v58 = vpop.f32.mrf.mxu1 }
 0x465   :  { %v5722_v16 = vadd.f32 %v6411_v30, %v11186_v19  ;;  %6603 = vmatmul.mubr.bf16.gmra.mxu0 %v5953_v13  ;;  %v5934_v38 = vmax.f32 %v5880_v36, 0.0 }
 0x466   :  { %v6413_v60 = vpop.f32.mrf.mxu0  ;;  %v6525_v26 = vpop.f32.mrf.mxu1 }
 0x467   :  { %v5883_v11 = vadd.f32 %v6523_v1, %v5722_v16  ;;  %v6414_v44 = vadd.f32 %v6413_v60, %v6412_v12  ;;  %v6526_v8 = vadd.f32 %v6525_v26, %v6524_v58  ;;  %v11245_v58 = vld [vmem:[%s11290_s8] ss:$0 sm:$0xff]  ;;  %s6688_s8 = smov [#allocation3]  }
 0x468   :  { %v6415_v61 = vpop.f32.mrf.mxu0  ;;  %v6527_v24 = vpop.f32.mrf.mxu1  ;;  %s6227_s1 = sshll.u32 %s6688_s8, 4  ;;  %s6228_s1 = int_to_ptr.vmem [resolvable:$true] %s6227_s1 }
 0x469   :  { %v5935_v17 = vmax.f32 %v5883_v11, 0.0  ;;  %v5727_v27 = vadd.f32 %v6414_v44, %v11186_v19  ;;  %s6665_s19 = scalar_lea.vmem %s6228_s1, 4096  ;;  %p6670_p1 = scmp.lt.s32.totalorder %s6228_s1, %s6228_s1 }
 0x46a   :  { %v6416_v45 = vpop.f32.mrf.mxu0  ;;  %v6528_v47 = vpop.f32.mrf.mxu1  ;;  %p6666_p0 = scmp.ne.s32.totalorder %s6228_s1, %s6665_s19  ;;  %p6671_p2 = scmp.lt.s32.totalorder %s6665_s19, %s6665_s19 }
 0x46b   :  { %v6417_v37 = vadd.f32 %v6416_v45, %v6415_v61  ;;  %v5954_v20 = vpack.c.bf16 %v5935_v17, %v5934_v38  ;;  %v5888_v23 = vadd.f32 %v6526_v8, %v5727_v27  ;;  %v6529_v28 = vadd.f32 %v6528_v47, %v6527_v24 }
 0x46c   :  { %v6418_v42 = vpop.f32.mrf.mxu0  ;;  %v6530_v7 = vpop.f32.mrf.mxu1  ;;  %p6672_p3 = por %p6671_p2, %p6670_p1 }
 0x46d   :  { %v5730_v63 = vadd.f32 %v6417_v37, %v11186_v19  ;;  %6606 = vmatprep.mubr.bf16.mxu0 %v5954_v20  ;;  %v5936_v34 = vmax.f32 %v5888_v23, 0.0 }
 0x46e   :  { %v6419_v18 = vpop.f32.mrf.mxu0  ;;  %v6531_v59 = vpop.f32.mrf.mxu1  ;;  %p6673_p4 = pnand %p6672_p3, %p6666_p0 }
 0x46f   :  { %v5891_v33 = vadd.f32 %v6529_v28, %v5730_v63  ;;  %v6420_v31 = vadd.f32 %v6419_v18, %v6418_v42  ;;  %v6532_v49 = vadd.f32 %v6531_v59, %v6530_v7 }
 0x470   :  { %v6421_v2 = vpop.f32.mrf.mxu0  ;;  %v6533_v15 = vpop.f32.mrf.mxu1 }
 0x471   :  { %v5937_v52 = vmax.f32 %v5891_v33, 0.0  ;;  %v5735_v29 = vadd.f32 %v6420_v31, %v11186_v19 }
 0x472   :  { %v6422_v41 = vpop.f32.mrf.mxu0  ;;  %v6534_v25 = vpop.f32.mrf.mxu1 }
 0x473   :  { %v5955_v3 = vpack.c.bf16 %v5937_v52, %v5936_v34  ;;  %v6423_v40 = vadd.f32 %v6422_v41, %v6421_v2  ;;  %v5896_v5 = vadd.f32 %v6532_v49, %v5735_v29  ;;  %v6535_v62 = vadd.f32 %v6534_v25, %v6533_v15 }
 0x474   :  { %v6424_v0 = vpop.f32.mrf.mxu0  ;;  %v6536_v57 = vpop.f32.mrf.mxu1 }
 0x475   :  { %v5738_v32 = vadd.f32 %v6423_v40, %v11186_v19  ;;  %6607 = vmatmul.mubr.bf16.gmra.mxu0 %v5955_v3  ;;  %v5938_v10 = vmax.f32 %v5896_v5, 0.0 }
 0x476   :  { %v6425_v53 = vpop.f32.mrf.mxu0  ;;  %v6537_v55 = vpop.f32.mrf.mxu1 }
 0x477   :  { %v5899_v14 = vadd.f32 %v6535_v62, %v5738_v32  ;;  %v6426_v6 = vadd.f32 %v6425_v53, %v6424_v0  ;;  %v6538_v39 = vadd.f32 %v6537_v55, %v6536_v57 }
 0x478   :  { %v6427_v43 = vpop.f32.mrf.mxu0  ;;  %v6539_v56 = vpop.f32.mrf.mxu1 }
 0x479   :  { %v5939_v4 = vmax.f32 %v5899_v14, 0.0  ;;  %v5743_v50 = vadd.f32 %v6426_v6, %v11186_v19 }
 0x47a   :  { %v6428_v22 = vpop.f32.mrf.mxu0  ;;  %v6540_v21 = vpop.f32.mrf.mxu1 }
 0x47b   :  { %v6429_v54 = vadd.f32 %v6428_v22, %v6427_v43  ;;  %v5956_v48 = vpack.c.bf16 %v5939_v4, %v5938_v10  ;;  %v5904_v46 = vadd.f32 %v6538_v39, %v5743_v50  ;;  %v6541_v9 = vadd.f32 %v6540_v21, %v6539_v56 }
 0x47d   :  { %v5746_v35 = vadd.f32 %v6429_v54, %v11186_v19  ;;  %6610 = vmatprep.mubr.bf16.mxu0 %v5956_v48  ;;  %v5940_v51 = vmax.f32 %v5904_v46, 0.0 }
 0x47f   :  { %v5907_v13 = vadd.f32 %v6541_v9, %v5746_v35 }
 0x481   :  { %v5941_v30 = vmax.f32 %v5907_v13, 0.0 }
 0x483   :  { %v5957_v12 = vpack.c.bf16 %v5941_v30, %v5940_v51 }
 0x485   :  { %v6584_v36 = vpop.f32.mrf.mxu0  ;;  %6611 = vmatmul.mubr.bf16.gmra.mxu0 %v5957_v12 }
 0x486   :  { %v6072_v16 = vadd.f32 %v6584_v36, %v11245_v58 }
 0x487   :  { %v6063_v1 = vpop.f32.mrf.mxu0 }
 0x488   :  { %6192 = vst [vmem:[#allocation3 + $0x10] sm:$0xff] %v6072_v16  ;;  %v6064_v60 = vadd.f32 %v11245_v58, %v6063_v1 }
 0x489   :  { %v6585_v19 = vpop.f32.mrf.mxu0 }
 0x48a   :  { %6190 = vst [vmem:[#allocation3] sm:$0xff] %v6064_v60  ;;  %v6075_v26 = vadd.f32 %v6585_v19, %v11245_v58 }
 0x48b   :  { %v6066_v11 = vpop.f32.mrf.mxu0 }
 0x48c   :  { %6193 = vst [vmem:[#allocation3 + $0x18] sm:$0xff] %v6075_v26  ;;  %v6067_v44 = vadd.f32 %v11245_v58, %v6066_v11 }
 0x48e   :  { %6191 = vst [vmem:[#allocation3 + $0x8] sm:$0xff] %v6067_v44 }
 0x495   :  { %v6588_v61 = vpop.f32.mrf.mxu0 }
 0x496   :  { %v6088_v24 = vadd.f32 %v6588_v61, %v11245_v58 }
 0x497   :  { %v6079_v38 = vpop.f32.mrf.mxu0 }
 0x498   :  { %6196 = vst [vmem:[#allocation3 + $0x30] sm:$0xff] %v6088_v24  ;;  %v6080_v17 = vadd.f32 %v11245_v58, %v6079_v38 }
 0x499   :  { %v6589_v27 = vpop.f32.mrf.mxu0 }
 0x49a   :  { %6194 = vst [vmem:[#allocation3 + $0x20] sm:$0xff] %v6080_v17  ;;  %v6091_v45 = vadd.f32 %v6589_v27, %v11245_v58 }
 0x49b   :  { %v6082_v47 = vpop.f32.mrf.mxu0 }
 0x49c   :  { %6197 = vst [vmem:[#allocation3 + $0x38] sm:$0xff] %v6091_v45  ;;  %v6083_v8 = vadd.f32 %v11245_v58, %v6082_v47 }
 0x49e   :  { %6195 = vst [vmem:[#allocation3 + $0x28] sm:$0xff] %v6083_v8 }
 0x4a5   :  { %v6592_v37 = vpop.f32.mrf.mxu0 }
 0x4a6   :  { %v6104_v20 = vadd.f32 %v6592_v37, %v11245_v58 }
 0x4a7   :  { %v6095_v42 = vpop.f32.mrf.mxu0 }
 0x4a8   :  { %6200 = vst [vmem:[#allocation3 + $0x50] sm:$0xff] %v6104_v20  ;;  %v6096_v7 = vadd.f32 %v11245_v58, %v6095_v42 }
 0x4a9   :  { %v6593_v23 = vpop.f32.mrf.mxu0 }
 0x4aa   :  { %6198 = vst [vmem:[#allocation3 + $0x40] sm:$0xff] %v6096_v7  ;;  %v6107_v63 = vadd.f32 %v6593_v23, %v11245_v58 }
 0x4ab   :  { %v6098_v28 = vpop.f32.mrf.mxu0 }
 0x4ac   :  { %6201 = vst [vmem:[#allocation3 + $0x58] sm:$0xff] %v6107_v63  ;;  %v6099_v18 = vadd.f32 %v11245_v58, %v6098_v28 }
 0x4ae   :  { %6199 = vst [vmem:[#allocation3 + $0x48] sm:$0xff] %v6099_v18 }
 0x4b5   :  { %v6596_v59 = vpop.f32.mrf.mxu0 }
 0x4b6   :  { %v6120_v33 = vadd.f32 %v6596_v59, %v11245_v58 }
 0x4b7   :  { %v6111_v31 = vpop.f32.mrf.mxu0 }
 0x4b8   :  { %6204 = vst [vmem:[#allocation3 + $0x70] sm:$0xff] %v6120_v33  ;;  %v6112_v2 = vadd.f32 %v11245_v58, %v6111_v31 }
 0x4b9   :  { %v6597_v15 = vpop.f32.mrf.mxu0 }
 0x4ba   :  { %6202 = vst [vmem:[#allocation3 + $0x60] sm:$0xff] %v6112_v2  ;;  %v6123_v34 = vadd.f32 %v6597_v15, %v11245_v58 }
 0x4bb   :  { %v6114_v52 = vpop.f32.mrf.mxu0 }
 0x4bc   :  { %6205 = vst [vmem:[#allocation3 + $0x78] sm:$0xff] %v6123_v34  ;;  %v6115_v29 = vadd.f32 %v11245_v58, %v6114_v52 }
 0x4be   :  { %6203 = vst [vmem:[#allocation3 + $0x68] sm:$0xff] %v6115_v29 }
 0x4d3   :  { %v6600_v41 = vpop.f32.mrf.mxu0 }
 0x4d4   :  { %v6136_v25 = vadd.f32 %v6600_v41, %v11245_v58 }
 0x4d5   :  { %v6127_v3 = vpop.f32.mrf.mxu0 }
 0x4d6   :  { %6208 = vst [vmem:[#allocation3 + $0x90] sm:$0xff] %v6136_v25  ;;  %v6128_v49 = vadd.f32 %v11245_v58, %v6127_v3 }
 0x4d7   :  { %v6601_v40 = vpop.f32.mrf.mxu0 }
 0x4d8   :  { %6206 = vst [vmem:[#allocation3 + $0x80] sm:$0xff] %v6128_v49  ;;  %v6139_v0 = vadd.f32 %v6601_v40, %v11245_v58 }
 0x4d9   :  { %v6130_v57 = vpop.f32.mrf.mxu0 }
 0x4da   :  { %6209 = vst [vmem:[#allocation3 + $0x98] sm:$0xff] %v6139_v0  ;;  %v6131_v5 = vadd.f32 %v11245_v58, %v6130_v57 }
 0x4dc   :  { %6207 = vst [vmem:[#allocation3 + $0x88] sm:$0xff] %v6131_v5 }
 0x525   :  { %v6604_v32 = vpop.f32.mrf.mxu0 }
 0x526   :  { %v6152_v62 = vadd.f32 %v6604_v32, %v11245_v58 }
 0x527   :  { %v6143_v53 = vpop.f32.mrf.mxu0 }
 0x528   :  { %6212 = vst [vmem:[#allocation3 + $0xb0] sm:$0xff] %v6152_v62  ;;  %v6144_v55 = vadd.f32 %v11245_v58, %v6143_v53 }
 0x529   :  { %v6605_v14 = vpop.f32.mrf.mxu0 }
 0x52a   :  { %6210 = vst [vmem:[#allocation3 + $0xa0] sm:$0xff] %v6144_v55  ;;  %v6155_v6 = vadd.f32 %v6605_v14, %v11245_v58 }
 0x52b   :  { %v6146_v43 = vpop.f32.mrf.mxu0 }
 0x52c   :  { %6213 = vst [vmem:[#allocation3 + $0xb8] sm:$0xff] %v6155_v6  ;;  %v6147_v56 = vadd.f32 %v11245_v58, %v6146_v43 }
 0x52e   :  { %6211 = vst [vmem:[#allocation3 + $0xa8] sm:$0xff] %v6147_v56 }
 0x535   :  { %v6608_v10 = vpop.f32.mrf.mxu0 }
 0x536   :  { %v6168_v4 = vadd.f32 %v6608_v10, %v11245_v58 }
 0x537   :  { %v6159_v50 = vpop.f32.mrf.mxu0 }
 0x538   :  { %6216 = vst [vmem:[#allocation3 + $0xd0] sm:$0xff] %v6168_v4  ;;  %v6160_v22 = vadd.f32 %v11245_v58, %v6159_v50 }
 0x539   :  { %v6609_v21 = vpop.f32.mrf.mxu0 }
 0x53a   :  { %6214 = vst [vmem:[#allocation3 + $0xc0] sm:$0xff] %v6160_v22  ;;  %v6171_v39 = vadd.f32 %v6609_v21, %v11245_v58 }
 0x53b   :  { %v6162_v54 = vpop.f32.mrf.mxu0 }
 0x53c   :  { %6217 = vst [vmem:[#allocation3 + $0xd8] sm:$0xff] %v6171_v39  ;;  %v6163_v48 = vadd.f32 %v11245_v58, %v6162_v54 }
 0x53e   :  { %6215 = vst [vmem:[#allocation3 + $0xc8] sm:$0xff] %v6163_v48 }
 0x545   :  { %v6612_v46 = vpop.f32.mrf.mxu0 }
 0x546   :  { %v6184_v35 = vadd.f32 %v6612_v46, %v11245_v58 }
 0x547   :  { %v6175_v9 = vpop.f32.mrf.mxu0 }
 0x548   :  { %6220 = vst [vmem:[#allocation3 + $0xf0] sm:$0xff] %v6184_v35  ;;  %v6176_v13 = vadd.f32 %v11245_v58, %v6175_v9 }
 0x549   :  { %v6613_v51 = vpop.f32.mrf.mxu0 }
 0x54a   :  { %6218 = vst [vmem:[#allocation3 + $0xe0] sm:$0xff] %v6176_v13  ;;  %v6187_v30 = vadd.f32 %v6613_v51, %v11245_v58 }
 0x54b   :  { %v6178_v12 = vpop.f32.mrf.mxu0 }
 0x54c   :  { %6221 = vst [vmem:[#allocation3 + $0xf8] sm:$0xff] %v6187_v30  ;;  %v6179_v36 = vadd.f32 %v11245_v58, %v6178_v12 }
 0x54e   :  { %6219 = vst [vmem:[#allocation3 + $0xe8] sm:$0xff] %v6179_v36 }
 0x54f   :  { %6676 = shalt.err (!%p6673_p4)
}
 0x550   :  { %s6689_s20 = smov 128   ;;  %s6690_s21 = smov 8  }
 0x551   :  { %6233 = dma.vmem_to_hbm [thread:$0]  %s6228_s1, 4096, %s11291_s9, [#allocation4], %s6689_s20, %s6689_s20, %s6690_s21  }
 0x552   :  { %6685 = dma.done.wait [#allocation4], 4096  }
 0x553   :  { %6686 = vsyncadd [#allocation4], 4294963200 }
 0x554   :  { %6237 = vsyncpa [#allocation4], 1 }

</bundles_post_ra>
